<compile_context>
chip_gen: v5e
topology: v5e:2x2
jax: 0.10.0
libtpu: 0.0.40
codegen_flags: <defaults>
</compile_context>

<pallas_src>
import numpy as np
import jax
import jax.numpy as jnp
from jax.experimental import pallas as pl
from jax.experimental.pallas import tpu as pltpu

HIDDEN = 512  # hard-coded in the PyTorch module (fc_1 / fc_2 are Linear(512, 512))

# Lazily-probed capability flag: does this jax support single-buffering of
# constant-index inputs via pipeline_mode=pl.Buffered(1)?
_BUFFERED1_OK = None


def _decoder_kernel(x_ref, w0_ref, b0_ref, w1_ref, b1_ref, w2_ref, b2_ref,
                    wo_ref, bo_ref, out_ref):
    """One grid step produces one lane-dense column tile of fc_out.

    The trunk (first fc -> relu -> fc_1 -> relu -> fc_2 -> relu) is recomputed
    per tile: ~1.2 MFLOPs is nothing next to the fc_out weight DMA, and keeping
    the grid free of carried state keeps the axis "parallel" (v7x megacore).
    Weights are bf16; all matmuls accumulate in f32.
    """
    def lin(x, w, b):
        return jnp.dot(x, w, preferred_element_type=jnp.float32) + b

    net = lin(x_ref[...], w0_ref[...], b0_ref[...])
    net = lin(jnp.maximum(net, 0.0).astype(jnp.bfloat16), w1_ref[...], b1_ref[...])
    net = lin(jnp.maximum(net, 0.0).astype(jnp.bfloat16), w2_ref[...], b2_ref[...])
    h = jnp.maximum(net, 0.0).astype(jnp.bfloat16)            # actvn before fc_out
    # wo_ref block is (1, H, tile_out): one contiguous pre-tiled weight slab.
    out_ref[...] = jnp.dot(h, wo_ref[0],
                           preferred_element_type=jnp.float32) + bo_ref[...]


def prepare_decoder_params(params, *, dim, n_points, z_dim, c_dim,
                           max_tile_out=8192, min_split_cols=1024):
    """One-time device-side weight preparation (cache and reuse across calls).

    Returns {"arrays": <device pytree>, "meta": <static config>}.
    """
    assert not (z_dim == 0 and c_dim == 0), "Decoder needs z_dim != 0 or c_dim != 0"
    H = HIDDEN
    out_dim = dim * n_points

    # Lane-dense fc_out column tiling.
    padded128 = pl.cdiv(out_dim, 128) * 128
    nt = pl.cdiv(padded128, max_tile_out)
    if nt == 1 and padded128 >= min_split_cols:
        nt = 2  # give both v7x TensorCores a tile; ~free on v5e/v6e
    tile_out = pl.cdiv(padded128, nt * 128) * 128
    padded = nt * tile_out

    # Which first layer actually feeds the trunk (PyTorch forward semantics).
    use_c = c_dim != 0
    w_first = params["w0"] if use_c else params["wz"]
    b_first = params["b0"] if use_c else params["bz"]
    in_dim = c_dim if use_c else z_dim

    wo = params["wo"].astype(jnp.bfloat16)
    bo = params["bo"].astype(jnp.float32)
    if padded != out_dim:
        wo = jnp.pad(wo, ((0, 0), (0, padded - out_dim)))
        bo = jnp.pad(bo, ((0, 0), (0, padded - out_dim)))
    # Pre-tile fc_out weight so each grid step's fetch is one contiguous DMA
    # (instead of 512 strided row segments).
    wo_tiles = wo.reshape(H, nt, tile_out).transpose(1, 0, 2)   # (nt, H, tile_out)

    arrays = {
        "w_first": w_first.astype(jnp.bfloat16),
        "b_first": b_first.astype(jnp.float32),
        "w1": params["w1"].astype(jnp.bfloat16),
        "b1": params["b1"].astype(jnp.float32),
        "w2": params["w2"].astype(jnp.bfloat16),
        "b2": params["b2"].astype(jnp.float32),
        "wo_tiles": wo_tiles,
        "bo": bo,
    }
    arrays = jax.device_put(arrays)
    meta = dict(dim=dim, n_points=n_points, out_dim=out_dim, padded=padded,
                tile_out=tile_out, nt=nt, in_dim=in_dim, use_c=use_c)
    return {"arrays": arrays, "meta": meta}


def decoder_forward(z, c, prepared):
    """Pallas equivalent of Decoder.forward(z, c) using pre-prepared params.

    Runtime is set by streaming the fc_out weight and is flat in batch size up
    to hundreds of rows, so batch multiple queries into one call when possible.
    """
    global _BUFFERED1_OK
    meta, p = prepared["meta"], prepared["arrays"]
    H = HIDDEN
    tile_out, nt, padded = meta["tile_out"], meta["nt"], meta["padded"]
    in_dim = meta["in_dim"]

    x = c if meta["use_c"] else z
    B = x.shape[0]
    assert x.shape[1] == in_dim, (x.shape, in_dim)

    # Pad the batch up to a full f32 sublane (8): unmasked output stores and
    # clean MXU operand layout; extra rows are free (weight-DMA bound).
    Bp = max(8, pl.cdiv(B, 8) * 8)
    xb = jnp.zeros((Bp, in_dim), jnp.bfloat16).at[:B].set(x.astype(jnp.bfloat16))

    ins = (xb, p["w_first"], p["b_first"], p["w1"], p["b1"], p["w2"], p["b2"],
           p["wo_tiles"], p["bo"])

    in_bytes = sum(int(np.prod(a.shape)) * a.dtype.itemsize for a in ins)
    out_bytes = Bp * padded * 4
    flops = 2 * Bp * (nt * (in_dim * H + 2 * H * H) + H * padded)
    cost = pl.CostEstimate(flops=flops, transcendentals=0,
                           bytes_accessed=in_bytes + out_bytes)

    # Scoped-VMEM budget: double-buffered wo/out tiles + single-buffered trunk.
    vmem_need = (2 * H * tile_out * 2            # wo tile (bf16) x2 buffers
                 + 2 * Bp * tile_out * 4         # out tile (f32) x2 buffers
                 + 2 * (in_dim * H + 2 * H * H)  # trunk weights (bf16)
                 + (1 << 20))                    # activations / biases / slack
    vmem_limit = int(min(48 << 20, max(16 << 20, int(vmem_need * 1.25))))

    def run(single_buffer):
        def const_spec(shape):
            zeros = (0,) * len(shape)
            if single_buffer:
                return pl.BlockSpec(shape, lambda i: zeros,
                                    pipeline_mode=pl.Buffered(1))
            return pl.BlockSpec(shape, lambda i: zeros)

        return pl.pallas_call(
            _decoder_kernel,
            out_shape=jax.ShapeDtypeStruct((Bp, padded), jnp.float32),
            grid=(nt,),
            in_specs=[
                const_spec((Bp, in_dim)),                           # activation
                const_spec((in_dim, H)), const_spec((1, H)),        # fc_0 / fc_z
                const_spec((H, H)), const_spec((1, H)),             # fc_1
                const_spec((H, H)), const_spec((1, H)),             # fc_2
                pl.BlockSpec((1, H, tile_out), lambda i: (i, 0, 0)),  # fc_out W tile
                pl.BlockSpec((1, tile_out), lambda i: (0, i)),        # fc_out b tile
            ],
            out_specs=pl.BlockSpec((Bp, tile_out), lambda i: (0, i)),
            compiler_params=pltpu.CompilerParams(
                dimension_semantics=("parallel",),     # no carried state
                vmem_limit_bytes=vmem_limit),
            cost_estimate=cost,
        )(*ins)

    if _BUFFERED1_OK is None:
        try:
            flat = jax.block_until_ready(run(True))
            _BUFFERED1_OK = True
        except Exception:
            _BUFFERED1_OK = False
            flat = run(False)
    elif _BUFFERED1_OK:
        flat = run(True)
    else:
        flat = run(False)

    return flat[:B, :meta["out_dim"]].reshape(B, meta["n_points"], meta["dim"])


def _ref_forward(z, c, params, *, dim, n_points, z_dim, c_dim):
    """Pure-JAX reference with the same bf16-weight / f32-accumulate recipe."""
    def lin(x, w, b):
        return jnp.dot(x.astype(jnp.bfloat16), w.astype(jnp.bfloat16),
                       preferred_element_type=jnp.float32) + b.astype(jnp.float32)

    if c_dim != 0:
        x, w0, b0 = c, params["w0"], params["b0"]
    else:
        x, w0, b0 = z, params["wz"], params["bz"]
    net = lin(x, w0, b0)
    net = lin(jnp.maximum(net, 0.0), params["w1"], params["b1"])
    net = lin(jnp.maximum(net, 0.0), params["w2"], params["b2"])
    out = lin(jnp.maximum(net, 0.0), params["wo"], params["bo"])
    return out.reshape(x.shape[0], n_points, dim)


def _init_params(key, *, z_dim, c_dim, dim, n_points):
    ks = jax.random.split(key, 10)
    scale = 0.05
    out_dim = dim * n_points
    p = {
        "w1": scale * jax.random.normal(ks[4], (HIDDEN, HIDDEN), jnp.float32),
        "b1": scale * jax.random.normal(ks[5], (1, HIDDEN), jnp.float32),
        "w2": scale * jax.random.normal(ks[6], (HIDDEN, HIDDEN), jnp.float32),
        "b2": scale * jax.random.normal(ks[7], (1, HIDDEN), jnp.float32),
        "wo": scale * jax.random.normal(ks[8], (HIDDEN, out_dim), jnp.float32),
        "bo": scale * jax.random.normal(ks[9], (1, out_dim), jnp.float32),
    }
    if z_dim != 0:
        p["wz"] = scale * jax.random.normal(ks[0], (z_dim, HIDDEN), jnp.float32)
        p["bz"] = scale * jax.random.normal(ks[1], (1, HIDDEN), jnp.float32)
    if c_dim != 0:
        p["w0"] = scale * jax.random.normal(ks[2], (c_dim, HIDDEN), jnp.float32)
        p["b0"] = scale * jax.random.normal(ks[3], (1, HIDDEN), jnp.float32)
    return p


if __name__ == "__main__":
    key = jax.random.PRNGKey(0)

    def run_case(tag, *, B, dim, z_dim, c_dim, n_points, max_tile_out=8192):
        kp, kz, kc = jax.random.split(jax.random.fold_in(key, tag), 3)
        params = _init_params(kp, z_dim=z_dim, c_dim=c_dim, dim=dim,
                              n_points=n_points)
        z = jax.random.normal(kz, (B, z_dim), jnp.float32) if z_dim else None
        c = jax.random.normal(kc, (B, c_dim), jnp.float32) if c_dim else None
        prepared = prepare_decoder_params(params, dim=dim, n_points=n_points,
                                          z_dim=z_dim, c_dim=c_dim,
                                          max_tile_out=max_tile_out)
        pts = decoder_forward(z, c, prepared)
        pts = jax.block_until_ready(pts)
        assert pts.shape == (B, n_points, dim), pts.shape
        ref = _ref_forward(z, c, params, dim=dim, n_points=n_points,
                           z_dim=z_dim, c_dim=c_dim)
        np.testing.assert_allclose(np.asarray(pts), np.asarray(ref),
                                   rtol=1e-2, atol=1e-2)

    # Default PSGN config: out_dim=3072 -> 2 column tiles (spans both v7x TCs).
    run_case(0, B=2, dim=3, z_dim=128, c_dim=128, n_points=1024)
    # Small out_dim: single lane-dense tile; batch row-padded 2 -> 8.
    run_case(1, B=2, dim=3, z_dim=32, c_dim=128, n_points=256)
    # Ragged out_dim: 300 -> padded to 384, padding sliced off afterwards.
    run_case(2, B=3, dim=3, z_dim=32, c_dim=128, n_points=100)
    # c_dim == 0: forward uses fc_z(z) (that branch is now handled, not dropped).
    run_case(3, B=2, dim=3, z_dim=32, c_dim=0, n_points=256)
    # Multi-tile path via a small max_tile_out: 3 tiles of 1024 columns.
    run_case(4, B=2, dim=3, z_dim=128, c_dim=128, n_points=1024, max_tile_out=1024)

    print("KERNEL_OK")
</pallas_src>

<mosaic_0001>
module attributes {stable_mosaic.version = 11 : i64} {
  func.func @_decoder_kernel(%arg0: i32, %arg1: memref<8x128xbf16, #tpu.memory_space<vmem>>, %arg2: memref<128x512xbf16, #tpu.memory_space<vmem>>, %arg3: memref<1x512xf32, #tpu.memory_space<vmem>>, %arg4: memref<512x512xbf16, #tpu.memory_space<vmem>>, %arg5: memref<1x512xf32, #tpu.memory_space<vmem>>, %arg6: memref<512x512xbf16, #tpu.memory_space<vmem>>, %arg7: memref<1x512xf32, #tpu.memory_space<vmem>>, %arg8: memref<1x512x1536xbf16, #tpu.memory_space<vmem>>, %arg9: memref<1x1536xf32, #tpu.memory_space<vmem>>, %arg10: memref<8x1536xf32, #tpu.memory_space<vmem>>) attributes {dimension_semantics = [#tpu.dimension_semantics<parallel>], iteration_bounds = array<i64: 2>, scalar_prefetch = 0 : i64, scratch_operands = 0 : i64, tpu.core_type = #tpu.core_type<tc>, window_params = [{pipeline_mode = #tpu.pipeline_mode<synchronous>, transform_indices = @transform_0, window_bounds = array<i64: 8, 128>}, {pipeline_mode = #tpu.pipeline_mode<synchronous>, transform_indices = @transform_1, window_bounds = array<i64: 128, 512>}, {pipeline_mode = #tpu.pipeline_mode<synchronous>, transform_indices = @transform_2, window_bounds = array<i64: 1, 512>}, {pipeline_mode = #tpu.pipeline_mode<synchronous>, transform_indices = @transform_3, window_bounds = array<i64: 512, 512>}, {pipeline_mode = #tpu.pipeline_mode<synchronous>, transform_indices = @transform_4, window_bounds = array<i64: 1, 512>}, {pipeline_mode = #tpu.pipeline_mode<synchronous>, transform_indices = @transform_5, window_bounds = array<i64: 512, 512>}, {pipeline_mode = #tpu.pipeline_mode<synchronous>, transform_indices = @transform_6, window_bounds = array<i64: 1, 512>}, {transform_indices = @transform_7, window_bounds = array<i64: 1, 512, 1536>}, {transform_indices = @transform_8, window_bounds = array<i64: 1, 1536>}, {transform_indices = @transform_9, window_bounds = array<i64: 8, 1536>}]} {
    %c0 = arith.constant 0 : index
    %c0_0 = arith.constant 0 : index
    %0 = vector.load %arg1[%c0, %c0_0] : memref<8x128xbf16, #tpu.memory_space<vmem>>, vector<8x128xbf16>
    %c0_1 = arith.constant 0 : index
    %c0_2 = arith.constant 0 : index
    %1 = vector.load %arg2[%c0_1, %c0_2] : memref<128x512xbf16, #tpu.memory_space<vmem>>, vector<128x512xbf16>
    %c0_3 = arith.constant 0 : index
    %c0_4 = arith.constant 0 : index
    %2 = vector.load %arg3[%c0_3, %c0_4] : memref<1x512xf32, #tpu.memory_space<vmem>>, vector<1x512xf32>
    %cst = arith.constant dense<0.000000e+00> : vector<8x512xf32>
    %3 = tpu.matmul %0, %1, %cst {dimension_numbers = #tpu.dot_dimension_numbers<[1], [0], [0], [1], [0, 0, 1, 1], [], []>} : vector<8x128xbf16>, vector<128x512xbf16>, vector<8x512xf32> -> vector<8x512xf32>
    %4 = vector.broadcast %2 : vector<1x512xf32> to vector<8x512xf32>
    %5 = arith.addf %3, %4 : vector<8x512xf32>
    %cst_5 = arith.constant 0.000000e+00 : f32
    %6 = vector.broadcast %cst_5 : f32 to vector<8x512xf32>
    %7 = arith.maximumf %5, %6 : vector<8x512xf32>
    %8 = arith.truncf %7 : vector<8x512xf32> to vector<8x512xbf16>
    %c0_6 = arith.constant 0 : index
    %c0_7 = arith.constant 0 : index
    %9 = vector.load %arg4[%c0_6, %c0_7] : memref<512x512xbf16, #tpu.memory_space<vmem>>, vector<512x512xbf16>
    %c0_8 = arith.constant 0 : index
    %c0_9 = arith.constant 0 : index
    %10 = vector.load %arg5[%c0_8, %c0_9] : memref<1x512xf32, #tpu.memory_space<vmem>>, vector<1x512xf32>
    %cst_10 = arith.constant dense<0.000000e+00> : vector<8x512xf32>
    %11 = tpu.matmul %8, %9, %cst_10 {dimension_numbers = #tpu.dot_dimension_numbers<[1], [0], [0], [1], [0, 0, 1, 1], [], []>} : vector<8x512xbf16>, vector<512x512xbf16>, vector<8x512xf32> -> vector<8x512xf32>
    %12 = vector.broadcast %10 : vector<1x512xf32> to vector<8x512xf32>
    %13 = arith.addf %11, %12 : vector<8x512xf32>
    %cst_11 = arith.constant 0.000000e+00 : f32
    %14 = vector.broadcast %cst_11 : f32 to vector<8x512xf32>
    %15 = arith.maximumf %13, %14 : vector<8x512xf32>
    %16 = arith.truncf %15 : vector<8x512xf32> to vector<8x512xbf16>
    %c0_12 = arith.constant 0 : index
    %c0_13 = arith.constant 0 : index
    %17 = vector.load %arg6[%c0_12, %c0_13] : memref<512x512xbf16, #tpu.memory_space<vmem>>, vector<512x512xbf16>
    %c0_14 = arith.constant 0 : index
    %c0_15 = arith.constant 0 : index
    %18 = vector.load %arg7[%c0_14, %c0_15] : memref<1x512xf32, #tpu.memory_space<vmem>>, vector<1x512xf32>
    %cst_16 = arith.constant dense<0.000000e+00> : vector<8x512xf32>
    %19 = tpu.matmul %16, %17, %cst_16 {dimension_numbers = #tpu.dot_dimension_numbers<[1], [0], [0], [1], [0, 0, 1, 1], [], []>} : vector<8x512xbf16>, vector<512x512xbf16>, vector<8x512xf32> -> vector<8x512xf32>
    %20 = vector.broadcast %18 : vector<1x512xf32> to vector<8x512xf32>
    %21 = arith.addf %19, %20 : vector<8x512xf32>
    %cst_17 = arith.constant 0.000000e+00 : f32
    %22 = vector.broadcast %cst_17 : f32 to vector<8x512xf32>
    %23 = arith.maximumf %21, %22 : vector<8x512xf32>
    %24 = arith.truncf %23 : vector<8x512xf32> to vector<8x512xbf16>
    %c0_18 = arith.constant 0 : index
    %c0_19 = arith.constant 0 : index
    %c0_20 = arith.constant 0 : index
    %25 = vector.load %arg8[%c0_18, %c0_19, %c0_20] : memref<1x512x1536xbf16, #tpu.memory_space<vmem>>, vector<1x512x1536xbf16>
    %26 = vector.shape_cast %25 : vector<1x512x1536xbf16> to vector<512x1536xbf16>
    %cst_21 = arith.constant dense<0.000000e+00> : vector<8x1536xf32>
    %27 = tpu.matmul %24, %26, %cst_21 {dimension_numbers = #tpu.dot_dimension_numbers<[1], [0], [0], [1], [0, 0, 1, 1], [], []>} : vector<8x512xbf16>, vector<512x1536xbf16>, vector<8x1536xf32> -> vector<8x1536xf32>
    %c0_22 = arith.constant 0 : index
    %c0_23 = arith.constant 0 : index
    %28 = vector.load %arg9[%c0_22, %c0_23] : memref<1x1536xf32, #tpu.memory_space<vmem>>, vector<1x1536xf32>
    %29 = vector.broadcast %28 : vector<1x1536xf32> to vector<8x1536xf32>
    %30 = arith.addf %27, %29 : vector<8x1536xf32>
    %c0_24 = arith.constant 0 : index
    %c0_25 = arith.constant 0 : index
    %31 = vector.load %arg10[%c0_24, %c0_25] : memref<8x1536xf32, #tpu.memory_space<vmem>>, vector<8x1536xf32>
    tpu.vector_store %arg10[%c0_24, %c0_25], %30 {strides = array<i32>} : memref<8x1536xf32, #tpu.memory_space<vmem>>, vector<8x1536xf32>,
    return
  }
  func.func @transform_0(%arg0: i32) -> (i32, i32) {
    %c0_i32 = arith.constant 0 : i32
    %c0_i32_0 = arith.constant 0 : i32
    %c0_i32_1 = arith.constant 0 : i32
    return %c0_i32, %c0_i32_0 : i32, i32
  }
  func.func @transform_1(%arg0: i32) -> (i32, i32) {
    %c0_i32 = arith.constant 0 : i32
    %c0_i32_0 = arith.constant 0 : i32
    %c0_i32_1 = arith.constant 0 : i32
    return %c0_i32, %c0_i32_0 : i32, i32
  }
  func.func @transform_2(%arg0: i32) -> (i32, i32) {
    %c0_i32 = arith.constant 0 : i32
    %c0_i32_0 = arith.constant 0 : i32
    %c0_i32_1 = arith.constant 0 : i32
    return %c0_i32, %c0_i32_0 : i32, i32
  }
  func.func @transform_3(%arg0: i32) -> (i32, i32) {
    %c0_i32 = arith.constant 0 : i32
    %c0_i32_0 = arith.constant 0 : i32
    %c0_i32_1 = arith.constant 0 : i32
    return %c0_i32, %c0_i32_0 : i32, i32
  }
  func.func @transform_4(%arg0: i32) -> (i32, i32) {
    %c0_i32 = arith.constant 0 : i32
    %c0_i32_0 = arith.constant 0 : i32
    %c0_i32_1 = arith.constant 0 : i32
    return %c0_i32, %c0_i32_0 : i32, i32
  }
  func.func @transform_5(%arg0: i32) -> (i32, i32) {
    %c0_i32 = arith.constant 0 : i32
    %c0_i32_0 = arith.constant 0 : i32
    %c0_i32_1 = arith.constant 0 : i32
    return %c0_i32, %c0_i32_0 : i32, i32
  }
  func.func @transform_6(%arg0: i32) -> (i32, i32) {
    %c0_i32 = arith.constant 0 : i32
    %c0_i32_0 = arith.constant 0 : i32
    %c0_i32_1 = arith.constant 0 : i32
    return %c0_i32, %c0_i32_0 : i32, i32
  }
  func.func @transform_7(%arg0: i32) -> (i32, i32, i32) {
    %c0_i32 = arith.constant 0 : i32
    %c0_i32_0 = arith.constant 0 : i32
    %c0_i32_1 = arith.constant 0 : i32
    return %arg0, %c0_i32, %c0_i32_0 : i32, i32, i32
  }
  func.func @transform_8(%arg0: i32) -> (i32, i32) {
    %c0_i32 = arith.constant 0 : i32
    %c0_i32_0 = arith.constant 0 : i32
    return %c0_i32, %arg0 : i32, i32
  }
  func.func @transform_9(%arg0: i32) -> (i32, i32) {
    %c0_i32 = arith.constant 0 : i32
    %c0_i32_0 = arith.constant 0 : i32
    return %c0_i32, %arg0 : i32, i32
  }
}

module attributes {stable_mosaic.version = 11 : i64} {
  func.func @_decoder_kernel(%arg0: i32, %arg1: memref<8x128xbf16, #tpu.memory_space<vmem>>, %arg2: memref<128x512xbf16, #tpu.memory_space<vmem>>, %arg3: memref<1x512xf32, #tpu.memory_space<vmem>>, %arg4: memref<512x512xbf16, #tpu.memory_space<vmem>>, %arg5: memref<1x512xf32, #tpu.memory_space<vmem>>, %arg6: memref<512x512xbf16, #tpu.memory_space<vmem>>, %arg7: memref<1x512xf32, #tpu.memory_space<vmem>>, %arg8: memref<1x512x1536xbf16, #tpu.memory_space<vmem>>, %arg9: memref<1x1536xf32, #tpu.memory_space<vmem>>, %arg10: memref<8x1536xf32, #tpu.memory_space<vmem>>) attributes {dimension_semantics = [#tpu.dimension_semantics<parallel>], iteration_bounds = array<i64: 2>, scalar_prefetch = 0 : i64, scratch_operands = 0 : i64, tpu.core_type = #tpu.core_type<tc>, window_params = [{pipeline_mode = #tpu.pipeline_mode<synchronous>, transform_indices = @transform_0, window_bounds = array<i64: 8, 128>}, {pipeline_mode = #tpu.pipeline_mode<synchronous>, transform_indices = @transform_1, window_bounds = array<i64: 128, 512>}, {pipeline_mode = #tpu.pipeline_mode<synchronous>, transform_indices = @transform_2, window_bounds = array<i64: 1, 512>}, {pipeline_mode = #tpu.pipeline_mode<synchronous>, transform_indices = @transform_3, window_bounds = array<i64: 512, 512>}, {pipeline_mode = #tpu.pipeline_mode<synchronous>, transform_indices = @transform_4, window_bounds = array<i64: 1, 512>}, {pipeline_mode = #tpu.pipeline_mode<synchronous>, transform_indices = @transform_5, window_bounds = array<i64: 512, 512>}, {pipeline_mode = #tpu.pipeline_mode<synchronous>, transform_indices = @transform_6, window_bounds = array<i64: 1, 512>}, {transform_indices = @transform_7, window_bounds = array<i64: 1, 512, 1536>}, {transform_indices = @transform_8, window_bounds = array<i64: 1, 1536>}, {transform_indices = @transform_9, window_bounds = array<i64: 8, 1536>}]} {
    %c0 = arith.constant 0 : index
    %c0_0 = arith.constant 0 : index
    %0 = vector.load %arg1[%c0, %c0_0] : memref<8x128xbf16, #tpu.memory_space<vmem>>, vector<8x128xbf16>
    %c0_1 = arith.constant 0 : index
    %c0_2 = arith.constant 0 : index
    %1 = vector.load %arg2[%c0_1, %c0_2] : memref<128x512xbf16, #tpu.memory_space<vmem>>, vector<128x512xbf16>
    %c0_3 = arith.constant 0 : index
    %c0_4 = arith.constant 0 : index
    %2 = vector.load %arg3[%c0_3, %c0_4] : memref<1x512xf32, #tpu.memory_space<vmem>>, vector<1x512xf32>
    %cst = arith.constant dense<0.000000e+00> : vector<8x512xf32>
    %3 = tpu.matmul %0, %1, %cst {dimension_numbers = #tpu.dot_dimension_numbers<[1], [0], [0], [1], [0, 0, 1, 1], [], []>} : vector<8x128xbf16>, vector<128x512xbf16>, vector<8x512xf32> -> vector<8x512xf32>
    %4 = vector.broadcast %2 : vector<1x512xf32> to vector<8x512xf32>
    %5 = arith.addf %3, %4 : vector<8x512xf32>
    %cst_5 = arith.constant 0.000000e+00 : f32
    %6 = vector.broadcast %cst_5 : f32 to vector<8x512xf32>
    %7 = arith.maximumf %5, %6 : vector<8x512xf32>
    %8 = arith.truncf %7 : vector<8x512xf32> to vector<8x512xbf16>
    %c0_6 = arith.constant 0 : index
    %c0_7 = arith.constant 0 : index
    %9 = vector.load %arg4[%c0_6, %c0_7] : memref<512x512xbf16, #tpu.memory_space<vmem>>, vector<512x512xbf16>
    %c0_8 = arith.constant 0 : index
    %c0_9 = arith.constant 0 : index
    %10 = vector.load %arg5[%c0_8, %c0_9] : memref<1x512xf32, #tpu.memory_space<vmem>>, vector<1x512xf32>
    %cst_10 = arith.constant dense<0.000000e+00> : vector<8x512xf32>
    %11 = tpu.matmul %8, %9, %cst_10 {dimension_numbers = #tpu.dot_dimension_numbers<[1], [0], [0], [1], [0, 0, 1, 1], [], []>} : vector<8x512xbf16>, vector<512x512xbf16>, vector<8x512xf32> -> vector<8x512xf32>
    %12 = vector.broadcast %10 : vector<1x512xf32> to vector<8x512xf32>
    %13 = arith.addf %11, %12 : vector<8x512xf32>
    %cst_11 = arith.constant 0.000000e+00 : f32
    %14 = vector.broadcast %cst_11 : f32 to vector<8x512xf32>
    %15 = arith.maximumf %13, %14 : vector<8x512xf32>
    %16 = arith.truncf %15 : vector<8x512xf32> to vector<8x512xbf16>
    %c0_12 = arith.constant 0 : index
    %c0_13 = arith.constant 0 : index
    %17 = vector.load %arg6[%c0_12, %c0_13] : memref<512x512xbf16, #tpu.memory_space<vmem>>, vector<512x512xbf16>
    %c0_14 = arith.constant 0 : index
    %c0_15 = arith.constant 0 : index
    %18 = vector.load %arg7[%c0_14, %c0_15] : memref<1x512xf32, #tpu.memory_space<vmem>>, vector<1x512xf32>
    %cst_16 = arith.constant dense<0.000000e+00> : vector<8x512xf32>
    %19 = tpu.matmul %16, %17, %cst_16 {dimension_numbers = #tpu.dot_dimension_numbers<[1], [0], [0], [1], [0, 0, 1, 1], [], []>} : vector<8x512xbf16>, vector<512x512xbf16>, vector<8x512xf32> -> vector<8x512xf32>
    %20 = vector.broadcast %18 : vector<1x512xf32> to vector<8x512xf32>
    %21 = arith.addf %19, %20 : vector<8x512xf32>
    %cst_17 = arith.constant 0.000000e+00 : f32
    %22 = vector.broadcast %cst_17 : f32 to vector<8x512xf32>
    %23 = arith.maximumf %21, %22 : vector<8x512xf32>
    %24 = arith.truncf %23 : vector<8x512xf32> to vector<8x512xbf16>
    %c0_18 = arith.constant 0 : index
    %c0_19 = arith.constant 0 : index
    %c0_20 = arith.constant 0 : index
    %25 = vector.load %arg8[%c0_18, %c0_19, %c0_20] : memref<1x512x1536xbf16, #tpu.memory_space<vmem>>, vector<1x512x1536xbf16>
    %26 = vector.shape_cast %25 : vector<1x512x1536xbf16> to vector<512x1536xbf16>
    %cst_21 = arith.constant dense<0.000000e+00> : vector<8x1536xf32>
    %27 = tpu.matmul %24, %26, %cst_21 {dimension_numbers = #tpu.dot_dimension_numbers<[1], [0], [0], [1], [0, 0, 1, 1], [], []>} : vector<8x512xbf16>, vector<512x1536xbf16>, vector<8x1536xf32> -> vector<8x1536xf32>
    %c0_22 = arith.constant 0 : index
    %c0_23 = arith.constant 0 : index
    %28 = vector.load %arg9[%c0_22, %c0_23] : memref<1x1536xf32, #tpu.memory_space<vmem>>, vector<1x1536xf32>
    %29 = vector.broadcast %28 : vector<1x1536xf32> to vector<8x1536xf32>
    %30 = arith.addf %27, %29 : vector<8x1536xf32>
    %c0_24 = arith.constant 0 : index
    %c0_25 = arith.constant 0 : index
    %31 = vector.load %arg10[%c0_24, %c0_25] : memref<8x1536xf32, #tpu.memory_space<vmem>>, vector<8x1536xf32>
    tpu.vector_store %arg10[%c0_24, %c0_25], %30 {strides = array<i32>} : memref<8x1536xf32, #tpu.memory_space<vmem>>, vector<8x1536xf32>,
    return
  }
  func.func @transform_0(%arg0: i32) -> (i32, i32) {
    %c0_i32 = arith.constant 0 : i32
    %c0_i32_0 = arith.constant 0 : i32
    %c0_i32_1 = arith.constant 0 : i32
    return %c0_i32, %c0_i32_0 : i32, i32
  }
  func.func @transform_1(%arg0: i32) -> (i32, i32) {
    %c0_i32 = arith.constant 0 : i32
    %c0_i32_0 = arith.constant 0 : i32
    %c0_i32_1 = arith.constant 0 : i32
    return %c0_i32, %c0_i32_0 : i32, i32
  }
  func.func @transform_2(%arg0: i32) -> (i32, i32) {
    %c0_i32 = arith.constant 0 : i32
    %c0_i32_0 = arith.constant 0 : i32
    %c0_i32_1 = arith.constant 0 : i32
    return %c0_i32, %c0_i32_0 : i32, i32
  }
  func.func @transform_3(%arg0: i32) -> (i32, i32) {
    %c0_i32 = arith.constant 0 : i32
    %c0_i32_0 = arith.constant 0 : i32
    %c0_i32_1 = arith.constant 0 : i32
    return %c0_i32, %c0_i32_0 : i32, i32
  }
  func.func @transform_4(%arg0: i32) -> (i32, i32) {
    %c0_i32 = arith.constant 0 : i32
    %c0_i32_0 = arith.constant 0 : i32
    %c0_i32_1 = arith.constant 0 : i32
    return %c0_i32, %c0_i32_0 : i32, i32
  }
  func.func @transform_5(%arg0: i32) -> (i32, i32) {
    %c0_i32 = arith.constant 0 : i32
    %c0_i32_0 = arith.constant 0 : i32
    %c0_i32_1 = arith.constant 0 : i32
    return %c0_i32, %c0_i32_0 : i32, i32
  }
  func.func @transform_6(%arg0: i32) -> (i32, i32) {
    %c0_i32 = arith.constant 0 : i32
    %c0_i32_0 = arith.constant 0 : i32
    %c0_i32_1 = arith.constant 0 : i32
    return %c0_i32, %c0_i32_0 : i32, i32
  }
  func.func @transform_7(%arg0: i32) -> (i32, i32, i32) {
    %c0_i32 = arith.constant 0 : i32
    %c0_i32_0 = arith.constant 0 : i32
    %c0_i32_1 = arith.constant 0 : i32
    return %arg0, %c0_i32, %c0_i32_0 : i32, i32, i32
  }
  func.func @transform_8(%arg0: i32) -> (i32, i32) {
    %c0_i32 = arith.constant 0 : i32
    %c0_i32_0 = arith.constant 0 : i32
    return %c0_i32, %arg0 : i32, i32
  }
  func.func @transform_9(%arg0: i32) -> (i32, i32) {
    %c0_i32 = arith.constant 0 : i32
    %c0_i32_0 = arith.constant 0 : i32
    return %c0_i32, %arg0 : i32, i32
  }
}

</mosaic_0001>

<bundles_post_ra>
// kernel: tpu_custom_call.1
= control target key start
LH: loop header
LB: loop body
LE: loop exit
PB: predicated region body
PF: predicated region fallthrough
CT: control target
= control target key end

     0   :  { %s11059_s0 = inlined_call_operand.hbm [shape: bf16[8,128], index: 0, kind: input, shape index: {}]   ;;  %s11060_s1 = inlined_call_operand.hbm [shape: bf16[128,512], index: 1, kind: input, shape index: {}]   ;;  %s11061_s2 = inlined_call_operand.hbm [shape: f32[1,512], index: 2, kind: input, shape index: {}]   ;;  %s11062_s3 = inlined_call_operand.hbm [shape: bf16[512,512], index: 3, kind: input, shape index: {}]   ;;  %s11063_s4 = inlined_call_operand.hbm [shape: f32[1,512], index: 4, kind: input, shape index: {}]   ;;  %s11064_s5 = inlined_call_operand.hbm [shape: bf16[512,512], index: 5, kind: input, shape index: {}]   ;;  %s11065_s6 = inlined_call_operand.hbm [shape: f32[1,512], index: 6, kind: input, shape index: {}]   ;;  %s11066_s7 = inlined_call_operand.hbm [shape: bf16[2,512,1536], index: 7, kind: input, shape index: {}]   ;;  %s11067_s8 = inlined_call_operand.hbm [shape: f32[1,3072], index: 8, kind: input, shape index: {}]   ;;  %s11068_s9 = inlined_call_operand.hbm [shape: f32[8,3072], index: 9, kind: output, shape index: {}]  }
   0x1   :  { %11075 = sst [smem:[#allocation28_spill]] %s11059_s0 }
   0x2   :  { %11076 = sst [smem:[#allocation29_spill]] %s11060_s1 }
   0x3   :  { %11077 = sst [smem:[#allocation30_spill]] %s11062_s3 }
   0x4   :  { %11078 = sst [smem:[#allocation31_spill]] %s11064_s5 }
   0x5   :  { %14 = vsyncpa [#allocation3], 0 }
   0x6   :  { %15 = vsyncpa [#allocation6], 0 }
   0x7   :  { %16 = vsyncpa [#allocation9], 0 }
   0x8   :  { %17 = vsyncpa [#allocation12], 0 }
   0x9   :  { %18 = vsyncpa [#allocation15], 0 }
   0xa   :  { %20 = vsyncpa [#allocation15 + $0x1], 0 }
   0xb   :  { %21 = vsyncpa [#allocation4], 0 }
   0xc   :  { %23 = vsyncpa [#allocation4 + $0x1], 0  ;;  %s9825_s30 = smov 0   ;;  %s9827_s10 = smov 0  }
   0xd   :  { %s9829_s11 = smov 0   ;;  %s9831_s12 = smov 0  }
   0xe LB: > { %11079 = sst [smem:[#allocation24_spill]] %s9750_s30  ;;  %s9849_s16 = sadd.s32 4294967295, %s9762_s12   ;;  %s9762_s12 = sphi %s9831_s12, %s11105_s12   ;;  %s9758_s11 = sphi %s9829_s11, %s11109_s11   ;;  %s9754_s10 = sphi %s9827_s10, %s11108_s10   ;;  %s9750_s30 = sphi %s9825_s30, %s11107_s30  }
   0xf   : > { %s11080_s1 = sld [smem:[#allocation29_spill]]  ;;  %p5895_p0 = scmp.ge.s32.totalorder %s9762_s12, 1 }
  0x10   : > { %p11074_p1 = scmp.eq.s32.totalorder %s9849_s16, 0  ;;  %p259_p2 = scmp.lt.s32.totalorder %s9762_s12, 3 }
  0x11   : > { %s9764_s18 = smov [#allocation5]   ;;  %s11082_s3 = sld [smem:[#allocation30_spill]] }
  0x12   : > { %p9854_p3 = pnand %p5895_p0, %p259_p2  ;;  %s284_s19 = sshll.u32 %s9764_s18, 4  ;;  %s285_s19 = int_to_ptr.vmem [resolvable:$true] %s284_s19 }
  0x13   : > { %s11084_s5 = sld [smem:[#allocation31_spill]]  ;;  %s9765_s27 = smov [#allocation8]  }
  0x14   : > { %p9317_p4 = pneg %p9854_p3  ;;  %s310_s28 = sshll.u32 %s9765_s27, 4  ;;  %s311_s28 = int_to_ptr.vmem [resolvable:$true] %s310_s28 }
  0x15   : > { %s282_s15 = sshll.u32 %s11080_s1, 4  ;;  %s9766_s29 = smov 256   ;;  %s283_s15 = int_to_ptr.hbm [resolvable:$true] %s282_s15 }
  0x16   : > { %p9866_p6 = pnand %p9317_p4, %p11074_p1  ;;  %s9767_s13 = smov 16  }
  0x17   : > { %s308_s22 = sshll.u32 %s11082_s3, 4  ;;  %s9768_s14 = smov [#allocation11]   ;;  %s309_s22 = int_to_ptr.hbm [resolvable:$true] %s308_s22 }
  0x18   : > { %9323 = dma.hbm_to_vmem [thread:$0]  (!%p9866_p6), %s283_s15, 4096, %s285_s19, [#allocation6], %s9766_s29, %s9766_s29, %s9767_s13  }
  0x19   : > { %s334_s26 = sshll.u32 %s11084_s5, 4  ;;  %s336_s18 = sshll.u32 %s9768_s14, 4  ;;  %s335_s26 = int_to_ptr.hbm [resolvable:$true] %s334_s26  ;;  %s337_s18 = int_to_ptr.vmem [resolvable:$true] %s336_s18 }
  0x1a   : > { %9329 = dma.hbm_to_vmem [thread:$0]  (!%p9866_p6), %s309_s22, 16384, %s311_s28, [#allocation9], %s9766_s29, %s9766_s29, %s9767_s13  }
  0x1b   : > { %9335 = dma.hbm_to_vmem [thread:$0]  (!%p9866_p6), %s335_s26, 16384, %s337_s18, [#allocation12], %s9766_s29, %s9766_s29, %s9767_s13  }
  0x1c   : > { %s5894_s20 = sadd.s32 4294967294, %s9762_s12   ;;  %s9881_s21 = sadd.s32 1, %s9762_s12  }
  0x1d   : > { %11085 = sst [smem:[#allocation25_spill]] %s9881_s21  ;;  %s183_s15 = sadd.s32 1, %s9758_s11 }
  0x1e   : > { %s180_s19 = ssub.s32 %s9762_s12, %s9881_s21  ;;  %p190_p7 = scmp.ne.s32.totalorder %s9758_s11, %s9754_s10 }
  0x1f   : > { %p181_p8 = scmp.eq.s32.totalorder %s180_s19, 0  ;;  %p191_p9 = scmp.eq.s32.totalorder %s9762_s12, 0 }
  0x20   : > { %p196_p10 = scmp.ne.s32.totalorder %s9754_s10, %s9750_s30  ;;  %p246_p11 = scmp.eq.s32.totalorder %s9849_s16, 1 }
  0x21   : > { %s9893_s22 = scalar_select %p181_p8, %s9758_s11, %s183_s15  }
  0x22   : > { %p192_p12 = por %p191_p9, %p190_p7  ;;  %p9897_p13 = por %p11074_p1, %p196_p10 }
  0x23   : > { %11086 = sst [smem:[#allocation26_spill]] %s9893_s22  ;;  %p9901_p0 = por %p246_p11, %p190_p7 }
  0x24   : > { %p252_p2 = scmp.eq.s32.totalorder %s5894_s20, 1  ;;  %p9357_p4 = scmp.lt.s32.totalorder %s9762_s12, 2 }
  0x25   : > { %s362_s26 = sand.u32 1, %s9762_s12   ;;  %s11071_s28 = sand.u32 1, %s9758_s11  }
  0x26   : > { %p9907_p5 = por %p252_p2, %p196_p10  ;;  %s9278_s29 = smul.u32 3072, %s9762_s12 }
  0x27   : > { %s9277_s13 = smul.u32 3072, %s11071_s28  ;;  %p9915_p8 = pnand %p9357_p4, %p192_p12 }
  0x28   : > { %s11089_s27 = scalar_select %p9907_p5, 1, 0 }
  0x29   : > { %s371_s20 = scalar_lea.hbm %s11066_s7, %s9278_s29  ;;  %s366_s1 = scalar_lea.vmem [#allocation14], %s9277_s13 }
  0x2a   : > { %11090 = sst [smem:[#allocation27_spill]] %s11089_s27  ;;  %s372_s19 = sshll.u32 %s371_s20, 4  ;;  %s373_s19 = int_to_ptr.hbm [resolvable:$true] %s372_s19 }
  0x2b   : > { %s374_s3 = sshll.u32 %s366_s1, 4  ;;  %s11092_s0 = sld [smem:[#allocation28_spill]]  ;;  %s375_s3 = int_to_ptr.vmem [resolvable:$true] %s374_s3 }
  0x2c   : > { %s9925_s28 = scalar_lea.sflag [#allocation15], %s362_s26  ;;  %s9500_s27 = sshra.s32 %s373_s19, 4  ;;  %s9501_s27 = int_to_ptr.hbm [resolvable:$true] %s9500_s27 }
  0x2d   : > { %s9502_s30 = scalar_lea.hbm %s9501_s27, 3072  ;;  %p9504_p9 = pneg %p9915_p8 }
  0x2e   : > { %p9503_p7 = scmp.ne.s32.totalorder %s9501_s27, %s9502_s30  ;;  %s9507_s1 = scalar_lea.hbm %s11066_s7, 6144 }
  0x2f   : > { %p9508_p12 = scmp.lt.s32.totalorder %s9501_s27, %s11066_s7  ;;  %p9509_p2 = scmp.lt.s32.totalorder %s9507_s1, %s9502_s30 }
  0x30   : > { %p9505_p10 = pnand %p9504_p9, %p9503_p7 }
  0x31   : > { %s271_s21 = sshll.u32 %s11092_s0, 4  ;;  %p9510_p4 = por %p9509_p2, %p9508_p12  ;;  %s272_s21 = int_to_ptr.hbm [resolvable:$true] %s271_s21 }
  0x32   : > { %p9506_p11 = pneg %p9505_p10 }
  0x34   : > { %p9511_p1 = pnand %p9510_p4, %p9506_p11 }
  0x36   : > { %9514 = shalt.err (!%p9511_p1)
}
  0x37   : > { %s9769_s5 = smov 768   ;;  %s9770_s22 = smov 48  }
  0x38   : > { %9342 = dma.hbm_to_vmem [thread:$0]  (!%p9915_p8), %s373_s19, 49152, %s375_s3, %s9925_s28, %s9769_s5, %s9769_s5, %s9770_s22  }
  0x39   : > { %s9771_s26 = smov [#allocation2]   ;;  %s297_s27 = sshll.u32 %s11061_s2, 4  ;;  %s298_s27 = int_to_ptr.hbm [resolvable:$true] %s297_s27 }
  0x3a   : > { %s273_s20 = sshll.u32 %s9771_s26, 4  ;;  %s323_s18 = sshll.u32 %s11063_s4, 4  ;;  %s274_s20 = int_to_ptr.vmem [resolvable:$true] %s273_s20  ;;  %s324_s18 = int_to_ptr.hbm [resolvable:$true] %s323_s18 }
  0x3b   : > { %9320 = dma.hbm_to_vmem [thread:$0]  (!%p9866_p6), %s272_s21, 64, %s274_s20, [#allocation3]  }
  0x3c   : > { %s9772_s15 = smov [#allocation7]   ;;  %s9773_s19 = smov [#allocation10]  }
  0x3d   : > { %s299_s3 = sshll.u32 %s9772_s15, 4  ;;  %s325_s5 = sshll.u32 %s9773_s19, 4  ;;  %s300_s3 = int_to_ptr.vmem [resolvable:$true] %s299_s3  ;;  %s326_s5 = int_to_ptr.vmem [resolvable:$true] %s325_s5 }
  0x3e   : > { %9326 = dma.hbm_to_vmem [thread:$0]  (!%p9866_p6), %s298_s27, 64, %s300_s3, [#allocation6]  }
  0x3f   : > { %s349_s29 = sshll.u32 %s11065_s6, 4  ;;  %s11093_s21 = sand.u32 1, %s9758_s11   ;;  %s350_s29 = int_to_ptr.hbm [resolvable:$true] %s349_s29 }
  0x40   : > { %9332 = dma.hbm_to_vmem [thread:$0]  (!%p9866_p6), %s324_s18, 64, %s326_s5, [#allocation9]  }
  0x41   : > { %s9279_s20 = smul.u32 12, %s11093_s21  ;;  %s9774_s13 = smov [#allocation13]  }
  0x42   : > { %s351_s30 = sshll.u32 %s9774_s13, 4  ;;  %s389_s1 = smul.u32 12, %s9762_s12  ;;  %s352_s30 = int_to_ptr.vmem [resolvable:$true] %s351_s30 }
  0x43   : > { %9338 = dma.hbm_to_vmem [thread:$0]  (!%p9866_p6), %s350_s29, 64, %s352_s30, [#allocation12]  }
  0x44   : > { %s392_s3 = scalar_lea.hbm %s11067_s8, %s389_s1  ;;  %s388_s19 = scalar_lea.vmem [#allocation16], %s9279_s20 }
  0x45   : > { %s396_s22 = sshll.u32 %s388_s19, 4  ;;  %s394_s26 = sshll.u32 %s392_s3, 4  ;;  %s397_s22 = int_to_ptr.vmem [resolvable:$true] %s396_s22  ;;  %s395_s26 = int_to_ptr.hbm [resolvable:$true] %s394_s26 }
  0x46   : > { %s9650_s0 = sshra.s32 %s395_s26, 4  ;;  %s9657_s29 = scalar_lea.hbm %s11067_s8, 24  ;;  %s9651_s0 = int_to_ptr.hbm [resolvable:$true] %s9650_s0 }
  0x47   : > { %s9652_s18 = scalar_lea.hbm %s9651_s0, 12  ;;  %p9658_p6 = scmp.lt.s32.totalorder %s9651_s0, %s11067_s8 }
  0x48   : > { %p9653_p1 = scmp.ne.s32.totalorder %s9651_s0, %s9652_s18  ;;  %p9659_p11 = scmp.lt.s32.totalorder %s9657_s29, %s9652_s18 }
  0x4a   : > { %p9655_p7 = pnand %p9653_p1, %p9504_p9  ;;  %p9660_p12 = por %p9659_p11, %p9658_p6 }
  0x4c   : > { %p9656_p10 = pneg %p9655_p7 }
  0x4e   : > { %p9661_p2 = pnand %p9660_p12, %p9656_p10 }
  0x50   : > { %9664 = shalt.err (!%p9661_p2)
}
  0x51   : > { %9345 = dma.hbm_to_vmem [thread:$0]  (!%p9915_p8), %s395_s26, 192, %s397_s22, %s9925_s28  }
  0x52   : > { %405 = sbr.rel (%p9854_p3) target bundleno = 1143 (0x477), region = 56  ;;  %p11094_p9 = scmp.eq.s32.totalorder (!%p9854_p3), %s9849_s16, 0 }
  0x57   : > { %9725 = dma.done.wait (%p11094_p9), [#allocation3], 64   ;;  %p11095_p4 = pmov %p11094_p9 }
  0x59   : > { %9727 = vsyncadd (%p11095_p4), [#allocation3], 4294967232  ;;  %p11096_p1 = pmov %p11095_p4 }
  0x5b   : > { %9729 = dma.done.wait (%p11096_p1), [#allocation6], 4160   ;;  %p11097_p7 = pmov %p11096_p1 }
  0x5c   : > { %p11098_p10 = pmov %p11096_p1 }
  0x5d   : > { %9731 = vsyncadd (%p11097_p7), [#allocation6], 4294963136 }
  0x5e   : > { %9733 = dma.done.wait (%p11098_p10), [#allocation9], 16448   ;;  %p11099_p8 = pmov %p11096_p1 }
  0x5f   : > { %p11100_p3 = pmov %p11096_p1 }
  0x60   : > { %9735 = vsyncadd (%p11099_p8), [#allocation9], 4294950848 }
  0x61   : > { %9737 = dma.done.wait (%p11100_p3), [#allocation12], 16448   ;;  %p11101_p6 = pmov %p11096_p1 }
  0x62   : > { %s442_s0 = sand.u32 1, %s9849_s16   ;;  %s9996_s17 = sand.u32 1, %s9754_s10  }
  0x63   : > { %9739 = vsyncadd (%p11101_p6), [#allocation12], 4294950848  ;;  %s9280_s28 = smul.u32 3072, %s9996_s17  ;;  %s443_s14 = scalar_lea.sflag [#allocation15], %s442_s0 }
  0x65   : > { %s9999_s20 = scalar_lea.vmem [#allocation14], %s9280_s28 }
  0x66   : > { %9741 = dma.done.wait (%p9897_p13), %s443_s14, 49344  }
  0x67   : > { %9743 = vsyncadd (%p9897_p13), %s443_s14, 4294917952  ;;  %v6027_v0 = vld [vmem:[#allocation5 + $0xe0] sm:$0xf]  ;;  %v8634_v1 = vld [vmem:[#allocation5 + $0xec] sm:$0xf0]  ;;  %s9281_s24 = smul.u32 12, %s9996_s17 }
  0x68   : > { %v8632_v2 = vld [vmem:[#allocation5 + $0xe4] sm:$0xf]  ;;  %v6028_v3 = vor.u32 %v8634_v1, %v6027_v0  ;;  %v6029_v4 = vld [vmem:[#allocation5 + $0xf0] sm:$0xf0]  ;;  %v6035_v5 = vld [vmem:[#allocation5 + $0xe8] sm:$0xf] }
  0x69   : > { %v8635_v6 = vld [vmem:[#allocation5 + $0xf4] sm:$0xf0]  ;;  %v6032_v7 = vor.u32 %v8632_v2, %v6029_v4  ;;  %v8633_v9 = vld [vmem:[#allocation5 + $0xec] sm:$0xf]  ;;  %v6037_v10 = vld [vmem:[#allocation5 + $0xf8] sm:$0xf0] }
  0x6a   : > { %v6036_v8 = vor.u32 %v8635_v6, %v6035_v5  ;;  %v6011_v11 = vld [vmem:[#allocation5 + $0xc0] sm:$0xf]  ;;  %702 = vmatpush.bf16.msra.mxu0 %v6028_v3  ;;  %v6040_v12 = vor.u32 %v8633_v9, %v6037_v10  ;;  %v8630_v13 = vld [vmem:[#allocation5 + $0xcc] sm:$0xf0]  ;;  %v8628_v14 = vld [vmem:[#allocation5 + $0xc4] sm:$0xf] }
  0x6b   : > { %v6013_v15 = vld [vmem:[#allocation5 + $0xd0] sm:$0xf0]  ;;  %715 = vmatpush.bf16.msra.mxu1 %v6032_v7  ;;  %v6012_v16 = vor.u32 %v8630_v13, %v6011_v11  ;;  %v6019_v18 = vld [vmem:[#allocation5 + $0xc8] sm:$0xf]  ;;  %v8631_v19 = vld [vmem:[#allocation5 + $0xd4] sm:$0xf0] }
  0x6c   : > { %728 = vmatpush.bf16.msra.mxu2 %v6036_v8  ;;  %v6016_v17 = vor.u32 %v8628_v14, %v6013_v15  ;;  %v8629_v20 = vld [vmem:[#allocation5 + $0xcc] sm:$0xf]  ;;  %741 = vmatpush.bf16.msra.mxu3 %v6040_v12  ;;  %v6020_v21 = vor.u32 %v8631_v19, %v6019_v18  ;;  %v6021_v22 = vld [vmem:[#allocation5 + $0xd8] sm:$0xf0]  ;;  %v5995_v23 = vld [vmem:[#allocation5 + $0xa0] sm:$0xf] }
  0x6d   : > { %v8626_v24 = vld [vmem:[#allocation5 + $0xac] sm:$0xf0]  ;;  %v6024_v25 = vor.u32 %v8629_v20, %v6021_v22  ;;  %v8624_v26 = vld [vmem:[#allocation5 + $0xa4] sm:$0xf]  ;;  %v5997_v27 = vld [vmem:[#allocation5 + $0xb0] sm:$0xf0] }
  0x6e   : > { %v6003_v28 = vld [vmem:[#allocation5 + $0xa8] sm:$0xf]  ;;  %703 = vmatpush.bf16.msra.mxu0 %v6012_v16  ;;  %v5996_v29 = vor.u32 %v8626_v24, %v5995_v23  ;;  %v8627_v30 = vld [vmem:[#allocation5 + $0xb4] sm:$0xf0]  ;;  %v8625_v31 = vld [vmem:[#allocation5 + $0xac] sm:$0xf]  ;;  %v6000_v33 = vor.u32 %v8624_v26, %v5997_v27 }
  0x6f   : > { %v6005_v32 = vld [vmem:[#allocation5 + $0xb8] sm:$0xf0]  ;;  %716 = vmatpush.bf16.msra.mxu1 %v6016_v17  ;;  %v6004_v34 = vor.u32 %v8627_v30, %v6003_v28  ;;  %v5979_v35 = vld [vmem:[#allocation5 + $0x80] sm:$0xf]  ;;  %v8622_v36 = vld [vmem:[#allocation5 + $0x8c] sm:$0xf0] }
  0x70   : > { %729 = vmatpush.bf16.msra.mxu2 %v6020_v21  ;;  %v8620_v37 = vld [vmem:[#allocation5 + $0x84] sm:$0xf]  ;;  %742 = vmatpush.bf16.msra.mxu3 %v6024_v25  ;;  %v6008_v38 = vor.u32 %v8625_v31, %v6005_v32  ;;  %v5981_v39 = vld [vmem:[#allocation5 + $0x90] sm:$0xf0]  ;;  %v5987_v40 = vld [vmem:[#allocation5 + $0x88] sm:$0xf]  ;;  %v5980_v44 = vor.u32 %v8622_v36, %v5979_v35 }
  0x71   : > { %v8623_v41 = vld [vmem:[#allocation5 + $0x94] sm:$0xf0]  ;;  %v8621_v42 = vld [vmem:[#allocation5 + $0x8c] sm:$0xf]  ;;  %v5989_v43 = vld [vmem:[#allocation5 + $0x98] sm:$0xf0]  ;;  %v5984_v45 = vor.u32 %v8620_v37, %v5981_v39 }
  0x72   : > { %704 = vmatpush.bf16.msra.mxu0 %v5996_v29  ;;  %v5988_v46 = vor.u32 %v8623_v41, %v5987_v40  ;;  %v5963_v47 = vld [vmem:[#allocation5 + $0x60] sm:$0xf]  ;;  %v8618_v48 = vld [vmem:[#allocation5 + $0x6c] sm:$0xf0]  ;;  %v8616_v49 = vld [vmem:[#allocation5 + $0x64] sm:$0xf]  ;;  %v5992_v50 = vor.u32 %v8621_v42, %v5989_v43 }
  0x73   : > { %717 = vmatpush.bf16.msra.mxu1 %v6000_v33  ;;  %v5965_v51 = vld [vmem:[#allocation5 + $0x70] sm:$0xf0]  ;;  %v5971_v52 = vld [vmem:[#allocation5 + $0x68] sm:$0xf]  ;;  %v8619_v53 = vld [vmem:[#allocation5 + $0x74] sm:$0xf0]  ;;  %v5964_v56 = vor.u32 %v8618_v48, %v5963_v47 }
  0x74   : > { %730 = vmatpush.bf16.msra.mxu2 %v6004_v34  ;;  %743 = vmatpush.bf16.msra.mxu3 %v6008_v38  ;;  %v8617_v54 = vld [vmem:[#allocation5 + $0x6c] sm:$0xf]  ;;  %v5973_v55 = vld [vmem:[#allocation5 + $0x78] sm:$0xf0]  ;;  %v5968_v57 = vor.u32 %v8616_v49, %v5965_v51  ;;  %v5972_v58 = vor.u32 %v8619_v53, %v5971_v52  ;;  %v5947_v59 = vld [vmem:[#allocation5 + $0x40] sm:$0xf] }
  0x75   : > { %v8614_v60 = vld [vmem:[#allocation5 + $0x4c] sm:$0xf0]  ;;  %v8612_v61 = vld [vmem:[#allocation5 + $0x44] sm:$0xf]  ;;  %v5976_v62 = vor.u32 %v8617_v54, %v5973_v55  ;;  %v5949_v63 = vld [vmem:[#allocation5 + $0x50] sm:$0xf0] }
  0x76   : > { %705 = vmatpush.bf16.msra.mxu0 %v5980_v44  ;;  %v5955_v0 = vld [vmem:[#allocation5 + $0x48] sm:$0xf]  ;;  %v8615_v1 = vld [vmem:[#allocation5 + $0x54] sm:$0xf0]  ;;  %v8613_v2 = vld [vmem:[#allocation5 + $0x4c] sm:$0xf]  ;;  %v5948_v4 = vor.u32 %v8614_v60, %v5947_v59  ;;  %v5952_v5 = vor.u32 %v8612_v61, %v5949_v63 }
  0x77   : > { %718 = vmatpush.bf16.msra.mxu1 %v5984_v45  ;;  %v5957_v3 = vld [vmem:[#allocation5 + $0x58] sm:$0xf0]  ;;  %v5956_v6 = vor.u32 %v8615_v1, %v5955_v0  ;;  %v5931_v7 = vld [vmem:[#allocation5 + $0x20] sm:$0xf]  ;;  %v8610_v8 = vld [vmem:[#allocation5 + $0x2c] sm:$0xf0] }
  0x78   : > { %731 = vmatpush.bf16.msra.mxu2 %v5988_v46  ;;  %744 = vmatpush.bf16.msra.mxu3 %v5992_v50  ;;  %v8608_v9 = vld [vmem:[#allocation5 + $0x24] sm:$0xf]  ;;  %v5960_v10 = vor.u32 %v8613_v2, %v5957_v3  ;;  %v5933_v11 = vld [vmem:[#allocation5 + $0x30] sm:$0xf0]  ;;  %v5939_v12 = vld [vmem:[#allocation5 + $0x28] sm:$0xf]  ;;  %v5932_v16 = vor.u32 %v8610_v8, %v5931_v7 }
  0x79   : > { %v8611_v13 = vld [vmem:[#allocation5 + $0x34] sm:$0xf0]  ;;  %v8609_v14 = vld [vmem:[#allocation5 + $0x2c] sm:$0xf]  ;;  %v5941_v15 = vld [vmem:[#allocation5 + $0x38] sm:$0xf0]  ;;  %v5936_v18 = vor.u32 %v8608_v9, %v5933_v11 }
  0x7a   : > { %706 = vmatpush.bf16.msra.mxu0 %v5964_v56  ;;  %v5915_v17 = vld [vmem:[#allocation5] sm:$0xf]  ;;  %v5940_v19 = vor.u32 %v8611_v13, %v5939_v12  ;;  %v8606_v20 = vld [vmem:[#allocation5 + $0xc] sm:$0xf0]  ;;  %v8604_v21 = vld [vmem:[#allocation5 + $0x4] sm:$0xf]  ;;  %v5944_v23 = vor.u32 %v8609_v14, %v5941_v15 }
  0x7b   : > { %719 = vmatpush.bf16.msra.mxu1 %v5968_v57  ;;  %v5917_v22 = vld [vmem:[#allocation5 + $0x10] sm:$0xf0]  ;;  %v5923_v24 = vld [vmem:[#allocation5 + $0x8] sm:$0xf]  ;;  %v8607_v25 = vld [vmem:[#allocation5 + $0x14] sm:$0xf0]  ;;  %v5916_v30 = vor.u32 %v8606_v20, %v5915_v17 }
  0x7c   : > { %732 = vmatpush.bf16.msra.mxu2 %v5972_v58  ;;  %745 = vmatpush.bf16.msra.mxu3 %v5976_v62  ;;  %v8605_v26 = vld [vmem:[#allocation5 + $0xc] sm:$0xf]  ;;  %v5925_v27 = vld [vmem:[#allocation5 + $0x18] sm:$0xf0]  ;;  %v6155_v28 = vld [vmem:[#allocation8 + $0xe0] sm:$0xf]  ;;  %v5920_v33 = vor.u32 %v8604_v21, %v5917_v22  ;;  %v5924_v34 = vor.u32 %v8607_v25, %v5923_v24 }
  0x7d   : > { %v8666_v29 = vld [vmem:[#allocation8 + $0xec] sm:$0xf0]  ;;  %v6283_v31 = vld [vmem:[#allocation8 + $0x1e0] sm:$0xf]  ;;  %v5928_v35 = vor.u32 %v8605_v26, %v5925_v27  ;;  %v499_v44 = vld [vmem:[#allocation2] sm:$0xf] }
  0x7e   : > { %707 = vmatpush.bf16.msra.mxu0 %v5948_v4  ;;  %v8698_v32 = vld [vmem:[#allocation8 + $0x1ec] sm:$0xf0]  ;;  %v6156_v36 = vor.u32 %v8666_v29, %v6155_v28  ;;  %v6139_v37 = vld [vmem:[#allocation8 + $0xc0] sm:$0xf]  ;;  %s10630_s30 = scalar_lea.vmem [#allocation16], %s9281_s24  ;;  %s9282_s1 = smul.u32 96, %s9996_s17 }
  0x7f   : > { %720 = vmatpush.bf16.msra.mxu1 %v5952_v5  ;;  %v6411_v38 = vld [vmem:[#allocation8 + $0x2e0] sm:$0xf]  ;;  %v8730_v39 = vld [vmem:[#allocation8 + $0x2ec] sm:$0xf0]  ;;  %v6284_v40 = vor.u32 %v8698_v32, %v6283_v31  ;;  %s9276_s15 = smul.u32 96, %s9849_s16  ;;  %s5719_s5 = scalar_lea.sflag [#allocation4], %s9996_s17 }
  0x80   : > { %733 = vmatpush.bf16.msra.mxu2 %v5956_v6  ;;  %746 = vmatpush.bf16.msra.mxu3 %v5960_v10  ;;  %v8662_v41 = vld [vmem:[#allocation8 + $0xcc] sm:$0xf0]  ;;  %v6539_v42 = vld [vmem:[#allocation8 + $0x3e0] sm:$0xf]  ;;  %v6412_v47 = vor.u32 %v8730_v39, %v6411_v38  ;;  %s10678_s27 = scalar_lea.vmem [#allocation17], %s9282_s1  ;;  %s9700_s13 = scalar_lea.hbm %s11068_s9, 192 }
  0x81   : > { %v8762_v43 = vld [vmem:[#allocation8 + $0x3ec] sm:$0xf0]  ;;  %v6267_v45 = vld [vmem:[#allocation8 + $0x1c0] sm:$0xf]  ;;  %v6140_v48 = vor.u32 %v8662_v41, %v6139_v37  ;;  %s5730_s22 = scalar_lea.hbm %s11068_s9, %s9276_s15  ;;  %s5732_s26 = sshll.u32 %s10678_s27, 4  ;;  %s5733_s26 = int_to_ptr.vmem [resolvable:$true] %s5732_s26 }
  0x82   : > { %708 = vmatpush.bf16.msra.mxu0 %v5932_v16  ;;  %v8694_v46 = vld [vmem:[#allocation8 + $0x1cc] sm:$0xf0]  ;;  %v6540_v49 = vor.u32 %v8762_v43, %v6539_v42  ;;  %v6123_v50 = vld [vmem:[#allocation8 + $0xa0] sm:$0xf]  ;;  %s5734_s18 = sshll.u32 %s5730_s22, 4  ;;  %s5735_s18 = int_to_ptr.hbm [resolvable:$true] %s5734_s18 }
  0x83   : > { %721 = vmatpush.bf16.msra.mxu1 %v5936_v18  ;;  %v6395_v51 = vld [vmem:[#allocation8 + $0x2c0] sm:$0xf]  ;;  %v8726_v52 = vld [vmem:[#allocation8 + $0x2cc] sm:$0xf0]  ;;  %v6268_v53 = vor.u32 %v8694_v46, %v6267_v45  ;;  %s9694_s23 = sshra.s32 %s5735_s18, 4  ;;  %s9695_s23 = int_to_ptr.hbm [resolvable:$true] %s9694_s23 }
  0x84   : > { %734 = vmatpush.bf16.msra.mxu2 %v5940_v19  ;;  %747 = vmatpush.bf16.msra.mxu3 %v5944_v23  ;;  %v8658_v54 = vld [vmem:[#allocation8 + $0xac] sm:$0xf0]  ;;  %v6523_v55 = vld [vmem:[#allocation8 + $0x3c0] sm:$0xf]  ;;  %v6396_v59 = vor.u32 %v8726_v52, %v6395_v51  ;;  %s9696_s29 = scalar_lea.hbm %s9695_s23, 96  ;;  %p9701_p2 = scmp.lt.s32.totalorder %s9695_s23, %s11068_s9 }
  0x85   : > { %v8758_v56 = vld [vmem:[#allocation8 + $0x3cc] sm:$0xf0]  ;;  %v6251_v57 = vld [vmem:[#allocation8 + $0x1a0] sm:$0xf]  ;;  %v6124_v60 = vor.u32 %v8658_v54, %v6123_v50  ;;  %p9697_p13 = scmp.ne.s32.totalorder %s9695_s23, %s9696_s29  ;;  %p9702_p9 = scmp.lt.s32.totalorder %s9700_s13, %s9696_s29 }
  0x86   : > { %709 = vmatpush.bf16.msra.mxu0 %v5916_v30  ;;  %v8690_v58 = vld [vmem:[#allocation8 + $0x1ac] sm:$0xf0]  ;;  %v6524_v61 = vor.u32 %v8758_v56, %v6523_v55  ;;  %v6107_v62 = vld [vmem:[#allocation8 + $0x80] sm:$0xf]  ;;  %v8664_v55 = vld [vmem:[#allocation8 + $0xe4] sm:$0xf] }
  0x87   : > { %722 = vmatpush.bf16.msra.mxu1 %v5920_v33  ;;  %v6379_v63 = vld [vmem:[#allocation8 + $0x2a0] sm:$0xf]  ;;  %v8722_v0 = vld [vmem:[#allocation8 + $0x2ac] sm:$0xf0]  ;;  %v6252_v1 = vor.u32 %v8690_v58, %v6251_v57  ;;  %v6157_v56 = vld [vmem:[#allocation8 + $0xf0] sm:$0xf0]  ;;  %p9698_p11 = pnand %p9697_p13, %p9901_p0  ;;  %p9703_p4 = por %p9702_p9, %p9701_p2 }
  0x88   : > { %735 = vmatpush.bf16.msra.mxu2 %v5924_v34  ;;  %748 = vmatpush.bf16.msra.mxu3 %v5928_v35  ;;  %v8654_v2 = vld [vmem:[#allocation8 + $0x8c] sm:$0xf0]  ;;  %v6507_v3 = vld [vmem:[#allocation8 + $0x3a0] sm:$0xf]  ;;  %v6380_v7 = vor.u32 %v8722_v0, %v6379_v63  ;;  %v8696_v57 = vld [vmem:[#allocation8 + $0x1e4] sm:$0xf] }
  0x89   : > { %710 = vmatmul.bf16.vlgmr.msra.gmra.mxu0 %v499_v44  ;;  %v8754_v4 = vld [vmem:[#allocation8 + $0x3ac] sm:$0xf0]  ;;  %v6235_v5 = vld [vmem:[#allocation8 + $0x180] sm:$0xf]  ;;  %v6108_v8 = vor.u32 %v8654_v2, %v6107_v62  ;;  %v6285_v58 = vld [vmem:[#allocation8 + $0x1f0] sm:$0xf0]  ;;  %p9699_p12 = pneg %p9698_p11 }
  0x8a   : > { %1540 = vmatpush.bf16.msrb.mxu0 %v6156_v36  ;;  %723 = vmatmul.bf16.vlgmr.msra.gmra.mxu1 %v499_v44  ;;  %v8686_v6 = vld [vmem:[#allocation8 + $0x18c] sm:$0xf0]  ;;  %v6508_v9 = vor.u32 %v8754_v4, %v6507_v3  ;;  %v6091_v10 = vld [vmem:[#allocation8 + $0x60] sm:$0xf]  ;;  %v8660_v62 = vld [vmem:[#allocation8 + $0xc4] sm:$0xf]  ;;  %v6160_v3 = vor.u32 %v8664_v55, %v6157_v56 }
  0x8b   : > { %1553 = vmatpush.bf16.msrb.mxu1 %v6284_v40  ;;  %736 = vmatmul.bf16.vlgmr.msra.gmra.mxu2 %v499_v44  ;;  %v6363_v11 = vld [vmem:[#allocation8 + $0x280] sm:$0xf]  ;;  %v8718_v12 = vld [vmem:[#allocation8 + $0x28c] sm:$0xf0]  ;;  %v6236_v13 = vor.u32 %v8686_v6, %v6235_v5  ;;  %v8728_v5 = vld [vmem:[#allocation8 + $0x2e4] sm:$0xf]  ;;  %p9704_p1 = pnand %p9703_p4, %p9699_p12 }
  0x8c   : > { %749 = vmatmul.bf16.vlgmr.msra.gmra.mxu3 %v499_v44  ;;  %1566 = vmatpush.bf16.msrb.mxu2 %v6412_v47  ;;  %v8650_v14 = vld [vmem:[#allocation8 + $0x6c] sm:$0xf0]  ;;  %v6491_v15 = vld [vmem:[#allocation8 + $0x380] sm:$0xf]  ;;  %v6364_v19 = vor.u32 %v8718_v12, %v6363_v11  ;;  %v6413_v6 = vld [vmem:[#allocation8 + $0x2f0] sm:$0xf0] }
  0x8d   : > { %1579 = vmatpush.bf16.msrb.mxu3 %v6540_v49  ;;  %v8750_v16 = vld [vmem:[#allocation8 + $0x38c] sm:$0xf0]  ;;  %v6219_v17 = vld [vmem:[#allocation8 + $0x160] sm:$0xf]  ;;  %v6092_v20 = vor.u32 %v8650_v14, %v6091_v10  ;;  %v6541_v10 = vld [vmem:[#allocation8 + $0x3f0] sm:$0xf0] }
  0x8e   : > { %1541 = vmatpush.bf16.msrb.mxu0 %v6140_v48  ;;  %v8682_v18 = vld [vmem:[#allocation8 + $0x16c] sm:$0xf0]  ;;  %v6492_v21 = vor.u32 %v8750_v16, %v6491_v15  ;;  %v6075_v22 = vld [vmem:[#allocation8 + $0x40] sm:$0xf]  ;;  %v8692_v11 = vld [vmem:[#allocation8 + $0x1c4] sm:$0xf]  ;;  %v6416_v15 = vor.u32 %v8728_v5, %v6413_v6 }
  0x8f   : > { %1554 = vmatpush.bf16.msrb.mxu1 %v6268_v53  ;;  %v6347_v23 = vld [vmem:[#allocation8 + $0x260] sm:$0xf]  ;;  %v8714_v24 = vld [vmem:[#allocation8 + $0x26c] sm:$0xf0]  ;;  %v6220_v25 = vor.u32 %v8682_v18, %v6219_v17  ;;  %v6269_v12 = vld [vmem:[#allocation8 + $0x1d0] sm:$0xf0] }
  0x90   : > { %1567 = vmatpush.bf16.msrb.mxu2 %v6396_v59  ;;  %v8646_v26 = vld [vmem:[#allocation8 + $0x4c] sm:$0xf0]  ;;  %v6475_v27 = vld [vmem:[#allocation8 + $0x360] sm:$0xf]  ;;  %v6348_v31 = vor.u32 %v8714_v24, %v6347_v23  ;;  %v8656_v18 = vld [vmem:[#allocation8 + $0xa4] sm:$0xf] }
  0x91   : > { %1580 = vmatpush.bf16.msrb.mxu3 %v6524_v61  ;;  %v8746_v28 = vld [vmem:[#allocation8 + $0x36c] sm:$0xf0]  ;;  %v6203_v29 = vld [vmem:[#allocation8 + $0x140] sm:$0xf]  ;;  %v6076_v32 = vor.u32 %v8646_v26, %v6075_v22  ;;  %v6125_v22 = vld [vmem:[#allocation8 + $0xb0] sm:$0xf0] }
  0x92   : > { %1542 = vmatpush.bf16.msrb.mxu0 %v6124_v60  ;;  %v8678_v30 = vld [vmem:[#allocation8 + $0x14c] sm:$0xf0]  ;;  %v6476_v33 = vor.u32 %v8746_v28, %v6475_v27  ;;  %v6059_v34 = vld [vmem:[#allocation8 + $0x20] sm:$0xf]  ;;  %v8756_v23 = vld [vmem:[#allocation8 + $0x3c4] sm:$0xf]  ;;  %v6128_v28 = vor.u32 %v8656_v18, %v6125_v22 }
  0x93   : > { %1555 = vmatpush.bf16.msrb.mxu1 %v6252_v1  ;;  %v6331_v35 = vld [vmem:[#allocation8 + $0x240] sm:$0xf]  ;;  %v8710_v36 = vld [vmem:[#allocation8 + $0x24c] sm:$0xf0]  ;;  %v6204_v37 = vor.u32 %v8678_v30, %v6203_v29  ;;  %v6525_v24 = vld [vmem:[#allocation8 + $0x3d0] sm:$0xf0] }
  0x94   : > { %1568 = vmatpush.bf16.msrb.mxu2 %v6380_v7  ;;  %v8642_v38 = vld [vmem:[#allocation8 + $0x2c] sm:$0xf0]  ;;  %v6459_v39 = vld [vmem:[#allocation8 + $0x340] sm:$0xf]  ;;  %v6332_v43 = vor.u32 %v8710_v36, %v6331_v35  ;;  %v6288_v7 = vor.u32 %v8696_v57, %v6285_v58  ;;  %v6253_v26 = vld [vmem:[#allocation8 + $0x1b0] sm:$0xf0]  ;;  %v6528_v29 = vor.u32 %v8756_v23, %v6525_v24 }
  0x95   : > { %1581 = vmatpush.bf16.msrb.mxu3 %v6508_v9  ;;  %v8742_v40 = vld [vmem:[#allocation8 + $0x34c] sm:$0xf0]  ;;  %v6187_v41 = vld [vmem:[#allocation8 + $0x120] sm:$0xf]  ;;  %v6060_v45 = vor.u32 %v8642_v38, %v6059_v34  ;;  %v8760_v9 = vld [vmem:[#allocation8 + $0x3e4] sm:$0xf] }
  0x96   : > { %1543 = vmatpush.bf16.msrb.mxu0 %v6108_v8  ;;  %v8674_v42 = vld [vmem:[#allocation8 + $0x12c] sm:$0xf0]  ;;  %v6043_v44 = vld [vmem:[#allocation8] sm:$0xf]  ;;  %v6460_v46 = vor.u32 %v8742_v40, %v6459_v39  ;;  %v6141_v8 = vld [vmem:[#allocation8 + $0xd0] sm:$0xf0]  ;;  %v6544_v17 = vor.u32 %v8760_v9, %v6541_v10 }
  0x97   : > { %1556 = vmatpush.bf16.msrb.mxu1 %v6236_v13  ;;  %v8638_v47 = vld [vmem:[#allocation8 + $0xc] sm:$0xf0]  ;;  %v6315_v48 = vld [vmem:[#allocation8 + $0x220] sm:$0xf]  ;;  %v6188_v50 = vor.u32 %v8674_v42, %v6187_v41  ;;  %v6144_v16 = vor.u32 %v8660_v62, %v6141_v8  ;;  %v8652_v30 = vld [vmem:[#allocation8 + $0x84] sm:$0xf] }
  0x98   : > { %1569 = vmatpush.bf16.msrb.mxu2 %v6364_v19  ;;  %v8706_v49 = vld [vmem:[#allocation8 + $0x22c] sm:$0xf0]  ;;  %v6171_v51 = vld [vmem:[#allocation8 + $0x100] sm:$0xf]  ;;  %v6044_v60 = vor.u32 %v8638_v47, %v6043_v44  ;;  %v8724_v19 = vld [vmem:[#allocation8 + $0x2c4] sm:$0xf] }
  0x99   : > { %1582 = vmatpush.bf16.msrb.mxu3 %v6492_v21  ;;  %v6443_v52 = vld [vmem:[#allocation8 + $0x320] sm:$0xf]  ;;  %v8738_v53 = vld [vmem:[#allocation8 + $0x32c] sm:$0xf0]  ;;  %v6316_v59 = vor.u32 %v8706_v49, %v6315_v48  ;;  %v6272_v21 = vor.u32 %v8692_v11, %v6269_v12  ;;  %v6109_v34 = vld [vmem:[#allocation8 + $0x90] sm:$0xf0] }
  0x9a   : > { %1544 = vmatpush.bf16.msrb.mxu0 %v6092_v20  ;;  %v8670_v54 = vld [vmem:[#allocation8 + $0x10c] sm:$0xf0]  ;;  %v6444_v61 = vor.u32 %v8738_v53, %v6443_v52  ;;  %v6299_v63 = vld [vmem:[#allocation8 + $0x200] sm:$0xf]  ;;  %v6397_v20 = vld [vmem:[#allocation8 + $0x2d0] sm:$0xf0]  ;;  %v6112_v40 = vor.u32 %v8652_v30, %v6109_v34 }
  0x9b   : > { %1557 = vmatpush.bf16.msrb.mxu1 %v6220_v25  ;;  %v8702_v0 = vld [vmem:[#allocation8 + $0x20c] sm:$0xf0]  ;;  %v6427_v1 = vld [vmem:[#allocation8 + $0x300] sm:$0xf]  ;;  %v6172_v2 = vor.u32 %v8670_v54, %v6171_v51  ;;  %v8688_v25 = vld [vmem:[#allocation8 + $0x1a4] sm:$0xf]  ;;  %v6400_v27 = vor.u32 %v8724_v19, %v6397_v20 }
  0x9c   : > { %1570 = vmatpush.bf16.msrb.mxu2 %v6348_v31  ;;  %v8734_v4 = vld [vmem:[#allocation8 + $0x30c] sm:$0xf0]  ;;  %v6300_v13 = vor.u32 %v8702_v0, %v6299_v63  ;;  %v8720_v31 = vld [vmem:[#allocation8 + $0x2a4] sm:$0xf]  ;;  %v6509_v36 = vld [vmem:[#allocation8 + $0x3b0] sm:$0xf0] }
  0x9d   : > { %1583 = vmatpush.bf16.msrb.mxu3 %v6476_v33  ;;  %v6428_v14 = vor.u32 %v8734_v4, %v6427_v1  ;;  %v6256_v33 = vor.u32 %v8688_v25, %v6253_v26  ;;  %v8752_v35 = vld [vmem:[#allocation8 + $0x3a4] sm:$0xf]  ;;  %v6237_v38 = vld [vmem:[#allocation8 + $0x190] sm:$0xf0] }
  0x9e   : > { %1545 = vmatpush.bf16.msrb.mxu0 %v6076_v32  ;;  %v6381_v32 = vld [vmem:[#allocation8 + $0x2b0] sm:$0xf0]  ;;  %v6512_v41 = vor.u32 %v8752_v35, %v6509_v36  ;;  %v8648_v42 = vld [vmem:[#allocation8 + $0x64] sm:$0xf] }
  0x9f   : > { %1558 = vmatpush.bf16.msrb.mxu1 %v6204_v37  ;;  %v8684_v37 = vld [vmem:[#allocation8 + $0x184] sm:$0xf]  ;;  %v6384_v39 = vor.u32 %v8720_v31, %v6381_v32  ;;  %v6365_v44 = vld [vmem:[#allocation8 + $0x290] sm:$0xf0] }
  0xa0   : > { %1571 = vmatpush.bf16.msrb.mxu2 %v6332_v43  ;;  %v8716_v43 = vld [vmem:[#allocation8 + $0x284] sm:$0xf]  ;;  %v6493_v48 = vld [vmem:[#allocation8 + $0x390] sm:$0xf0] }
  0xa1   : > { %1584 = vmatpush.bf16.msrb.mxu3 %v6460_v46  ;;  %v6093_v46 = vld [vmem:[#allocation8 + $0x70] sm:$0xf0]  ;;  %v8748_v47 = vld [vmem:[#allocation8 + $0x384] sm:$0xf]  ;;  %v6368_v51 = vor.u32 %v8716_v43, %v6365_v44  ;;  %v8699_v43 = vld [vmem:[#allocation8 + $0x1f4] sm:$0xf0] }
  0xa2   : > { %1546 = vmatpush.bf16.msrb.mxu0 %v6060_v45  ;;  %v6240_v45 = vor.u32 %v8684_v37, %v6237_v38  ;;  %v8680_v49 = vld [vmem:[#allocation8 + $0x164] sm:$0xf]  ;;  %v6096_v52 = vor.u32 %v8648_v42, %v6093_v46  ;;  %v6496_v53 = vor.u32 %v8748_v47, %v6493_v48  ;;  %v6077_v56 = vld [vmem:[#allocation8 + $0x50] sm:$0xf0]  ;;  %v6291_v42 = vld [vmem:[#allocation8 + $0x1e8] sm:$0xf] }
  0xa3   : > { %1559 = vmatpush.bf16.msrb.mxu1 %v6188_v50  ;;  %v6221_v50 = vld [vmem:[#allocation8 + $0x170] sm:$0xf0]  ;;  %v8644_v55 = vld [vmem:[#allocation8 + $0x44] sm:$0xf] }
  0xa4   : > { %1572 = vmatpush.bf16.msrb.mxu2 %v6316_v59  ;;  %v6224_v54 = vor.u32 %v8680_v49, %v6221_v50  ;;  %v8676_v57 = vld [vmem:[#allocation8 + $0x144] sm:$0xf]  ;;  %v6205_v58 = vld [vmem:[#allocation8 + $0x150] sm:$0xf0]  ;;  %v6080_v59 = vor.u32 %v8644_v55, %v6077_v56  ;;  %v6292_v50 = vor.u32 %v8699_v43, %v6291_v42  ;;  %v8695_v55 = vld [vmem:[#allocation8 + $0x1d4] sm:$0xf0] }
  0xa5   : > { %1585 = vmatpush.bf16.msrb.mxu3 %v6444_v61  ;;  %v8712_v61 = vld [vmem:[#allocation8 + $0x264] sm:$0xf]  ;;  %v6349_v62 = vld [vmem:[#allocation8 + $0x270] sm:$0xf0] }
  0xa6   : > { %1547 = vmatpush.bf16.msrb.mxu0 %v6044_v60  ;;  %v6208_v60 = vor.u32 %v8676_v57, %v6205_v58  ;;  %v8744_v63 = vld [vmem:[#allocation8 + $0x364] sm:$0xf]  ;;  %v6352_v0 = vor.u32 %v8712_v61, %v6349_v62  ;;  %v6477_v1 = vld [vmem:[#allocation8 + $0x370] sm:$0xf0]  ;;  %v6419_v61 = vld [vmem:[#allocation8 + $0x2e8] sm:$0xf] }
  0xa7   : > { %1560 = vmatpush.bf16.msrb.mxu1 %v6172_v2  ;;  %v6480_v2 = vor.u32 %v8744_v63, %v6477_v1  ;;  %v6061_v4 = vld [vmem:[#allocation8 + $0x30] sm:$0xf0]  ;;  %v8672_v6 = vld [vmem:[#allocation8 + $0x124] sm:$0xf]  ;;  %v8731_v62 = vld [vmem:[#allocation8 + $0x2f4] sm:$0xf0] }
  0xa8   : > { %1573 = vmatpush.bf16.msrb.mxu2 %v6300_v13  ;;  %v8708_v9 = vld [vmem:[#allocation8 + $0x244] sm:$0xf]  ;;  %v6333_v10 = vld [vmem:[#allocation8 + $0x250] sm:$0xf0]  ;;  %v6547_v63 = vld [vmem:[#allocation8 + $0x3e8] sm:$0xf] }
  0xa9   : > { %1586 = vmatpush.bf16.msrb.mxu3 %v6428_v14  ;;  %v8740_v11 = vld [vmem:[#allocation8 + $0x344] sm:$0xf]  ;;  %v6336_v12 = vor.u32 %v8708_v9, %v6333_v10  ;;  %v6461_v13 = vld [vmem:[#allocation8 + $0x350] sm:$0xf0]  ;;  %v6420_v10 = vor.u32 %v8731_v62, %v6419_v61  ;;  %v8643_v61 = vld [vmem:[#allocation8 + $0x34] sm:$0xf0] }
  0xaa   : > { %1592 = vmatpush.bf16.msra.mxu0 %v6160_v3  ;;  %v8640_v3 = vld [vmem:[#allocation8 + $0x24] sm:$0xf]  ;;  %v6464_v14 = vor.u32 %v8740_v11, %v6461_v13  ;;  %v6173_v19 = vld [vmem:[#allocation8 + $0x110] sm:$0xf0]  ;;  %v6195_v62 = vld [vmem:[#allocation8 + $0x128] sm:$0xf] }
  0xab   : > { %1605 = vmatpush.bf16.msra.mxu1 %v6288_v7  ;;  %v6064_v5 = vor.u32 %v8640_v3, %v6061_v4  ;;  %v6189_v7 = vld [vmem:[#allocation8 + $0x130] sm:$0xf0]  ;;  %v8736_v24 = vld [vmem:[#allocation8 + $0x324] sm:$0xf]  ;;  %v8763_v3 = vld [vmem:[#allocation8 + $0x3f4] sm:$0xf0] }
  0xac   : > { %1618 = vmatpush.bf16.msra.mxu2 %v6416_v15  ;;  %v6192_v8 = vor.u32 %v8672_v6, %v6189_v7  ;;  %v8636_v15 = vld [vmem:[#allocation8 + $0x4] sm:$0xf]  ;;  %v6317_v22 = vld [vmem:[#allocation8 + $0x230] sm:$0xf0]  ;;  %v6131_v4 = vld [vmem:[#allocation8 + $0xa8] sm:$0xf] }
  0xad   : > { %1631 = vmatpush.bf16.msra.mxu3 %v6544_v17  ;;  %v8668_v17 = vld [vmem:[#allocation8 + $0x104] sm:$0xf]  ;;  %v6445_v25 = vld [vmem:[#allocation8 + $0x330] sm:$0xf0]  ;;  %v6259_v7 = vld [vmem:[#allocation8 + $0x1a8] sm:$0xf] }
  0xae   : > { %1593 = vmatpush.bf16.msra.mxu0 %v6144_v16  ;;  %v6045_v16 = vld [vmem:[#allocation8 + $0x10] sm:$0xf0]  ;;  %v6176_v20 = vor.u32 %v8668_v17, %v6173_v19  ;;  %v6448_v26 = vor.u32 %v8736_v24, %v6445_v25  ;;  %v8732_v30 = vld [vmem:[#allocation8 + $0x304] sm:$0xf]  ;;  %v8759_v19 = vld [vmem:[#allocation8 + $0x3d4] sm:$0xf0] }
  0xaf   : > { %1606 = vmatpush.bf16.msra.mxu1 %v6272_v21  ;;  %v6048_v18 = vor.u32 %v8636_v15, %v6045_v16  ;;  %v8704_v21 = vld [vmem:[#allocation8 + $0x224] sm:$0xf]  ;;  %v6429_v31 = vld [vmem:[#allocation8 + $0x310] sm:$0xf0]  ;;  %v8727_v15 = vld [vmem:[#allocation8 + $0x2d4] sm:$0xf0] }
  0xb0   : > { %1619 = vmatpush.bf16.msra.mxu2 %v6400_v27  ;;  %v6320_v23 = vor.u32 %v8704_v21, %v6317_v22  ;;  %v8700_v27 = vld [vmem:[#allocation8 + $0x204] sm:$0xf]  ;;  %v6432_v32 = vor.u32 %v8732_v30, %v6429_v31  ;;  %v6531_v16 = vld [vmem:[#allocation8 + $0x3c8] sm:$0xf]  ;;  %v8655_v21 = vld [vmem:[#allocation8 + $0x94] sm:$0xf0] }
  0xb1   : > { %1632 = vmatpush.bf16.msra.mxu3 %v6528_v29  ;;  %v6243_v22 = vld [vmem:[#allocation8 + $0x188] sm:$0xf]  ;;  %v8723_v30 = vld [vmem:[#allocation8 + $0x2b4] sm:$0xf0] }
  0xb2   : > { %1594 = vmatpush.bf16.msra.mxu0 %v6128_v28  ;;  %v6301_v28 = vld [vmem:[#allocation8 + $0x210] sm:$0xf0] }
  0xb3   : > { %1607 = vmatpush.bf16.msra.mxu1 %v6256_v33  ;;  %v6304_v29 = vor.u32 %v8700_v27, %v6301_v28  ;;  %v532_v33 = vld [vmem:[#allocation7] sm:$0xf]  ;;  %v6532_v27 = vor.u32 %v8759_v19, %v6531_v16  ;;  %v8697_v16 = vld [vmem:[#allocation8 + $0x1ec] sm:$0xf] }
  0xb4   : > { %1620 = vmatpush.bf16.msra.mxu2 %v6384_v39  ;;  %v534_v34 = vperm.slane %v532_v33, 0  ;;  %v535_v35 = vperm.slane %v532_v33, 1  ;;  %v6163_v39 = vld [vmem:[#allocation8 + $0xe8] sm:$0xf]  ;;  %v536_v46 = vperm.slane %v532_v33, 2  ;;  %v537_v49 = vperm.slane %v532_v33, 3 }
  0xb5   : > { %1633 = vmatpush.bf16.msra.mxu3 %v6512_v41  ;;  %v8755_v33 = vld [vmem:[#allocation8 + $0x3b4] sm:$0xf0] }
  0xb6   : > { %1595 = vmatpush.bf16.msra.mxu0 %v6112_v40  ;;  %v8667_v40 = vld [vmem:[#allocation8 + $0xf4] sm:$0xf0] }
  0xb7   : > { %1608 = vmatpush.bf16.msra.mxu1 %v6240_v45  ;;  %v6164_v47 = vor.u32 %v8667_v40, %v6163_v39  ;;  %v6371_v40 = vld [vmem:[#allocation8 + $0x288] sm:$0xf] }
  0xb8   : > { %1621 = vmatpush.bf16.msra.mxu2 %v6368_v51  ;;  %v6147_v51 = vld [vmem:[#allocation8 + $0xc8] sm:$0xf] }
  0xb9   : > { %1634 = vmatpush.bf16.msra.mxu3 %v6496_v53 }
  0xba   : > { %1596 = vmatpush.bf16.msra.mxu0 %v6096_v52  ;;  %v8663_v52 = vld [vmem:[#allocation8 + $0xd4] sm:$0xf0] }
  0xbb   : > { %1609 = vmatpush.bf16.msra.mxu1 %v6224_v54  ;;  %v6275_v54 = vld [vmem:[#allocation8 + $0x1c8] sm:$0xf] }
  0xbc   : > { %1622 = vmatpush.bf16.msra.mxu2 %v6352_v0 }
  0xbd   : > { %1635 = vmatpush.bf16.msra.mxu3 %v6480_v2  ;;  %v6276_v2 = vor.u32 %v8695_v55, %v6275_v54  ;;  %v6355_v54 = vld [vmem:[#allocation8 + $0x268] sm:$0xf]  ;;  %v8715_v55 = vld [vmem:[#allocation8 + $0x274] sm:$0xf0] }
  0xbe   : > { %1597 = vmatpush.bf16.msra.mxu0 %v6080_v59 }
  0xbf   : > { %1610 = vmatpush.bf16.msra.mxu1 %v6208_v60  ;;  %v6148_v60 = vor.u32 %v8663_v52, %v6147_v51 }
  0xc0   : > { %1623 = vmatpush.bf16.msra.mxu2 %v6336_v12  ;;  %v6548_v12 = vor.u32 %v8763_v3, %v6547_v63  ;;  %v8675_v63 = vld [vmem:[#allocation8 + $0x134] sm:$0xf0] }
  0xc1   : > { %1636 = vmatpush.bf16.msra.mxu3 %v6464_v14  ;;  %v6403_v14 = vld [vmem:[#allocation8 + $0x2c8] sm:$0xf]  ;;  %v8711_v3 = vld [vmem:[#allocation8 + $0x254] sm:$0xf0] }
  0xc2   : > { %1598 = vmatpush.bf16.msra.mxu0 %v6064_v5  ;;  %v8659_v5 = vld [vmem:[#allocation8 + $0xb4] sm:$0xf0]  ;;  %v6404_v25 = vor.u32 %v8727_v15, %v6403_v14  ;;  %v6165_v15 = vld [vmem:[#allocation8 + $0xf8] sm:$0xf0] }
  0xc3   : > { %1611 = vmatpush.bf16.msra.mxu1 %v6192_v8  ;;  %v8691_v8 = vld [vmem:[#allocation8 + $0x1b4] sm:$0xf0]  ;;  %v6132_v13 = vor.u32 %v8659_v5, %v6131_v4  ;;  %v6467_v4 = vld [vmem:[#allocation8 + $0x348] sm:$0xf] }
  0xc4   : > { %1624 = vmatpush.bf16.msra.mxu2 %v6320_v23  ;;  %v8687_v23 = vld [vmem:[#allocation8 + $0x194] sm:$0xf0] }
  0xc5   : > { %1637 = vmatpush.bf16.msra.mxu3 %v6448_v26  ;;  %v6244_v31 = vor.u32 %v8687_v23, %v6243_v22 }
  0xc6   : > { %1599 = vmatpush.bf16.msra.mxu0 %v6048_v18  ;;  %v6260_v18 = vor.u32 %v8691_v8, %v6259_v7  ;;  %v8743_v7 = vld [vmem:[#allocation8 + $0x354] sm:$0xf0]  ;;  %v6051_v8 = vld [vmem:[#allocation8 + $0x8] sm:$0xf] }
  0xc7   : > { %1612 = vmatpush.bf16.msra.mxu1 %v6176_v20  ;;  %v6115_v20 = vld [vmem:[#allocation8 + $0x88] sm:$0xf]  ;;  %v6468_v19 = vor.u32 %v8743_v7, %v6467_v4  ;;  %v6517_v7 = vld [vmem:[#allocation8 + $0x3b8] sm:$0xf0] }
  0xc8   : > { %1625 = vmatpush.bf16.msra.mxu2 %v6304_v29  ;;  %v6116_v28 = vor.u32 %v8655_v21, %v6115_v20  ;;  %v6387_v29 = vld [vmem:[#allocation8 + $0x2a8] sm:$0xf]  ;;  %v8707_v21 = vld [vmem:[#allocation8 + $0x234] sm:$0xf0] }
  0xc9   : > { %1638 = vmatpush.bf16.msra.mxu3 %v6432_v32  ;;  %v6515_v32 = vld [vmem:[#allocation8 + $0x3a8] sm:$0xf] }
  0xca   : > { %v6516_v39 = vor.u32 %v8755_v33, %v6515_v32  ;;  %v6323_v20 = vld [vmem:[#allocation8 + $0x228] sm:$0xf]  ;;  %v6277_v32 = vld [vmem:[#allocation8 + $0x1d8] sm:$0xf0] }
 0x106   : > { %v711_v36 = vpop.f32.mrf.mxu0 }
 0x107   : > { %v712_v37 = vadd.f32 %v711_v36, %v534_v34  ;;  %v724_v38 = vpop.f32.mrf.mxu1  ;;  %v6099_v34 = vld [vmem:[#allocation8 + $0x68] sm:$0xf] }
 0x108   : > { %v725_v41 = vadd.f32 %v724_v38, %v535_v35  ;;  %v8651_v35 = vld [vmem:[#allocation8 + $0x74] sm:$0xf0]  ;;  %v6227_v36 = vld [vmem:[#allocation8 + $0x168] sm:$0xf]  ;;  %v6388_v38 = vor.u32 %v8723_v30, %v6387_v29  ;;  %v6324_v29 = vor.u32 %v8707_v21, %v6323_v20  ;;  %v6149_v30 = vld [vmem:[#allocation8 + $0xd8] sm:$0xf0] }
 0x109   : > { %v754_v44 = vmax.f32 %v712_v37, 0.0  ;;  %v8683_v37 = vld [vmem:[#allocation8 + $0x174] sm:$0xf0]  ;;  %v6100_v42 = vor.u32 %v8651_v35, %v6099_v34  ;;  %v6307_v34 = vld [vmem:[#allocation8 + $0x208] sm:$0xf] }
 0x10a   : > { %v755_v45 = vmax.f32 %v725_v41, 0.0  ;;  %v8719_v41 = vld [vmem:[#allocation8 + $0x294] sm:$0xf0]  ;;  %v6228_v43 = vor.u32 %v8683_v37, %v6227_v36  ;;  %v6435_v36 = vld [vmem:[#allocation8 + $0x308] sm:$0xf] }
 0x10b   : > { %v10005_v48 = vpack.c.bf16 %v754_v44, %v754_v44  ;;  %v6499_v44 = vld [vmem:[#allocation8 + $0x388] sm:$0xf]  ;;  %v6372_v51 = vor.u32 %v8719_v41, %v6371_v40  ;;  %v8703_v35 = vld [vmem:[#allocation8 + $0x214] sm:$0xf0]  ;;  %v8749_v20 = vld [vmem:[#allocation8 + $0x38c] sm:$0xf] }
 0x10c   : > { %v10007_v53 = vpack.c.bf16 %v755_v45, %v755_v45  ;;  %v8751_v45 = vld [vmem:[#allocation8 + $0x394] sm:$0xf0]  ;;  %v6501_v21 = vld [vmem:[#allocation8 + $0x398] sm:$0xf0] }
 0x10d   : > { %1548 = vmatmul.bf16.vlgmr.msrb.gmra.mxu0 %v10005_v48  ;;  %v6500_v52 = vor.u32 %v8751_v45, %v6499_v44  ;;  %v8735_v37 = vld [vmem:[#allocation8 + $0x314] sm:$0xf0]  ;;  %v8657_v44 = vld [vmem:[#allocation8 + $0xac] sm:$0xf]  ;;  %v6308_v45 = vor.u32 %v8703_v35, %v6307_v34  ;;  %v6069_v35 = vld [vmem:[#allocation8 + $0x38] sm:$0xf0] }
 0x10e   : > { %v737_v56 = vpop.f32.mrf.mxu2  ;;  %1561 = vmatmul.bf16.vlgmr.msrb.gmra.mxu1 %v10007_v53  ;;  %1644 = vmatpush.bf16.msrb.mxu0 %v6164_v47  ;;  %v713_v59 = vpop.f32.mrf.mxu0  ;;  %v8647_v47 = vld [vmem:[#allocation8 + $0x54] sm:$0xf0]  ;;  %v8641_v34 = vld [vmem:[#allocation8 + $0x2c] sm:$0xf] }
 0x10f   : > { %v738_v57 = vadd.f32 %v737_v56, %v536_v46  ;;  %v750_v58 = vpop.f32.mrf.mxu3  ;;  %1657 = vmatpush.bf16.msrb.mxu1 %v6292_v50  ;;  %v726_v1 = vpop.f32.mrf.mxu1  ;;  %v6083_v46 = vld [vmem:[#allocation8 + $0x48] sm:$0xf]  ;;  %v8679_v50 = vld [vmem:[#allocation8 + $0x154] sm:$0xf0] }
 0x110   : > { %v751_v0 = vadd.f32 %v750_v58, %v537_v49  ;;  %v6211_v49 = vld [vmem:[#allocation8 + $0x148] sm:$0xf]  ;;  %v6084_v56 = vor.u32 %v8647_v47, %v6083_v46  ;;  %v8747_v59 = vld [vmem:[#allocation8 + $0x374] sm:$0xf0]  ;;  %v6133_v46 = vld [vmem:[#allocation8 + $0xb8] sm:$0xf0] }
 0x111   : > { %v756_v6 = vmax.f32 %v738_v57, 0.0  ;;  %v6212_v57 = vor.u32 %v8679_v50, %v6211_v49  ;;  %v6483_v58 = vld [vmem:[#allocation8 + $0x368] sm:$0xf]  ;;  %v8689_v47 = vld [vmem:[#allocation8 + $0x1ac] sm:$0xf]  ;;  %v6436_v50 = vor.u32 %v8735_v37, %v6435_v36 }
 0x112   : > { %v757_v9 = vmax.f32 %v751_v0, 0.0  ;;  %1645 = vmatpush.bf16.msrb.mxu0 %v6148_v60  ;;  %v6067_v60 = vld [vmem:[#allocation8 + $0x28] sm:$0xf]  ;;  %v6356_v0 = vor.u32 %v8715_v55, %v6355_v54  ;;  %v6484_v1 = vor.u32 %v8747_v59, %v6483_v58  ;;  %v6261_v49 = vld [vmem:[#allocation8 + $0x1b8] sm:$0xf0] }
 0x113   : > { %v10011_v11 = vpack.c.bf16 %v756_v6, %v756_v6  ;;  %1658 = vmatpush.bf16.msrb.mxu1 %v6276_v2  ;;  %v6339_v2 = vld [vmem:[#allocation8 + $0x248] sm:$0xf]  ;;  %v6068_v5 = vor.u32 %v8643_v61, %v6067_v60  ;;  %v6196_v6 = vor.u32 %v8675_v63, %v6195_v62  ;;  %v8725_v54 = vld [vmem:[#allocation8 + $0x2cc] sm:$0xf]  ;;  %v6405_v55 = vld [vmem:[#allocation8 + $0x2d8] sm:$0xf0] }
 0x114   : > { %v10013_v17 = vpack.c.bf16 %v757_v9, %v757_v9  ;;  %v8639_v9 = vld [vmem:[#allocation8 + $0x14] sm:$0xf0]  ;;  %v6340_v14 = vor.u32 %v8711_v3, %v6339_v2  ;;  %v8757_v58 = vld [vmem:[#allocation8 + $0x3cc] sm:$0xf]  ;;  %v6533_v59 = vld [vmem:[#allocation8 + $0x3d8] sm:$0xf0] }
 0x115   : > { %1574 = vmatmul.bf16.vlgmr.msrb.gmra.mxu2 %v10011_v11  ;;  %v6052_v22 = vor.u32 %v8639_v9, %v6051_v8  ;;  %v8653_v60 = vld [vmem:[#allocation8 + $0x8c] sm:$0xf]  ;;  %v6117_v61 = vld [vmem:[#allocation8 + $0x98] sm:$0xf0] }
 0x116   : > { %1587 = vmatmul.bf16.vlgmr.msrb.gmra.mxu3 %v10013_v17  ;;  %1670 = vmatpush.bf16.msrb.mxu2 %v6420_v10  ;;  %v739_v24 = vpop.f32.mrf.mxu2  ;;  %v6179_v10 = vld [vmem:[#allocation8 + $0x108] sm:$0xf]  ;;  %v8685_v62 = vld [vmem:[#allocation8 + $0x18c] sm:$0xf]  ;;  %v6245_v63 = vld [vmem:[#allocation8 + $0x198] sm:$0xf0]  ;;  %v6120_v4 = vor.u32 %v8653_v60, %v6117_v61 }
 0x117   : > { %1683 = vmatpush.bf16.msrb.mxu3 %v6548_v12  ;;  %v752_v26 = vpop.f32.mrf.mxu3  ;;  %1646 = vmatpush.bf16.msrb.mxu0 %v6132_v13  ;;  %v8671_v12 = vld [vmem:[#allocation8 + $0x114] sm:$0xf0]  ;;  %v8665_v13 = vld [vmem:[#allocation8 + $0xec] sm:$0xf]  ;;  %v6451_v24 = vld [vmem:[#allocation8 + $0x328] sm:$0xf] }
 0x118   : > { %1659 = vmatpush.bf16.msrb.mxu1 %v6260_v18  ;;  %v6293_v18 = vld [vmem:[#allocation8 + $0x1f8] sm:$0xf0]  ;;  %v6180_v23 = vor.u32 %v8671_v12, %v6179_v10  ;;  %v6168_v26 = vor.u32 %v8665_v13, %v6165_v15  ;;  %v8721_v2 = vld [vmem:[#allocation8 + $0x2ac] sm:$0xf] }
 0x119   : > { %v6389_v3 = vld [vmem:[#allocation8 + $0x2b8] sm:$0xf0]  ;;  %v8649_v8 = vld [vmem:[#allocation8 + $0x6c] sm:$0xf] }
 0x11a   : > { %1671 = vmatpush.bf16.msrb.mxu2 %v6404_v25  ;;  %v8739_v25 = vld [vmem:[#allocation8 + $0x334] sm:$0xf0]  ;;  %v6101_v9 = vld [vmem:[#allocation8 + $0x78] sm:$0xf0]  ;;  %v8681_v10 = vld [vmem:[#allocation8 + $0x16c] sm:$0xf]  ;;  %v6392_v13 = vor.u32 %v8721_v2, %v6389_v3 }
 0x11b   : > { %1684 = vmatpush.bf16.msrb.mxu3 %v6532_v27  ;;  %1647 = vmatpush.bf16.msrb.mxu0 %v6116_v28  ;;  %v6296_v27 = vor.u32 %v8697_v16, %v6293_v18  ;;  %v8661_v28 = vld [vmem:[#allocation8 + $0xcc] sm:$0xf]  ;;  %v6452_v33 = vor.u32 %v8739_v25, %v6451_v24  ;;  %v6229_v12 = vld [vmem:[#allocation8 + $0x178] sm:$0xf0]  ;;  %v6104_v18 = vor.u32 %v8649_v8, %v6101_v9 }
 0x11c   : > { %1660 = vmatpush.bf16.msrb.mxu1 %v6244_v31  ;;  %v8693_v31 = vld [vmem:[#allocation8 + $0x1cc] sm:$0xf]  ;;  %v6152_v40 = vor.u32 %v8661_v28, %v6149_v30  ;;  %v6373_v16 = vld [vmem:[#allocation8 + $0x298] sm:$0xf0] }
 0x11d   : > { %1600 = vmatmul.bf16.vlgmr.msra.gmra.mxu0 %v10005_v48  ;;  %v6280_v41 = vor.u32 %v8693_v31, %v6277_v32  ;;  %v8717_v15 = vld [vmem:[#allocation8 + $0x28c] sm:$0xf]  ;;  %v6213_v25 = vld [vmem:[#allocation8 + $0x158] sm:$0xf0] }
 0x11e   : > { %1672 = vmatpush.bf16.msrb.mxu2 %v6388_v38  ;;  %1613 = vmatmul.bf16.vlgmr.msra.gmra.mxu1 %v10007_v53  ;;  %v8729_v38 = vld [vmem:[#allocation8 + $0x2ec] sm:$0xf]  ;;  %v6197_v37 = vld [vmem:[#allocation8 + $0x138] sm:$0xf0] }
 0x11f   : > { %1685 = vmatpush.bf16.msrb.mxu3 %v6516_v39  ;;  %1648 = vmatpush.bf16.msrb.mxu0 %v6100_v42  ;;  %v6421_v39 = vld [vmem:[#allocation8 + $0x2f8] sm:$0xf0]  ;;  %v8761_v42 = vld [vmem:[#allocation8 + $0x3ec] sm:$0xf] }
 0x120   : > { %1661 = vmatpush.bf16.msrb.mxu1 %v6228_v43  ;;  %v6549_v43 = vld [vmem:[#allocation8 + $0x3f8] sm:$0xf0]  ;;  %v8677_v24 = vld [vmem:[#allocation8 + $0x14c] sm:$0xf] }
 0x121   : > { %v8713_v28 = vld [vmem:[#allocation8 + $0x26c] sm:$0xf]  ;;  %v6216_v31 = vor.u32 %v8677_v24, %v6213_v25  ;;  %v6309_v9 = vld [vmem:[#allocation8 + $0x218] sm:$0xf0]  ;;  %v6907_v25 = vld [vmem:[#allocation11 + $0x2c0] sm:$0xf] }
 0x122   : > { %1673 = vmatpush.bf16.msrb.mxu2 %v6372_v51  ;;  %v6424_v51 = vor.u32 %v8729_v38, %v6421_v39  ;;  %v8745_v32 = vld [vmem:[#allocation8 + $0x36c] sm:$0xf] }
 0x123   : > { %1686 = vmatpush.bf16.msrb.mxu3 %v6500_v52  ;;  %1649 = vmatpush.bf16.msrb.mxu0 %v6084_v56  ;;  %v6552_v52 = vor.u32 %v8761_v42, %v6549_v43  ;;  %v6136_v56 = vor.u32 %v8657_v44, %v6133_v46  ;;  %v8673_v36 = vld [vmem:[#allocation8 + $0x12c] sm:$0xf]  ;;  %v6072_v43 = vor.u32 %v8641_v34, %v6069_v35  ;;  %v8778_v34 = vld [vmem:[#allocation11 + $0x6c] sm:$0xf0] }
 0x124   : > { %1662 = vmatpush.bf16.msrb.mxu1 %v6212_v57  ;;  %v6264_v57 = vor.u32 %v8689_v47, %v6261_v49  ;;  %v8741_v42 = vld [vmem:[#allocation8 + $0x34c] sm:$0xf]  ;;  %v6200_v44 = vor.u32 %v8673_v36, %v6197_v37  ;;  %v6053_v47 = vld [vmem:[#allocation8 + $0x18] sm:$0xf0]  ;;  %v6731_v36 = vld [vmem:[#allocation11 + $0x160] sm:$0xf] }
 0x125   : > { %1626 = vmatmul.bf16.vlgmr.msra.gmra.mxu2 %v10011_v11  ;;  %v8637_v46 = vld [vmem:[#allocation8 + $0xc] sm:$0xf]  ;;  %v8810_v37 = vld [vmem:[#allocation11 + $0x16c] sm:$0xf0] }
 0x126   : > { %1639 = vmatmul.bf16.vlgmr.msra.gmra.mxu3 %v10013_v17  ;;  %1674 = vmatpush.bf16.msrb.mxu2 %v6356_v0  ;;  %v6408_v0 = vor.u32 %v8725_v54, %v6405_v55  ;;  %v8669_v49 = vld [vmem:[#allocation8 + $0x10c] sm:$0xf]  ;;  %v8794_v54 = vld [vmem:[#allocation11 + $0xec] sm:$0xf0]  ;;  %v6795_v55 = vld [vmem:[#allocation11 + $0x1e0] sm:$0xf]  ;;  %v6056_v60 = vor.u32 %v8637_v46, %v6053_v47 }
 0x127   : > { %1687 = vmatpush.bf16.msrb.mxu3 %v6484_v1  ;;  %1650 = vmatpush.bf16.msrb.mxu0 %v6068_v5  ;;  %v6536_v1 = vor.u32 %v8757_v58, %v6533_v59  ;;  %v6248_v5 = vor.u32 %v8685_v62, %v6245_v63  ;;  %v8705_v58 = vld [vmem:[#allocation8 + $0x22c] sm:$0xf]  ;;  %v6325_v59 = vld [vmem:[#allocation8 + $0x238] sm:$0xf0]  ;;  %v6555_v47 = vld [vmem:[#allocation11] sm:$0xf] }
 0x128   : > { %1663 = vmatpush.bf16.msrb.mxu1 %v6196_v6  ;;  %v8753_v6 = vld [vmem:[#allocation8 + $0x3ac] sm:$0xf]  ;;  %v6453_v63 = vld [vmem:[#allocation8 + $0x338] sm:$0xf0]  ;;  %v6328_v3 = vor.u32 %v8705_v58, %v6325_v59  ;;  %v8784_v58 = vld [vmem:[#allocation11 + $0xa4] sm:$0xf] }
 0x129   : > { %v8737_v62 = vld [vmem:[#allocation8 + $0x32c] sm:$0xf]  ;;  %v6637_v59 = vld [vmem:[#allocation11 + $0xb0] sm:$0xf0] }
 0x12a   : > { %1675 = vmatpush.bf16.msrb.mxu2 %v6340_v14  ;;  %v6520_v14 = vor.u32 %v8753_v6, %v6517_v7  ;;  %v8822_v6 = vld [vmem:[#allocation11 + $0x1cc] sm:$0xf0]  ;;  %v6456_v7 = vor.u32 %v8737_v62, %v6453_v63  ;;  %v8701_v8 = vld [vmem:[#allocation8 + $0x20c] sm:$0xf]  ;;  %v6891_v63 = vld [vmem:[#allocation11 + $0x2a0] sm:$0xf] }
 0x12b   : > { %1688 = vmatpush.bf16.msrb.mxu3 %v6468_v19  ;;  %1651 = vmatpush.bf16.msrb.mxu0 %v6052_v22  ;;  %v6232_v19 = vor.u32 %v8681_v10, %v6229_v12  ;;  %v8645_v22 = vld [vmem:[#allocation8 + $0x4c] sm:$0xf]  ;;  %v6437_v12 = vld [vmem:[#allocation8 + $0x318] sm:$0xf0]  ;;  %v8802_v62 = vld [vmem:[#allocation11 + $0x12c] sm:$0xf0] }
 0x12c   : > { %1664 = vmatpush.bf16.msrb.mxu1 %v6180_v23  ;;  %v6085_v23 = vld [vmem:[#allocation8 + $0x58] sm:$0xf0]  ;;  %v8733_v10 = vld [vmem:[#allocation8 + $0x30c] sm:$0xf] }
 0x12d   : > { %v6088_v30 = vor.u32 %v8645_v22, %v6085_v23  ;;  %v6763_v22 = vld [vmem:[#allocation11 + $0x1a0] sm:$0xf]  ;;  %v8818_v23 = vld [vmem:[#allocation11 + $0x1ac] sm:$0xf0] }
 0x12e   : > { %1676 = vmatpush.bf16.msrb.mxu2 %v6324_v29  ;;  %1652 = vmatmul.bf16.vlgmr.msrb.gmra.mxu0 %v10005_v48  ;;  %v6357_v29 = vld [vmem:[#allocation8 + $0x278] sm:$0xf0] }
 0x12f   : > { %1696 = vmatpush.bf16.msra.mxu0 %v6168_v26  ;;  %1689 = vmatpush.bf16.msrb.mxu3 %v6452_v33  ;;  %v6376_v26 = vor.u32 %v8717_v15, %v6373_v16  ;;  %v6485_v33 = vld [vmem:[#allocation8 + $0x378] sm:$0xf0]  ;;  %v6360_v38 = vor.u32 %v8713_v28, %v6357_v29  ;;  %v6619_v28 = vld [vmem:[#allocation11 + $0x80] sm:$0xf]  ;;  %v8782_v29 = vld [vmem:[#allocation11 + $0x8c] sm:$0xf0] }
 0x130   : > { %1709 = vmatpush.bf16.msra.mxu1 %v6296_v27  ;;  %v6504_v27 = vor.u32 %v8749_v20, %v6501_v21  ;;  %v6488_v39 = vor.u32 %v8745_v32, %v6485_v33  ;;  %v8786_v20 = vld [vmem:[#allocation11 + $0xac] sm:$0xf0]  ;;  %v6440_v21 = vor.u32 %v8733_v10, %v6437_v12  ;;  %v6620_v33 = vor.u32 %v8782_v29, %v6619_v28  ;;  %v6843_v29 = vld [vmem:[#allocation11 + $0x240] sm:$0xf] }
 0x131   : > { %1665 = vmatmul.bf16.vlgmr.msrb.gmra.mxu1 %v10007_v53  ;;  %v8814_v32 = vld [vmem:[#allocation11 + $0x18c] sm:$0xf0] }
 0x132   : > { %1677 = vmatpush.bf16.msrb.mxu2 %v6308_v45  ;;  %v6469_v45 = vld [vmem:[#allocation8 + $0x358] sm:$0xf0]  ;;  %v8846_v10 = vld [vmem:[#allocation11 + $0x28c] sm:$0xf0] }
 0x133   : > { %1697 = vmatpush.bf16.msra.mxu0 %v6152_v40  ;;  %1690 = vmatpush.bf16.msrb.mxu3 %v6436_v50  ;;  %v8709_v40 = vld [vmem:[#allocation8 + $0x24c] sm:$0xf]  ;;  %v6181_v50 = vld [vmem:[#allocation8 + $0x118] sm:$0xf0] }
 0x134   : > { %1710 = vmatpush.bf16.msra.mxu1 %v6280_v41  ;;  %v6341_v41 = vld [vmem:[#allocation8 + $0x258] sm:$0xf0]  ;;  %v6184_v61 = vor.u32 %v8669_v49, %v6181_v50  ;;  %v8766_v49 = vld [vmem:[#allocation11 + $0xc] sm:$0xf0]  ;;  %v8792_v50 = vld [vmem:[#allocation11 + $0xe4] sm:$0xf] }
 0x135   : > { %1678 = vmatmul.bf16.vlgmr.msrb.gmra.mxu2 %v10011_v11 }
 0x136   : > { %1722 = vmatpush.bf16.msra.mxu2 %v6424_v51  ;;  %1691 = vmatmul.bf16.vlgmr.msrb.gmra.mxu3 %v10013_v17  ;;  %v6667_v51 = vld [vmem:[#allocation11 + $0xe0] sm:$0xf] }
 0x137   : > { %1735 = vmatpush.bf16.msra.mxu3 %v6552_v52  ;;  %1698 = vmatpush.bf16.msra.mxu0 %v6136_v56  ;;  %v6344_v52 = vor.u32 %v8709_v40, %v6341_v41  ;;  %v8826_v56 = vld [vmem:[#allocation11 + $0x1ec] sm:$0xf0]  ;;  %v6732_v41 = vor.u32 %v8810_v37, %v6731_v36  ;;  %v6827_v36 = vld [vmem:[#allocation11 + $0x220] sm:$0xf] }
 0x138   : > { %1711 = vmatpush.bf16.msra.mxu1 %v6264_v57  ;;  %v6472_v57 = vor.u32 %v8741_v42, %v6469_v45  ;;  %v6796_v2 = vor.u32 %v8826_v56, %v6795_v55  ;;  %v8774_v40 = vld [vmem:[#allocation11 + $0x4c] sm:$0xf0]  ;;  %v6715_v42 = vld [vmem:[#allocation11 + $0x140] sm:$0xf]  ;;  %v8788_v55 = vld [vmem:[#allocation11 + $0xc4] sm:$0xf] }
 0x139   : > { %v8770_v45 = vld [vmem:[#allocation11 + $0x2c] sm:$0xf0]  ;;  %v6653_v56 = vld [vmem:[#allocation11 + $0xd0] sm:$0xf0] }
 0x13a   : > { %1723 = vmatpush.bf16.msra.mxu2 %v6408_v0  ;;  %v6668_v0 = vor.u32 %v8794_v54, %v6667_v51  ;;  %v6669_v51 = vld [vmem:[#allocation11 + $0xf0] sm:$0xf0]  ;;  %v8834_v37 = vld [vmem:[#allocation11 + $0x22c] sm:$0xf0] }
 0x13b   : > { %1736 = vmatpush.bf16.msra.mxu3 %v6536_v1  ;;  %1699 = vmatpush.bf16.msra.mxu0 %v6120_v4  ;;  %v6651_v1 = vld [vmem:[#allocation11 + $0xc0] sm:$0xf]  ;;  %v8790_v4 = vld [vmem:[#allocation11 + $0xcc] sm:$0xf0]  ;;  %v6672_v54 = vor.u32 %v8792_v50, %v6669_v51  ;;  %v6733_v50 = vld [vmem:[#allocation11 + $0x170] sm:$0xf0] }
 0x13c   : > { %1712 = vmatpush.bf16.msra.mxu1 %v6248_v5  ;;  %v6779_v5 = vld [vmem:[#allocation11 + $0x1c0] sm:$0xf]  ;;  %v6652_v15 = vor.u32 %v8790_v4, %v6651_v1  ;;  %v8850_v1 = vld [vmem:[#allocation11 + $0x2ac] sm:$0xf0] }
 0x13d   : > { %v6780_v16 = vor.u32 %v8822_v6, %v6779_v5  ;;  %v6892_v4 = vor.u32 %v8850_v1, %v6891_v63  ;;  %v6683_v6 = vld [vmem:[#allocation11 + $0x100] sm:$0xf] }
 0x13e   : > { %1724 = vmatpush.bf16.msra.mxu2 %v6392_v13  ;;  %v6923_v13 = vld [vmem:[#allocation11 + $0x2e0] sm:$0xf] }
 0x13f   : > { %1737 = vmatpush.bf16.msra.mxu3 %v6520_v14  ;;  %1700 = vmatpush.bf16.msra.mxu0 %v6104_v18  ;;  %v8858_v14 = vld [vmem:[#allocation11 + $0x2ec] sm:$0xf0]  ;;  %v6312_v18 = vor.u32 %v8701_v8, %v6309_v9  ;;  %v6875_v8 = vld [vmem:[#allocation11 + $0x280] sm:$0xf] }
 0x140   : > { %1713 = vmatpush.bf16.msra.mxu1 %v6232_v19  ;;  %v6635_v19 = vld [vmem:[#allocation11 + $0xa0] sm:$0xf]  ;;  %v6924_v24 = vor.u32 %v8858_v14, %v6923_v13  ;;  %v6876_v12 = vor.u32 %v8846_v10, %v6875_v8  ;;  %v8776_v13 = vld [vmem:[#allocation11 + $0x64] sm:$0xf]  ;;  %v6605_v14 = vld [vmem:[#allocation11 + $0x70] sm:$0xf0] }
 0x141   : > { %v6701_v8 = vld [vmem:[#allocation11 + $0x130] sm:$0xf0] }
 0x142   : > { %1725 = vmatpush.bf16.msra.mxu2 %v6376_v26  ;;  %v8854_v26 = vld [vmem:[#allocation11 + $0x2cc] sm:$0xf0] }
 0x143   : > { %1738 = vmatpush.bf16.msra.mxu3 %v6504_v27  ;;  %1701 = vmatpush.bf16.msra.mxu0 %v6088_v30  ;;  %v6636_v27 = vor.u32 %v8786_v20, %v6635_v19  ;;  %v6764_v30 = vor.u32 %v8818_v23, %v6763_v22  ;;  %v6859_v19 = vld [vmem:[#allocation11 + $0x260] sm:$0xf]  ;;  %v8842_v20 = vld [vmem:[#allocation11 + $0x26c] sm:$0xf0]  ;;  %v8772_v23 = vld [vmem:[#allocation11 + $0x44] sm:$0xf] }
 0x144   : > { %1714 = vmatpush.bf16.msra.mxu1 %v6216_v31  ;;  %v6747_v31 = vld [vmem:[#allocation11 + $0x180] sm:$0xf]  ;;  %v6860_v22 = vor.u32 %v8842_v20, %v6859_v19  ;;  %v8796_v20 = vld [vmem:[#allocation11 + $0x104] sm:$0xf] }
 0x145   : > { %v6748_v35 = vor.u32 %v8814_v32, %v6747_v31  ;;  %v8768_v32 = vld [vmem:[#allocation11 + $0x24] sm:$0xf] }
 0x146   : > { %1726 = vmatpush.bf16.msra.mxu2 %v6360_v38 }
 0x147   : > { %1739 = vmatpush.bf16.msra.mxu3 %v6488_v39  ;;  %1702 = vmatpush.bf16.msra.mxu0 %v6072_v43  ;;  %v6587_v39 = vld [vmem:[#allocation11 + $0x40] sm:$0xf]  ;;  %v8806_v43 = vld [vmem:[#allocation11 + $0x14c] sm:$0xf0] }
 0x148   : > { %1715 = vmatpush.bf16.msra.mxu1 %v6200_v44  ;;  %v6571_v44 = vld [vmem:[#allocation11 + $0x20] sm:$0xf] }
 0x149   : > { %v6572_v46 = vor.u32 %v8770_v45, %v6571_v44  ;;  %v6811_v44 = vld [vmem:[#allocation11 + $0x200] sm:$0xf]  ;;  %v8830_v45 = vld [vmem:[#allocation11 + $0x20c] sm:$0xf0] }
 0x14a   : > { %1727 = vmatpush.bf16.msra.mxu2 %v6344_v52  ;;  %v6556_v52 = vor.u32 %v8766_v49, %v6555_v47  ;;  %v8890_v47 = vld [vmem:[#allocation11 + $0x3ec] sm:$0xf0]  ;;  %v8808_v49 = vld [vmem:[#allocation11 + $0x164] sm:$0xf] }
 0x14b   : > { %1740 = vmatpush.bf16.msra.mxu3 %v6472_v57  ;;  %1703 = vmatpush.bf16.msra.mxu0 %v6056_v60  ;;  %v6656_v57 = vor.u32 %v8788_v55, %v6653_v56  ;;  %v6640_v60 = vor.u32 %v8784_v58, %v6637_v59  ;;  %v6925_v55 = vld [vmem:[#allocation11 + $0x2f0] sm:$0xf0]  ;;  %v8886_v58 = vld [vmem:[#allocation11 + $0x3cc] sm:$0xf0] }
 0x14c   : > { %1716 = vmatpush.bf16.msra.mxu1 %v6184_v61  ;;  %v6699_v61 = vld [vmem:[#allocation11 + $0x120] sm:$0xf] }
 0x14e   : > { %1728 = vmatpush.bf16.msra.mxu2 %v6328_v3  ;;  %1704 = vmatmul.bf16.vlgmr.msra.gmra.mxu0 %v10005_v48  ;;  %v6908_v48 = vor.u32 %v8854_v26, %v6907_v25  ;;  %v6621_v3 = vld [vmem:[#allocation11 + $0x90] sm:$0xf0]  ;;  %v8820_v25 = vld [vmem:[#allocation11 + $0x1c4] sm:$0xf] }
 0x14f   : > { %2534 = vmatpush.bf16.msrb.mxu0 %v6668_v0  ;;  %1741 = vmatpush.bf16.msra.mxu3 %v6456_v7  ;;  %v6700_v0 = vor.u32 %v8802_v62, %v6699_v61  ;;  %v8798_v7 = vld [vmem:[#allocation11 + $0x10c] sm:$0xf0]  ;;  %v6717_v61 = vld [vmem:[#allocation11 + $0x150] sm:$0xf0]  ;;  %v8852_v62 = vld [vmem:[#allocation11 + $0x2c4] sm:$0xf] }
 0x150   : > { %2547 = vmatpush.bf16.msrb.mxu1 %v6796_v2  ;;  %v8780_v2 = vld [vmem:[#allocation11 + $0x84] sm:$0xf]  ;;  %v6684_v9 = vor.u32 %v8798_v7, %v6683_v6 }
 0x151   : > { %1717 = vmatmul.bf16.vlgmr.msra.gmra.mxu1 %v10007_v53  ;;  %v6603_v53 = vld [vmem:[#allocation11 + $0x60] sm:$0xf]  ;;  %v6624_v5 = vor.u32 %v8780_v2, %v6621_v3  ;;  %v10029_v2 = vld [vmem:[#allocation10] sm:$0xf]  ;;  %v8800_v7 = vld [vmem:[#allocation11 + $0x124] sm:$0xf] }
 0x152   : > { %1729 = vmatpush.bf16.msra.mxu2 %v6312_v18  ;;  %v6604_v38 = vor.u32 %v8778_v34, %v6603_v53  ;;  %v6797_v18 = vld [vmem:[#allocation11 + $0x1f0] sm:$0xf0]  ;;  %v7019_v3 = vld [vmem:[#allocation11 + $0x3a0] sm:$0xf] }
 0x153   : > { %2535 = vmatpush.bf16.msrb.mxu0 %v6652_v15  ;;  %1742 = vmatpush.bf16.msra.mxu3 %v6440_v21  ;;  %v8824_v15 = vld [vmem:[#allocation11 + $0x1e4] sm:$0xf]  ;;  %v6765_v34 = vld [vmem:[#allocation11 + $0x1b0] sm:$0xf0] }
 0x154   : > { %2548 = vmatpush.bf16.msrb.mxu1 %v6780_v16  ;;  %v6608_v16 = vor.u32 %v8776_v13, %v6605_v14  ;;  %v6800_v21 = vor.u32 %v8824_v15, %v6797_v18  ;;  %v6893_v13 = vld [vmem:[#allocation11 + $0x2b0] sm:$0xf0]  ;;  %v892_v14 = vperm.slane %v10029_v2, 0  ;;  %v8878_v18 = vld [vmem:[#allocation11 + $0x38c] sm:$0xf0] }
 0x155   : > { %1730 = vmatmul.bf16.vlgmr.msra.gmra.mxu2 %v10011_v11  ;;  %v6588_v11 = vor.u32 %v8774_v40, %v6587_v39  ;;  %v8764_v39 = vld [vmem:[#allocation11 + $0x4] sm:$0xf]  ;;  %v6557_v40 = vld [vmem:[#allocation11 + $0x10] sm:$0xf0] }
 0x156   : > { %2560 = vmatpush.bf16.msrb.mxu2 %v6924_v24  ;;  %1743 = vmatmul.bf16.vlgmr.msra.gmra.mxu3 %v10013_v17  ;;  %v6716_v17 = vor.u32 %v8806_v43, %v6715_v42  ;;  %v6589_v24 = vld [vmem:[#allocation11 + $0x50] sm:$0xf0]  ;;  %v6560_v42 = vor.u32 %v8764_v39, %v6557_v40 }
 0x157   : > { %2536 = vmatpush.bf16.msrb.mxu0 %v6636_v27  ;;  %v6592_v26 = vor.u32 %v8772_v23, %v6589_v24  ;;  %v6781_v27 = vld [vmem:[#allocation11 + $0x1d0] sm:$0xf0] }
 0x158   : > { %2549 = vmatpush.bf16.msrb.mxu1 %v6764_v30  ;;  %v6784_v28 = vor.u32 %v8820_v25, %v6781_v27  ;;  %v8838_v30 = vld [vmem:[#allocation11 + $0x24c] sm:$0xf0]  ;;  %v6749_v43 = vld [vmem:[#allocation11 + $0x190] sm:$0xf0]  ;;  %v6987_v27 = vld [vmem:[#allocation11 + $0x360] sm:$0xf] }
 0x159   : > { %v6844_v31 = vor.u32 %v8838_v30, %v6843_v29  ;;  %v6877_v24 = vld [vmem:[#allocation11 + $0x290] sm:$0xf0] }
 0x15a   : > { %2561 = vmatpush.bf16.msrb.mxu2 %v6908_v48  ;;  %v6573_v48 = vld [vmem:[#allocation11 + $0x30] sm:$0xf0] }
 0x15b   : > { %2537 = vmatpush.bf16.msrb.mxu0 %v6620_v33  ;;  %v8816_v33 = vld [vmem:[#allocation11 + $0x1a4] sm:$0xf]  ;;  %v6576_v53 = vor.u32 %v8768_v32, %v6573_v48  ;;  %v6861_v32 = vld [vmem:[#allocation11 + $0x270] sm:$0xf0] }
 0x15c   : > { %2550 = vmatpush.bf16.msrb.mxu1 %v6748_v35  ;;  %v6768_v35 = vor.u32 %v8816_v33, %v6765_v34  ;;  %v6971_v34 = vld [vmem:[#allocation11 + $0x340] sm:$0xf] }
 0x15e   : > { %2562 = vmatpush.bf16.msrb.mxu2 %v6892_v4  ;;  %v8882_v4 = vld [vmem:[#allocation11 + $0x3ac] sm:$0xf0] }
 0x15f   : > { %2538 = vmatpush.bf16.msrb.mxu0 %v6604_v38  ;;  %v6828_v38 = vor.u32 %v8834_v37, %v6827_v36  ;;  %v7020_v6 = vor.u32 %v8882_v4, %v7019_v3  ;;  %v8836_v37 = vld [vmem:[#allocation11 + $0x244] sm:$0xf] }
 0x160   : > { %2551 = vmatpush.bf16.msrb.mxu1 %v6732_v41  ;;  %v8812_v41 = vld [vmem:[#allocation11 + $0x184] sm:$0xf] }
 0x162   : > { %2563 = vmatpush.bf16.msrb.mxu2 %v6876_v12  ;;  %v6704_v12 = vor.u32 %v8800_v7, %v6701_v8 }
 0x163   : > { %2539 = vmatpush.bf16.msrb.mxu0 %v6588_v11  ;;  %v6752_v11 = vor.u32 %v8812_v41, %v6749_v43  ;;  %v6675_v43 = vld [vmem:[#allocation11 + $0xe8] sm:$0xf] }
 0x164   : > { %2552 = vmatpush.bf16.msrb.mxu1 %v6716_v17  ;;  %v7051_v17 = vld [vmem:[#allocation11 + $0x3e0] sm:$0xf] }
 0x165   : > { %v7052_v51 = vor.u32 %v8890_v47, %v7051_v17 }
 0x166   : > { %2564 = vmatpush.bf16.msrb.mxu2 %v6860_v22  ;;  %v8844_v22 = vld [vmem:[#allocation11 + $0x284] sm:$0xf] }
 0x167   : > { %2540 = vmatpush.bf16.msrb.mxu0 %v6572_v46  ;;  %v6812_v46 = vor.u32 %v8830_v45, %v6811_v44  ;;  %2573 = vmatpush.bf16.msrb.mxu3 %v7052_v51  ;;  %v8866_v44 = vld [vmem:[#allocation11 + $0x32c] sm:$0xf0] }
 0x168   : > { %2553 = vmatpush.bf16.msrb.mxu1 %v6700_v0  ;;  %v6909_v0 = vld [vmem:[#allocation11 + $0x2d0] sm:$0xf0] }
 0x169   : > { %v6912_v1 = vor.u32 %v8852_v62, %v6909_v0  ;;  %v6813_v0 = vld [vmem:[#allocation11 + $0x210] sm:$0xf0] }
 0x16a   : > { %2565 = vmatpush.bf16.msrb.mxu2 %v6844_v31  ;;  %v8840_v31 = vld [vmem:[#allocation11 + $0x264] sm:$0xf] }
 0x16b   : > { %2541 = vmatpush.bf16.msrb.mxu0 %v6556_v52  ;;  %v6736_v52 = vor.u32 %v8808_v49, %v6733_v50  ;;  %v6864_v33 = vor.u32 %v8840_v31, %v6861_v32  ;;  %v8832_v49 = vld [vmem:[#allocation11 + $0x224] sm:$0xf]  ;;  %v6829_v50 = vld [vmem:[#allocation11 + $0x230] sm:$0xf0]  ;;  %v8779_v31 = vld [vmem:[#allocation11 + $0x74] sm:$0xf0] }
 0x16c   : > { %2554 = vmatpush.bf16.msrb.mxu1 %v6684_v9  ;;  %v8848_v9 = vld [vmem:[#allocation11 + $0x2a4] sm:$0xf]  ;;  %v6803_v32 = vld [vmem:[#allocation11 + $0x1e8] sm:$0xf] }
 0x16d   : > { %v6896_v15 = vor.u32 %v8848_v9, %v6893_v13  ;;  %v6643_v9 = vld [vmem:[#allocation11 + $0xa8] sm:$0xf]  ;;  %v8787_v13 = vld [vmem:[#allocation11 + $0xb4] sm:$0xf0] }
 0x16e   : > { %2566 = vmatpush.bf16.msrb.mxu2 %v6828_v38  ;;  %v6845_v38 = vld [vmem:[#allocation11 + $0x250] sm:$0xf0] }
 0x16f   : > { %2586 = vmatpush.bf16.msra.mxu0 %v6672_v54  ;;  %v8856_v54 = vld [vmem:[#allocation11 + $0x2e4] sm:$0xf]  ;;  %v6848_v40 = vor.u32 %v8836_v37, %v6845_v38 }
 0x170   : > { %2599 = vmatpush.bf16.msra.mxu1 %v6800_v21  ;;  %v6928_v56 = vor.u32 %v8856_v54, %v6925_v55  ;;  %v6685_v21 = vld [vmem:[#allocation11 + $0x110] sm:$0xf0]  ;;  %v893_v55 = vperm.slane %v10029_v2, 1 }
 0x171   : > { %v6688_v23 = vor.u32 %v8796_v20, %v6685_v21  ;;  %v6627_v20 = vld [vmem:[#allocation11 + $0x88] sm:$0xf] }
 0x172   : > { %2567 = vmatpush.bf16.msrb.mxu2 %v6812_v46  ;;  %v8795_v46 = vld [vmem:[#allocation11 + $0xf4] sm:$0xf0] }
 0x173   : > { %2587 = vmatpush.bf16.msra.mxu0 %v6656_v57  ;;  %v7035_v57 = vld [vmem:[#allocation11 + $0x3c0] sm:$0xf] }
 0x174   : > { %2600 = vmatpush.bf16.msra.mxu1 %v6784_v28  ;;  %v7036_v59 = vor.u32 %v8886_v58, %v7035_v57  ;;  %v8874_v28 = vld [vmem:[#allocation11 + $0x36c] sm:$0xf0]  ;;  %v6676_v57 = vor.u32 %v8795_v46, %v6675_v43  ;;  %v8791_v58 = vld [vmem:[#allocation11 + $0xd4] sm:$0xf0]  ;;  %v6787_v43 = vld [vmem:[#allocation11 + $0x1c8] sm:$0xf] }
 0x175   : > { %v6988_v30 = vor.u32 %v8874_v28, %v6987_v27  ;;  %v894_v46 = vperm.slane %v10029_v2, 2 }
 0x176   : > { %2612 = vmatpush.bf16.msra.mxu2 %v6928_v56  ;;  %2574 = vmatpush.bf16.msrb.mxu3 %v7036_v59  ;;  %v6659_v56 = vld [vmem:[#allocation11 + $0xc8] sm:$0xf]  ;;  %v6939_v59 = vld [vmem:[#allocation11 + $0x300] sm:$0xf] }
 0x177   : > { %2588 = vmatpush.bf16.msra.mxu0 %v6640_v60  ;;  %v8804_v60 = vld [vmem:[#allocation11 + $0x144] sm:$0xf]  ;;  %v6660_v8 = vor.u32 %v8791_v58, %v6659_v56  ;;  %v6771_v56 = vld [vmem:[#allocation11 + $0x1a8] sm:$0xf] }
 0x178   : > { %2601 = vmatpush.bf16.msra.mxu1 %v6768_v35  ;;  %v6720_v63 = vor.u32 %v8804_v60, %v6717_v61  ;;  %v8870_v35 = vld [vmem:[#allocation11 + $0x34c] sm:$0xf0]  ;;  %v8868_v58 = vld [vmem:[#allocation11 + $0x344] sm:$0xf] }
 0x179   : > { %v6972_v36 = vor.u32 %v8870_v35, %v6971_v34  ;;  %v8862_v60 = vld [vmem:[#allocation11 + $0x30c] sm:$0xf0]  ;;  %v7005_v34 = vld [vmem:[#allocation11 + $0x390] sm:$0xf0] }
 0x17a   : > { %2613 = vmatpush.bf16.msra.mxu2 %v6912_v1  ;;  %2575 = vmatpush.bf16.msrb.mxu3 %v7020_v6  ;;  %v6940_v62 = vor.u32 %v8862_v60, %v6939_v59  ;;  %v8888_v1 = vld [vmem:[#allocation11 + $0x3e4] sm:$0xf]  ;;  %v6973_v59 = vld [vmem:[#allocation11 + $0x350] sm:$0xf0] }
 0x17b   : > { %2589 = vmatpush.bf16.msra.mxu0 %v6624_v5 }
 0x17c   : > { %2602 = vmatpush.bf16.msra.mxu1 %v6752_v11  ;;  %v6955_v11 = vld [vmem:[#allocation11 + $0x320] sm:$0xf] }
 0x17d   : > { %v6956_v47 = vor.u32 %v8866_v44, %v6955_v11  ;;  %v8823_v44 = vld [vmem:[#allocation11 + $0x1d4] sm:$0xf0] }
 0x17e   : > { %2614 = vmatpush.bf16.msra.mxu2 %v6896_v15  ;;  %v7037_v15 = vld [vmem:[#allocation11 + $0x3d0] sm:$0xf0] }
 0x17f   : > { %2590 = vmatpush.bf16.msra.mxu0 %v6608_v16  ;;  %v7003_v16 = vld [vmem:[#allocation11 + $0x380] sm:$0xf] }
 0x180   : > { %2603 = vmatpush.bf16.msra.mxu1 %v6736_v52  ;;  %v7004_v19 = vor.u32 %v8878_v18, %v7003_v16  ;;  %v6832_v52 = vor.u32 %v8832_v49, %v6829_v50 }
 0x182   : > { %2576 = vmatpush.bf16.msrb.mxu3 %v7004_v19  ;;  %v6644_v19 = vor.u32 %v8787_v13, %v6643_v9  ;;  %v6957_v9 = vld [vmem:[#allocation11 + $0x330] sm:$0xf0]  ;;  %v6677_v13 = vld [vmem:[#allocation11 + $0xf8] sm:$0xf0] }
 0x183   : > { %2591 = vmatpush.bf16.msra.mxu0 %v6592_v26  ;;  %v6880_v26 = vor.u32 %v8844_v22, %v6877_v24  ;;  %v8783_v22 = vld [vmem:[#allocation11 + $0x94] sm:$0xf0]  ;;  %v7021_v24 = vld [vmem:[#allocation11 + $0x3b0] sm:$0xf0] }
 0x184   : > { %2604 = vmatpush.bf16.msra.mxu1 %v6720_v63  ;;  %v8828_v63 = vld [vmem:[#allocation11 + $0x204] sm:$0xf] }
 0x185   : > { %2615 = vmatpush.bf16.msra.mxu2 %v6880_v26  ;;  %v6816_v4 = vor.u32 %v8828_v63, %v6813_v0  ;;  %v6976_v63 = vor.u32 %v8868_v58, %v6973_v59  ;;  %v6883_v58 = vld [vmem:[#allocation11 + $0x288] sm:$0xf]  ;;  %v8847_v59 = vld [vmem:[#allocation11 + $0x294] sm:$0xf0] }
 0x186   : > { %2577 = vmatpush.bf16.msrb.mxu3 %v6988_v30  ;;  %v6611_v30 = vld [vmem:[#allocation11 + $0x68] sm:$0xf] }
 0x187   : > { %2592 = vmatpush.bf16.msra.mxu0 %v6576_v53 }
 0x188   : > { %2605 = vmatpush.bf16.msra.mxu1 %v6704_v12 }
 0x189   : > { %2616 = vmatpush.bf16.msra.mxu2 %v6864_v33  ;;  %v8827_v33 = vld [vmem:[#allocation11 + $0x1f4] sm:$0xf0] }
 0x18a   : > { %v1549_v5 = vpop.f32.mrf.mxu0  ;;  %2578 = vmatpush.bf16.msrb.mxu3 %v6972_v36 }
 0x18b   : > { %2593 = vmatpush.bf16.msra.mxu0 %v6560_v42  ;;  %v1562_v10 = vpop.f32.mrf.mxu1  ;;  %v1550_v25 = vadd.f32 %v1549_v5, %v892_v14  ;;  %v7053_v5 = vld [vmem:[#allocation11 + $0x3f0] sm:$0xf0]  ;;  %v8884_v14 = vld [vmem:[#allocation11 + $0x3c4] sm:$0xf] }
 0x18c   : > { %2606 = vmatpush.bf16.msra.mxu1 %v6688_v23  ;;  %v7056_v7 = vor.u32 %v8888_v1, %v7053_v5  ;;  %v7040_v18 = vor.u32 %v8884_v14, %v7037_v15  ;;  %v8880_v23 = vld [vmem:[#allocation11 + $0x3a4] sm:$0xf]  ;;  %v8767_v5 = vld [vmem:[#allocation11 + $0x14] sm:$0xf0] }
 0x18d   : > { %v1563_v53 = vadd.f32 %v1562_v10, %v1550_v25  ;;  %2617 = vmatpush.bf16.msra.mxu2 %v6848_v40  ;;  %v7024_v26 = vor.u32 %v8880_v23, %v7021_v24  ;;  %v6804_v40 = vor.u32 %v8827_v33, %v6803_v32  ;;  %v6931_v24 = vld [vmem:[#allocation11 + $0x2e8] sm:$0xf] }
 0x18e   : > { %2579 = vmatpush.bf16.msrb.mxu3 %v6956_v47 }
 0x191   : > { %2618 = vmatpush.bf16.msra.mxu2 %v6832_v52  ;;  %v6788_v52 = vor.u32 %v8823_v44, %v6787_v43 }
 0x192   : > { %v1551_v29 = vpop.f32.mrf.mxu0  ;;  %2580 = vmatpush.bf16.msrb.mxu3 %v6940_v62 }
 0x193   : > { %v1564_v48 = vpop.f32.mrf.mxu1  ;;  %v6628_v29 = vor.u32 %v8783_v22, %v6627_v20  ;;  %v8811_v22 = vld [vmem:[#allocation11 + $0x174] sm:$0xf0] }
 0x195   : > { %2619 = vmatpush.bf16.msra.mxu2 %v6816_v4  ;;  %v6563_v4 = vld [vmem:[#allocation11 + $0x8] sm:$0xf] }
 0x196   : > { %2625 = vmatpush.bf16.msra.mxu3 %v7056_v7  ;;  %v8815_v7 = vld [vmem:[#allocation11 + $0x194] sm:$0xf0] }
 0x198   : > { %v1575_v39 = vpop.f32.mrf.mxu2 }
 0x199   : > { %v1576_v41 = vadd.f32 %v1575_v39, %v1563_v53  ;;  %v1588_v42 = vpop.f32.mrf.mxu3  ;;  %v8876_v53 = vld [vmem:[#allocation11 + $0x384] sm:$0xf]  ;;  %v6612_v39 = vor.u32 %v8779_v31, %v6611_v30  ;;  %v6661_v30 = vld [vmem:[#allocation11 + $0xd8] sm:$0xf0] }
 0x19a   : > { %v1601_v17 = vpop.f32.mrf.mxu0  ;;  %2626 = vmatpush.bf16.msra.mxu3 %v7040_v18  ;;  %v7008_v36 = vor.u32 %v8876_v53, %v7005_v34  ;;  %v6723_v34 = vld [vmem:[#allocation11 + $0x148] sm:$0xf] }
 0x19b   : > { %v1589_v45 = vadd.f32 %v1588_v42, %v1576_v41  ;;  %v1614_v51 = vpop.f32.mrf.mxu1  ;;  %v1602_v10 = vadd.f32 %v1601_v17, %v893_v55  ;;  %v6595_v41 = vld [vmem:[#allocation11 + $0x48] sm:$0xf]  ;;  %v8775_v42 = vld [vmem:[#allocation11 + $0x54] sm:$0xf0]  ;;  %v6989_v17 = vld [vmem:[#allocation11 + $0x370] sm:$0xf0] }
 0x19c   : > { %v8771_v55 = vld [vmem:[#allocation11 + $0x34] sm:$0xf0] }
 0x19d   : > { %v1748_v54 = vmax.f32 %v1589_v45, 0.0  ;;  %v1615_v21 = vadd.f32 %v1614_v51, %v1602_v10  ;;  %v8872_v45 = vld [vmem:[#allocation11 + $0x364] sm:$0xf]  ;;  %v6596_v51 = vor.u32 %v8775_v42, %v6595_v41 }
 0x19e   : > { %2627 = vmatpush.bf16.msra.mxu3 %v7024_v26  ;;  %v6992_v49 = vor.u32 %v8872_v45, %v6989_v17  ;;  %v6941_v26 = vld [vmem:[#allocation11 + $0x310] sm:$0xf0]  ;;  %v6707_v17 = vld [vmem:[#allocation11 + $0x128] sm:$0xf] }
 0x19f   : > { %v10033_v61 = vpack.c.bf16 %v1748_v54, %v1748_v54  ;;  %v6579_v54 = vld [vmem:[#allocation11 + $0x28] sm:$0xf] }
 0x1a0   : > { %v1577_v3 = vpop.f32.mrf.mxu2  ;;  %v6580_v1 = vor.u32 %v8771_v55, %v6579_v54 }
 0x1a1   : > { %v1590_v6 = vpop.f32.mrf.mxu3  ;;  %2542 = vmatmul.bf16.vlgmr.msrb.gmra.mxu0 %v10033_v61 }
 0x1a2   : > { %2638 = vmatpush.bf16.msrb.mxu0 %v6676_v57  ;;  %v1603_v12 = vpop.f32.mrf.mxu0  ;;  %2628 = vmatpush.bf16.msra.mxu3 %v7008_v36  ;;  %v8819_v57 = vld [vmem:[#allocation11 + $0x1b4] sm:$0xf0]  ;;  %v6755_v6 = vld [vmem:[#allocation11 + $0x188] sm:$0xf] }
 0x1a3   : > { %v1616_v16 = vpop.f32.mrf.mxu1  ;;  %v6772_v3 = vor.u32 %v8819_v57, %v6771_v56  ;;  %v8793_v12 = vld [vmem:[#allocation11 + $0xec] sm:$0xf]  ;;  %v6756_v20 = vor.u32 %v8815_v7, %v6755_v6  ;;  %v6915_v36 = vld [vmem:[#allocation11 + $0x2c8] sm:$0xf]  ;;  %v8799_v57 = vld [vmem:[#allocation11 + $0x114] sm:$0xf0]  ;;  %v6884_v6 = vor.u32 %v8847_v59, %v6883_v58 }
 0x1a4   : > { %v6680_v23 = vor.u32 %v8793_v12, %v6677_v13  ;;  %v6691_v56 = vld [vmem:[#allocation11 + $0x108] sm:$0xf]  ;;  %v8773_v12 = vld [vmem:[#allocation11 + $0x4c] sm:$0xf]  ;;  %v6597_v13 = vld [vmem:[#allocation11 + $0x58] sm:$0xf0] }
 0x1a5   : > { %v7043_v59 = vld [vmem:[#allocation11 + $0x3c8] sm:$0xf] }
 0x1a6   : > { %2639 = vmatpush.bf16.msrb.mxu0 %v6660_v8  ;;  %2629 = vmatpush.bf16.msra.mxu3 %v6992_v49  ;;  %v8864_v8 = vld [vmem:[#allocation11 + $0x324] sm:$0xf]  ;;  %v8851_v49 = vld [vmem:[#allocation11 + $0x2b4] sm:$0xf0] }
 0x1a7   : > { %v6960_v14 = vor.u32 %v8864_v8, %v6957_v9  ;;  %v6867_v8 = vld [vmem:[#allocation11 + $0x268] sm:$0xf] }
 0x1a8   : > { %v1627_v25 = vpop.f32.mrf.mxu2 }
 0x1a9   : > { %v1628_v27 = vadd.f32 %v1627_v25, %v1615_v21  ;;  %v1640_v28 = vpop.f32.mrf.mxu3  ;;  %v6739_v21 = vld [vmem:[#allocation11 + $0x168] sm:$0xf]  ;;  %v8860_v25 = vld [vmem:[#allocation11 + $0x304] sm:$0xf] }
 0x1aa   : > { %2640 = vmatpush.bf16.msrb.mxu0 %v6644_v19  ;;  %2630 = vmatpush.bf16.msra.mxu3 %v6976_v63  ;;  %v6564_v19 = vor.u32 %v8767_v5, %v6563_v4  ;;  %v6944_v31 = vor.u32 %v8860_v25, %v6941_v26  ;;  %v6692_v4 = vor.u32 %v8799_v57, %v6691_v56  ;;  %v895_v5 = vperm.slane %v10029_v2, 3  ;;  %v8817_v25 = vld [vmem:[#allocation11 + $0x1ac] sm:$0xf]  ;;  %v6773_v26 = vld [vmem:[#allocation11 + $0x1b8] sm:$0xf0] }
 0x1ab   : > { %v1641_v48 = vadd.f32 %v1640_v28, %v1628_v27  ;;  %v1653_v35 = vpop.f32.mrf.mxu0  ;;  %v8859_v28 = vld [vmem:[#allocation11 + $0x2f4] sm:$0xf0] }
 0x1ac   : > { %v1654_v60 = vadd.f32 %v1653_v35, %v894_v46  ;;  %v6932_v33 = vor.u32 %v8859_v28, %v6931_v24  ;;  %v8807_v35 = vld [vmem:[#allocation11 + $0x154] sm:$0xf0] }
 0x1ad   : > { %v1749_v37 = vmax.f32 %v1641_v48, 0.0  ;;  %v6740_v48 = vor.u32 %v8811_v22, %v6739_v21  ;;  %v6724_v43 = vor.u32 %v8807_v35, %v6723_v34  ;;  %v8803_v46 = vld [vmem:[#allocation11 + $0x134] sm:$0xf0]  ;;  %v8769_v22 = vld [vmem:[#allocation11 + $0x2c] sm:$0xf] }
 0x1ae   : > { %v1666_v38 = vpop.f32.mrf.mxu1  ;;  %2641 = vmatpush.bf16.msrb.mxu0 %v6628_v29  ;;  %2631 = vmatpush.bf16.msra.mxu3 %v6960_v14  ;;  %v8789_v29 = vld [vmem:[#allocation11 + $0xcc] sm:$0xf]  ;;  %v8839_v21 = vld [vmem:[#allocation11 + $0x254] sm:$0xf0] }
 0x1af   : > { %v10036_v11 = vpack.c.bf16 %v1749_v37, %v1749_v37  ;;  %v1667_v10 = vadd.f32 %v1666_v38, %v1654_v60  ;;  %v6664_v53 = vor.u32 %v8789_v29, %v6661_v30  ;;  %v8855_v38 = vld [vmem:[#allocation11 + $0x2d4] sm:$0xf0]  ;;  %v8777_v60 = vld [vmem:[#allocation11 + $0x6c] sm:$0xf]  ;;  %v6835_v30 = vld [vmem:[#allocation11 + $0x228] sm:$0xf] }
 0x1b0   : > { %v1629_v47 = vpop.f32.mrf.mxu2  ;;  %v6916_v44 = vor.u32 %v8855_v38, %v6915_v36  ;;  %v8821_v14 = vld [vmem:[#allocation11 + $0x1cc] sm:$0xf]  ;;  %v6757_v36 = vld [vmem:[#allocation11 + $0x198] sm:$0xf0] }
 0x1b1   : > { %v1642_v50 = vpop.f32.mrf.mxu3  ;;  %2555 = vmatmul.bf16.vlgmr.msrb.gmra.mxu1 %v10036_v11  ;;  %2594 = vmatmul.bf16.vlgmr.msra.gmra.mxu0 %v10033_v61  ;;  %v6899_v47 = vld [vmem:[#allocation11 + $0x2a8] sm:$0xf]  ;;  %v8813_v35 = vld [vmem:[#allocation11 + $0x18c] sm:$0xf] }
 0x1b2   : > { %2642 = vmatpush.bf16.msrb.mxu0 %v6612_v39  ;;  %2651 = vmatpush.bf16.msrb.mxu1 %v6804_v40  ;;  %v8785_v39 = vld [vmem:[#allocation11 + $0xac] sm:$0xf]  ;;  %v6645_v40 = vld [vmem:[#allocation11 + $0xb8] sm:$0xf0]  ;;  %v6900_v54 = vor.u32 %v8851_v49, %v6899_v47 }
 0x1b3   : > { %v1655_v62 = vpop.f32.mrf.mxu0  ;;  %2632 = vmatpush.bf16.msra.mxu3 %v6944_v31  ;;  %v6648_v45 = vor.u32 %v8785_v39, %v6645_v40  ;;  %v8781_v50 = vld [vmem:[#allocation11 + $0x8c] sm:$0xf]  ;;  %v6741_v49 = vld [vmem:[#allocation11 + $0x178] sm:$0xf0] }
 0x1b4   : > { %v6613_v62 = vld [vmem:[#allocation11 + $0x78] sm:$0xf0]  ;;  %v8809_v47 = vld [vmem:[#allocation11 + $0x16c] sm:$0xf] }
 0x1b5   : > { %v6616_v7 = vor.u32 %v8777_v60, %v6613_v62  ;;  %v6744_v57 = vor.u32 %v8809_v47, %v6741_v49  ;;  %v8887_v60 = vld [vmem:[#allocation11 + $0x3d4] sm:$0xf0]  ;;  %v8805_v62 = vld [vmem:[#allocation11 + $0x14c] sm:$0xf]  ;;  %v7061_v47 = vld [vmem:[#allocation11 + $0x3f8] sm:$0xf0] }
 0x1b6   : > { %v1668_v0 = vpop.f32.mrf.mxu1  ;;  %2643 = vmatpush.bf16.msrb.mxu0 %v6596_v51  ;;  %2652 = vmatpush.bf16.msrb.mxu1 %v6788_v52  ;;  %v6629_v51 = vld [vmem:[#allocation11 + $0x98] sm:$0xf0]  ;;  %v6708_v52 = vor.u32 %v8803_v46, %v6707_v17  ;;  %v7059_v17 = vld [vmem:[#allocation11 + $0x3e8] sm:$0xf]  ;;  %v8891_v46 = vld [vmem:[#allocation11 + $0x3f4] sm:$0xf0] }
 0x1b7   : > { %v6632_v55 = vor.u32 %v8781_v50, %v6629_v51  ;;  %v8825_v0 = vld [vmem:[#allocation11 + $0x1ec] sm:$0xf]  ;;  %v6933_v51 = vld [vmem:[#allocation11 + $0x2f8] sm:$0xf0] }
 0x1b8   : > { %v1679_v15 = vpop.f32.mrf.mxu2  ;;  %v8857_v50 = vld [vmem:[#allocation11 + $0x2ec] sm:$0xf] }
 0x1b9   : > { %v1692_v16 = vpop.f32.mrf.mxu3  ;;  %v1680_v18 = vadd.f32 %v1679_v15, %v1667_v10  ;;  %v8843_v10 = vld [vmem:[#allocation11 + $0x274] sm:$0xf0]  ;;  %v6789_v15 = vld [vmem:[#allocation11 + $0x1d8] sm:$0xf0]  ;;  %v6936_v58 = vor.u32 %v8857_v50, %v6933_v51  ;;  %v8885_v51 = vld [vmem:[#allocation11 + $0x3cc] sm:$0xf] }
 0x1ba   : > { %2644 = vmatpush.bf16.msrb.mxu0 %v6580_v1  ;;  %2653 = vmatpush.bf16.msrb.mxu1 %v6772_v3  ;;  %v6805_v1 = vld [vmem:[#allocation11 + $0x1f8] sm:$0xf0]  ;;  %v6792_v2 = vor.u32 %v8821_v14, %v6789_v15 }
 0x1bb   : > { %v1693_v27 = vadd.f32 %v1692_v16, %v1680_v18  ;;  %v6808_v9 = vor.u32 %v8825_v0, %v6805_v1  ;;  %v6868_v16 = vor.u32 %v8843_v10, %v6867_v8  ;;  %v6600_v18 = vor.u32 %v8773_v12, %v6597_v13  ;;  %v6725_v0 = vld [vmem:[#allocation11 + $0x158] sm:$0xf0]  ;;  %v8853_v1 = vld [vmem:[#allocation11 + $0x2cc] sm:$0xf]  ;;  %v7027_v8 = vld [vmem:[#allocation11 + $0x3a8] sm:$0xf] }
 0x1bc   : > { %v8801_v10 = vld [vmem:[#allocation11 + $0x12c] sm:$0xf]  ;;  %v6709_v12 = vld [vmem:[#allocation11 + $0x138] sm:$0xf0] }
 0x1bd   : > { %v1750_v32 = vmax.f32 %v1693_v27, 0.0  ;;  %v8849_v13 = vld [vmem:[#allocation11 + $0x2ac] sm:$0xf]  ;;  %v6901_v14 = vld [vmem:[#allocation11 + $0x2b8] sm:$0xf0] }
 0x1be   : > { %2645 = vmatpush.bf16.msrb.mxu0 %v6564_v19  ;;  %2654 = vmatpush.bf16.msrb.mxu1 %v6756_v20  ;;  %v6851_v19 = vld [vmem:[#allocation11 + $0x248] sm:$0xf] }
 0x1bf   : > { %v10041_v37 = vpack.c.bf16 %v1750_v32, %v1750_v32  ;;  %v6852_v28 = vor.u32 %v8839_v21, %v6851_v19  ;;  %v6776_v32 = vor.u32 %v8817_v25, %v6773_v26  ;;  %v8879_v19 = vld [vmem:[#allocation11 + $0x394] sm:$0xf0]  ;;  %v8845_v21 = vld [vmem:[#allocation11 + $0x28c] sm:$0xf]  ;;  %v6995_v26 = vld [vmem:[#allocation11 + $0x368] sm:$0xf] }
 0x1c0   : > { %v1681_v41 = vpop.f32.mrf.mxu2 }
 0x1c1   : > { %v1694_v42 = vpop.f32.mrf.mxu3  ;;  %2607 = vmatmul.bf16.vlgmr.msra.gmra.mxu1 %v10036_v11  ;;  %2646 = vmatmul.bf16.vlgmr.msrb.gmra.mxu0 %v10033_v61 }
 0x1c2   : > { %2690 = vmatpush.bf16.msra.mxu0 %v6680_v23  ;;  %2568 = vmatmul.bf16.vlgmr.msrb.gmra.mxu2 %v10041_v37  ;;  %v6581_v23 = vld [vmem:[#allocation11 + $0x38] sm:$0xf0]  ;;  %v6819_v42 = vld [vmem:[#allocation11 + $0x208] sm:$0xf] }
 0x1c3   : > { %2655 = vmatpush.bf16.msrb.mxu1 %v6740_v48  ;;  %2664 = vmatpush.bf16.msrb.mxu2 %v6932_v33  ;;  %v6584_v29 = vor.u32 %v8769_v22, %v6581_v23  ;;  %v8835_v48 = vld [vmem:[#allocation11 + $0x234] sm:$0xf0]  ;;  %v8765_v33 = vld [vmem:[#allocation11 + $0xc] sm:$0xf]  ;;  %v6885_v22 = vld [vmem:[#allocation11 + $0x298] sm:$0xf0] }
 0x1c4   : > { %v6836_v40 = vor.u32 %v8835_v48, %v6835_v30  ;;  %v6888_v25 = vor.u32 %v8845_v21, %v6885_v22  ;;  %v8871_v48 = vld [vmem:[#allocation11 + $0x354] sm:$0xf0]  ;;  %v8946_v21 = vld [vmem:[%s9999_s20 + $0x1ac] sm:$0xf0]  ;;  %v7211_v22 = vld [vmem:[%s9999_s20 + $0x120] sm:$0xf] }
 0x1c6   : > { %2691 = vmatpush.bf16.msra.mxu0 %v6664_v53  ;;  %v6565_v53 = vld [vmem:[#allocation11 + $0x18] sm:$0xf0] }
 0x1c7   : > { %2656 = vmatpush.bf16.msrb.mxu1 %v6724_v43  ;;  %2665 = vmatpush.bf16.msrb.mxu2 %v6916_v44  ;;  %v6568_v41 = vor.u32 %v8765_v33, %v6565_v53  ;;  %v8831_v43 = vld [vmem:[#allocation11 + $0x214] sm:$0xf0]  ;;  %v8837_v33 = vld [vmem:[#allocation11 + $0x24c] sm:$0xf]  ;;  %v6853_v53 = vld [vmem:[#allocation11 + $0x258] sm:$0xf0] }
 0x1ca   : > { %2692 = vmatpush.bf16.msra.mxu0 %v6648_v45  ;;  %v6760_v45 = vor.u32 %v8813_v35, %v6757_v36  ;;  %v6856_v35 = vor.u32 %v8837_v33, %v6853_v53  ;;  %v6963_v36 = vld [vmem:[#allocation11 + $0x328] sm:$0xf]  ;;  %v9066_v33 = vld [vmem:[%s9999_s20 + $0x56c] sm:$0xf0] }
 0x1cb   : > { %v1705_v63 = vpop.f32.mrf.mxu0  ;;  %2657 = vmatpush.bf16.msrb.mxu1 %v6708_v52  ;;  %2666 = vmatpush.bf16.msrb.mxu2 %v6900_v54  ;;  %v6820_v54 = vor.u32 %v8831_v43, %v6819_v42  ;;  %v6947_v43 = vld [vmem:[#allocation11 + $0x308] sm:$0xf] }
 0x1cc   : > { %v1706_v20 = vadd.f32 %v1705_v63, %v895_v5  ;;  %v7044_v5 = vor.u32 %v8887_v60, %v7043_v59  ;;  %v8877_v59 = vld [vmem:[#allocation11 + $0x38c] sm:$0xf]  ;;  %v7013_v60 = vld [vmem:[#allocation11 + $0x398] sm:$0xf0] }
 0x1ce   : > { %v1718_v3 = vpop.f32.mrf.mxu1  ;;  %2693 = vmatpush.bf16.msra.mxu0 %v6632_v55  ;;  %v7060_v55 = vor.u32 %v8891_v46, %v7059_v17  ;;  %v6821_v17 = vld [vmem:[#allocation11 + $0x218] sm:$0xf0]  ;;  %v8889_v46 = vld [vmem:[#allocation11 + $0x3ec] sm:$0xf] }
 0x1cf   : > { %2658 = vmatpush.bf16.msrb.mxu1 %v6692_v4  ;;  %2667 = vmatpush.bf16.msrb.mxu2 %v6884_v6  ;;  %v1719_v31 = vadd.f32 %v1718_v3, %v1706_v20  ;;  %v6917_v3 = vld [vmem:[#allocation11 + $0x2d8] sm:$0xf0]  ;;  %v6728_v6 = vor.u32 %v8805_v62, %v6725_v0  ;;  %v8797_v20 = vld [vmem:[#allocation11 + $0x10c] sm:$0xf]  ;;  %v7064_v50 = vor.u32 %v8889_v46, %v7061_v47  ;;  %v7405_v46 = vld [vmem:[%s9999_s20 + $0x2d0] sm:$0xf0] }
 0x1d0   : > { %v7016_v62 = vor.u32 %v8877_v59, %v7013_v60  ;;  %v6997_v0 = vld [vmem:[#allocation11 + $0x378] sm:$0xf0] }
 0x1d2   : > { %2694 = vmatpush.bf16.msra.mxu0 %v6616_v7  ;;  %2659 = vmatmul.bf16.vlgmr.msrb.gmra.mxu1 %v10036_v11  ;;  %v6920_v7 = vor.u32 %v8853_v1, %v6917_v3  ;;  %v7403_v1 = vld [vmem:[%s9999_s20 + $0x2a0] sm:$0xf]  ;;  %v8982_v3 = vld [vmem:[%s9999_s20 + $0x2cc] sm:$0xf0] }
 0x1d3   : > { %2703 = vmatpush.bf16.msra.mxu1 %v6808_v9  ;;  %v1707_v24 = vpop.f32.mrf.mxu0  ;;  %2620 = vmatmul.bf16.vlgmr.msra.gmra.mxu2 %v10041_v37  ;;  %v8883_v9 = vld [vmem:[#allocation11 + $0x3b4] sm:$0xf0] }
 0x1d4   : > { %2668 = vmatpush.bf16.msrb.mxu2 %v6868_v16  ;;  %v7028_v15 = vor.u32 %v8883_v9, %v7027_v8  ;;  %v6904_v16 = vor.u32 %v8849_v13, %v6901_v14  ;;  %v8865_v8 = vld [vmem:[#allocation11 + $0x32c] sm:$0xf]  ;;  %v6965_v9 = vld [vmem:[#allocation11 + $0x338] sm:$0xf0] }
 0x1d5   : > { %v6968_v13 = vor.u32 %v8865_v8, %v6965_v9  ;;  %v7499_v8 = vld [vmem:[%s9999_s20 + $0x360] sm:$0xf]  ;;  %v9006_v9 = vld [vmem:[%s9999_s20 + $0x38c] sm:$0xf0] }
 0x1d6   : > { %v1720_v27 = vpop.f32.mrf.mxu1  ;;  %2695 = vmatpush.bf16.msra.mxu0 %v6600_v18  ;;  %v7011_v18 = vld [vmem:[#allocation11 + $0x388] sm:$0xf] }
 0x1d7   : > { %2704 = vmatpush.bf16.msra.mxu1 %v6792_v2  ;;  %v6693_v2 = vld [vmem:[#allocation11 + $0x118] sm:$0xf0]  ;;  %v7012_v23 = vor.u32 %v8879_v19, %v7011_v18  ;;  %v8875_v27 = vld [vmem:[#allocation11 + $0x374] sm:$0xf0] }
 0x1d8   : > { %v1731_v34 = vpop.f32.mrf.mxu2  ;;  %2669 = vmatpush.bf16.msrb.mxu2 %v6852_v28  ;;  %v6696_v24 = vor.u32 %v8797_v20, %v6693_v2  ;;  %v8841_v28 = vld [vmem:[#allocation11 + $0x26c] sm:$0xf]  ;;  %v6996_v30 = vor.u32 %v8875_v27, %v6995_v26  ;;  %v6949_v18 = vld [vmem:[#allocation11 + $0x318] sm:$0xf0]  ;;  %v7259_v2 = vld [vmem:[%s9999_s20 + $0x180] sm:$0xf] }
 0x1d9   : > { %v1732_v38 = vadd.f32 %v1731_v34, %v1719_v31  ;;  %v1744_v39 = vpop.f32.mrf.mxu3  ;;  %v9078_v26 = vld [vmem:[%s9999_s20 + $0x5cc] sm:$0xf0] }
 0x1da   : > { %2696 = vmatpush.bf16.msra.mxu0 %v6584_v29  ;;  %v6869_v29 = vld [vmem:[#allocation11 + $0x278] sm:$0xf0] }
 0x1db   : > { %v1745_v44 = vadd.f32 %v1744_v39, %v1732_v38  ;;  %2705 = vmatpush.bf16.msra.mxu1 %v6776_v32  ;;  %v6872_v31 = vor.u32 %v8841_v28, %v6869_v29  ;;  %v6979_v32 = vld [vmem:[#allocation11 + $0x348] sm:$0xf]  ;;  %v8867_v38 = vld [vmem:[#allocation11 + $0x334] sm:$0xf0]  ;;  %v8833_v39 = vld [vmem:[#allocation11 + $0x22c] sm:$0xf] }
 0x1dc   : > { %2670 = vmatpush.bf16.msrb.mxu2 %v6836_v40  ;;  %v6980_v34 = vor.u32 %v8871_v48, %v6979_v32  ;;  %v6837_v40 = vld [vmem:[#allocation11 + $0x238] sm:$0xf0]  ;;  %v7739_v48 = vld [vmem:[%s9999_s20 + $0x540] sm:$0xf] }
 0x1dd   : > { %v1751_v52 = vmax.f32 %v1745_v44, 0.0  ;;  %v6840_v42 = vor.u32 %v8833_v39, %v6837_v40  ;;  %v8863_v44 = vld [vmem:[#allocation11 + $0x314] sm:$0xf0]  ;;  %v7740_v53 = vor.u32 %v9066_v33, %v7739_v48  ;;  %v9126_v48 = vld [vmem:[%s9999_s20 + $0x74c] sm:$0xf0] }
 0x1de   : > { %2697 = vmatpush.bf16.msra.mxu0 %v6568_v41  ;;  %v6964_v41 = vor.u32 %v8867_v38, %v6963_v36  ;;  %v6948_v49 = vor.u32 %v8863_v44, %v6947_v43  ;;  %v9054_v38 = vld [vmem:[%s9999_s20 + $0x50c] sm:$0xf0]  ;;  %v7643_v43 = vld [vmem:[%s9999_s20 + $0x480] sm:$0xf] }
 0x1df   : > { %v10049_v56 = vpack.c.bf16 %v1751_v52, %v1751_v52  ;;  %2706 = vmatpush.bf16.msra.mxu1 %v6760_v45  ;;  %v8829_v45 = vld [vmem:[#allocation11 + $0x20c] sm:$0xf]  ;;  %v7045_v52 = vld [vmem:[#allocation11 + $0x3d8] sm:$0xf0] }
 0x1e0   : > { %v1733_v63 = vpop.f32.mrf.mxu2  ;;  %2671 = vmatpush.bf16.msrb.mxu2 %v6820_v54  ;;  %v7048_v54 = vor.u32 %v8885_v51, %v7045_v52  ;;  %v8171_v51 = vld [vmem:[%s9999_s20 + $0x8a0] sm:$0xf] }
 0x1e1   : > { %v1746_v4 = vpop.f32.mrf.mxu3  ;;  %2581 = vmatmul.bf16.vlgmr.msrb.gmra.mxu3 %v10049_v56  ;;  %2698 = vmatmul.bf16.vlgmr.msra.gmra.mxu0 %v10033_v61  ;;  %v6712_v61 = vor.u32 %v8801_v10, %v6709_v12  ;;  %v8873_v63 = vld [vmem:[#allocation11 + $0x36c] sm:$0xf]  ;;  %v7355_v10 = vld [vmem:[%s9999_s20 + $0x240] sm:$0xf]  ;;  %v8970_v12 = vld [vmem:[%s9999_s20 + $0x26c] sm:$0xf0] }
 0x1e2   : > { %2677 = vmatpush.bf16.msrb.mxu3 %v7060_v55  ;;  %v8881_v55 = vld [vmem:[#allocation11 + $0x3ac] sm:$0xf]  ;;  %v7404_v4 = vor.u32 %v8982_v3, %v7403_v1  ;;  %v7356_v14 = vor.u32 %v8970_v12, %v7355_v10  ;;  %v8123_v1 = vld [vmem:[%s9999_s20 + $0x840] sm:$0xf]  ;;  %v7500_v12 = vor.u32 %v9006_v9, %v7499_v8  ;;  %v7597_v8 = vld [vmem:[%s9999_s20 + $0x450] sm:$0xf0] }
 0x1e3   : > { %2707 = vmatpush.bf16.msra.mxu1 %v6744_v57  ;;  %2672 = vmatmul.bf16.vlgmr.msrb.gmra.mxu2 %v10041_v37  ;;  %v7029_v57 = vld [vmem:[#allocation11 + $0x3b8] sm:$0xf0]  ;;  %v8075_v10 = vld [vmem:[%s9999_s20 + $0x7e0] sm:$0xf] }
 0x1e4   : > { %2716 = vmatpush.bf16.msra.mxu2 %v6936_v58  ;;  %v7032_v58 = vor.u32 %v8881_v55, %v7029_v57  ;;  %5082 = vmatpush.bf16.msrb.mxu0 %v7404_v4  ;;  %v8964_v55 = vld [vmem:[%s9999_s20 + $0x244] sm:$0xf]  ;;  %v7357_v57 = vld [vmem:[%s9999_s20 + $0x270] sm:$0xf0]  ;;  %v9162_v4 = vld [vmem:[%s9999_s20 + $0x86c] sm:$0xf0] }
 0x1e6   : > { %2678 = vmatpush.bf16.msrb.mxu3 %v7044_v5  ;;  %v7000_v5 = vor.u32 %v8873_v63, %v6997_v0  ;;  %v7547_v63 = vld [vmem:[%s9999_s20 + $0x3c0] sm:$0xf]  ;;  %v9018_v0 = vld [vmem:[%s9999_s20 + $0x3ec] sm:$0xf0] }
 0x1e7   : > { %2708 = vmatpush.bf16.msra.mxu1 %v6728_v6  ;;  %v8869_v6 = vld [vmem:[#allocation11 + $0x34c] sm:$0xf]  ;;  %v7548_v3 = vor.u32 %v9018_v0, %v7547_v63  ;;  %v7645_v0 = vld [vmem:[%s9999_s20 + $0x4b0] sm:$0xf0] }
 0x1e8   : > { %2717 = vmatpush.bf16.msra.mxu2 %v6920_v7  ;;  %v6981_v7 = vld [vmem:[#allocation11 + $0x358] sm:$0xf0]  ;;  %5083 = vmatpush.bf16.msrb.mxu0 %v7356_v14  ;;  %v8940_v14 = vld [vmem:[%s9999_s20 + $0x184] sm:$0xf] }
 0x1ea   : > { %2679 = vmatpush.bf16.msrb.mxu3 %v7028_v15  ;;  %v7307_v15 = vld [vmem:[%s9999_s20 + $0x1e0] sm:$0xf] }
 0x1eb   : > { %2709 = vmatpush.bf16.msra.mxu1 %v6712_v61  ;;  %v8958_v61 = vld [vmem:[%s9999_s20 + $0x20c] sm:$0xf0] }
 0x1ec   : > { %2718 = vmatpush.bf16.msra.mxu2 %v6904_v16  ;;  %v8861_v16 = vld [vmem:[#allocation11 + $0x30c] sm:$0xf]  ;;  %v7308_v19 = vor.u32 %v8958_v61, %v7307_v15  ;;  %v7261_v15 = vld [vmem:[%s9999_s20 + $0x1b0] sm:$0xf0] }
 0x1ed   : > { %v6952_v20 = vor.u32 %v8861_v16, %v6949_v18 }
 0x1ee   : > { %2680 = vmatpush.bf16.msrb.mxu3 %v7012_v23  ;;  %5084 = vmatpush.bf16.msrb.mxu0 %v7308_v19  ;;  %v7260_v23 = vor.u32 %v8946_v21, %v7259_v2  ;;  %v7264_v19 = vor.u32 %v8940_v14, %v7261_v15  ;;  %v8994_v2 = vld [vmem:[%s9999_s20 + $0x32c] sm:$0xf0]  ;;  %v8027_v21 = vld [vmem:[%s9999_s20 + $0x780] sm:$0xf] }
 0x1ef   : > { %2710 = vmatpush.bf16.msra.mxu1 %v6696_v24  ;;  %v8934_v24 = vld [vmem:[%s9999_s20 + $0x14c] sm:$0xf0]  ;;  %v8507_v15 = vld [vmem:[%s9999_s20 + $0xb40] sm:$0xf] }
 0x1f0   : > { %2719 = vmatpush.bf16.msra.mxu2 %v6888_v25  ;;  %v7787_v25 = vld [vmem:[%s9999_s20 + $0x5a0] sm:$0xf]  ;;  %v7212_v28 = vor.u32 %v8934_v24, %v7211_v22  ;;  %v9138_v22 = vld [vmem:[%s9999_s20 + $0x7ac] sm:$0xf0] }
 0x1f1   : > { %2633 = vmatmul.bf16.vlgmr.msra.gmra.mxu3 %v10049_v56  ;;  %v7788_v27 = vor.u32 %v9078_v26, %v7787_v25  ;;  %v8028_v24 = vor.u32 %v9138_v22, %v8027_v21  ;;  %v8928_v25 = vld [vmem:[%s9999_s20 + $0x124] sm:$0xf]  ;;  %v7213_v26 = vld [vmem:[%s9999_s20 + $0x150] sm:$0xf0] }
 0x1f2   : > { %2681 = vmatpush.bf16.msrb.mxu3 %v6996_v30  ;;  %2711 = vmatmul.bf16.vlgmr.msra.gmra.mxu1 %v10036_v11  ;;  %v6824_v11 = vor.u32 %v8829_v45, %v6821_v17  ;;  %v7163_v30 = vld [vmem:[%s9999_s20 + $0xc0] sm:$0xf]  ;;  %v9042_v45 = vld [vmem:[%s9999_s20 + $0x4ac] sm:$0xf0]  ;;  %v8976_v17 = vld [vmem:[%s9999_s20 + $0x2a4] sm:$0xf] }
 0x1f3   : > { %5085 = vmatpush.bf16.msrb.mxu0 %v7260_v23  ;;  %5095 = vmatpush.bf16.msrb.mxu1 %v7788_v27  ;;  %v7644_v47 = vor.u32 %v9042_v45, %v7643_v43  ;;  %v9072_v27 = vld [vmem:[%s9999_s20 + $0x5a4] sm:$0xf]  ;;  %v7117_v45 = vld [vmem:[%s9999_s20 + $0x90] sm:$0xf0] }
 0x1f4   : > { %2720 = vmatpush.bf16.msra.mxu2 %v6872_v31  ;;  %v8922_v31 = vld [vmem:[%s9999_s20 + $0xec] sm:$0xf0] }
 0x1f5   : > { %v7164_v32 = vor.u32 %v8922_v31, %v7163_v30  ;;  %v7789_v30 = vld [vmem:[%s9999_s20 + $0x5d0] sm:$0xf0] }
 0x1f6   : > { %2682 = vmatpush.bf16.msrb.mxu3 %v6980_v34  ;;  %v7115_v34 = vld [vmem:[%s9999_s20 + $0x60] sm:$0xf]  ;;  %v7792_v31 = vor.u32 %v9072_v27, %v7789_v30  ;;  %v7501_v30 = vld [vmem:[%s9999_s20 + $0x390] sm:$0xf0] }
 0x1f7   : > { %5086 = vmatpush.bf16.msrb.mxu0 %v7212_v28  ;;  %5096 = vmatpush.bf16.msrb.mxu1 %v7740_v53  ;;  %v7216_v28 = vor.u32 %v8928_v25, %v7213_v26  ;;  %v8916_v53 = vld [vmem:[%s9999_s20 + $0xc4] sm:$0xf]  ;;  %v8459_v25 = vld [vmem:[%s9999_s20 + $0xae0] sm:$0xf]  ;;  %v9246_v26 = vld [vmem:[%s9999_s20 + $0xb0c] sm:$0xf0] }
 0x1f8   : > { %2721 = vmatpush.bf16.msra.mxu2 %v6856_v35  ;;  %v8910_v35 = vld [vmem:[%s9999_s20 + $0x8c] sm:$0xf0]  ;;  %v8460_v27 = vor.u32 %v9246_v26, %v8459_v25  ;;  %v7363_v25 = vld [vmem:[%s9999_s20 + $0x248] sm:$0xf]  ;;  %v8971_v26 = vld [vmem:[%s9999_s20 + $0x274] sm:$0xf0] }
 0x1f9   : > { %v7116_v36 = vor.u32 %v8910_v35, %v7115_v34  ;;  %v7165_v34 = vld [vmem:[%s9999_s20 + $0xf0] sm:$0xf0]  ;;  %v9060_v35 = vld [vmem:[%s9999_s20 + $0x544] sm:$0xf] }
 0x1fa   : > { %2683 = vmatpush.bf16.msrb.mxu3 %v6964_v41  ;;  %v7067_v41 = vld [vmem:[%s9999_s20] sm:$0xf] }
 0x1fb   : > { %5087 = vmatpush.bf16.msrb.mxu0 %v7164_v32  ;;  %v7979_v32 = vld [vmem:[%s9999_s20 + $0x720] sm:$0xf] }
 0x1fc   : > { %2722 = vmatpush.bf16.msra.mxu2 %v6840_v42  ;;  %v8898_v42 = vld [vmem:[%s9999_s20 + $0x2c] sm:$0xf0]  ;;  %v7980_v33 = vor.u32 %v9126_v48, %v7979_v32  ;;  %v8077_v48 = vld [vmem:[%s9999_s20 + $0x810] sm:$0xf0] }
 0x1fd   : > { %v7068_v44 = vor.u32 %v8898_v42, %v7067_v41  ;;  %v7931_v41 = vld [vmem:[%s9999_s20 + $0x6c0] sm:$0xf]  ;;  %v9114_v42 = vld [vmem:[%s9999_s20 + $0x6ec] sm:$0xf0] }
 0x1fe   : > { %2684 = vmatpush.bf16.msrb.mxu3 %v6948_v49  ;;  %v7408_v49 = vor.u32 %v8976_v17, %v7405_v46  ;;  %v7932_v43 = vor.u32 %v9114_v42, %v7931_v41  ;;  %v9048_v17 = vld [vmem:[%s9999_s20 + $0x4e4] sm:$0xf]  ;;  %v7453_v41 = vld [vmem:[%s9999_s20 + $0x330] sm:$0xf0] }
 0x1ff   : > { %5088 = vmatpush.bf16.msrb.mxu0 %v7116_v36  ;;  %v9132_v42 = vld [vmem:[%s9999_s20 + $0x784] sm:$0xf] }
 0x200   : > { %2723 = vmatpush.bf16.msra.mxu2 %v6824_v11  ;;  %v7595_v11 = vld [vmem:[%s9999_s20 + $0x420] sm:$0xf] }
 0x201   : > { %2685 = vmatmul.bf16.vlgmr.msrb.gmra.mxu3 %v10049_v56 }
 0x202   : > { %2729 = vmatpush.bf16.msra.mxu3 %v7064_v50  ;;  %v9030_v50 = vld [vmem:[%s9999_s20 + $0x44c] sm:$0xf0] }
 0x203   : > { %2724 = vmatmul.bf16.vlgmr.msra.gmra.mxu2 %v10041_v37  ;;  %v6984_v37 = vor.u32 %v8869_v6, %v6981_v7  ;;  %5089 = vmatpush.bf16.msrb.mxu0 %v7068_v44  ;;  %v7596_v52 = vor.u32 %v9030_v50, %v7595_v11  ;;  %v7309_v6 = vld [vmem:[%s9999_s20 + $0x210] sm:$0xf0]  ;;  %v8124_v7 = vor.u32 %v9162_v4, %v8123_v1  ;;  %v8904_v44 = vld [vmem:[%s9999_s20 + $0x64] sm:$0xf]  ;;  %v7883_v11 = vld [vmem:[%s9999_s20 + $0x660] sm:$0xf] }
 0x204   : > { %v7120_v46 = vor.u32 %v8904_v44, %v7117_v45  ;;  %v9102_v50 = vld [vmem:[%s9999_s20 + $0x68c] sm:$0xf0]  ;;  %v8029_v45 = vld [vmem:[%s9999_s20 + $0x7b0] sm:$0xf0] }
 0x205   : > { %v9090_v4 = vld [vmem:[%s9999_s20 + $0x62c] sm:$0xf0] }
 0x206   : > { %2730 = vmatpush.bf16.msra.mxu3 %v7048_v54  ;;  %v9174_v54 = vld [vmem:[%s9999_s20 + $0x8cc] sm:$0xf0] }
 0x207   : > { %5134 = vmatpush.bf16.msra.mxu0 %v7408_v49  ;;  %v8172_v60 = vor.u32 %v9174_v54, %v8171_v51  ;;  %v8892_v54 = vld [vmem:[%s9999_s20 + $0x4] sm:$0xf] }
 0x209   : > { %5108 = vmatpush.bf16.msrb.mxu2 %v8172_v60 }
 0x20a   : > { %2731 = vmatpush.bf16.msra.mxu3 %v7032_v58 }
 0x20d   : > { %5109 = vmatpush.bf16.msrb.mxu2 %v8124_v7  ;;  %v9270_v7 = vld [vmem:[%s9999_s20 + $0xbcc] sm:$0xf0] }
 0x20e   : > { %2732 = vmatpush.bf16.msra.mxu3 %v7016_v62  ;;  %v7360_v62 = vor.u32 %v8964_v55, %v7357_v57  ;;  %v7069_v55 = vld [vmem:[%s9999_s20 + $0x30] sm:$0xf0]  ;;  %v9036_v57 = vld [vmem:[%s9999_s20 + $0x484] sm:$0xf] }
 0x20f   : > { %v7072_v63 = vor.u32 %v8892_v54, %v7069_v55  ;;  %v7648_v1 = vor.u32 %v9036_v57, %v7645_v0 }
 0x210   : > { %5135 = vmatpush.bf16.msra.mxu0 %v7360_v62 }
 0x212   : > { %2733 = vmatpush.bf16.msra.mxu3 %v7000_v5  ;;  %v8952_v5 = vld [vmem:[%s9999_s20 + $0x1e4] sm:$0xf] }
 0x216   : > { %2734 = vmatpush.bf16.msra.mxu3 %v6984_v37  ;;  %v7312_v37 = vor.u32 %v8952_v5, %v7309_v6  ;;  %v8555_v5 = vld [vmem:[%s9999_s20 + $0xba0] sm:$0xf] }
 0x217   : > { %v8556_v9 = vor.u32 %v9270_v7, %v8555_v5  ;;  %v9198_v7 = vld [vmem:[%s9999_s20 + $0x98c] sm:$0xf0] }
 0x218   : > { %5136 = vmatpush.bf16.msra.mxu0 %v7312_v37  ;;  %v9024_v37 = vld [vmem:[%s9999_s20 + $0x424] sm:$0xf] }
 0x21a   : > { %2735 = vmatpush.bf16.msra.mxu3 %v6968_v13  ;;  %v9150_v13 = vld [vmem:[%s9999_s20 + $0x80c] sm:$0xf0] }
 0x21b   : > { %v8076_v18 = vor.u32 %v9150_v13, %v8075_v10  ;;  %v7600_v10 = vor.u32 %v9024_v37, %v7597_v8  ;;  %v8173_v13 = vld [vmem:[%s9999_s20 + $0x8d0] sm:$0xf0] }
 0x21c   : > { %5137 = vmatpush.bf16.msra.mxu0 %v7264_v19  ;;  %v9012_v19 = vld [vmem:[%s9999_s20 + $0x3c4] sm:$0xf] }
 0x21d   : > { %5110 = vmatpush.bf16.msrb.mxu2 %v8076_v18 }
 0x21e   : > { %2736 = vmatpush.bf16.msra.mxu3 %v6952_v20  ;;  %v10071_v29 = vpop.f32.mrf.mxu0  ;;  %v7451_v20 = vld [vmem:[%s9999_s20 + $0x300] sm:$0xf] }
 0x21f   : > { %v7452_v23 = vor.u32 %v8994_v2, %v7451_v20  ;;  %v7549_v20 = vld [vmem:[%s9999_s20 + $0x3f0] sm:$0xf0]  ;;  %v9156_v2 = vld [vmem:[%s9999_s20 + $0x844] sm:$0xf] }
 0x220   : > { %5138 = vmatpush.bf16.msra.mxu0 %v7216_v28  ;;  %v7552_v22 = vor.u32 %v9012_v19, %v7549_v20  ;;  %v9000_v28 = vld [vmem:[%s9999_s20 + $0x364] sm:$0xf] }
 0x221   : > { %2737 = vmatmul.bf16.vlgmr.msra.gmra.mxu3 %v10049_v56  ;;  %v7691_v56 = vld [vmem:[%s9999_s20 + $0x4e0] sm:$0xf]  ;;  %5111 = vmatpush.bf16.msrb.mxu2 %v8028_v24  ;;  %v7504_v32 = vor.u32 %v9000_v28, %v7501_v30  ;;  %v8557_v28 = vld [vmem:[%s9999_s20 + $0xbd0] sm:$0xf0] }
 0x222   : > { %v7692_v40 = vor.u32 %v9054_v38, %v7691_v56  ;;  %v7168_v38 = vor.u32 %v8916_v53, %v7165_v34  ;;  %5121 = vmatpush.bf16.msrb.mxu3 %v8556_v9  ;;  %v10163_v53 = vld [vmem:[#allocation13] sm:$0xf]  ;;  %v8411_v34 = vld [vmem:[%s9999_s20 + $0xa80] sm:$0xf]  ;;  %v9096_v9 = vld [vmem:[%s9999_s20 + $0x664] sm:$0xf] }
 0x224   : > { %5097 = vmatpush.bf16.msrb.mxu1 %v7692_v40  ;;  %5139 = vmatpush.bf16.msra.mxu0 %v7168_v38 }
 0x225   : > { %5112 = vmatpush.bf16.msrb.mxu2 %v7980_v33 }
 0x226   : > { %v2545_v39 = vpop.f32.mrf.mxu0 }
 0x227   : > { %v7741_v39 = vld [vmem:[%s9999_s20 + $0x570] sm:$0xf0] }
 0x228   : > { %5098 = vmatpush.bf16.msrb.mxu1 %v7644_v47  ;;  %v7744_v40 = vor.u32 %v9060_v35, %v7741_v39  ;;  %v7693_v47 = vld [vmem:[%s9999_s20 + $0x510] sm:$0xf0]  ;;  %5140 = vmatpush.bf16.msra.mxu0 %v7120_v46  ;;  %v9234_v35 = vld [vmem:[%s9999_s20 + $0xaac] sm:$0xf0]  ;;  %v1886_v46 = vperm.slane %v10163_v53, 0 }
 0x229   : > { %v7696_v49 = vor.u32 %v9048_v17, %v7693_v47  ;;  %5113 = vmatpush.bf16.msrb.mxu2 %v7932_v43  ;;  %v8412_v39 = vor.u32 %v9234_v35, %v8411_v34  ;;  %v8032_v17 = vor.u32 %v9132_v42, %v8029_v45  ;;  %v8363_v47 = vld [vmem:[%s9999_s20 + $0xa20] sm:$0xf]  ;;  %v8959_v34 = vld [vmem:[%s9999_s20 + $0x214] sm:$0xf0]  ;;  %v9252_v35 = vld [vmem:[%s9999_s20 + $0xb44] sm:$0xf] }
 0x22a   : > { %v2544_v57 = vadd.f32 %v10071_v29, %v1886_v46  ;;  %v8267_v29 = vld [vmem:[%s9999_s20 + $0x960] sm:$0xf]  ;;  %v7267_v45 = vld [vmem:[%s9999_s20 + $0x188] sm:$0xf]  ;;  %v8947_v46 = vld [vmem:[%s9999_s20 + $0x1b4] sm:$0xf0] }
 0x22b   : > { %v8268_v8 = vor.u32 %v9198_v7, %v8267_v29  ;;  %v8923_v29 = vld [vmem:[%s9999_s20 + $0xf4] sm:$0xf0]  ;;  %v7747_v7 = vld [vmem:[%s9999_s20 + $0x548] sm:$0xf] }
 0x22c   : > { %5099 = vmatpush.bf16.msrb.mxu1 %v7596_v52  ;;  %v7884_v52 = vor.u32 %v9102_v50, %v7883_v11  ;;  %5141 = vmatpush.bf16.msra.mxu0 %v7072_v63  ;;  %v9120_v50 = vld [vmem:[%s9999_s20 + $0x724] sm:$0xf] }
 0x22e   : > { %v10093_v58 = vpop.f32.mrf.mxu1  ;;  %v10095_v59 = vpop.f32.mrf.mxu0  ;;  %5114 = vmatpush.bf16.msrb.mxu2 %v7884_v52  ;;  %v7981_v52 = vld [vmem:[%s9999_s20 + $0x750] sm:$0xf0] }
 0x22f   : > { %v7984_v54 = vor.u32 %v9120_v50, %v7981_v52  ;;  %v7268_v52 = vor.u32 %v8947_v46, %v7267_v45 }
 0x230   : > { %5100 = vmatpush.bf16.msrb.mxu1 %v7548_v3  ;;  %v7835_v3 = vld [vmem:[%s9999_s20 + $0x600] sm:$0xf] }
 0x231   : > { %v7836_v6 = vor.u32 %v9090_v4, %v7835_v3  ;;  %v7933_v3 = vld [vmem:[%s9999_s20 + $0x6f0] sm:$0xf0]  ;;  %v2557_v4 = vadd.f32 %v10093_v58, %v2544_v57  ;;  %v8983_v58 = vld [vmem:[%s9999_s20 + $0x2d4] sm:$0xf0] }
 0x232   : > { %v8935_v57 = vld [vmem:[%s9999_s20 + $0x154] sm:$0xf0] }
 0x233   : > { %5115 = vmatpush.bf16.msrb.mxu2 %v7836_v6 }
 0x234   : > { %5101 = vmatpush.bf16.msrb.mxu1 %v7500_v12  ;;  %v9168_v12 = vld [vmem:[%s9999_s20 + $0x8a4] sm:$0xf] }
 0x235   : > { %v8176_v14 = vor.u32 %v9168_v12, %v8173_v13  ;;  %v7411_v13 = vld [vmem:[%s9999_s20 + $0x2a8] sm:$0xf] }
 0x236   : > { %v2558_v61 = vpop.f32.mrf.mxu1  ;;  %v2597_v16 = vpop.f32.mrf.mxu0  ;;  %v7412_v19 = vor.u32 %v8983_v58, %v7411_v13  ;;  %v1888_v13 = vperm.slane %v10163_v53, 2 }
 0x237   : > { %v9258_v61 = vld [vmem:[%s9999_s20 + $0xb6c] sm:$0xf0]  ;;  %5160 = vmatpush.bf16.msra.mxu2 %v8176_v14 }
 0x238   : > { %5102 = vmatpush.bf16.msrb.mxu1 %v7452_v23  ;;  %v8508_v18 = vor.u32 %v9258_v61, %v8507_v15  ;;  %v8125_v23 = vld [vmem:[%s9999_s20 + $0x870] sm:$0xf0]  ;;  %v8219_v61 = vld [vmem:[%s9999_s20 + $0x900] sm:$0xf] }
 0x239   : > { %v8128_v24 = vor.u32 %v9156_v2, %v8125_v23  ;;  %v9084_v2 = vld [vmem:[%s9999_s20 + $0x604] sm:$0xf] }
 0x23a   : > { %5122 = vmatpush.bf16.msrb.mxu3 %v8508_v18  ;;  %v9264_v23 = vld [vmem:[%s9999_s20 + $0xba4] sm:$0xf] }
 0x23b   : > { %5161 = vmatpush.bf16.msra.mxu2 %v8128_v24  ;;  %v8560_v30 = vor.u32 %v9264_v23, %v8557_v28  ;;  %v8899_v28 = vld [vmem:[%s9999_s20 + $0x34] sm:$0xf0] }
 0x23c   : > { %5147 = vmatpush.bf16.msra.mxu1 %v7792_v31  ;;  %v9144_v31 = vld [vmem:[%s9999_s20 + $0x7e4] sm:$0xf] }
 0x23d   : > { %v8080_v33 = vor.u32 %v9144_v31, %v8077_v48  ;;  %v1887_v31 = vperm.slane %v10163_v53, 1  ;;  %v7364_v48 = vor.u32 %v8971_v26, %v7363_v25 }
 0x23e   : > { %v10122_v56 = vpop.f32.mrf.mxu1  ;;  %v10124_v36 = vpop.f32.mrf.mxu0  ;;  %5123 = vmatpush.bf16.msrb.mxu3 %v8460_v27 }
 0x23f   : > { %5162 = vmatpush.bf16.msra.mxu2 %v8080_v33  ;;  %v7315_v33 = vld [vmem:[%s9999_s20 + $0x1e8] sm:$0xf]  ;;  %v2648_v23 = vadd.f32 %v10124_v36, %v1888_v13  ;;  %v9151_v13 = vld [vmem:[%s9999_s20 + $0x814] sm:$0xf0] }
 0x240   : > { %5148 = vmatpush.bf16.msra.mxu1 %v7744_v40  ;;  %v8988_v40 = vld [vmem:[%s9999_s20 + $0x304] sm:$0xf] }
 0x241   : > { %v7456_v44 = vor.u32 %v8988_v40, %v7453_v41  ;;  %v2596_v41 = vadd.f32 %v10095_v59, %v1887_v31 }
 0x242   : > { %5124 = vmatpush.bf16.msrb.mxu3 %v8412_v39  ;;  %v8509_v39 = vld [vmem:[%s9999_s20 + $0xb70] sm:$0xf0] }
 0x243   : > { %5163 = vmatpush.bf16.msra.mxu2 %v8032_v17  ;;  %v8512_v40 = vor.u32 %v9252_v35, %v8509_v39  ;;  %v2609_v17 = vadd.f32 %v10122_v56, %v2596_v41  ;;  %v7413_v35 = vld [vmem:[%s9999_s20 + $0x2d8] sm:$0xf0] }
 0x244   : > { %5149 = vmatpush.bf16.msra.mxu1 %v7696_v49  ;;  %v9222_v49 = vld [vmem:[%s9999_s20 + $0xa4c] sm:$0xf0] }
 0x245   : > { %v10135_v51 = vpop.f32.mrf.mxu2  ;;  %v8364_v11 = vor.u32 %v9222_v49, %v8363_v47  ;;  %v9240_v47 = vld [vmem:[%s9999_s20 + $0xae4] sm:$0xf]  ;;  %v8461_v49 = vld [vmem:[%s9999_s20 + $0xb10] sm:$0xf0] }
 0x246   : > { %v2610_v60 = vpop.f32.mrf.mxu1  ;;  %v2649_v62 = vpop.f32.mrf.mxu0  ;;  %v2570_v6 = vadd.f32 %v10135_v51, %v2557_v4 }
 0x247   : > { %5125 = vmatpush.bf16.msrb.mxu3 %v8364_v11  ;;  %v8315_v60 = vld [vmem:[%s9999_s20 + $0x9c0] sm:$0xf]  ;;  %v9210_v62 = vld [vmem:[%s9999_s20 + $0x9ec] sm:$0xf0]  ;;  %5164 = vmatpush.bf16.msra.mxu2 %v7984_v54  ;;  %v8464_v11 = vor.u32 %v9240_v47, %v8461_v49  ;;  %v7219_v54 = vld [vmem:[%s9999_s20 + $0x128] sm:$0xf] }
 0x248   : > { %5150 = vmatpush.bf16.msra.mxu1 %v7648_v1  ;;  %v8316_v0 = vor.u32 %v9210_v62, %v8315_v60  ;;  %v9108_v1 = vld [vmem:[%s9999_s20 + $0x6c4] sm:$0xf]  ;;  %v7795_v60 = vld [vmem:[%s9999_s20 + $0x5a8] sm:$0xf]  ;;  %v9079_v62 = vld [vmem:[%s9999_s20 + $0x5d4] sm:$0xf0]  ;;  %v7220_v4 = vor.u32 %v8935_v57, %v7219_v54 }
 0x249   : > { %v7936_v5 = vor.u32 %v9108_v1, %v7933_v3  ;;  %v8179_v47 = vld [vmem:[%s9999_s20 + $0x8a8] sm:$0xf]  ;;  %v9180_v49 = vld [vmem:[%s9999_s20 + $0x904] sm:$0xf] }
 0x24b   : > { %5126 = vmatpush.bf16.msrb.mxu3 %v8316_v0  ;;  %5165 = vmatpush.bf16.msra.mxu2 %v7936_v5  ;;  %v8413_v0 = vld [vmem:[%s9999_s20 + $0xab0] sm:$0xf0]  ;;  %v7796_v5 = vor.u32 %v9079_v62, %v7795_v60 }
 0x24c   : > { %5151 = vmatpush.bf16.msra.mxu1 %v7600_v10  ;;  %v7885_v10 = vld [vmem:[%s9999_s20 + $0x690] sm:$0xf0] }
 0x24d   : > { %v2571_v16 = vpop.f32.mrf.mxu2  ;;  %v7888_v14 = vor.u32 %v9096_v9, %v7885_v10  ;;  %v9216_v9 = vld [vmem:[%s9999_s20 + $0xa24] sm:$0xf]  ;;  %v8365_v10 = vld [vmem:[%s9999_s20 + $0xa50] sm:$0xf0] }
 0x24e   : > { %v9186_v16 = vld [vmem:[%s9999_s20 + $0x92c] sm:$0xf0] }
 0x24f   : > { %v10154_v21 = vpop.f32.mrf.mxu1  ;;  %5127 = vmatpush.bf16.msrb.mxu3 %v8268_v8  ;;  %5166 = vmatpush.bf16.msra.mxu2 %v7888_v14  ;;  %v8220_v20 = vor.u32 %v9186_v16, %v8219_v61  ;;  %v9067_v8 = vld [vmem:[%s9999_s20 + $0x574] sm:$0xf0]  ;;  %v7699_v16 = vld [vmem:[%s9999_s20 + $0x4e8] sm:$0xf] }
 0x250   : > { %5152 = vmatpush.bf16.msra.mxu1 %v7552_v22  ;;  %v7837_v22 = vld [vmem:[%s9999_s20 + $0x630] sm:$0xf0]  ;;  %v8911_v61 = vld [vmem:[%s9999_s20 + $0x94] sm:$0xf0]  ;;  %v2661_v31 = vadd.f32 %v10154_v21, %v2648_v23  ;;  %v7221_v23 = vld [vmem:[%s9999_s20 + $0x158] sm:$0xf0] }
 0x251   : > { %v7840_v27 = vor.u32 %v9084_v2, %v7837_v22  ;;  %v8317_v2 = vld [vmem:[%s9999_s20 + $0x9f0] sm:$0xf0] }
 0x253   : > { %5128 = vmatpush.bf16.msrb.mxu3 %v8220_v20  ;;  %5167 = vmatpush.bf16.msra.mxu2 %v7840_v27  ;;  %v9204_v20 = vld [vmem:[%s9999_s20 + $0x9c4] sm:$0xf]  ;;  %v7075_v27 = vld [vmem:[%s9999_s20 + $0x8] sm:$0xf] }
 0x254   : > { %5153 = vmatpush.bf16.msra.mxu1 %v7504_v32  ;;  %v8320_v22 = vor.u32 %v9204_v20, %v8317_v2  ;;  %v7076_v41 = vor.u32 %v8899_v28, %v7075_v27  ;;  %v8035_v20 = vld [vmem:[%s9999_s20 + $0x788] sm:$0xf]  ;;  %v9139_v2 = vld [vmem:[%s9999_s20 + $0x7b4] sm:$0xf0] }
 0x255   : > { %v8036_v28 = vor.u32 %v9139_v2, %v8035_v20  ;;  %v8515_v2 = vld [vmem:[%s9999_s20 + $0xb48] sm:$0xf] }
 0x256   : > { %v10167_v38 = vpop.f32.mrf.mxu2 }
 0x257   : > { %v2662_v43 = vpop.f32.mrf.mxu1  ;;  %5173 = vmatpush.bf16.msra.mxu3 %v8560_v30  ;;  %v2622_v59 = vadd.f32 %v10167_v38, %v2609_v17  ;;  %v7651_v30 = vld [vmem:[%s9999_s20 + $0x488] sm:$0xf] }
 0x258   : > { %5154 = vmatpush.bf16.msra.mxu1 %v7456_v44  ;;  %v7316_v44 = vor.u32 %v8959_v34, %v7315_v33  ;;  %v8269_v33 = vld [vmem:[%s9999_s20 + $0x990] sm:$0xf0]  ;;  %v8977_v34 = vld [vmem:[%s9999_s20 + $0x2ac] sm:$0xf] }
 0x259   : > { %v7416_v46 = vor.u32 %v8977_v34, %v7413_v35  ;;  %v7173_v34 = vld [vmem:[%s9999_s20 + $0xf8] sm:$0xf0]  ;;  %v9061_v35 = vld [vmem:[%s9999_s20 + $0x54c] sm:$0xf] }
 0x25b   : > { %5174 = vmatpush.bf16.msra.mxu3 %v8512_v40 }
 0x25e   : > { %v10178_v55 = vpop.f32.mrf.mxu0  ;;  %v2623_v63 = vpop.f32.mrf.mxu2 }
 0x25f   : > { %5175 = vmatpush.bf16.msra.mxu3 %v8464_v11  ;;  %v9228_v63 = vld [vmem:[%s9999_s20 + $0xa84] sm:$0xf]  ;;  %v9175_v11 = vld [vmem:[%s9999_s20 + $0x8d4] sm:$0xf0] }
 0x260   : > { %v8416_v1 = vor.u32 %v9228_v63, %v8413_v0  ;;  %v7555_v63 = vld [vmem:[%s9999_s20 + $0x3c8] sm:$0xf]  ;;  %v9019_v0 = vld [vmem:[%s9999_s20 + $0x3f4] sm:$0xf0] }
 0x263   : > { %5176 = vmatpush.bf16.msra.mxu3 %v8416_v1  ;;  %v8131_v1 = vld [vmem:[%s9999_s20 + $0x848] sm:$0xf] }
 0x264   : > { %v2582_v37 = vpop.f32.mrf.mxu3 }
 0x265   : > { %v2583_v12 = vadd.f32 %v2582_v37, %v2570_v6  ;;  %v7171_v6 = vld [vmem:[%s9999_s20 + $0xc8] sm:$0xf] }
 0x266   : > { %v2701_v51 = vpop.f32.mrf.mxu0  ;;  %v10195_v18 = vpop.f32.mrf.mxu2  ;;  %v7172_v14 = vor.u32 %v8923_v29, %v7171_v6  ;;  %v7556_v6 = vor.u32 %v9019_v0, %v7555_v63  ;;  %v7653_v63 = vld [vmem:[%s9999_s20 + $0x4b8] sm:$0xf0]  ;;  %v7419_v0 = vld [vmem:[%s9999_s20 + $0x2b0] sm:$0xf] }
 0x267   : > { %v2742_v15 = vmax.f32 %v2583_v12, 0.0  ;;  %v8368_v12 = vor.u32 %v9216_v9, %v8365_v10  ;;  %v7748_v51 = vor.u32 %v9067_v8, %v7747_v7  ;;  %v2674_v39 = vadd.f32 %v10195_v18, %v2661_v31  ;;  %v8221_v18 = vld [vmem:[%s9999_s20 + $0x930] sm:$0xf0]  ;;  %v7507_v9 = vld [vmem:[%s9999_s20 + $0x368] sm:$0xf] }
 0x268   : > { %v9007_v10 = vld [vmem:[%s9999_s20 + $0x394] sm:$0xf0]  ;;  %v7987_v31 = vld [vmem:[%s9999_s20 + $0x728] sm:$0xf] }
 0x269   : > { %v10200_v24 = vpack.c.bf16 %v2742_v15, %v2742_v15  ;;  %v7123_v15 = vld [vmem:[%s9999_s20 + $0x68] sm:$0xf]  ;;  %5177 = vmatpush.bf16.msra.mxu3 %v8368_v12 }
 0x26a   : > { %v7124_v25 = vor.u32 %v8911_v61, %v7123_v15  ;;  %v8083_v12 = vld [vmem:[%s9999_s20 + $0x7e8] sm:$0xf] }
 0x26b   : > { %5090 = vmatmul.bf16.vlgmr.msrb.gmra.mxu0 %v10200_v24  ;;  %v8084_v15 = vor.u32 %v9151_v13, %v8083_v12  ;;  %v9169_v12 = vld [vmem:[%s9999_s20 + $0x8ac] sm:$0xf]  ;;  %v8181_v13 = vld [vmem:[%s9999_s20 + $0x8d8] sm:$0xf0] }
 0x26c   : > { %5186 = vmatpush.bf16.msrb.mxu0 %v7412_v19  ;;  %v2584_v32 = vpop.f32.mrf.mxu3  ;;  %v9055_v19 = vld [vmem:[%s9999_s20 + $0x514] sm:$0xf0]  ;;  %v8184_v20 = vor.u32 %v9169_v12, %v8181_v13  ;;  %v8323_v12 = vld [vmem:[%s9999_s20 + $0x9c8] sm:$0xf] }
 0x26d   : > { %v7700_v26 = vor.u32 %v9055_v19, %v7699_v16  ;;  %v9043_v32 = vld [vmem:[%s9999_s20 + $0x4b4] sm:$0xf0]  ;;  %5178 = vmatpush.bf16.msra.mxu3 %v8320_v22  ;;  %v7459_v16 = vld [vmem:[%s9999_s20 + $0x308] sm:$0xf]  ;;  %v8929_v22 = vld [vmem:[%s9999_s20 + $0x12c] sm:$0xf] }
 0x26e   : > { %v2675_v43 = vpop.f32.mrf.mxu2  ;;  %v7652_v21 = vor.u32 %v9043_v32, %v7651_v30  ;;  %v8995_v19 = vld [vmem:[%s9999_s20 + $0x334] sm:$0xf0]  ;;  %v7224_v30 = vor.u32 %v8929_v22, %v7221_v23  ;;  %v9013_v23 = vld [vmem:[%s9999_s20 + $0x3cc] sm:$0xf] }
 0x26f   : > { %v10212_v42 = vpop.f32.mrf.mxu1  ;;  %v7603_v43 = vld [vmem:[%s9999_s20 + $0x428] sm:$0xf]  ;;  %v7460_v27 = vor.u32 %v8995_v19, %v7459_v16  ;;  %v9259_v22 = vld [vmem:[%s9999_s20 + $0xb74] sm:$0xf0] }
 0x270   : > { %5187 = vmatpush.bf16.msrb.mxu0 %v7364_v48  ;;  %v9192_v48 = vld [vmem:[%s9999_s20 + $0x964] sm:$0xf]  ;;  %v9211_v13 = vld [vmem:[%s9999_s20 + $0x9f4] sm:$0xf0] }
 0x271   : > { %v8272_v36 = vor.u32 %v9192_v48, %v8269_v33  ;;  %v9127_v48 = vld [vmem:[%s9999_s20 + $0x754] sm:$0xf0]  ;;  %v8917_v33 = vld [vmem:[%s9999_s20 + $0xcc] sm:$0xf] }
 0x273   : > { %5179 = vmatpush.bf16.msra.mxu3 %v8272_v36  ;;  %v7749_v36 = vld [vmem:[%s9999_s20 + $0x578] sm:$0xf0] }
 0x274   : > { %5188 = vmatpush.bf16.msrb.mxu0 %v7316_v44  ;;  %v2634_v50 = vpop.f32.mrf.mxu3  ;;  %v9031_v44 = vld [vmem:[%s9999_s20 + $0x454] sm:$0xf0] }
 0x275   : > { %v2635_v56 = vadd.f32 %v2634_v50, %v2622_v59  ;;  %v8965_v59 = vld [vmem:[%s9999_s20 + $0x24c] sm:$0xf]  ;;  %v7365_v50 = vld [vmem:[%s9999_s20 + $0x278] sm:$0xf0]  ;;  %v7604_v57 = vor.u32 %v9031_v44, %v7603_v43  ;;  %v7752_v43 = vor.u32 %v9061_v35, %v7749_v36  ;;  %v9115_v44 = vld [vmem:[%s9999_s20 + $0x6f4] sm:$0xf0] }
 0x276   : > { %v7368_v62 = vor.u32 %v8965_v59, %v7365_v50  ;;  %v7891_v59 = vld [vmem:[%s9999_s20 + $0x668] sm:$0xf]  ;;  %v9103_v50 = vld [vmem:[%s9999_s20 + $0x694] sm:$0xf0] }
 0x277   : > { %v2743_v3 = vmax.f32 %v2635_v56, 0.0  ;;  %v2714_v38 = vpop.f32.mrf.mxu1  ;;  %v8180_v56 = vor.u32 %v9175_v11, %v8179_v47  ;;  %v7701_v47 = vld [vmem:[%s9999_s20 + $0x518] sm:$0xf0]  ;;  %v8467_v35 = vld [vmem:[%s9999_s20 + $0xae8] sm:$0xf] }
 0x278   : > { %5189 = vmatpush.bf16.msrb.mxu0 %v7268_v52  ;;  %v8224_v52 = vor.u32 %v9180_v49, %v8221_v18  ;;  %v8953_v38 = vld [vmem:[%s9999_s20 + $0x1ec] sm:$0xf]  ;;  %v9247_v36 = vld [vmem:[%s9999_s20 + $0xb14] sm:$0xf0] }
 0x279   : > { %v10229_v37 = vpack.c.bf16 %v2743_v3, %v2743_v3  ;;  %v9163_v3 = vld [vmem:[%s9999_s20 + $0x874] sm:$0xf0] }
 0x27a   : > { %5180 = vmatpush.bf16.msra.mxu3 %v8224_v52  ;;  %v8132_v7 = vor.u32 %v9163_v3, %v8131_v1 }
 0x27b   : > { %5103 = vmatmul.bf16.vlgmr.msrb.gmra.mxu1 %v10229_v37  ;;  %5142 = vmatmul.bf16.vlgmr.msra.gmra.mxu0 %v10200_v24 }
 0x27c   : > { %5190 = vmatpush.bf16.msrb.mxu0 %v7220_v4  ;;  %5199 = vmatpush.bf16.msrb.mxu1 %v7796_v5  ;;  %v2636_v58 = vpop.f32.mrf.mxu3  ;;  %v7317_v4 = vld [vmem:[%s9999_s20 + $0x218] sm:$0xf0] }
 0x27d   : > { %v7320_v8 = vor.u32 %v8953_v38, %v7317_v4  ;;  %v8941_v58 = vld [vmem:[%s9999_s20 + $0x18c] sm:$0xf]  ;;  %v7843_v4 = vld [vmem:[%s9999_s20 + $0x608] sm:$0xf] }
 0x280   : > { %5191 = vmatpush.bf16.msrb.mxu0 %v7172_v14  ;;  %5200 = vmatpush.bf16.msrb.mxu1 %v7748_v51  ;;  %v7269_v14 = vld [vmem:[%s9999_s20 + $0x1b8] sm:$0xf0]  ;;  %v7508_v51 = vor.u32 %v9007_v10, %v7507_v9  ;;  %v9271_v9 = vld [vmem:[%s9999_s20 + $0xbd4] sm:$0xf0]  ;;  %v9025_v10 = vld [vmem:[%s9999_s20 + $0x42c] sm:$0xf] }
 0x281   : > { %v7272_v61 = vor.u32 %v8941_v58, %v7269_v14  ;;  %v7371_v14 = vld [vmem:[%s9999_s20 + $0x250] sm:$0xf] }
 0x284   : > { %5192 = vmatpush.bf16.msrb.mxu0 %v7124_v25  ;;  %5201 = vmatpush.bf16.msrb.mxu1 %v7700_v26  ;;  %v2686_v40 = vpop.f32.mrf.mxu3  ;;  %v9073_v25 = vld [vmem:[%s9999_s20 + $0x5ac] sm:$0xf]  ;;  %v7797_v26 = vld [vmem:[%s9999_s20 + $0x5d8] sm:$0xf0] }
 0x285   : > { %v2687_v45 = vadd.f32 %v2686_v40, %v2674_v39  ;;  %v7800_v32 = vor.u32 %v9073_v25, %v7797_v26  ;;  %v1889_v39 = vperm.slane %v10163_v53, 3  ;;  %v7988_v40 = vor.u32 %v9127_v48, %v7987_v31  ;;  %v9049_v53 = vld [vmem:[%s9999_s20 + $0x4ec] sm:$0xf]  ;;  %v7557_v26 = vld [vmem:[%s9999_s20 + $0x3f8] sm:$0xf0] }
 0x286   : > { %v10256_v17 = vpop.f32.mrf.mxu2  ;;  %v8960_v31 = vld [vmem:[%s9999_s20 + $0x21c] sm:$0xf0]  ;;  %v8516_v48 = vor.u32 %v9259_v22, %v8515_v2  ;;  %v8324_v22 = vor.u32 %v9211_v13, %v8323_v12  ;;  %v7515_v13 = vld [vmem:[%s9999_s20 + $0x370] sm:$0xf] }
 0x287   : > { %v2744_v54 = vmax.f32 %v2687_v45, 0.0  ;;  %v8905_v45 = vld [vmem:[%s9999_s20 + $0x6c] sm:$0xf]  ;;  %v2700_v49 = vadd.f32 %v10178_v55, %v1889_v39  ;;  %v8984_v55 = vld [vmem:[%s9999_s20 + $0x2dc] sm:$0xf0] }
 0x288   : > { %5193 = vmatpush.bf16.msrb.mxu0 %v7076_v41  ;;  %5202 = vmatpush.bf16.msrb.mxu1 %v7652_v21  ;;  %v7176_v41 = vor.u32 %v8917_v33, %v7173_v34  ;;  %v7939_v21 = vld [vmem:[%s9999_s20 + $0x6c8] sm:$0xf]  ;;  %v7560_v33 = vor.u32 %v9013_v23, %v7557_v26  ;;  %v9001_v39 = vld [vmem:[%s9999_s20 + $0x36c] sm:$0xf]  ;;  %v9056_v2 = vld [vmem:[%s9999_s20 + $0x51c] sm:$0xf0] }
 0x289   : > { %v10264_v60 = vpack.c.bf16 %v2744_v54, %v2744_v54  ;;  %v7940_v18 = vor.u32 %v9115_v44, %v7939_v21  ;;  %v2713_v52 = vadd.f32 %v10212_v42, %v2700_v49  ;;  %v7704_v54 = vor.u32 %v9049_v53, %v7701_v47  ;;  %v9145_v21 = vld [vmem:[%s9999_s20 + $0x7ec] sm:$0xf]  ;;  %v7275_v44 = vld [vmem:[%s9999_s20 + $0x190] sm:$0xf]  ;;  %v8419_v53 = vld [vmem:[%s9999_s20 + $0xa88] sm:$0xf] }
 0x28a   : > { %v7892_v42 = vor.u32 %v9103_v50, %v7891_v59  ;;  %v7461_v59 = vld [vmem:[%s9999_s20 + $0x338] sm:$0xf0]  ;;  %v9199_v26 = vld [vmem:[%s9999_s20 + $0x994] sm:$0xf0] }
 0x28b   : > { %5116 = vmatmul.bf16.vlgmr.msrb.gmra.mxu2 %v10264_v60  ;;  %5155 = vmatmul.bf16.vlgmr.msra.gmra.mxu1 %v10229_v37  ;;  %v2726_v1 = vadd.f32 %v10256_v17, %v2713_v52  ;;  %v7605_v17 = vld [vmem:[%s9999_s20 + $0x458] sm:$0xf0]  ;;  %v9133_v52 = vld [vmem:[%s9999_s20 + $0x78c] sm:$0xf] }
 0x28c   : > { %5238 = vmatpush.bf16.msra.mxu0 %v7416_v46  ;;  %5203 = vmatpush.bf16.msrb.mxu1 %v7604_v57  ;;  %v2688_v5 = vpop.f32.mrf.mxu3  ;;  %v7125_v46 = vld [vmem:[%s9999_s20 + $0x98] sm:$0xf0]  ;;  %v8893_v57 = vld [vmem:[%s9999_s20 + $0xc] sm:$0xf]  ;;  %v7608_v19 = vor.u32 %v9025_v10, %v7605_v17 }
 0x28d   : > { %5194 = vmatmul.bf16.vlgmr.msrb.gmra.mxu0 %v10200_v24  ;;  %5212 = vmatpush.bf16.msrb.mxu2 %v8180_v56  ;;  %v7128_v11 = vor.u32 %v8905_v45, %v7125_v46  ;;  %v7077_v56 = vld [vmem:[%s9999_s20 + $0x38] sm:$0xf0]  ;;  %v9091_v5 = vld [vmem:[%s9999_s20 + $0x634] sm:$0xf0]  ;;  %v8948_v45 = vld [vmem:[%s9999_s20 + $0x1bc] sm:$0xf0]  ;;  %v8468_v46 = vor.u32 %v9247_v36, %v8467_v35 }
 0x28e   : > { %v2727_v29 = vpop.f32.mrf.mxu2  ;;  %v7080_v38 = vor.u32 %v8893_v57, %v7077_v56  ;;  %v7276_v50 = vor.u32 %v8948_v45, %v7275_v44  ;;  %v7227_v57 = vld [vmem:[%s9999_s20 + $0x130] sm:$0xf]  ;;  %v8936_v56 = vld [vmem:[%s9999_s20 + $0x15c] sm:$0xf0]  ;;  %v8978_v36 = vld [vmem:[%s9999_s20 + $0x2b4] sm:$0xf] }
 0x290   : > { %5239 = vmatpush.bf16.msra.mxu0 %v7368_v62  ;;  %5204 = vmatpush.bf16.msrb.mxu1 %v7556_v6  ;;  %v9037_v62 = vld [vmem:[%s9999_s20 + $0x48c] sm:$0xf] }
 0x291   : > { %5213 = vmatpush.bf16.msrb.mxu2 %v8132_v7  ;;  %v7656_v29 = vor.u32 %v9037_v62, %v7653_v63  ;;  %v7420_v7 = vor.u32 %v8984_v55, %v7419_v0  ;;  %v7803_v62 = vld [vmem:[%s9999_s20 + $0x5b0] sm:$0xf]  ;;  %v9080_v63 = vld [vmem:[%s9999_s20 + $0x5dc] sm:$0xf0] }
 0x294   : > { %5240 = vmatpush.bf16.msra.mxu0 %v7320_v8  ;;  %5205 = vmatpush.bf16.msrb.mxu1 %v7508_v51  ;;  %v8563_v8 = vld [vmem:[%s9999_s20 + $0xba8] sm:$0xf]  ;;  %v8972_v51 = vld [vmem:[%s9999_s20 + $0x27c] sm:$0xf0] }
 0x295   : > { %5214 = vmatpush.bf16.msrb.mxu2 %v8084_v15  ;;  %v7844_v15 = vor.u32 %v9091_v5, %v7843_v4  ;;  %v7372_v25 = vor.u32 %v8972_v51, %v7371_v14  ;;  %v7804_v4 = vor.u32 %v9080_v63, %v7803_v62  ;;  %v9121_v5 = vld [vmem:[%s9999_s20 + $0x72c] sm:$0xf] }
 0x296   : > { %v9109_v51 = vld [vmem:[%s9999_s20 + $0x6cc] sm:$0xf] }
 0x298   : > { %5241 = vmatpush.bf16.msra.mxu0 %v7272_v61  ;;  %5206 = vmatpush.bf16.msrb.mxu1 %v7460_v27  ;;  %v8564_v61 = vor.u32 %v9271_v9, %v8563_v8  ;;  %v9157_v27 = vld [vmem:[%s9999_s20 + $0x84c] sm:$0xf]  ;;  %v7755_v8 = vld [vmem:[%s9999_s20 + $0x550] sm:$0xf]  ;;  %v9068_v9 = vld [vmem:[%s9999_s20 + $0x57c] sm:$0xf0] }
 0x299   : > { %5215 = vmatpush.bf16.msrb.mxu2 %v8036_v28  ;;  %v8133_v28 = vld [vmem:[%s9999_s20 + $0x878] sm:$0xf0]  ;;  %v7756_v14 = vor.u32 %v9068_v9, %v7755_v8  ;;  %v9241_v9 = vld [vmem:[%s9999_s20 + $0xaec] sm:$0xf] }
 0x29a   : > { %v8136_v34 = vor.u32 %v9157_v27, %v8133_v28 }
 0x29b   : > { %5168 = vmatmul.bf16.vlgmr.msra.gmra.mxu2 %v10264_v60  ;;  %5207 = vmatmul.bf16.vlgmr.msrb.gmra.mxu1 %v10229_v37 }
 0x29c   : > { %5242 = vmatpush.bf16.msra.mxu0 %v7224_v30  ;;  %5251 = vmatpush.bf16.msra.mxu1 %v7800_v32  ;;  %v7323_v30 = vld [vmem:[%s9999_s20 + $0x1f0] sm:$0xf] }
 0x29d   : > { %5216 = vmatpush.bf16.msrb.mxu2 %v7988_v40  ;;  %v7324_v40 = vor.u32 %v8960_v31, %v7323_v30  ;;  %v9097_v30 = vld [vmem:[%s9999_s20 + $0x66c] sm:$0xf]  ;;  %v7893_v31 = vld [vmem:[%s9999_s20 + $0x698] sm:$0xf0] }
 0x2a0   : > { %5243 = vmatpush.bf16.msra.mxu0 %v7176_v41  ;;  %5252 = vmatpush.bf16.msra.mxu1 %v7752_v43  ;;  %v7509_v41 = vld [vmem:[%s9999_s20 + $0x398] sm:$0xf0] }
 0x2a1   : > { %5217 = vmatpush.bf16.msrb.mxu2 %v7940_v18  ;;  %v8085_v43 = vld [vmem:[%s9999_s20 + $0x818] sm:$0xf0]  ;;  %v7512_v47 = vor.u32 %v9001_v39, %v7509_v41  ;;  %v9235_v18 = vld [vmem:[%s9999_s20 + $0xab4] sm:$0xf0]  ;;  %v7421_v39 = vld [vmem:[%s9999_s20 + $0x2e0] sm:$0xf0] }
 0x2a2   : > { %v8088_v49 = vor.u32 %v9145_v21, %v8085_v43  ;;  %v8420_v0 = vor.u32 %v9235_v18, %v8419_v53  ;;  %v8227_v41 = vld [vmem:[%s9999_s20 + $0x908] sm:$0xf]  ;;  %v9187_v21 = vld [vmem:[%s9999_s20 + $0x934] sm:$0xf0]  ;;  %v9085_v43 = vld [vmem:[%s9999_s20 + $0x60c] sm:$0xf] }
 0x2a3   : > { %v9265_v53 = vld [vmem:[%s9999_s20 + $0xbac] sm:$0xf]  ;;  %v7611_v18 = vld [vmem:[%s9999_s20 + $0x430] sm:$0xf] }
 0x2a4   : > { %v2738_v3 = vpop.f32.mrf.mxu3  ;;  %5244 = vmatpush.bf16.msra.mxu0 %v7128_v11  ;;  %5253 = vmatpush.bf16.msra.mxu1 %v7704_v54  ;;  %v8989_v11 = vld [vmem:[%s9999_s20 + $0x30c] sm:$0xf]  ;;  %v8037_v54 = vld [vmem:[%s9999_s20 + $0x7b8] sm:$0xf0] }
 0x2a5   : > { %v2739_v6 = vadd.f32 %v2738_v3, %v2726_v1  ;;  %5218 = vmatpush.bf16.msrb.mxu2 %v7892_v42  ;;  %v7464_v55 = vor.u32 %v8989_v11, %v7461_v59  ;;  %v8040_v1 = vor.u32 %v9133_v52, %v8037_v54  ;;  %v8371_v3 = vld [vmem:[%s9999_s20 + $0xa28] sm:$0xf]  ;;  %v9223_v42 = vld [vmem:[%s9999_s20 + $0xa54] sm:$0xf0]  ;;  %v9032_v11 = vld [vmem:[%s9999_s20 + $0x45c] sm:$0xf0] }
 0x2a6   : > { %v8372_v10 = vor.u32 %v9223_v42, %v8371_v3  ;;  %v8187_v59 = vld [vmem:[%s9999_s20 + $0x8b0] sm:$0xf]  ;;  %v9176_v52 = vld [vmem:[%s9999_s20 + $0x8dc] sm:$0xf0]  ;;  %v8966_v54 = vld [vmem:[%s9999_s20 + $0x254] sm:$0xf]  ;;  %v7612_v63 = vor.u32 %v9032_v11, %v7611_v18 }
 0x2a7   : > { %v2745_v58 = vmax.f32 %v2739_v6, 0.0  ;;  %v7989_v6 = vld [vmem:[%s9999_s20 + $0x758] sm:$0xf0]  ;;  %v7563_v42 = vld [vmem:[%s9999_s20 + $0x3d0] sm:$0xf] }
 0x2a8   : > { %5245 = vmatpush.bf16.msra.mxu0 %v7080_v38  ;;  %5254 = vmatpush.bf16.msra.mxu1 %v7656_v29  ;;  %v7228_v38 = vor.u32 %v8936_v56, %v7227_v57  ;;  %v7179_v29 = vld [vmem:[%s9999_s20 + $0xd0] sm:$0xf]  ;;  %v7992_v17 = vor.u32 %v9121_v5, %v7989_v6  ;;  %v7373_v57 = vld [vmem:[%s9999_s20 + $0x280] sm:$0xf0]  ;;  %v9164_v5 = vld [vmem:[%s9999_s20 + $0x87c] sm:$0xf0] }
 0x2a9   : > { %v10325_v16 = vpack.c.bf16 %v2745_v58, %v2745_v58  ;;  %5219 = vmatpush.bf16.msrb.mxu2 %v7844_v15  ;;  %v7941_v15 = vld [vmem:[%s9999_s20 + $0x6f8] sm:$0xf0]  ;;  %v7376_v3 = vor.u32 %v8966_v54, %v7373_v57  ;;  %v8954_v6 = vld [vmem:[%s9999_s20 + $0x1f4] sm:$0xf]  ;;  %v9205_v18 = vld [vmem:[%s9999_s20 + $0x9cc] sm:$0xf] }
 0x2aa   : > { %v7944_v23 = vor.u32 %v9109_v51, %v7941_v15  ;;  %v9152_v51 = vld [vmem:[%s9999_s20 + $0x81c] sm:$0xf0]  ;;  %v8942_v15 = vld [vmem:[%s9999_s20 + $0x194] sm:$0xf]  ;;  %v8325_v11 = vld [vmem:[%s9999_s20 + $0x9f8] sm:$0xf0] }
 0x2ab   : > { %5129 = vmatmul.bf16.vlgmr.msrb.gmra.mxu3 %v10325_v16  ;;  %5246 = vmatmul.bf16.vlgmr.msra.gmra.mxu0 %v10200_v24  ;;  %v9116_v57 = vld [vmem:[%s9999_s20 + $0x6fc] sm:$0xf0] }
 0x2ac   : > { %5290 = vmatpush.bf16.msrb.mxu0 %v7420_v7  ;;  %5225 = vmatpush.bf16.msrb.mxu3 %v8564_v61  ;;  %v2740_v32 = vpop.f32.mrf.mxu3  ;;  %v8924_v7 = vld [vmem:[%s9999_s20 + $0xfc] sm:$0xf0]  ;;  %v7131_v61 = vld [vmem:[%s9999_s20 + $0x70] sm:$0xf] }
 0x2ad   : > { %5255 = vmatpush.bf16.msra.mxu1 %v7608_v19  ;;  %5264 = vmatpush.bf16.msra.mxu2 %v8184_v20  ;;  %v7180_v58 = vor.u32 %v8924_v7, %v7179_v29  ;;  %v8912_v19 = vld [vmem:[%s9999_s20 + $0x9c] sm:$0xf0]  ;;  %v7707_v20 = vld [vmem:[%s9999_s20 + $0x4f0] sm:$0xf]  ;;  %v7325_v29 = vld [vmem:[%s9999_s20 + $0x220] sm:$0xf0] }
 0x2ae   : > { %5220 = vmatmul.bf16.vlgmr.msrb.gmra.mxu2 %v10264_v60  ;;  %v7132_v27 = vor.u32 %v8912_v19, %v7131_v61  ;;  %v7708_v28 = vor.u32 %v9056_v2, %v7707_v20  ;;  %v7083_v32 = vld [vmem:[%s9999_s20 + $0x10] sm:$0xf]  ;;  %v7328_v12 = vor.u32 %v8954_v6, %v7325_v29  ;;  %v7277_v61 = vld [vmem:[%s9999_s20 + $0x1c0] sm:$0xf0]  ;;  %v9229_v2 = vld [vmem:[%s9999_s20 + $0xa8c] sm:$0xf] }
 0x2af   : > { %v8894_v29 = vld [vmem:[%s9999_s20 + $0x14] sm:$0xf] }
 0x2b0   : > { %5291 = vmatpush.bf16.msrb.mxu0 %v7372_v25  ;;  %5226 = vmatpush.bf16.msrb.mxu3 %v8516_v48  ;;  %v8275_v25 = vld [vmem:[%s9999_s20 + $0x968] sm:$0xf]  ;;  %v8900_v48 = vld [vmem:[%s9999_s20 + $0x3c] sm:$0xf0] }
 0x2b1   : > { %5256 = vmatpush.bf16.msra.mxu1 %v7560_v33  ;;  %5265 = vmatpush.bf16.msra.mxu2 %v8136_v34  ;;  %v7659_v33 = vld [vmem:[%s9999_s20 + $0x490] sm:$0xf]  ;;  %v9044_v34 = vld [vmem:[%s9999_s20 + $0x4bc] sm:$0xf0]  ;;  %v8276_v35 = vor.u32 %v9199_v26, %v8275_v25  ;;  %v7084_v44 = vor.u32 %v8900_v48, %v7083_v32  ;;  %v7280_v25 = vor.u32 %v8942_v15, %v7277_v61  ;;  %v7229_v32 = vld [vmem:[%s9999_s20 + $0x160] sm:$0xf0] }
 0x2b2   : > { %v7660_v45 = vor.u32 %v9044_v34, %v7659_v33  ;;  %v7467_v26 = vld [vmem:[%s9999_s20 + $0x310] sm:$0xf]  ;;  %v9074_v33 = vld [vmem:[%s9999_s20 + $0x5b4] sm:$0xf]  ;;  %v7805_v34 = vld [vmem:[%s9999_s20 + $0x5e0] sm:$0xf0] }
 0x2b3   : > { %v8571_v15 = vld [vmem:[%s9999_s20 + $0xbb0] sm:$0xf]  ;;  %v9272_v61 = vld [vmem:[%s9999_s20 + $0xbdc] sm:$0xf0] }
 0x2b4   : > { %5292 = vmatpush.bf16.msrb.mxu0 %v7324_v40  ;;  %5227 = vmatpush.bf16.msrb.mxu3 %v8468_v46  ;;  %v7896_v40 = vor.u32 %v9097_v30, %v7893_v31  ;;  %v7845_v46 = vld [vmem:[%s9999_s20 + $0x638] sm:$0xf0]  ;;  %v9140_v30 = vld [vmem:[%s9999_s20 + $0x7bc] sm:$0xf0]  ;;  %v8930_v31 = vld [vmem:[%s9999_s20 + $0x134] sm:$0xf] }
 0x2b5   : > { %5257 = vmatpush.bf16.msra.mxu1 %v7512_v47  ;;  %5266 = vmatpush.bf16.msra.mxu2 %v8088_v49  ;;  %v8565_v47 = vld [vmem:[%s9999_s20 + $0xbd8] sm:$0xf0]  ;;  %v7424_v49 = vor.u32 %v8978_v36, %v7421_v39  ;;  %v7848_v56 = vor.u32 %v9085_v43, %v7845_v46  ;;  %v9217_v36 = vld [vmem:[%s9999_s20 + $0xa2c] sm:$0xf]  ;;  %v7808_v43 = vor.u32 %v9074_v33, %v7805_v34  ;;  %v7181_v46 = vld [vmem:[%s9999_s20 + $0x100] sm:$0xf0] }
 0x2b6   : > { %v8568_v62 = vor.u32 %v9265_v53, %v8565_v47  ;;  %v8373_v39 = vld [vmem:[%s9999_s20 + $0xa58] sm:$0xf0]  ;;  %v9062_v47 = vld [vmem:[%s9999_s20 + $0x554] sm:$0xf]  ;;  %v8523_v33 = vld [vmem:[%s9999_s20 + $0xb50] sm:$0xf] }
 0x2b7   : > { %v8376_v53 = vor.u32 %v9217_v36, %v8373_v39  ;;  %v9260_v34 = vld [vmem:[%s9999_s20 + $0xb7c] sm:$0xf0]  ;;  %v9014_v39 = vld [vmem:[%s9999_s20 + $0x3d4] sm:$0xf] }
 0x2b8   : > { %5293 = vmatpush.bf16.msrb.mxu0 %v7276_v50  ;;  %5228 = vmatpush.bf16.msrb.mxu3 %v8420_v0  ;;  %v8228_v50 = vor.u32 %v9187_v21, %v8227_v41  ;;  %v9253_v0 = vld [vmem:[%s9999_s20 + $0xb4c] sm:$0xf]  ;;  %v7232_v41 = vor.u32 %v8930_v31, %v7229_v32  ;;  %v7995_v21 = vld [vmem:[%s9999_s20 + $0x730] sm:$0xf]  ;;  %v7379_v31 = vld [vmem:[%s9999_s20 + $0x258] sm:$0xf] }
 0x2b9   : > { %5258 = vmatpush.bf16.msra.mxu1 %v7464_v55  ;;  %5267 = vmatpush.bf16.msra.mxu2 %v8040_v1  ;;  %v8517_v55 = vld [vmem:[%s9999_s20 + $0xb78] sm:$0xf0]  ;;  %v8188_v1 = vor.u32 %v9176_v52, %v8187_v59  ;;  %v7947_v52 = vld [vmem:[%s9999_s20 + $0x6d0] sm:$0xf]  ;;  %v8973_v32 = vld [vmem:[%s9999_s20 + $0x284] sm:$0xf0] }
 0x2ba   : > { %v8520_v7 = vor.u32 %v9253_v0, %v8517_v55  ;;  %v9050_v0 = vld [vmem:[%s9999_s20 + $0x4f4] sm:$0xf]  ;;  %v7709_v55 = vld [vmem:[%s9999_s20 + $0x520] sm:$0xf0] }
 0x2bb   : > { %5181 = vmatmul.bf16.vlgmr.msra.gmra.mxu3 %v10325_v16  ;;  %v7712_v6 = vor.u32 %v9050_v0, %v7709_v55  ;;  %v8427_v0 = vld [vmem:[%s9999_s20 + $0xa90] sm:$0xf]  ;;  %v9236_v55 = vld [vmem:[%s9999_s20 + $0xabc] sm:$0xf0] }
 0x2bc   : > { %5294 = vmatpush.bf16.msrb.mxu0 %v7228_v38  ;;  %5229 = vmatpush.bf16.msrb.mxu3 %v8372_v10  ;;  %v9020_v38 = vld [vmem:[%s9999_s20 + $0x3fc] sm:$0xf0]  ;;  %v8469_v10 = vld [vmem:[%s9999_s20 + $0xb18] sm:$0xf0] }
 0x2bd   : > { %5303 = vmatpush.bf16.msrb.mxu1 %v7804_v4  ;;  %5268 = vmatpush.bf16.msra.mxu2 %v7992_v17  ;;  %v8139_v4 = vld [vmem:[%s9999_s20 + $0x850] sm:$0xf]  ;;  %v7564_v8 = vor.u32 %v9020_v38, %v7563_v42  ;;  %v8472_v19 = vor.u32 %v9241_v9, %v8469_v10  ;;  %v7948_v42 = vor.u32 %v9116_v57, %v7947_v52  ;;  %v7661_v10 = vld [vmem:[%s9999_s20 + $0x4c0] sm:$0xf0]  ;;  %v9146_v52 = vld [vmem:[%s9999_s20 + $0x7f4] sm:$0xf] }
 0x2be   : > { %5259 = vmatmul.bf16.vlgmr.msra.gmra.mxu1 %v10229_v37  ;;  %v8140_v17 = vor.u32 %v9164_v5, %v8139_v4  ;;  %v7899_v4 = vld [vmem:[%s9999_s20 + $0x670] sm:$0xf]  ;;  %v9104_v5 = vld [vmem:[%s9999_s20 + $0x69c] sm:$0xf0] }
 0x2c0   : > { %5295 = vmatpush.bf16.msrb.mxu0 %v7180_v58  ;;  %5230 = vmatpush.bf16.msrb.mxu3 %v8324_v22  ;;  %v9008_v58 = vld [vmem:[%s9999_s20 + $0x39c] sm:$0xf0]  ;;  %v8421_v22 = vld [vmem:[%s9999_s20 + $0xab8] sm:$0xf0] }
 0x2c1   : > { %5304 = vmatpush.bf16.msrb.mxu1 %v7756_v14  ;;  %5269 = vmatpush.bf16.msra.mxu2 %v7944_v23  ;;  %v8091_v14 = vld [vmem:[%s9999_s20 + $0x7f0] sm:$0xf]  ;;  %v7516_v20 = vor.u32 %v9008_v58, %v7515_v13  ;;  %v8424_v48 = vor.u32 %v9229_v2, %v8421_v22  ;;  %v9181_v13 = vld [vmem:[%s9999_s20 + $0x90c] sm:$0xf]  ;;  %v8229_v58 = vld [vmem:[%s9999_s20 + $0x938] sm:$0xf0] }
 0x2c2   : > { %v8092_v23 = vor.u32 %v9152_v51, %v8091_v14  ;;  %v7900_v14 = vor.u32 %v9104_v5, %v7899_v4  ;;  %v7851_v2 = vld [vmem:[%s9999_s20 + $0x610] sm:$0xf]  ;;  %v9092_v22 = vld [vmem:[%s9999_s20 + $0x63c] sm:$0xf0]  ;;  %v9134_v5 = vld [vmem:[%s9999_s20 + $0x794] sm:$0xf] }
 0x2c4   : > { %5296 = vmatpush.bf16.msrb.mxu0 %v7132_v27  ;;  %5231 = vmatpush.bf16.msrb.mxu3 %v8276_v35  ;;  %v8996_v27 = vld [vmem:[%s9999_s20 + $0x33c] sm:$0xf0] }
 0x2c5   : > { %5305 = vmatpush.bf16.msrb.mxu1 %v7708_v28  ;;  %5270 = vmatpush.bf16.msra.mxu2 %v7896_v40  ;;  %v8043_v28 = vld [vmem:[%s9999_s20 + $0x790] sm:$0xf]  ;;  %v7468_v35 = vor.u32 %v8996_v27, %v7467_v26  ;;  %v7613_v26 = vld [vmem:[%s9999_s20 + $0x460] sm:$0xf0]  ;;  %v9170_v27 = vld [vmem:[%s9999_s20 + $0x8b4] sm:$0xf] }
 0x2c6   : > { %v8044_v40 = vor.u32 %v9140_v30, %v8043_v28  ;;  %v8189_v28 = vld [vmem:[%s9999_s20 + $0x8e0] sm:$0xf0]  ;;  %v8572_v30 = vor.u32 %v9272_v61, %v8571_v15  ;;  %v9122_v15 = vld [vmem:[%s9999_s20 + $0x734] sm:$0xf] }
 0x2c7   : > { %v8192_v36 = vor.u32 %v9170_v27, %v8189_v28  ;;  %v7997_v61 = vld [vmem:[%s9999_s20 + $0x760] sm:$0xf0]  ;;  %v9212_v27 = vld [vmem:[%s9999_s20 + $0x9fc] sm:$0xf0] }
 0x2c8   : > { %5297 = vmatpush.bf16.msrb.mxu0 %v7084_v44  ;;  %5232 = vmatpush.bf16.msrb.mxu3 %v8228_v50  ;;  %v9128_v44 = vld [vmem:[%s9999_s20 + $0x75c] sm:$0xf0]  ;;  %v8000_v28 = vor.u32 %v9122_v15, %v7997_v61  ;;  %v7571_v15 = vld [vmem:[%s9999_s20 + $0x3d8] sm:$0xf] }
 0x2c9   : > { %5306 = vmatpush.bf16.msrb.mxu1 %v7660_v45  ;;  %5271 = vmatpush.bf16.msra.mxu2 %v7848_v56  ;;  %v8918_v45 = vld [vmem:[%s9999_s20 + $0xd4] sm:$0xf]  ;;  %v7996_v59 = vor.u32 %v9128_v44, %v7995_v21  ;;  %v8524_v44 = vor.u32 %v9260_v34, %v8523_v33  ;;  %v7139_v33 = vld [vmem:[%s9999_s20 + $0x78] sm:$0xf] }
 0x2ca   : > { %v7184_v50 = vor.u32 %v8918_v45, %v7181_v46  ;;  %v8906_v56 = vld [vmem:[%s9999_s20 + $0x74] sm:$0xf]  ;;  %v7331_v45 = vld [vmem:[%s9999_s20 + $0x1f8] sm:$0xf]  ;;  %v8961_v46 = vld [vmem:[%s9999_s20 + $0x224] sm:$0xf0] }
 0x2cb   : > { %5298 = vmatmul.bf16.vlgmr.msrb.gmra.mxu0 %v10200_v24  ;;  %5233 = vmatmul.bf16.vlgmr.msrb.gmra.mxu3 %v10325_v16  ;;  %v9158_v21 = vld [vmem:[%s9999_s20 + $0x854] sm:$0xf] }
 0x2cc   : > { %5342 = vmatpush.bf16.msra.mxu0 %v7424_v49  ;;  %5277 = vmatpush.bf16.msra.mxu3 %v8568_v62  ;;  %v7757_v49 = vld [vmem:[%s9999_s20 + $0x580] sm:$0xf0] }
 0x2cd   : > { %5307 = vmatpush.bf16.msrb.mxu1 %v7612_v63  ;;  %5316 = vmatpush.bf16.msrb.mxu2 %v8188_v1  ;;  %v7760_v54 = vor.u32 %v9062_v47, %v7757_v49  ;;  %v7133_v62 = vld [vmem:[%s9999_s20 + $0xa0] sm:$0xf0]  ;;  %v8328_v63 = vor.u32 %v9205_v18, %v8325_v11  ;;  %v9193_v1 = vld [vmem:[%s9999_s20 + $0x96c] sm:$0xf]  ;;  %v9248_v47 = vld [vmem:[%s9999_s20 + $0xb1c] sm:$0xf0] }
 0x2ce   : > { %5272 = vmatmul.bf16.vlgmr.msra.gmra.mxu2 %v10264_v60  ;;  %v7136_v38 = vor.u32 %v8906_v56, %v7133_v62  ;;  %v9002_v11 = vld [vmem:[%s9999_s20 + $0x374] sm:$0xf]  ;;  %v7283_v56 = vld [vmem:[%s9999_s20 + $0x198] sm:$0xf]  ;;  %v8949_v62 = vld [vmem:[%s9999_s20 + $0x1c4] sm:$0xf0] }
 0x2cf   : > { %v7284_v4 = vor.u32 %v8949_v62, %v7283_v56  ;;  %v9188_v56 = vld [vmem:[%s9999_s20 + $0x93c] sm:$0xf0] }
 0x2d0   : > { %5343 = vmatpush.bf16.msra.mxu0 %v7376_v3  ;;  %5278 = vmatpush.bf16.msra.mxu3 %v8520_v7  ;;  %v8277_v3 = vld [vmem:[%s9999_s20 + $0x998] sm:$0xf0]  ;;  %v7085_v7 = vld [vmem:[%s9999_s20 + $0x40] sm:$0xf0] }
 0x2d1   : > { %5308 = vmatpush.bf16.msrb.mxu1 %v7564_v8  ;;  %5317 = vmatpush.bf16.msrb.mxu2 %v8140_v17  ;;  %v9038_v8 = vld [vmem:[%s9999_s20 + $0x494] sm:$0xf]  ;;  %v8280_v9 = vor.u32 %v9193_v1, %v8277_v3  ;;  %v7427_v17 = vld [vmem:[%s9999_s20 + $0x2b8] sm:$0xf]  ;;  %v7088_v51 = vor.u32 %v8894_v29, %v7085_v7  ;;  %v8428_v7 = vor.u32 %v9236_v55, %v8427_v0  ;;  %v8573_v55 = vld [vmem:[%s9999_s20 + $0xbe0] sm:$0xf0] }
 0x2d2   : > { %v7235_v29 = vld [vmem:[%s9999_s20 + $0x138] sm:$0xf]  ;;  %v9266_v0 = vld [vmem:[%s9999_s20 + $0xbb4] sm:$0xf] }
 0x2d4   : > { %5344 = vmatpush.bf16.msra.mxu0 %v7328_v12  ;;  %5279 = vmatpush.bf16.msra.mxu3 %v8472_v19  ;;  %v8985_v12 = vld [vmem:[%s9999_s20 + $0x2e4] sm:$0xf0]  ;;  %v7664_v19 = vor.u32 %v9038_v8, %v7661_v10 }
 0x2d5   : > { %5309 = vmatpush.bf16.msrb.mxu1 %v7516_v20  ;;  %5318 = vmatpush.bf16.msrb.mxu2 %v8092_v23  ;;  %v7428_v20 = vor.u32 %v8985_v12, %v7427_v17  ;;  %v9026_v23 = vld [vmem:[%s9999_s20 + $0x434] sm:$0xf]  ;;  %v8937_v8 = vld [vmem:[%s9999_s20 + $0x164] sm:$0xf0]  ;;  %v8379_v17 = vld [vmem:[%s9999_s20 + $0xa30] sm:$0xf] }
 0x2d6   : > { %v9081_v10 = vld [vmem:[%s9999_s20 + $0x5e4] sm:$0xf0]  ;;  %v9224_v12 = vld [vmem:[%s9999_s20 + $0xa5c] sm:$0xf0] }
 0x2d8   : > { %5345 = vmatpush.bf16.msra.mxu0 %v7280_v25  ;;  %5280 = vmatpush.bf16.msra.mxu3 %v8424_v48  ;;  %v8232_v25 = vor.u32 %v9181_v13, %v8229_v58  ;;  %v7852_v48 = vor.u32 %v9092_v22, %v7851_v2  ;;  %v8925_v2 = vld [vmem:[%s9999_s20 + $0x104] sm:$0xf0]  ;;  %v7763_v22 = vld [vmem:[%s9999_s20 + $0x558] sm:$0xf] }
 0x2d9   : > { %5310 = vmatpush.bf16.msrb.mxu1 %v7468_v35  ;;  %5319 = vmatpush.bf16.msrb.mxu2 %v8044_v40  ;;  %v7616_v35 = vor.u32 %v9026_v23, %v7613_v26  ;;  %v7380_v40 = vor.u32 %v8973_v32, %v7379_v31  ;;  %v9069_v23 = vld [vmem:[%s9999_s20 + $0x584] sm:$0xf0]  ;;  %v8331_v26 = vld [vmem:[%s9999_s20 + $0x9d0] sm:$0xf]  ;;  %v9110_v32 = vld [vmem:[%s9999_s20 + $0x6d4] sm:$0xf] }
 0x2da   : > { %v7764_v31 = vor.u32 %v9069_v23, %v7763_v22  ;;  %v8332_v34 = vor.u32 %v9212_v27, %v8331_v26  ;;  %v8955_v26 = vld [vmem:[%s9999_s20 + $0x1fc] sm:$0xf]  ;;  %v7333_v27 = vld [vmem:[%s9999_s20 + $0x228] sm:$0xf0] }
 0x2dc   : > { %5346 = vmatpush.bf16.msra.mxu0 %v7232_v41  ;;  %5281 = vmatpush.bf16.msra.mxu3 %v8376_v53  ;;  %v7565_v41 = vld [vmem:[%s9999_s20 + $0x400] sm:$0xf0]  ;;  %v8475_v53 = vld [vmem:[%s9999_s20 + $0xaf0] sm:$0xf] }
 0x2dd   : > { %5355 = vmatpush.bf16.msra.mxu1 %v7808_v43  ;;  %5320 = vmatpush.bf16.msrb.mxu2 %v7996_v59  ;;  %v8141_v43 = vld [vmem:[%s9999_s20 + $0x880] sm:$0xf0]  ;;  %v7568_v49 = vor.u32 %v9014_v39, %v7565_v41  ;;  %v7332_v59 = vor.u32 %v8961_v46, %v7331_v45  ;;  %v8476_v57 = vor.u32 %v9248_v47, %v8475_v53  ;;  %v9057_v39 = vld [vmem:[%s9999_s20 + $0x524] sm:$0xf0]  ;;  %v9200_v41 = vld [vmem:[%s9999_s20 + $0x99c] sm:$0xf0] }
 0x2de   : > { %5311 = vmatmul.bf16.vlgmr.msrb.gmra.mxu1 %v10229_v37  ;;  %v8144_v18 = vor.u32 %v9158_v21, %v8141_v43  ;;  %v9098_v43 = vld [vmem:[%s9999_s20 + $0x674] sm:$0xf]  ;;  %v7901_v46 = vld [vmem:[%s9999_s20 + $0x6a0] sm:$0xf0]  ;;  %v7091_v53 = vld [vmem:[%s9999_s20 + $0x18] sm:$0xf] }
 0x2df   : > { %v8901_v47 = vld [vmem:[%s9999_s20 + $0x44] sm:$0xf0]  ;;  %v7904_v62 = vor.u32 %v9098_v43, %v7901_v46  ;;  %v8429_v43 = vld [vmem:[%s9999_s20 + $0xac0] sm:$0xf0]  ;;  %v7475_v46 = vld [vmem:[%s9999_s20 + $0x318] sm:$0xf] }
 0x2e0   : > { %5347 = vmatpush.bf16.msra.mxu0 %v7184_v50  ;;  %5282 = vmatpush.bf16.msra.mxu3 %v8328_v63  ;;  %v7517_v50 = vld [vmem:[%s9999_s20 + $0x3a0] sm:$0xf0] }
 0x2e1   : > { %5356 = vmatpush.bf16.msra.mxu1 %v7760_v54  ;;  %5321 = vmatpush.bf16.msrb.mxu2 %v7948_v42  ;;  %v8093_v54 = vld [vmem:[%s9999_s20 + $0x820] sm:$0xf0]  ;;  %v7520_v1 = vor.u32 %v9002_v11, %v7517_v50  ;;  %v8990_v42 = vld [vmem:[%s9999_s20 + $0x314] sm:$0xf]  ;;  %v9045_v11 = vld [vmem:[%s9999_s20 + $0x4c4] sm:$0xf0] }
 0x2e2   : > { %v8096_v3 = vor.u32 %v9146_v52, %v8093_v54  ;;  %v7429_v54 = vld [vmem:[%s9999_s20 + $0x2e8] sm:$0xf0] }
 0x2e4   : > { %5348 = vmatpush.bf16.msra.mxu0 %v7136_v38  ;;  %5283 = vmatpush.bf16.msra.mxu3 %v8280_v9  ;;  %v7469_v38 = vld [vmem:[%s9999_s20 + $0x340] sm:$0xf0]  ;;  %v7811_v9 = vld [vmem:[%s9999_s20 + $0x5b8] sm:$0xf] }
 0x2e5   : > { %5357 = vmatpush.bf16.msra.mxu1 %v7712_v6  ;;  %5322 = vmatpush.bf16.msrb.mxu2 %v7900_v14  ;;  %v8045_v6 = vld [vmem:[%s9999_s20 + $0x7c0] sm:$0xf0]  ;;  %v7472_v13 = vor.u32 %v8990_v42, %v7469_v38  ;;  %v7236_v14 = vor.u32 %v8937_v8, %v7235_v29  ;;  %v9086_v42 = vld [vmem:[%s9999_s20 + $0x614] sm:$0xf]  ;;  %v9033_v29 = vld [vmem:[%s9999_s20 + $0x464] sm:$0xf0] }
 0x2e6   : > { %v8048_v58 = vor.u32 %v9134_v5, %v8045_v6  ;;  %v7853_v38 = vld [vmem:[%s9999_s20 + $0x640] sm:$0xf0]  ;;  %v9177_v8 = vld [vmem:[%s9999_s20 + $0x8e4] sm:$0xf0] }
 0x2e8   : > { %5349 = vmatpush.bf16.msra.mxu0 %v7088_v51  ;;  %5284 = vmatpush.bf16.msra.mxu3 %v8232_v25  ;;  %v10483_v63 = vpop.f32.mrf.mxu0  ;;  %v7812_v51 = vor.u32 %v9081_v10, %v7811_v9  ;;  %v8576_v9 = vor.u32 %v9266_v0, %v8573_v55  ;;  %v8967_v10 = vld [vmem:[%s9999_s20 + $0x25c] sm:$0xf]  ;;  %v9218_v55 = vld [vmem:[%s9999_s20 + $0xa34] sm:$0xf] }
 0x2e9   : > { %5358 = vmatpush.bf16.msra.mxu1 %v7664_v19  ;;  %5323 = vmatpush.bf16.msrb.mxu2 %v7852_v48  ;;  %v7187_v19 = vld [vmem:[%s9999_s20 + $0xd8] sm:$0xf]  ;;  %v7949_v48 = vld [vmem:[%s9999_s20 + $0x700] sm:$0xf0] }
 0x2ea   : > { %v7952_v21 = vor.u32 %v9110_v32, %v7949_v48  ;;  %v7523_v48 = vld [vmem:[%s9999_s20 + $0x378] sm:$0xf] }
 0x2eb   : > { %5350 = vmatmul.bf16.vlgmr.msra.gmra.mxu0 %v10200_v24  ;;  %5285 = vmatmul.bf16.vlgmr.msra.gmra.mxu3 %v10325_v16 }
 0x2ec   : > { %5394 = vmatpush.bf16.msrb.mxu0 %v7428_v20  ;;  %5329 = vmatpush.bf16.msrb.mxu3 %v8572_v30  ;;  %v8380_v20 = vor.u32 %v9224_v12, %v8379_v17  ;;  %v7188_v30 = vor.u32 %v8925_v2, %v7187_v19  ;;  %v7381_v17 = vld [vmem:[%s9999_s20 + $0x288] sm:$0xf0]  ;;  %v7856_v12 = vor.u32 %v9086_v42, %v7853_v38  ;;  %v9021_v19 = vld [vmem:[%s9999_s20 + $0x404] sm:$0xf0] }
 0x2ed   : > { %5359 = vmatpush.bf16.msra.mxu1 %v7616_v35  ;;  %5368 = vmatpush.bf16.msra.mxu2 %v8192_v36  ;;  %v8913_v35 = vld [vmem:[%s9999_s20 + $0xa4] sm:$0xf0]  ;;  %v7715_v36 = vld [vmem:[%s9999_s20 + $0x4f8] sm:$0xf]  ;;  %v7384_v61 = vor.u32 %v8967_v10, %v7381_v17  ;;  %v7765_v10 = vld [vmem:[%s9999_s20 + $0x588] sm:$0xf0] }
 0x2ee   : > { %5324 = vmatmul.bf16.vlgmr.msrb.gmra.mxu2 %v10264_v60  ;;  %v7716_v45 = vor.u32 %v9057_v39, %v7715_v36  ;;  %v9165_v2 = vld [vmem:[%s9999_s20 + $0x884] sm:$0xf0]  ;;  %v9206_v17 = vld [vmem:[%s9999_s20 + $0x9d4] sm:$0xf] }
 0x2ef   : > { %v9153_v36 = vld [vmem:[%s9999_s20 + $0x824] sm:$0xf0] }
 0x2f0   : > { %5395 = vmatpush.bf16.msrb.mxu0 %v7380_v40  ;;  %5330 = vmatpush.bf16.msrb.mxu3 %v8524_v44  ;;  %v5093_v25 = vpop.f32.mrf.mxu0  ;;  %v8283_v40 = vld [vmem:[%s9999_s20 + $0x970] sm:$0xf]  ;;  %v7140_v44 = vor.u32 %v8913_v35, %v7139_v33  ;;  %v7336_v33 = vor.u32 %v8955_v26, %v7333_v27  ;;  %v8099_v35 = vld [vmem:[%s9999_s20 + $0x7f8] sm:$0xf]  ;;  %v9194_v27 = vld [vmem:[%s9999_s20 + $0x974] sm:$0xf] }
 0x2f1   : > { %5360 = vmatpush.bf16.msra.mxu1 %v7568_v49  ;;  %5369 = vmatpush.bf16.msra.mxu2 %v8144_v18  ;;  %v8284_v49 = vor.u32 %v9200_v41, %v8283_v40  ;;  %v7667_v18 = vld [vmem:[%s9999_s20 + $0x498] sm:$0xf]  ;;  %v8943_v40 = vld [vmem:[%s9999_s20 + $0x19c] sm:$0xf]  ;;  %v7285_v41 = vld [vmem:[%s9999_s20 + $0x1c8] sm:$0xf0] }
 0x2f4   : > { %5396 = vmatpush.bf16.msrb.mxu0 %v7332_v59  ;;  %5331 = vmatpush.bf16.msrb.mxu3 %v8476_v57  ;;  %v8979_v59 = vld [vmem:[%s9999_s20 + $0x2bc] sm:$0xf]  ;;  %v8235_v57 = vld [vmem:[%s9999_s20 + $0x910] sm:$0xf] }
 0x2f5   : > { %5361 = vmatpush.bf16.msra.mxu1 %v7520_v1  ;;  %5370 = vmatpush.bf16.msra.mxu2 %v8096_v3  ;;  %v7092_v1 = vor.u32 %v8901_v47, %v7091_v53  ;;  %v7668_v3 = vor.u32 %v9045_v11, %v7667_v18  ;;  %v7432_v5 = vor.u32 %v8979_v59, %v7429_v54  ;;  %v8997_v53 = vld [vmem:[%s9999_s20 + $0x344] sm:$0xf0]  ;;  %v8931_v11 = vld [vmem:[%s9999_s20 + $0x13c] sm:$0xf] }
 0x2f6   : > { %v8236_v6 = vor.u32 %v9188_v56, %v8235_v57  ;;  %v7288_v47 = vor.u32 %v8943_v40, %v7285_v41  ;;  %v9141_v18 = vld [vmem:[%s9999_s20 + $0x7c4] sm:$0xf0]  ;;  %v7237_v57 = vld [vmem:[%s9999_s20 + $0x168] sm:$0xf0]  ;;  %v9075_v56 = vld [vmem:[%s9999_s20 + $0x5bc] sm:$0xf] }
 0x2f7   : > { %v7240_v38 = vor.u32 %v8931_v11, %v7237_v57  ;;  %v7669_v40 = vld [vmem:[%s9999_s20 + $0x4c8] sm:$0xf0]  ;;  %v7435_v41 = vld [vmem:[%s9999_s20 + $0x2c0] sm:$0xf]  ;;  %v7859_v11 = vld [vmem:[%s9999_s20 + $0x618] sm:$0xf] }
 0x2f8   : > { %5397 = vmatpush.bf16.msrb.mxu0 %v7284_v4  ;;  %5332 = vmatpush.bf16.msrb.mxu3 %v8428_v7  ;;  %v10521_v50 = vpop.f32.mrf.mxu1  ;;  %v10523_v52 = vpop.f32.mrf.mxu0  ;;  %v7619_v4 = vld [vmem:[%s9999_s20 + $0x438] sm:$0xf]  ;;  %v9027_v57 = vld [vmem:[%s9999_s20 + $0x43c] sm:$0xf] }
 0x2f9   : > { %5362 = vmatpush.bf16.msra.mxu1 %v7472_v13  ;;  %5371 = vmatpush.bf16.msra.mxu2 %v8048_v58  ;;  %v8195_v7 = vld [vmem:[%s9999_s20 + $0x8b8] sm:$0xf]  ;;  %v9254_v13 = vld [vmem:[%s9999_s20 + $0xb54] sm:$0xf]  ;;  %v8525_v58 = vld [vmem:[%s9999_s20 + $0xb80] sm:$0xf0] }
 0x2fa   : > { %v8528_v25 = vor.u32 %v9254_v13, %v8525_v58 }
 0x2fc   : > { %5398 = vmatpush.bf16.msrb.mxu0 %v7236_v14  ;;  %5333 = vmatpush.bf16.msrb.mxu3 %v8380_v20  ;;  %v7620_v14 = vor.u32 %v9033_v29, %v7619_v4  ;;  %v8147_v20 = vld [vmem:[%s9999_s20 + $0x858] sm:$0xf]  ;;  %v8919_v29 = vld [vmem:[%s9999_s20 + $0xdc] sm:$0xf] }
 0x2fd   : > { %5407 = vmatpush.bf16.msrb.mxu1 %v7812_v51  ;;  %5372 = vmatpush.bf16.msra.mxu2 %v8000_v28  ;;  %v8196_v51 = vor.u32 %v9177_v8, %v8195_v7  ;;  %v9242_v28 = vld [vmem:[%s9999_s20 + $0xaf4] sm:$0xf]  ;;  %v8148_v32 = vor.u32 %v9165_v2, %v8147_v20  ;;  %v7189_v8 = vld [vmem:[%s9999_s20 + $0x108] sm:$0xf0] }
 0x2fe   : > { %5363 = vmatmul.bf16.vlgmr.msra.gmra.mxu1 %v10229_v37 }
 0x300   : > { %5399 = vmatpush.bf16.msrb.mxu0 %v7188_v30  ;;  %5334 = vmatpush.bf16.msrb.mxu3 %v8332_v34  ;;  %v5106_v22 = vpop.f32.mrf.mxu1  ;;  %v5145_v23 = vpop.f32.mrf.mxu0  ;;  %v8477_v30 = vld [vmem:[%s9999_s20 + $0xb20] sm:$0xf0]  ;;  %v9009_v34 = vld [vmem:[%s9999_s20 + $0x3a4] sm:$0xf0] }
 0x301   : > { %5408 = vmatpush.bf16.msrb.mxu1 %v7764_v31  ;;  %5373 = vmatpush.bf16.msra.mxu2 %v7952_v21  ;;  %v7572_v31 = vor.u32 %v9021_v19, %v7571_v15  ;;  %v8480_v39 = vor.u32 %v9242_v28, %v8477_v30  ;;  %v9230_v21 = vld [vmem:[%s9999_s20 + $0xa94] sm:$0xf]  ;;  %v7955_v15 = vld [vmem:[%s9999_s20 + $0x6d8] sm:$0xf]  ;;  %v8907_v19 = vld [vmem:[%s9999_s20 + $0x7c] sm:$0xf] }
 0x302   : > { %v8432_v54 = vor.u32 %v9230_v21, %v8429_v43  ;;  %v7141_v22 = vld [vmem:[%s9999_s20 + $0xa8] sm:$0xf0]  ;;  %v9051_v23 = vld [vmem:[%s9999_s20 + $0x4fc] sm:$0xf]  ;;  %v8285_v28 = vld [vmem:[%s9999_s20 + $0x9a0] sm:$0xf0] }
 0x303   : > { %v8986_v21 = vld [vmem:[%s9999_s20 + $0x2ec] sm:$0xf0]  ;;  %v9182_v43 = vld [vmem:[%s9999_s20 + $0x914] sm:$0xf] }
 0x304   : > { %5400 = vmatpush.bf16.msrb.mxu0 %v7140_v44  ;;  %5335 = vmatpush.bf16.msrb.mxu3 %v8284_v49  ;;  %v7524_v44 = vor.u32 %v9009_v34, %v7523_v48  ;;  %v8051_v49 = vld [vmem:[%s9999_s20 + $0x798] sm:$0xf]  ;;  %v8895_v34 = vld [vmem:[%s9999_s20 + $0x1c] sm:$0xf] }
 0x305   : > { %5409 = vmatpush.bf16.msrb.mxu1 %v7716_v45  ;;  %5374 = vmatpush.bf16.msra.mxu2 %v7904_v62  ;;  %v8100_v45 = vor.u32 %v9153_v36, %v8099_v35  ;;  %v7813_v62 = vld [vmem:[%s9999_s20 + $0x5e8] sm:$0xf0]  ;;  %v8052_v42 = vor.u32 %v9141_v18, %v8051_v49  ;;  %v8288_v36 = vor.u32 %v9194_v27, %v8285_v28 }
 0x306   : > { %v7816_v4 = vor.u32 %v9075_v56, %v7813_v62  ;;  %v7093_v35 = vld [vmem:[%s9999_s20 + $0x48] sm:$0xf0]  ;;  %v7436_v62 = vor.u32 %v8986_v21, %v7435_v41  ;;  %v8991_v21 = vld [vmem:[%s9999_s20 + $0x31c] sm:$0xf] }
 0x307   : > { %v7096_v49 = vor.u32 %v8895_v34, %v7093_v35  ;;  %v8950_v34 = vld [vmem:[%s9999_s20 + $0x1cc] sm:$0xf0] }
 0x308   : > { %5401 = vmatpush.bf16.msrb.mxu0 %v7092_v1  ;;  %5336 = vmatpush.bf16.msrb.mxu3 %v8236_v6  ;;  %v10564_v59 = vpop.f32.mrf.mxu1  ;;  %v8381_v1 = vld [vmem:[%s9999_s20 + $0xa60] sm:$0xf0]  ;;  %v9129_v6 = vld [vmem:[%s9999_s20 + $0x764] sm:$0xf0] }
 0x309   : > { %5410 = vmatpush.bf16.msrb.mxu1 %v7668_v3  ;;  %5375 = vmatpush.bf16.msra.mxu2 %v7856_v12  ;;  %v7476_v3 = vor.u32 %v8997_v53, %v7475_v46  ;;  %v8384_v7 = vor.u32 %v9218_v55, %v8381_v1  ;;  %v8333_v12 = vld [vmem:[%s9999_s20 + $0xa00] sm:$0xf0]  ;;  %v8579_v53 = vld [vmem:[%s9999_s20 + $0xbb8] sm:$0xf]  ;;  %v7621_v1 = vld [vmem:[%s9999_s20 + $0x468] sm:$0xf0] }
 0x30a   : > { %v10569_v0 = vpop.f32.mrf.mxu0  ;;  %v8336_v2 = vor.u32 %v9206_v17, %v8333_v12  ;;  %v7573_v12 = vld [vmem:[%s9999_s20 + $0x408] sm:$0xf0] }
 0x30b   : > { %5402 = vmatmul.bf16.vlgmr.msrb.gmra.mxu0 %v10200_v24  ;;  %5337 = vmatmul.bf16.vlgmr.msrb.gmra.mxu3 %v10325_v16 }
 0x30c   : > { %5446 = vmatpush.bf16.msra.mxu0 %v7432_v5  ;;  %5381 = vmatpush.bf16.msra.mxu3 %v8576_v9  ;;  %v8003_v5 = vld [vmem:[%s9999_s20 + $0x738] sm:$0xf]  ;;  %v9063_v9 = vld [vmem:[%s9999_s20 + $0x55c] sm:$0xf] }
 0x30d   : > { %5411 = vmatpush.bf16.msrb.mxu1 %v7620_v14  ;;  %5420 = vmatpush.bf16.msrb.mxu2 %v8196_v51  ;;  %v8004_v58 = vor.u32 %v9129_v6, %v8003_v5  ;;  %v7192_v14 = vor.u32 %v8919_v29, %v7189_v8  ;;  %v7768_v51 = vor.u32 %v9063_v9, %v7765_v10  ;;  %v8974_v5 = vld [vmem:[%s9999_s20 + $0x28c] sm:$0xf0]  ;;  %v8531_v29 = vld [vmem:[%s9999_s20 + $0xb58] sm:$0xf]  ;;  %v9015_v10 = vld [vmem:[%s9999_s20 + $0x3dc] sm:$0xf] }
 0x30e   : > { %5376 = vmatmul.bf16.vlgmr.msra.gmra.mxu2 %v10264_v60  ;;  %v10581_v13 = vpop.f32.mrf.mxu2  ;;  %v7624_v8 = vor.u32 %v9027_v57, %v7621_v1  ;;  %v9225_v1 = vld [vmem:[%s9999_s20 + $0xa64] sm:$0xf0] }
 0x310   : > { %5447 = vmatpush.bf16.msra.mxu0 %v7384_v61  ;;  %5382 = vmatpush.bf16.msra.mxu3 %v8528_v25  ;;  %v9117_v61 = vld [vmem:[%s9999_s20 + $0x704] sm:$0xf0]  ;;  %v5158_v20 = vpop.f32.mrf.mxu1  ;;  %v7717_v25 = vld [vmem:[%s9999_s20 + $0x528] sm:$0xf0] }
 0x311   : > { %5412 = vmatpush.bf16.msrb.mxu1 %v7572_v31  ;;  %5421 = vmatpush.bf16.msrb.mxu2 %v8148_v32  ;;  %v7956_v30 = vor.u32 %v9117_v61, %v7955_v15  ;;  %v7907_v31 = vld [vmem:[%s9999_s20 + $0x678] sm:$0xf]  ;;  %v7144_v32 = vor.u32 %v8907_v19, %v7141_v22  ;;  %v7720_v48 = vor.u32 %v9051_v23, %v7717_v25  ;;  %v7339_v15 = vld [vmem:[%s9999_s20 + $0x200] sm:$0xf]  ;;  %v8962_v61 = vld [vmem:[%s9999_s20 + $0x22c] sm:$0xf0] }
 0x312   : > { %v5197_v26 = vpop.f32.mrf.mxu0  ;;  %v8483_v20 = vld [vmem:[%s9999_s20 + $0xaf8] sm:$0xf]  ;;  %v10633_v22 = vld [vmem:[%s10630_s30] sm:$0xff]  ;;  %v7576_v23 = vor.u32 %v9015_v10, %v7573_v12  ;;  %v7340_v28 = vor.u32 %v8962_v61, %v7339_v15 }
 0x313   : > { %v9003_v26 = vld [vmem:[%s9999_s20 + $0x37c] sm:$0xf]  ;;  %v3138_v35 = vperm.slane %v10633_v22, 0  ;;  %v9070_v10 = vld [vmem:[%s9999_s20 + $0x58c] sm:$0xf0] }
 0x314   : > { %5448 = vmatpush.bf16.msra.mxu0 %v7336_v33  ;;  %5383 = vmatpush.bf16.msra.mxu3 %v8480_v39  ;;  %v9105_v33 = vld [vmem:[%s9999_s20 + $0x6a4] sm:$0xf0]  ;;  %v9039_v39 = vld [vmem:[%s9999_s20 + $0x49c] sm:$0xf]  ;;  %v8339_v12 = vld [vmem:[%s9999_s20 + $0x9d8] sm:$0xf] }
 0x315   : > { %5413 = vmatpush.bf16.msrb.mxu1 %v7524_v44  ;;  %5422 = vmatpush.bf16.msrb.mxu2 %v8100_v45  ;;  %v8237_v44 = vld [vmem:[%s9999_s20 + $0x940] sm:$0xf0]  ;;  %v7908_v46 = vor.u32 %v9105_v33, %v7907_v31  ;;  %v7672_v18 = vor.u32 %v9039_v39, %v7669_v40  ;;  %v9147_v31 = vld [vmem:[%s9999_s20 + $0x7fc] sm:$0xf]  ;;  %v7291_v33 = vld [vmem:[%s9999_s20 + $0x1a0] sm:$0xf]  ;;  %v5092_v57 = vadd.f32 %v10483_v63, %v3138_v35 }
 0x316   : > { %v5119_v45 = vpop.f32.mrf.mxu2  ;;  %v8240_v55 = vor.u32 %v9182_v43, %v8237_v44  ;;  %v9237_v39 = vld [vmem:[%s9999_s20 + $0xac4] sm:$0xf0]  ;;  %v7477_v43 = vld [vmem:[%s9999_s20 + $0x348] sm:$0xf0]  ;;  %v7292_v44 = vor.u32 %v8950_v34, %v7291_v33  ;;  %v9099_v34 = vld [vmem:[%s9999_s20 + $0x67c] sm:$0xf] }
 0x317   : > { %v9135_v45 = vld [vmem:[%s9999_s20 + $0x79c] sm:$0xf]  ;;  %v8005_v63 = vld [vmem:[%s9999_s20 + $0x768] sm:$0xf0] }
 0x318   : > { %5449 = vmatpush.bf16.msra.mxu0 %v7288_v47  ;;  %5384 = vmatpush.bf16.msra.mxu3 %v8432_v54  ;;  %v9273_v47 = vld [vmem:[%s9999_s20 + $0xbe4] sm:$0xf0]  ;;  %v10608_v56 = vpop.f32.mrf.mxu1 }
 0x319   : > { %5414 = vmatpush.bf16.msrb.mxu1 %v7476_v3  ;;  %5423 = vmatpush.bf16.msrb.mxu2 %v8052_v42  ;;  %v9093_v54 = vld [vmem:[%s9999_s20 + $0x644] sm:$0xf0]  ;;  %v9171_v3 = vld [vmem:[%s9999_s20 + $0x8bc] sm:$0xf]  ;;  %v8197_v42 = vld [vmem:[%s9999_s20 + $0x8e8] sm:$0xf0] }
 0x31a   : > { %v7860_v6 = vor.u32 %v9093_v54, %v7859_v11  ;;  %v8200_v9 = vor.u32 %v9171_v3, %v8197_v42  ;;  %v7819_v11 = vld [vmem:[%s9999_s20 + $0x5c0] sm:$0xf]  ;;  %v9082_v54 = vld [vmem:[%s9999_s20 + $0x5ec] sm:$0xf0]  ;;  %v7480_v3 = vor.u32 %v8991_v21, %v7477_v43 }
 0x31b   : > { %v7675_v43 = vld [vmem:[%s9999_s20 + $0x4a0] sm:$0xf] }
 0x31c   : > { %5450 = vmatpush.bf16.msra.mxu0 %v7240_v38  ;;  %5385 = vmatpush.bf16.msra.mxu3 %v8384_v7  ;;  %v8580_v38 = vor.u32 %v9273_v47, %v8579_v53  ;;  %v9261_v7 = vld [vmem:[%s9999_s20 + $0xb84] sm:$0xf0]  ;;  %v7243_v53 = vld [vmem:[%s9999_s20 + $0x140] sm:$0xf] }
 0x31d   : > { %5459 = vmatpush.bf16.msra.mxu1 %v7816_v4  ;;  %5424 = vmatpush.bf16.msrb.mxu2 %v8004_v58  ;;  %v7387_v4 = vld [vmem:[%s9999_s20 + $0x260] sm:$0xf]  ;;  %v9159_v58 = vld [vmem:[%s9999_s20 + $0x85c] sm:$0xf] }
 0x31e   : > { %5415 = vmatmul.bf16.vlgmr.msrb.gmra.mxu1 %v10229_v37  ;;  %v7388_v17 = vor.u32 %v8974_v5, %v7387_v4  ;;  %v10624_v19 = vpop.f32.mrf.mxu2  ;;  %v7820_v5 = vor.u32 %v9082_v54, %v7819_v11  ;;  %v9267_v54 = vld [vmem:[%s9999_s20 + $0xbbc] sm:$0xf] }
 0x320   : > { %5451 = vmatpush.bf16.msra.mxu0 %v7192_v14  ;;  %5386 = vmatpush.bf16.msra.mxu3 %v8336_v2  ;;  %v8149_v14 = vld [vmem:[%s9999_s20 + $0x888] sm:$0xf0]  ;;  %v9249_v2 = vld [vmem:[%s9999_s20 + $0xb24] sm:$0xf0]  ;;  %v5210_v27 = vpop.f32.mrf.mxu1 }
 0x321   : > { %5460 = vmatpush.bf16.msra.mxu1 %v7768_v51  ;;  %5425 = vmatpush.bf16.msrb.mxu2 %v7956_v30  ;;  %v8532_v51 = vor.u32 %v9261_v7, %v8531_v29  ;;  %v8152_v25 = vor.u32 %v9159_v58, %v8149_v14  ;;  %v7525_v30 = vld [vmem:[%s9999_s20 + $0x3a8] sm:$0xf0]  ;;  %v7195_v29 = vld [vmem:[%s9999_s20 + $0xe0] sm:$0xf]  ;;  %v9213_v58 = vld [vmem:[%s9999_s20 + $0xa04] sm:$0xf0] }
 0x322   : > { %v7528_v40 = vor.u32 %v9003_v26, %v7525_v30  ;;  %v8914_v26 = vld [vmem:[%s9999_s20 + $0xac] sm:$0xf0]  ;;  %v7723_v27 = vld [vmem:[%s9999_s20 + $0x500] sm:$0xf]  ;;  %v8291_v30 = vld [vmem:[%s9999_s20 + $0x978] sm:$0xf] }
 0x324   : > { %5452 = vmatpush.bf16.msra.mxu0 %v7144_v32  ;;  %5387 = vmatpush.bf16.msra.mxu3 %v8288_v36  ;;  %v8101_v32 = vld [vmem:[%s9999_s20 + $0x828] sm:$0xf0]  ;;  %v8435_v36 = vld [vmem:[%s9999_s20 + $0xa98] sm:$0xf] }
 0x325   : > { %5461 = vmatpush.bf16.msra.mxu1 %v7720_v48  ;;  %5426 = vmatpush.bf16.msrb.mxu2 %v7908_v46  ;;  %v8484_v48 = vor.u32 %v9249_v2, %v8483_v20  ;;  %v8104_v41 = vor.u32 %v9147_v31, %v8101_v32  ;;  %v8053_v46 = vld [vmem:[%s9999_s20 + $0x7c8] sm:$0xf0]  ;;  %v9111_v20 = vld [vmem:[%s9999_s20 + $0x6dc] sm:$0xf]  ;;  %v9201_v31 = vld [vmem:[%s9999_s20 + $0x9a4] sm:$0xf0] }
 0x326   : > { %v8056_v42 = vor.u32 %v9135_v45, %v8053_v46  ;;  %v7957_v2 = vld [vmem:[%s9999_s20 + $0x708] sm:$0xf0]  ;;  %v3139_v32 = vperm.slane %v10633_v22, 1  ;;  %v8292_v21 = vor.u32 %v9201_v31, %v8291_v30  ;;  %v8980_v45 = vld [vmem:[%s9999_s20 + $0x2c4] sm:$0xf] }
 0x327   : > { %v7960_v33 = vor.u32 %v9111_v20, %v7957_v2  ;;  %v7437_v46 = vld [vmem:[%s9999_s20 + $0x2f0] sm:$0xf0]  ;;  %v9022_v20 = vld [vmem:[%s9999_s20 + $0x40c] sm:$0xf0]  ;;  %v8155_v2 = vld [vmem:[%s9999_s20 + $0x860] sm:$0xf] }
 0x328   : > { %5453 = vmatpush.bf16.msra.mxu0 %v7096_v49  ;;  %5388 = vmatpush.bf16.msra.mxu3 %v8240_v55  ;;  %v10651_v47 = vpop.f32.mrf.mxu0  ;;  %v8436_v49 = vor.u32 %v9237_v39, %v8435_v36  ;;  %v8387_v55 = vld [vmem:[%s9999_s20 + $0xa38] sm:$0xf]  ;;  %v7909_v39 = vld [vmem:[%s9999_s20 + $0x6a8] sm:$0xf0] }
 0x329   : > { %5462 = vmatpush.bf16.msra.mxu1 %v7672_v18  ;;  %5427 = vmatpush.bf16.msrb.mxu2 %v7860_v6  ;;  %v8938_v18 = vld [vmem:[%s9999_s20 + $0x16c] sm:$0xf0]  ;;  %v9123_v6 = vld [vmem:[%s9999_s20 + $0x73c] sm:$0xf]  ;;  %v8388_v7 = vor.u32 %v9225_v1, %v8387_v55  ;;  %v7912_v11 = vor.u32 %v9099_v34, %v7909_v39  ;;  %v8485_v30 = vld [vmem:[%s9999_s20 + $0xb28] sm:$0xf0] }
 0x32a   : > { %v7244_v4 = vor.u32 %v8938_v18, %v7243_v53  ;;  %v8008_v14 = vor.u32 %v9123_v6, %v8005_v63  ;;  %v8243_v53 = vld [vmem:[%s9999_s20 + $0x918] sm:$0xf]  ;;  %v9087_v1 = vld [vmem:[%s9999_s20 + $0x61c] sm:$0xf]  ;;  %v8203_v6 = vld [vmem:[%s9999_s20 + $0x8c0] sm:$0xf] }
 0x32b   : > { %5454 = vmatmul.bf16.vlgmr.msra.gmra.mxu0 %v10200_v24  ;;  %5389 = vmatmul.bf16.vlgmr.msra.gmra.mxu3 %v10325_v16  ;;  %v9178_v63 = vld [vmem:[%s9999_s20 + $0x8ec] sm:$0xf0] }
 0x32c   : > { %5498 = vmatpush.bf16.msrb.mxu0 %v7436_v62  ;;  %5433 = vmatpush.bf16.msrb.mxu3 %v8580_v38  ;;  %v5171_v62 = vpop.f32.mrf.mxu2  ;;  %v5105_v38 = vadd.f32 %v10521_v50, %v5092_v57  ;;  %v8581_v57 = vld [vmem:[%s9999_s20 + $0xbe8] sm:$0xf0]  ;;  %v9154_v39 = vld [vmem:[%s9999_s20 + $0x82c] sm:$0xf0] }
 0x32d   : > { %5463 = vmatpush.bf16.msra.mxu1 %v7624_v8  ;;  %5472 = vmatpush.bf16.msra.mxu2 %v8200_v9  ;;  %v8926_v8 = vld [vmem:[%s9999_s20 + $0x10c] sm:$0xf0]  ;;  %v7771_v9 = vld [vmem:[%s9999_s20 + $0x560] sm:$0xf] }
 0x32e   : > { %5428 = vmatmul.bf16.vlgmr.msrb.gmra.mxu2 %v10264_v60  ;;  %v5130_v50 = vpop.f32.mrf.mxu3  ;;  %v7196_v15 = vor.u32 %v8926_v8, %v7195_v29  ;;  %v7772_v61 = vor.u32 %v9070_v10, %v7771_v9  ;;  %v5144_v29 = vadd.f32 %v10523_v52, %v3139_v32  ;;  %v8584_v8 = vor.u32 %v9267_v54, %v8581_v57  ;;  %v8968_v9 = vld [vmem:[%s9999_s20 + $0x264] sm:$0xf]  ;;  %v7389_v10 = vld [vmem:[%s9999_s20 + $0x290] sm:$0xf0]  ;;  %v8059_v54 = vld [vmem:[%s9999_s20 + $0x7a0] sm:$0xf] }
 0x32f   : > { %v9142_v57 = vld [vmem:[%s9999_s20 + $0x7cc] sm:$0xf0] }
 0x330   : > { %5499 = vmatpush.bf16.msrb.mxu0 %v7388_v17  ;;  %5434 = vmatpush.bf16.msrb.mxu3 %v8532_v51  ;;  %v5118_v17 = vadd.f32 %v10581_v13, %v5105_v38  ;;  %v7147_v13 = vld [vmem:[%s9999_s20 + $0x80] sm:$0xf]  ;;  %v7440_v38 = vor.u32 %v8980_v45, %v7437_v46  ;;  %v8437_v45 = vld [vmem:[%s9999_s20 + $0xac8] sm:$0xf0] }
 0x331   : > { %5464 = vmatpush.bf16.msra.mxu1 %v7576_v23  ;;  %5473 = vmatpush.bf16.msra.mxu2 %v8152_v25  ;;  %v5249_v23 = vpop.f32.mrf.mxu0  ;;  %v8340_v25 = vor.u32 %v9213_v58, %v8339_v12  ;;  %v7148_v35 = vor.u32 %v8914_v26, %v7147_v13  ;;  %v9255_v58 = vld [vmem:[%s9999_s20 + $0xb5c] sm:$0xf]  ;;  %v9166_v13 = vld [vmem:[%s9999_s20 + $0x88c] sm:$0xf0]  ;;  %v7341_v26 = vld [vmem:[%s9999_s20 + $0x230] sm:$0xf0] }
 0x332   : > { %v5131_v51 = vadd.f32 %v5130_v50, %v5118_v17  ;;  %v8533_v50 = vld [vmem:[%s9999_s20 + $0xb88] sm:$0xf0]  ;;  %v8156_v32 = vor.u32 %v9166_v13, %v8155_v2 }
 0x334   : > { %5500 = vmatpush.bf16.msrb.mxu0 %v7340_v28  ;;  %5435 = vmatpush.bf16.msrb.mxu3 %v8484_v48  ;;  %v9058_v28 = vld [vmem:[%s9999_s20 + $0x52c] sm:$0xf0]  ;;  %5706 = vst [vmem:[%s10678_s27] sm:$0xff] %v5131_v51  ;;  %v10685_v48 = vpop.f32.mrf.mxu2  ;;  %v8204_v51 = vor.u32 %v9178_v63, %v8203_v6  ;;  %v8389_v6 = vld [vmem:[%s9999_s20 + $0xa68] sm:$0xf0] }
 0x335   : > { %5465 = vmatpush.bf16.msra.mxu1 %v7528_v40  ;;  %5474 = vmatpush.bf16.msra.mxu2 %v8104_v41  ;;  %v7724_v36 = vor.u32 %v9058_v28, %v7723_v27  ;;  %v7099_v40 = vld [vmem:[%s9999_s20 + $0x20] sm:$0xf]  ;;  %v8902_v41 = vld [vmem:[%s9999_s20 + $0x4c] sm:$0xf0]  ;;  %v9243_v28 = vld [vmem:[%s9999_s20 + $0xafc] sm:$0xf] }
 0x336   : > { %v5132_v18 = vpop.f32.mrf.mxu3  ;;  %v7100_v62 = vor.u32 %v8902_v41, %v7099_v40  ;;  %v8488_v41 = vor.u32 %v9243_v28, %v8485_v30  ;;  %v7149_v28 = vld [vmem:[%s9999_s20 + $0xb0] sm:$0xf0]  ;;  %v9052_v30 = vld [vmem:[%s9999_s20 + $0x504] sm:$0xf] }
 0x337   : > { %v8998_v18 = vld [vmem:[%s9999_s20 + $0x34c] sm:$0xf0] }
 0x338   : > { %5501 = vmatpush.bf16.msrb.mxu0 %v7292_v44  ;;  %5436 = vmatpush.bf16.msrb.mxu3 %v8436_v49  ;;  %v9046_v44 = vld [vmem:[%s9999_s20 + $0x4cc] sm:$0xf0]  ;;  %v9189_v49 = vld [vmem:[%s9999_s20 + $0x944] sm:$0xf0] }
 0x339   : > { %5466 = vmatpush.bf16.msra.mxu1 %v7480_v3  ;;  %5475 = vmatpush.bf16.msra.mxu2 %v8056_v42  ;;  %v7676_v55 = vor.u32 %v9046_v44, %v7675_v43  ;;  %v7861_v3 = vld [vmem:[%s9999_s20 + $0x648] sm:$0xf0]  ;;  %v7627_v42 = vld [vmem:[%s9999_s20 + $0x440] sm:$0xf]  ;;  %v7293_v43 = vld [vmem:[%s9999_s20 + $0x1d0] sm:$0xf0] }
 0x33a   : > { %v7864_v12 = vor.u32 %v9087_v1, %v7861_v3  ;;  %v9231_v44 = vld [vmem:[%s9999_s20 + $0xa9c] sm:$0xf]  ;;  %v7245_v1 = vld [vmem:[%s9999_s20 + $0x170] sm:$0xf0]  ;;  %v9076_v3 = vld [vmem:[%s9999_s20 + $0x5c4] sm:$0xf] }
 0x33c   : > { %5502 = vmatpush.bf16.msrb.mxu0 %v7244_v4  ;;  %5437 = vmatpush.bf16.msrb.mxu3 %v8388_v7  ;;  %v8244_v4 = vor.u32 %v9189_v49, %v8243_v53  ;;  %v10706_v7 = vpop.f32.mrf.mxu1  ;;  %v5223_v17 = vpop.f32.mrf.mxu2  ;;  %v7483_v49 = vld [vmem:[%s9999_s20 + $0x320] sm:$0xf] }
 0x33d   : > { %5511 = vmatpush.bf16.msrb.mxu1 %v7820_v5  ;;  %5476 = vmatpush.bf16.msra.mxu2 %v8008_v14  ;;  %v9034_v5 = vld [vmem:[%s9999_s20 + $0x46c] sm:$0xf0]  ;;  %v5157_v14 = vadd.f32 %v10564_v59, %v5144_v29  ;;  %v8956_v59 = vld [vmem:[%s9999_s20 + $0x204] sm:$0xf]  ;;  %v7484_v29 = vor.u32 %v8998_v18, %v7483_v49  ;;  %v8011_v17 = vld [vmem:[%s9999_s20 + $0x740] sm:$0xf] }
 0x33e   : > { %5467 = vmatmul.bf16.vlgmr.msra.gmra.mxu1 %v10229_v37  ;;  %v7628_v52 = vor.u32 %v9034_v5, %v7627_v42  ;;  %v5182_v27 = vpop.f32.mrf.mxu3  ;;  %v7344_v34 = vor.u32 %v8956_v59, %v7341_v26  ;;  %v7821_v42 = vld [vmem:[%s9999_s20 + $0x5f0] sm:$0xf0]  ;;  %v9219_v5 = vld [vmem:[%s9999_s20 + $0xa3c] sm:$0xf]  ;;  %v7963_v59 = vld [vmem:[%s9999_s20 + $0x6e0] sm:$0xf] }
 0x33f   : > { %v5170_v23 = vadd.f32 %v10624_v19, %v5157_v14  ;;  %v7197_v14 = vld [vmem:[%s9999_s20 + $0x110] sm:$0xf0]  ;;  %v9118_v26 = vld [vmem:[%s9999_s20 + $0x70c] sm:$0xf0]  ;;  %v7443_v49 = vld [vmem:[%s9999_s20 + $0x2c8] sm:$0xf] }
 0x340   : > { %5503 = vmatpush.bf16.msrb.mxu0 %v7196_v15  ;;  %5438 = vmatpush.bf16.msrb.mxu3 %v8340_v25  ;;  %v7579_v15 = vld [vmem:[%s9999_s20 + $0x3e0] sm:$0xf]  ;;  %v8536_v25 = vor.u32 %v9255_v58, %v8533_v50  ;;  %v8920_v58 = vld [vmem:[%s9999_s20 + $0xe4] sm:$0xf]  ;;  %v8392_v50 = vor.u32 %v9219_v5, %v8389_v6  ;;  %v8987_v18 = vld [vmem:[%s9999_s20 + $0x2f4] sm:$0xf0] }
 0x341   : > { %5512 = vmatpush.bf16.msrb.mxu1 %v7772_v61  ;;  %5477 = vmatpush.bf16.msra.mxu2 %v7960_v33  ;;  %v7392_v61 = vor.u32 %v8968_v9, %v7389_v10  ;;  %v5183_v31 = vadd.f32 %v5182_v27, %v5170_v23  ;;  %v7580_v19 = vor.u32 %v9022_v20, %v7579_v15  ;;  %v7531_v33 = vld [vmem:[%s9999_s20 + $0x380] sm:$0xf]  ;;  %v8341_v20 = vld [vmem:[%s9999_s20 + $0xa08] sm:$0xf0] }
 0x342   : > { %v7824_v10 = vor.u32 %v9076_v3, %v7821_v42  ;;  %v7200_v23 = vor.u32 %v8920_v58, %v7197_v14  ;;  %v7867_v42 = vld [vmem:[%s9999_s20 + $0x620] sm:$0xf]  ;;  %v7444_v5 = vor.u32 %v8987_v18, %v7443_v49  ;;  %v8975_v58 = vld [vmem:[%s9999_s20 + $0x294] sm:$0xf0]  ;;  %v9136_v18 = vld [vmem:[%s9999_s20 + $0x7a4] sm:$0xf] }
 0x343   : > { %5707 = vst [vmem:[%s10678_s27 + $0x8] sm:$0xff] %v5183_v31  ;;  %v7725_v31 = vld [vmem:[%s9999_s20 + $0x530] sm:$0xf0] }
 0x344   : > { %5504 = vmatpush.bf16.msrb.mxu0 %v7148_v35  ;;  %5439 = vmatpush.bf16.msrb.mxu3 %v8292_v21  ;;  %v9010_v35 = vld [vmem:[%s9999_s20 + $0x3ac] sm:$0xf0]  ;;  %v5262_v40 = vpop.f32.mrf.mxu1  ;;  %v8944_v21 = vld [vmem:[%s9999_s20 + $0x1a4] sm:$0xf] }
 0x345   : > { %5513 = vmatpush.bf16.msrb.mxu1 %v7724_v36  ;;  %5478 = vmatpush.bf16.msra.mxu2 %v7912_v11  ;;  %v8107_v36 = vld [vmem:[%s9999_s20 + $0x800] sm:$0xf]  ;;  %v7532_v46 = vor.u32 %v9010_v35, %v7531_v33  ;;  %v7296_v11 = vor.u32 %v8944_v21, %v7293_v43  ;;  %v7964_v35 = vor.u32 %v9118_v26, %v7963_v59  ;;  %v8896_v43 = vld [vmem:[%s9999_s20 + $0x24] sm:$0xf]  ;;  %v8157_v59 = vld [vmem:[%s9999_s20 + $0x890] sm:$0xf0] }
 0x346   : > { %v8108_v53 = vor.u32 %v9154_v39, %v8107_v36  ;;  %v7915_v36 = vld [vmem:[%s9999_s20 + $0x680] sm:$0xf]  ;;  %v9106_v39 = vld [vmem:[%s9999_s20 + $0x6ac] sm:$0xf0]  ;;  %v7728_v21 = vor.u32 %v9052_v30, %v7725_v31 }
 0x347   : > { %v9250_v30 = vld [vmem:[%s9999_s20 + $0xb2c] sm:$0xf0] }
 0x348   : > { %5505 = vmatpush.bf16.msrb.mxu0 %v7100_v62  ;;  %5440 = vmatpush.bf16.msrb.mxu3 %v8244_v4  ;;  %v8932_v62 = vld [vmem:[%s9999_s20 + $0x144] sm:$0xf]  ;;  %v5184_v4 = vpop.f32.mrf.mxu3  ;;  %v10745_v63 = vpop.f32.mrf.mxu0 }
 0x349   : > { %5514 = vmatpush.bf16.msrb.mxu1 %v7676_v55  ;;  %5479 = vmatpush.bf16.msra.mxu2 %v7864_v12  ;;  %v8440_v55 = vor.u32 %v9231_v44, %v8437_v45  ;;  %v7248_v9 = vor.u32 %v8932_v62, %v7245_v1  ;;  %v9130_v12 = vld [vmem:[%s9999_s20 + $0x76c] sm:$0xf0]  ;;  %v7101_v44 = vld [vmem:[%s9999_s20 + $0x50] sm:$0xf0]  ;;  %v9040_v45 = vld [vmem:[%s9999_s20 + $0x4a4] sm:$0xf] }
 0x34a   : > { %v8012_v2 = vor.u32 %v9130_v12, %v8011_v17  ;;  %v8587_v62 = vld [vmem:[%s9999_s20 + $0xbc0] sm:$0xf]  ;;  %v7104_v1 = vor.u32 %v8896_v43, %v7101_v44  ;;  %v9028_v4 = vld [vmem:[%s9999_s20 + $0x444] sm:$0xf]  ;;  %v7395_v12 = vld [vmem:[%s9999_s20 + $0x268] sm:$0xf] }
 0x34b   : > { %5506 = vmatmul.bf16.vlgmr.msrb.gmra.mxu0 %v10200_v24  ;;  %5441 = vmatmul.bf16.vlgmr.msrb.gmra.mxu3 %v10325_v16  ;;  %v9238_v43 = vld [vmem:[%s9999_s20 + $0xacc] sm:$0xf0] }
 0x34c   : > { %5550 = vmatpush.bf16.msra.mxu0 %v7440_v38  ;;  %5485 = vmatpush.bf16.msra.mxu3 %v8584_v8  ;;  %v3140_v38 = vperm.slane %v10633_v22, 2  ;;  %v8060_v8 = vor.u32 %v9142_v57, %v8059_v54  ;;  %v8245_v54 = vld [vmem:[%s9999_s20 + $0x948] sm:$0xf0]  ;;  %v7916_v57 = vor.u32 %v9106_v39, %v7915_v36 }
 0x34d   : > { %5515 = vmatpush.bf16.msrb.mxu1 %v7628_v52  ;;  %5524 = vmatpush.bf16.msrb.mxu2 %v8204_v51  ;;  %v9064_v52 = vld [vmem:[%s9999_s20 + $0x564] sm:$0xf]  ;;  %v7773_v51 = vld [vmem:[%s9999_s20 + $0x590] sm:$0xf0] }
 0x34e   : > { %5480 = vmatmul.bf16.vlgmr.msra.gmra.mxu2 %v10264_v60  ;;  %v5196_v15 = vadd.f32 %v10569_v0, %v3140_v38  ;;  %v8908_v0 = vld [vmem:[%s9999_s20 + $0x84] sm:$0xf]  ;;  %v9094_v38 = vld [vmem:[%s9999_s20 + $0x64c] sm:$0xf0] }
 0x34f   : > { %v7868_v14 = vor.u32 %v9094_v38, %v7867_v42  ;;  %v8395_v38 = vld [vmem:[%s9999_s20 + $0xa40] sm:$0xf] }
 0x350   : > { %5551 = vmatpush.bf16.msra.mxu0 %v7392_v61  ;;  %5486 = vmatpush.bf16.msra.mxu3 %v8536_v25  ;;  %v9207_v61 = vld [vmem:[%s9999_s20 + $0x9dc] sm:$0xf]  ;;  %v5209_v13 = vadd.f32 %v10608_v56, %v5196_v15  ;;  %v7776_v25 = vor.u32 %v9064_v52, %v7773_v51  ;;  %v5301_v33 = vpop.f32.mrf.mxu0  ;;  %v8539_v52 = vld [vmem:[%s9999_s20 + $0xb60] sm:$0xf]  ;;  %v9262_v51 = vld [vmem:[%s9999_s20 + $0xb8c] sm:$0xf0] }
 0x351   : > { %5516 = vmatpush.bf16.msrb.mxu1 %v7580_v19  ;;  %5525 = vmatpush.bf16.msrb.mxu2 %v8156_v32  ;;  %v8344_v27 = vor.u32 %v9207_v61, %v8341_v20  ;;  %v9195_v56 = vld [vmem:[%s9999_s20 + $0x97c] sm:$0xf]  ;;  %v8293_v32 = vld [vmem:[%s9999_s20 + $0x9a8] sm:$0xf0]  ;;  %v8540_v26 = vor.u32 %v9262_v51, %v8539_v52  ;;  %v7533_v33 = vld [vmem:[%s9999_s20 + $0x3b0] sm:$0xf0] }
 0x352   : > { %v5222_v19 = vadd.f32 %v10685_v48, %v5209_v13  ;;  %v10769_v48 = vpop.f32.mrf.mxu2  ;;  %v7396_v13 = vor.u32 %v8975_v58, %v7395_v12  ;;  %v7203_v12 = vld [vmem:[%s9999_s20 + $0xe8] sm:$0xf]  ;;  %v9071_v52 = vld [vmem:[%s9999_s20 + $0x594] sm:$0xf0] }
 0x354   : > { %5552 = vmatpush.bf16.msra.mxu0 %v7344_v34  ;;  %5487 = vmatpush.bf16.msra.mxu3 %v8488_v41  ;;  %v5234_v34 = vpop.f32.mrf.mxu3  ;;  %v7152_v41 = vor.u32 %v8908_v0, %v7149_v28  ;;  %v7347_v0 = vld [vmem:[%s9999_s20 + $0x208] sm:$0xf]  ;;  %v8491_v28 = vld [vmem:[%s9999_s20 + $0xb00] sm:$0xf] }
 0x355   : > { %5517 = vmatpush.bf16.msrb.mxu1 %v7532_v46  ;;  %5526 = vmatpush.bf16.msrb.mxu2 %v8108_v53  ;;  %v5235_v40 = vadd.f32 %v5234_v34, %v5222_v19  ;;  %v8296_v46 = vor.u32 %v9195_v56, %v8293_v32  ;;  %v7677_v53 = vld [vmem:[%s9999_s20 + $0x4d0] sm:$0xf0]  ;;  %v9004_v56 = vld [vmem:[%s9999_s20 + $0x384] sm:$0xf]  ;;  %v8492_v39 = vor.u32 %v9250_v30, %v8491_v28  ;;  %v9059_v28 = vld [vmem:[%s9999_s20 + $0x534] sm:$0xf0] }
 0x356   : > { %v7680_v3 = vor.u32 %v9040_v45, %v7677_v53  ;;  %v9148_v34 = vld [vmem:[%s9999_s20 + $0x804] sm:$0xf]  ;;  %v7536_v44 = vor.u32 %v9004_v56, %v7533_v33  ;;  %v7485_v53 = vld [vmem:[%s9999_s20 + $0x350] sm:$0xf0] }
 0x357   : > { %5708 = vst [vmem:[%s10678_s27 + $0x10] sm:$0xff] %v5235_v40  ;;  %v7299_v40 = vld [vmem:[%s9999_s20 + $0x1a8] sm:$0xf]  ;;  %v9100_v33 = vld [vmem:[%s9999_s20 + $0x684] sm:$0xf] }
 0x358   : > { %5553 = vmatpush.bf16.msra.mxu0 %v7296_v11  ;;  %5488 = vmatpush.bf16.msra.mxu3 %v8440_v55  ;;  %v9183_v11 = vld [vmem:[%s9999_s20 + $0x91c] sm:$0xf]  ;;  %v9274_v55 = vld [vmem:[%s9999_s20 + $0xbec] sm:$0xf0] }
 0x359   : > { %5518 = vmatpush.bf16.msrb.mxu1 %v7484_v29  ;;  %5527 = vmatpush.bf16.msrb.mxu2 %v8060_v8  ;;  %v8248_v6 = vor.u32 %v9183_v11, %v8245_v54  ;;  %v7629_v29 = vld [vmem:[%s9999_s20 + $0x470] sm:$0xf0]  ;;  %v9172_v8 = vld [vmem:[%s9999_s20 + $0x8c4] sm:$0xf]  ;;  %v8588_v17 = vor.u32 %v9274_v55, %v8587_v62  ;;  %v7251_v54 = vld [vmem:[%s9999_s20 + $0x148] sm:$0xf] }
 0x35a   : > { %v5275_v15 = vpop.f32.mrf.mxu2  ;;  %v7632_v61 = vor.u32 %v9028_v4, %v7629_v29  ;;  %v8061_v11 = vld [vmem:[%s9999_s20 + $0x7d0] sm:$0xf0]  ;;  %v8939_v62 = vld [vmem:[%s9999_s20 + $0x174] sm:$0xf0]  ;;  %v7827_v55 = vld [vmem:[%s9999_s20 + $0x5c8] sm:$0xf] }
 0x35b   : > { %v9226_v4 = vld [vmem:[%s9999_s20 + $0xa6c] sm:$0xf0]  ;;  %v7252_v29 = vor.u32 %v8939_v62, %v7251_v54  ;;  %v8347_v15 = vld [vmem:[%s9999_s20 + $0x9e0] sm:$0xf]  ;;  %v8589_v54 = vld [vmem:[%s9999_s20 + $0xbf0] sm:$0xf0] }
 0x35c   : > { %5554 = vmatpush.bf16.msra.mxu0 %v7248_v9  ;;  %5489 = vmatpush.bf16.msra.mxu3 %v8392_v50  ;;  %v8205_v9 = vld [vmem:[%s9999_s20 + $0x8f0] sm:$0xf0]  ;;  %v5236_v50 = vpop.f32.mrf.mxu3  ;;  %v8396_v58 = vor.u32 %v9226_v4, %v8395_v38 }
 0x35d   : > { %5563 = vmatpush.bf16.msra.mxu1 %v7824_v10  ;;  %5528 = vmatpush.bf16.msrb.mxu2 %v8012_v2  ;;  %v10788_v10 = vpop.f32.mrf.mxu1  ;;  %v8208_v20 = vor.u32 %v9172_v8, %v8205_v9  ;;  %v9016_v2 = vld [vmem:[%s9999_s20 + $0x3e4] sm:$0xf]  ;;  %v8927_v50 = vld [vmem:[%s9999_s20 + $0x114] sm:$0xf0] }
 0x35e   : > { %5519 = vmatmul.bf16.vlgmr.msrb.gmra.mxu1 %v10229_v37  ;;  %v9124_v9 = vld [vmem:[%s9999_s20 + $0x744] sm:$0xf] }
 0x360   : > { %5555 = vmatpush.bf16.msra.mxu0 %v7200_v23  ;;  %5490 = vmatpush.bf16.msra.mxu3 %v8344_v27  ;;  %v7581_v23 = vld [vmem:[%s9999_s20 + $0x410] sm:$0xf0]  ;;  %v8963_v27 = vld [vmem:[%s9999_s20 + $0x234] sm:$0xf0] }
 0x361   : > { %5564 = vmatpush.bf16.msra.mxu1 %v7776_v25  ;;  %5529 = vmatpush.bf16.msrb.mxu2 %v7964_v35  ;;  %v9160_v25 = vld [vmem:[%s9999_s20 + $0x864] sm:$0xf]  ;;  %v7584_v31 = vor.u32 %v9016_v2, %v7581_v23  ;;  %v7348_v32 = vor.u32 %v8963_v27, %v7347_v0  ;;  %v8109_v35 = vld [vmem:[%s9999_s20 + $0x830] sm:$0xf0]  ;;  %v8915_v0 = vld [vmem:[%s9999_s20 + $0xb4] sm:$0xf0] }
 0x362   : > { %v8160_v19 = vor.u32 %v9160_v25, %v8157_v59  ;;  %v8112_v45 = vor.u32 %v9148_v34, %v8109_v35  ;;  %v9112_v25 = vld [vmem:[%s9999_s20 + $0x6e4] sm:$0xf]  ;;  %v7965_v59 = vld [vmem:[%s9999_s20 + $0x710] sm:$0xf0]  ;;  %v7731_v27 = vld [vmem:[%s9999_s20 + $0x508] sm:$0xf] }
 0x363   : > { %v7917_v34 = vld [vmem:[%s9999_s20 + $0x6b0] sm:$0xf0] }
 0x364   : > { %5556 = vmatpush.bf16.msra.mxu0 %v7152_v41  ;;  %5491 = vmatpush.bf16.msra.mxu3 %v8296_v46  ;;  %v8951_v41 = vld [vmem:[%s9999_s20 + $0x1d4] sm:$0xf0]  ;;  %v8992_v46 = vld [vmem:[%s9999_s20 + $0x324] sm:$0xf] }
 0x365   : > { %5565 = vmatpush.bf16.msra.mxu1 %v7728_v21  ;;  %5530 = vmatpush.bf16.msrb.mxu2 %v7916_v57  ;;  %v5314_v36 = vpop.f32.mrf.mxu1  ;;  %v8443_v21 = vld [vmem:[%s9999_s20 + $0xaa0] sm:$0xf]  ;;  %v7300_v49 = vor.u32 %v8951_v41, %v7299_v40  ;;  %v7107_v40 = vld [vmem:[%s9999_s20 + $0x28] sm:$0xf]  ;;  %v8903_v41 = vld [vmem:[%s9999_s20 + $0x54] sm:$0xf0] }
 0x366   : > { %v8444_v57 = vor.u32 %v9238_v43, %v8443_v21  ;;  %v7683_v21 = vld [vmem:[%s9999_s20 + $0x4a8] sm:$0xf] }
 0x368   : > { %5557 = vmatpush.bf16.msra.mxu0 %v7104_v1  ;;  %5492 = vmatpush.bf16.msra.mxu3 %v8248_v6  ;;  %v9083_v1 = vld [vmem:[%s9999_s20 + $0x5f4] sm:$0xf0]  ;;  %v10822_v42 = vpop.f32.mrf.mxu0  ;;  %v8064_v6 = vor.u32 %v9136_v18, %v8061_v11  ;;  %v7920_v18 = vor.u32 %v9100_v33, %v7917_v34  ;;  %v9268_v11 = vld [vmem:[%s9999_s20 + $0xbc4] sm:$0xf]  ;;  %v8945_v34 = vld [vmem:[%s9999_s20 + $0x1ac] sm:$0xf] }
 0x369   : > { %5566 = vmatpush.bf16.msra.mxu1 %v7680_v3  ;;  %5531 = vmatpush.bf16.msrb.mxu2 %v7868_v14  ;;  %v3141_v3 = vperm.slane %v10633_v22, 3  ;;  %v7828_v8 = vor.u32 %v9083_v1, %v7827_v55  ;;  %v7779_v14 = vld [vmem:[%s9999_s20 + $0x568] sm:$0xf]  ;;  %v9088_v55 = vld [vmem:[%s9999_s20 + $0x624] sm:$0xf] }
 0x36a   : > { %v7780_v23 = vor.u32 %v9071_v52, %v7779_v14  ;;  %v7869_v1 = vld [vmem:[%s9999_s20 + $0x650] sm:$0xf0]  ;;  %v9256_v14 = vld [vmem:[%s9999_s20 + $0xb64] sm:$0xf] }
 0x36b   : > { %5558 = vmatmul.bf16.vlgmr.msra.gmra.mxu0 %v10200_v24  ;;  %5493 = vmatmul.bf16.vlgmr.msra.gmra.mxu3 %v10325_v16  ;;  %v5248_v51 = vadd.f32 %v10651_v47, %v3141_v3  ;;  %v7155_v47 = vld [vmem:[%s9999_s20 + $0x88] sm:$0xf]  ;;  %v8541_v52 = vld [vmem:[%s9999_s20 + $0xb90] sm:$0xf0] }
 0x36c   : > { %5602 = vmatpush.bf16.msrb.mxu0 %v7444_v5  ;;  %5537 = vmatpush.bf16.msrb.mxu3 %v8588_v17  ;;  %v7488_v5 = vor.u32 %v8992_v46, %v7485_v53  ;;  %v8013_v17 = vld [vmem:[%s9999_s20 + $0x770] sm:$0xf0]  ;;  %v7156_v36 = vor.u32 %v8915_v0, %v7155_v47  ;;  %v7445_v46 = vld [vmem:[%s9999_s20 + $0x2f8] sm:$0xf0]  ;;  %v8251_v53 = vld [vmem:[%s9999_s20 + $0x920] sm:$0xf] }
 0x36d   : > { %5567 = vmatpush.bf16.msra.mxu1 %v7632_v61  ;;  %5576 = vmatpush.bf16.msra.mxu2 %v8208_v20  ;;  %v9214_v61 = vld [vmem:[%s9999_s20 + $0xa0c] sm:$0xf0]  ;;  %v8016_v20 = vor.u32 %v9124_v9, %v8013_v17  ;;  %v5261_v2 = vadd.f32 %v10706_v7, %v5248_v51  ;;  %v7635_v3 = vld [vmem:[%s9999_s20 + $0x448] sm:$0xf]  ;;  %v8969_v9 = vld [vmem:[%s9999_s20 + $0x26c] sm:$0xf] }
 0x36e   : > { %5532 = vmatmul.bf16.vlgmr.msrb.gmra.mxu2 %v10264_v60  ;;  %v5286_v56 = vpop.f32.mrf.mxu3  ;;  %v7397_v17 = vld [vmem:[%s9999_s20 + $0x298] sm:$0xf0]  ;;  %v8957_v47 = vld [vmem:[%s9999_s20 + $0x20c] sm:$0xf]  ;;  %v9244_v0 = vld [vmem:[%s9999_s20 + $0xb04] sm:$0xf] }
 0x36f   : > { %v5274_v30 = vadd.f32 %v10769_v48, %v5261_v2  ;;  %v7400_v2 = vor.u32 %v8969_v9, %v7397_v17  ;;  %v8921_v9 = vld [vmem:[%s9999_s20 + $0xec] sm:$0xf]  ;;  %v7205_v17 = vld [vmem:[%s9999_s20 + $0x118] sm:$0xf0] }
 0x370   : > { %5603 = vmatpush.bf16.msrb.mxu0 %v7396_v13  ;;  %5538 = vmatpush.bf16.msrb.mxu3 %v8540_v26  ;;  %v7204_v13 = vor.u32 %v8927_v50, %v7203_v12  ;;  %v8348_v26 = vor.u32 %v9214_v61, %v8347_v15  ;;  %v5353_v7 = vpop.f32.mrf.mxu0  ;;  %v7872_v50 = vor.u32 %v9088_v55, %v7869_v1  ;;  %v9220_v55 = vld [vmem:[%s9999_s20 + $0xa44] sm:$0xf]  ;;  %v8397_v1 = vld [vmem:[%s9999_s20 + $0xa70] sm:$0xf0] }
 0x371   : > { %5568 = vmatpush.bf16.msra.mxu1 %v7584_v31  ;;  %5577 = vmatpush.bf16.msra.mxu2 %v8160_v19  ;;  %v8299_v31 = vld [vmem:[%s9999_s20 + $0x980] sm:$0xf]  ;;  %v9202_v19 = vld [vmem:[%s9999_s20 + $0x9ac] sm:$0xf0]  ;;  %v5287_v35 = vadd.f32 %v5286_v56, %v5274_v30  ;;  %v10848_v48 = vpop.f32.mrf.mxu2  ;;  %v7539_v7 = vld [vmem:[%s9999_s20 + $0x388] sm:$0xf] }
 0x372   : > { %v8300_v43 = vor.u32 %v9202_v19, %v8299_v31  ;;  %v9011_v19 = vld [vmem:[%s9999_s20 + $0x3b4] sm:$0xf0]  ;;  %v8115_v56 = vld [vmem:[%s9999_s20 + $0x808] sm:$0xf] }
 0x373   : > { %5709 = vst [vmem:[%s10678_s27 + $0x18] sm:$0xff] %v5287_v35  ;;  %v7301_v35 = vld [vmem:[%s9999_s20 + $0x1d8] sm:$0xf0] }
 0x374   : > { %5604 = vmatpush.bf16.msrb.mxu0 %v7348_v32  ;;  %5539 = vmatpush.bf16.msrb.mxu3 %v8492_v39  ;;  %v7968_v32 = vor.u32 %v9112_v25, %v7965_v59  ;;  %v7732_v39 = vor.u32 %v9059_v28, %v7731_v27  ;;  %v9167_v25 = vld [vmem:[%s9999_s20 + $0x894] sm:$0xf0]  ;;  %v8544_v59 = vor.u32 %v9256_v14, %v8541_v52  ;;  %v8493_v27 = vld [vmem:[%s9999_s20 + $0xb30] sm:$0xf0]  ;;  %v9208_v52 = vld [vmem:[%s9999_s20 + $0x9e4] sm:$0xf] }
 0x375   : > { %5569 = vmatpush.bf16.msra.mxu1 %v7536_v44  ;;  %5578 = vmatpush.bf16.msra.mxu2 %v8112_v45  ;;  %v9047_v44 = vld [vmem:[%s9999_s20 + $0x4d4] sm:$0xf0]  ;;  %v8981_v45 = vld [vmem:[%s9999_s20 + $0x2cc] sm:$0xf]  ;;  %v8496_v33 = vor.u32 %v9244_v0, %v8493_v27  ;;  %v8301_v27 = vld [vmem:[%s9999_s20 + $0x9b0] sm:$0xf0] }
 0x376   : > { %v7684_v62 = vor.u32 %v9047_v44, %v7683_v21  ;;  %v7448_v38 = vor.u32 %v8981_v45, %v7445_v46  ;;  %v5288_v12 = vpop.f32.mrf.mxu3  ;;  %v8999_v44 = vld [vmem:[%s9999_s20 + $0x354] sm:$0xf0]  ;;  %v7304_v45 = vor.u32 %v8945_v34, %v7301_v35  ;;  %v8067_v46 = vld [vmem:[%s9999_s20 + $0x7a8] sm:$0xf]  ;;  %v8897_v34 = vld [vmem:[%s9999_s20 + $0x2c] sm:$0xf] }
 0x377   : > { %v9065_v12 = vld [vmem:[%s9999_s20 + $0x56c] sm:$0xf] }
 0x378   : > { %5605 = vmatpush.bf16.msrb.mxu0 %v7300_v49  ;;  %5540 = vmatpush.bf16.msrb.mxu3 %v8444_v57  ;;  %v9190_v49 = vld [vmem:[%s9999_s20 + $0x94c] sm:$0xf0]  ;;  %v7108_v57 = vor.u32 %v8903_v41, %v7107_v40  ;;  %v8445_v40 = vld [vmem:[%s9999_s20 + $0xad0] sm:$0xf0]  ;;  %v7540_v41 = vor.u32 %v9011_v19, %v7539_v7 }
 0x379   : > { %5570 = vmatpush.bf16.msra.mxu1 %v7488_v5  ;;  %5579 = vmatpush.bf16.msra.mxu2 %v8064_v6  ;;  %v8252_v4 = vor.u32 %v9190_v49, %v8251_v53  ;;  %v9035_v5 = vld [vmem:[%s9999_s20 + $0x474] sm:$0xf0]  ;;  %v8211_v6 = vld [vmem:[%s9999_s20 + $0x8c8] sm:$0xf]  ;;  %v5327_v51 = vpop.f32.mrf.mxu2  ;;  %v8933_v49 = vld [vmem:[%s9999_s20 + $0x14c] sm:$0xf] }
 0x37a   : > { %v7636_v15 = vor.u32 %v9035_v5, %v7635_v3  ;;  %v9143_v53 = vld [vmem:[%s9999_s20 + $0x7d4] sm:$0xf0]  ;;  %v8349_v51 = vld [vmem:[%s9999_s20 + $0xa10] sm:$0xf0] }
 0x37c   : > { %5606 = vmatpush.bf16.msrb.mxu0 %v7252_v29  ;;  %5541 = vmatpush.bf16.msrb.mxu3 %v8396_v58  ;;  %v9179_v29 = vld [vmem:[%s9999_s20 + $0x8f4] sm:$0xf0]  ;;  %v10869_v58 = vpop.f32.mrf.mxu1 }
 0x37d   : > { %5615 = vmatpush.bf16.msrb.mxu1 %v7828_v8  ;;  %5580 = vmatpush.bf16.msra.mxu2 %v8016_v20  ;;  %v8592_v8 = vor.u32 %v9268_v11, %v8589_v54  ;;  %v8212_v61 = vor.u32 %v9179_v29, %v8211_v6  ;;  %v7587_v20 = vld [vmem:[%s9999_s20 + $0x3e8] sm:$0xf]  ;;  %v7253_v11 = vld [vmem:[%s9999_s20 + $0x178] sm:$0xf0]  ;;  %v9077_v54 = vld [vmem:[%s9999_s20 + $0x5cc] sm:$0xf] }
 0x37e   : > { %5571 = vmatmul.bf16.vlgmr.msra.gmra.mxu1 %v10229_v37  ;;  %v7256_v5 = vor.u32 %v8933_v49, %v7253_v11  ;;  %v8019_v29 = vld [vmem:[%s9999_s20 + $0x748] sm:$0xf]  ;;  %v9029_v11 = vld [vmem:[%s9999_s20 + $0x44c] sm:$0xf] }
 0x37f   : > { %v7875_v49 = vld [vmem:[%s9999_s20 + $0x628] sm:$0xf] }
 0x380   : > { %5607 = vmatpush.bf16.msrb.mxu0 %v7204_v13  ;;  %5542 = vmatpush.bf16.msrb.mxu3 %v8348_v26  ;;  %v9023_v13 = vld [vmem:[%s9999_s20 + $0x414] sm:$0xf0]  ;;  %v7349_v26 = vld [vmem:[%s9999_s20 + $0x238] sm:$0xf0] }
 0x381   : > { %5616 = vmatpush.bf16.msrb.mxu1 %v7780_v23  ;;  %5581 = vmatpush.bf16.msra.mxu2 %v7968_v32  ;;  %v8163_v23 = vld [vmem:[%s9999_s20 + $0x868] sm:$0xf]  ;;  %v7588_v28 = vor.u32 %v9023_v13, %v7587_v20  ;;  %v7352_v31 = vor.u32 %v8957_v47, %v7349_v26  ;;  %v9155_v32 = vld [vmem:[%s9999_s20 + $0x834] sm:$0xf0]  ;;  %v7208_v20 = vor.u32 %v8921_v9, %v7205_v17  ;;  %v9053_v47 = vld [vmem:[%s9999_s20 + $0x50c] sm:$0xf] }
 0x382   : > { %v8164_v30 = vor.u32 %v9167_v25, %v8163_v23  ;;  %v8116_v21 = vor.u32 %v9155_v32, %v8115_v56  ;;  %v7971_v13 = vld [vmem:[%s9999_s20 + $0x6e8] sm:$0xf]  ;;  %v9119_v23 = vld [vmem:[%s9999_s20 + $0x714] sm:$0xf0]  ;;  %v8909_v25 = vld [vmem:[%s9999_s20 + $0x8c] sm:$0xf] }
 0x383   : > { %v7733_v26 = vld [vmem:[%s9999_s20 + $0x538] sm:$0xf0]  ;;  %v7972_v7 = vor.u32 %v9119_v23, %v7971_v13  ;;  %v7923_v32 = vld [vmem:[%s9999_s20 + $0x688] sm:$0xf]  ;;  %v9017_v17 = vld [vmem:[%s9999_s20 + $0x3ec] sm:$0xf] }
 0x384   : > { %5608 = vmatpush.bf16.msrb.mxu0 %v7156_v36  ;;  %5543 = vmatpush.bf16.msrb.mxu3 %v8300_v43  ;;  %v5366_v36 = vpop.f32.mrf.mxu1  ;;  %v7491_v43 = vld [vmem:[%s9999_s20 + $0x328] sm:$0xf]  ;;  %v7736_v56 = vor.u32 %v9053_v47, %v7733_v26  ;;  %v7541_v13 = vld [vmem:[%s9999_s20 + $0x3b8] sm:$0xf0]  ;;  %v9149_v23 = vld [vmem:[%s9999_s20 + $0x80c] sm:$0xf] }
 0x385   : > { %5617 = vmatpush.bf16.msrb.mxu1 %v7732_v39  ;;  %5582 = vmatpush.bf16.msra.mxu2 %v7920_v18  ;;  %v9232_v39 = vld [vmem:[%s9999_s20 + $0xaa4] sm:$0xf]  ;;  %v7109_v36 = vld [vmem:[%s9999_s20 + $0x58] sm:$0xf0]  ;;  %v9239_v47 = vld [vmem:[%s9999_s20 + $0xad4] sm:$0xf0] }
 0x386   : > { %v8448_v18 = vor.u32 %v9232_v39, %v8445_v40  ;;  %v9041_v39 = vld [vmem:[%s9999_s20 + $0x4ac] sm:$0xf]  ;;  %v7685_v40 = vld [vmem:[%s9999_s20 + $0x4d8] sm:$0xf0] }
 0x388   : > { %5609 = vmatpush.bf16.msrb.mxu0 %v7108_v57  ;;  %5544 = vmatpush.bf16.msrb.mxu3 %v8252_v4  ;;  %v7829_v57 = vld [vmem:[%s9999_s20 + $0x5f8] sm:$0xf0]  ;;  %v10903_v3 = vpop.f32.mrf.mxu0  ;;  %v8068_v4 = vor.u32 %v9143_v53, %v8067_v46  ;;  %v7112_v46 = vor.u32 %v8897_v34, %v7109_v36  ;;  %v7688_v53 = vor.u32 %v9041_v39, %v7685_v40  ;;  %v9125_v36 = vld [vmem:[%s9999_s20 + $0x74c] sm:$0xf] }
 0x389   : > { %5618 = vmatpush.bf16.msrb.mxu1 %v7684_v62  ;;  %5583 = vmatpush.bf16.msra.mxu2 %v7872_v50  ;;  %v3142_v62 = vperm.slane %v10633_v22, 4  ;;  %v7832_v6 = vor.u32 %v9077_v54, %v7829_v57  ;;  %v8400_v22 = vor.u32 %v9220_v55, %v8397_v1  ;;  %v7781_v50 = vld [vmem:[%s9999_s20 + $0x598] sm:$0xf0] }
 0x38a   : > { %v7637_v57 = vld [vmem:[%s9999_s20 + $0x478] sm:$0xf0] }
 0x38b   : > { %5610 = vmatmul.bf16.vlgmr.msrb.gmra.mxu0 %v10200_v24  ;;  %5545 = vmatmul.bf16.vlgmr.msrb.gmra.mxu3 %v10325_v16  ;;  %v5300_v14 = vadd.f32 %v10745_v63, %v3142_v62  ;;  %v8352_v63 = vor.u32 %v9208_v52, %v8349_v51  ;;  %v9173_v62 = vld [vmem:[%s9999_s20 + $0x8cc] sm:$0xf]  ;;  %v8213_v55 = vld [vmem:[%s9999_s20 + $0x8f8] sm:$0xf0]  ;;  %v7640_v9 = vor.u32 %v9029_v11, %v7637_v57  ;;  %v8499_v51 = vld [vmem:[%s9999_s20 + $0xb08] sm:$0xf] }
 0x38c   : > { %5654 = vmatpush.bf16.msra.mxu0 %v7448_v38  ;;  %5589 = vmatpush.bf16.msra.mxu3 %v8592_v8  ;;  %v7492_v38 = vor.u32 %v8999_v44, %v7491_v43  ;;  %v9131_v8 = vld [vmem:[%s9999_s20 + $0x774] sm:$0xf0]  ;;  %v8595_v44 = vld [vmem:[%s9999_s20 + $0xbc8] sm:$0xf]  ;;  %v8021_v39 = vld [vmem:[%s9999_s20 + $0x778] sm:$0xf0] }
 0x38d   : > { %5619 = vmatpush.bf16.msrb.mxu1 %v7636_v15  ;;  %5628 = vmatpush.bf16.msrb.mxu2 %v8212_v61  ;;  %v8020_v15 = vor.u32 %v9131_v8, %v8019_v29  ;;  %v5313_v61 = vadd.f32 %v10788_v10, %v5300_v14  ;;  %v9196_v10 = vld [vmem:[%s9999_s20 + $0x984] sm:$0xf]  ;;  %v9263_v29 = vld [vmem:[%s9999_s20 + $0xb94] sm:$0xf0]  ;;  %v8165_v14 = vld [vmem:[%s9999_s20 + $0x898] sm:$0xf0] }
 0x38e   : > { %5584 = vmatmul.bf16.vlgmr.msra.gmra.mxu2 %v10264_v60  ;;  %v8304_v35 = vor.u32 %v9196_v10, %v8301_v27  ;;  %v8993_v10 = vld [vmem:[%s9999_s20 + $0x32c] sm:$0xf]  ;;  %v7493_v27 = vld [vmem:[%s9999_s20 + $0x358] sm:$0xf0]  ;;  %v9203_v11 = vld [vmem:[%s9999_s20 + $0x9b4] sm:$0xf0] }
 0x38f   : > { %v5326_v0 = vadd.f32 %v10848_v48, %v5313_v61  ;;  %v7496_v34 = vor.u32 %v8993_v10, %v7493_v27 }
 0x390   : > { %5655 = vmatpush.bf16.msra.mxu0 %v7400_v2  ;;  %5590 = vmatpush.bf16.msra.mxu3 %v8544_v59  ;;  %v7784_v2 = vor.u32 %v9065_v12, %v7781_v50  ;;  %v7157_v59 = vld [vmem:[%s9999_s20 + $0xb8] sm:$0xf0]  ;;  %v9161_v50 = vld [vmem:[%s9999_s20 + $0x86c] sm:$0xf] }
 0x391   : > { %5620 = vmatpush.bf16.msrb.mxu1 %v7588_v28  ;;  %5629 = vmatpush.bf16.msrb.mxu2 %v8164_v30  ;;  %v5338_v28 = vpop.f32.mrf.mxu3  ;;  %v5405_v30 = vpop.f32.mrf.mxu0  ;;  %v7160_v48 = vor.u32 %v8909_v25, %v7157_v59  ;;  %v7589_v12 = vld [vmem:[%s9999_s20 + $0x418] sm:$0xf0]  ;;  %v8451_v59 = vld [vmem:[%s9999_s20 + $0xaa8] sm:$0xf] }
 0x392   : > { %v10925_v19 = vpop.f32.mrf.mxu2  ;;  %v7592_v61 = vor.u32 %v9017_v17, %v7589_v12  ;;  %v8117_v25 = vld [vmem:[%s9999_s20 + $0x838] sm:$0xf0] }
 0x393   : > { %v8069_v30 = vld [vmem:[%s9999_s20 + $0x7d8] sm:$0xf0] }
 0x394   : > { %5656 = vmatpush.bf16.msra.mxu0 %v7352_v31  ;;  %5591 = vmatpush.bf16.msra.mxu3 %v8496_v33  ;;  %v5339_v31 = vadd.f32 %v5338_v28, %v5326_v0  ;;  %v9107_v33 = vld [vmem:[%s9999_s20 + $0x6b4] sm:$0xf0]  ;;  %v8120_v0 = vor.u32 %v9149_v23, %v8117_v25  ;;  %v9137_v28 = vld [vmem:[%s9999_s20 + $0x7ac] sm:$0xf] }
 0x395   : > { %5621 = vmatpush.bf16.msrb.mxu1 %v7540_v41  ;;  %5630 = vmatpush.bf16.msrb.mxu2 %v8116_v21  ;;  %v9184_v41 = vld [vmem:[%s9999_s20 + $0x924] sm:$0xf]  ;;  %v8253_v21 = vld [vmem:[%s9999_s20 + $0x950] sm:$0xf0]  ;;  %v7924_v43 = vor.u32 %v9107_v33, %v7923_v32  ;;  %v9227_v32 = vld [vmem:[%s9999_s20 + $0xa74] sm:$0xf0] }
 0x396   : > { %5710 = vst [vmem:[%s10678_s27 + $0x20] sm:$0xff] %v5339_v31  ;;  %v8256_v54 = vor.u32 %v9184_v41, %v8253_v21  ;;  %v10968_v31 = vld [vmem:[%s10630_s30] sm:$0xff]  ;;  %v8355_v21 = vld [vmem:[%s9999_s20 + $0x9e8] sm:$0xf] }
 0x398   : > { %5657 = vmatpush.bf16.msra.mxu0 %v7304_v45  ;;  %5592 = vmatpush.bf16.msra.mxu3 %v8448_v18  ;;  %v9275_v45 = vld [vmem:[%s9999_s20 + $0xbf4] sm:$0xf0] }
 0x399   : > { %5622 = vmatpush.bf16.msrb.mxu1 %v7492_v38  ;;  %5631 = vmatpush.bf16.msrb.mxu2 %v8068_v4  ;;  %v9095_v18 = vld [vmem:[%s9999_s20 + $0x654] sm:$0xf0]  ;;  %v8596_v1 = vor.u32 %v9275_v45, %v8595_v44  ;;  %v5340_v38 = vpop.f32.mrf.mxu3  ;;  %v8024_v44 = vor.u32 %v9125_v36, %v8021_v39 }
 0x39a   : > { %v5379_v8 = vpop.f32.mrf.mxu2  ;;  %v7925_v38 = vld [vmem:[%s9999_s20 + $0x6b8] sm:$0xf0] }
 0x39b   : > { %v10944_v4 = vpop.f32.mrf.mxu1  ;;  %v8597_v8 = vld [vmem:[%s9999_s20 + $0xbf8] sm:$0xf0] }
 0x39c   : > { %5658 = vmatpush.bf16.msra.mxu0 %v7256_v5  ;;  %5593 = vmatpush.bf16.msra.mxu3 %v8400_v22  ;;  %v7876_v5 = vor.u32 %v9095_v18, %v7875_v49  ;;  %v8216_v22 = vor.u32 %v9173_v62, %v8213_v55 }
 0x39d   : > { %5667 = vmatpush.bf16.msra.mxu1 %v7832_v6  ;;  %5632 = vmatpush.bf16.msrb.mxu2 %v8020_v15  ;;  %v8547_v6 = vld [vmem:[%s9999_s20 + $0xb68] sm:$0xf]  ;;  %v9251_v15 = vld [vmem:[%s9999_s20 + $0xb34] sm:$0xf0] }
 0x39e   : > { %5623 = vmatmul.bf16.vlgmr.msrb.gmra.mxu1 %v10229_v37  ;;  %v8548_v52 = vor.u32 %v9263_v29, %v8547_v6  ;;  %v9269_v29 = vld [vmem:[%s9999_s20 + $0xbcc] sm:$0xf] }
 0x39f   : > { %v8600_v12 = vor.u32 %v9269_v29, %v8597_v8 }
 0x3a0   : > { %5659 = vmatpush.bf16.msra.mxu0 %v7208_v20  ;;  %5594 = vmatpush.bf16.msra.mxu3 %v8352_v63  ;;  %v8168_v20 = vor.u32 %v9161_v50, %v8165_v14 }
 0x3a1   : > { %5668 = vmatpush.bf16.msra.mxu1 %v7784_v2  ;;  %5633 = vmatpush.bf16.msrb.mxu2 %v7972_v7  ;;  %v9005_v2 = vld [vmem:[%s9999_s20 + $0x38c] sm:$0xf]  ;;  %v8452_v7 = vor.u32 %v9239_v47, %v8451_v59  ;;  %v3144_v47 = vperm.slane %v10968_v31, 6 }
 0x3a2   : > { %v7544_v26 = vor.u32 %v9005_v2, %v7541_v13  ;;  %v9245_v2 = vld [vmem:[%s9999_s20 + $0xb0c] sm:$0xf]  ;;  %v8501_v13 = vld [vmem:[%s9999_s20 + $0xb38] sm:$0xf0] }
 0x3a3   : > { %v5418_v63 = vpop.f32.mrf.mxu1  ;;  %v8504_v23 = vor.u32 %v9245_v2, %v8501_v13 }
 0x3a4   : > { %5660 = vmatpush.bf16.msra.mxu0 %v7160_v48  ;;  %5595 = vmatpush.bf16.msra.mxu3 %v8304_v35  ;;  %v3143_v48 = vperm.slane %v10968_v31, 5  ;;  %v8072_v35 = vor.u32 %v9137_v28, %v8069_v30  ;;  %v8453_v63 = vld [vmem:[%s9999_s20 + $0xad8] sm:$0xf0]  ;;  %v9209_v28 = vld [vmem:[%s9999_s20 + $0x9ec] sm:$0xf] }
 0x3a5   : > { %5669 = vmatpush.bf16.msra.mxu1 %v7736_v56  ;;  %5634 = vmatpush.bf16.msrb.mxu2 %v7924_v43  ;;  %v8403_v56 = vld [vmem:[%s9999_s20 + $0xa48] sm:$0xf]  ;;  %v9215_v43 = vld [vmem:[%s9999_s20 + $0xa14] sm:$0xf0]  ;;  %v8357_v30 = vld [vmem:[%s9999_s20 + $0xa18] sm:$0xf0] }
 0x3a6   : > { %v8404_v40 = vor.u32 %v9227_v32, %v8403_v56  ;;  %v5352_v41 = vadd.f32 %v10822_v42, %v3143_v48  ;;  %v8356_v49 = vor.u32 %v9215_v43, %v8355_v21  ;;  %v8307_v42 = vld [vmem:[%s9999_s20 + $0x988] sm:$0xf]  ;;  %v8360_v48 = vor.u32 %v9209_v28, %v8357_v30  ;;  %v9197_v32 = vld [vmem:[%s9999_s20 + $0x98c] sm:$0xf] }
 0x3a7   : > { %v9185_v21 = vld [vmem:[%s9999_s20 + $0x92c] sm:$0xf] }
 0x3a8   : > { %5661 = vmatpush.bf16.msra.mxu0 %v7112_v46  ;;  %5596 = vmatpush.bf16.msra.mxu3 %v8256_v54  ;;  %v10973_v33 = vpop.f32.mrf.mxu0  ;;  %v5365_v45 = vadd.f32 %v10869_v58, %v5352_v41  ;;  %v9113_v46 = vld [vmem:[%s9999_s20 + $0x6ec] sm:$0xf] }
 0x3a9   : > { %5670 = vmatpush.bf16.msra.mxu1 %v7688_v53  ;;  %5635 = vmatpush.bf16.msrb.mxu2 %v7876_v5  ;;  %v7973_v53 = vld [vmem:[%s9999_s20 + $0x718] sm:$0xf0]  ;;  %v8308_v5 = vor.u32 %v9203_v11, %v8307_v42 }
 0x3aa   : > { %v5378_v18 = vadd.f32 %v10925_v19, %v5365_v45  ;;  %v7976_v58 = vor.u32 %v9113_v46, %v7973_v53  ;;  %v8259_v19 = vld [vmem:[%s9999_s20 + $0x928] sm:$0xf]  ;;  %v3145_v53 = vperm.slane %v10968_v31, 7 }
 0x3ab   : > { %5662 = vmatmul.bf16.vlgmr.msra.gmra.mxu0 %v10200_v24  ;;  %5597 = vmatmul.bf16.vlgmr.msra.gmra.mxu3 %v10325_v16  ;;  %v8500_v24 = vor.u32 %v9251_v15, %v8499_v51  ;;  %v9257_v51 = vld [vmem:[%s9999_s20 + $0xb6c] sm:$0xf]  ;;  %v8549_v15 = vld [vmem:[%s9999_s20 + $0xb98] sm:$0xf0] }
 0x3ac   : > { %5641 = vmatpush.bf16.msrb.mxu3 %v8596_v1  ;;  %5636 = vmatmul.bf16.vlgmr.msrb.gmra.mxu2 %v10264_v60  ;;  %v9101_v1 = vld [vmem:[%s9999_s20 + $0x68c] sm:$0xf] }
 0x3ad   : > { %5671 = vmatpush.bf16.msra.mxu1 %v7640_v9  ;;  %5680 = vmatpush.bf16.msra.mxu2 %v8216_v22  ;;  %v7928_v6 = vor.u32 %v9101_v1, %v7925_v38  ;;  %v9089_v9 = vld [vmem:[%s9999_s20 + $0x62c] sm:$0xf]  ;;  %v7877_v22 = vld [vmem:[%s9999_s20 + $0x658] sm:$0xf0] }
 0x3ae   : > { %v5390_v54 = vpop.f32.mrf.mxu3 }
 0x3af   : > { %v5391_v62 = vadd.f32 %v5390_v54, %v5378_v18  ;;  %v5456_v18 = vadd.f32 %v10973_v33, %v3145_v53 }
 0x3b0   : > { %5642 = vmatpush.bf16.msrb.mxu3 %v8548_v52  ;;  %v5457_v57 = vpop.f32.mrf.mxu0  ;;  %v7880_v52 = vor.u32 %v9089_v9, %v7877_v22 }
 0x3b1   : > { %5672 = vmatpush.bf16.msra.mxu1 %v7592_v61  ;;  %5681 = vmatpush.bf16.msra.mxu2 %v8168_v20  ;;  %v5429_v55 = vpop.f32.mrf.mxu2  ;;  %5711 = vst [vmem:[%s10678_s27 + $0x28] sm:$0xff] %v5391_v62  ;;  %v8552_v20 = vor.u32 %v9257_v51, %v8549_v15 }
 0x3b4   : > { %5643 = vmatpush.bf16.msrb.mxu3 %v8500_v24  ;;  %v9233_v24 = vld [vmem:[%s9999_s20 + $0xaac] sm:$0xf] }
 0x3b5   : > { %5673 = vmatpush.bf16.msra.mxu1 %v7544_v26  ;;  %5682 = vmatpush.bf16.msra.mxu2 %v8120_v0  ;;  %v8456_v59 = vor.u32 %v9233_v24, %v8453_v63  ;;  %v9221_v26 = vld [vmem:[%s9999_s20 + $0xa4c] sm:$0xf]  ;;  %v8405_v0 = vld [vmem:[%s9999_s20 + $0xa78] sm:$0xf0] }
 0x3b6   : > { %v5392_v50 = vpop.f32.mrf.mxu3  ;;  %v8408_v27 = vor.u32 %v9221_v26, %v8405_v0 }
 0x3b8   : > { %5644 = vmatpush.bf16.msrb.mxu3 %v8452_v7 }
 0x3b9   : > { %5674 = vmatpush.bf16.msra.mxu1 %v7496_v34  ;;  %5683 = vmatpush.bf16.msra.mxu2 %v8072_v35  ;;  %v5431_v61 = vpop.f32.mrf.mxu2  ;;  %v8309_v34 = vld [vmem:[%s9999_s20 + $0x9b8] sm:$0xf0] }
 0x3ba   : > { %v8312_v41 = vor.u32 %v9197_v32, %v8309_v34 }
 0x3bb   : > { %v5468_v14 = vpop.f32.mrf.mxu1 }
 0x3bc   : > { %5645 = vmatpush.bf16.msrb.mxu3 %v8404_v40  ;;  %5675 = vmatmul.bf16.vlgmr.msra.gmra.mxu1 %v10229_v37  ;;  %v9191_v37 = vld [vmem:[%s9999_s20 + $0x954] sm:$0xf0]  ;;  %v5469_v42 = vadd.f32 %v5468_v14, %v5456_v18 }
 0x3bd   : > { %5684 = vmatpush.bf16.msra.mxu2 %v8024_v44  ;;  %v8260_v17 = vor.u32 %v9191_v37, %v8259_v19 }
 0x3c0   : > { %5646 = vmatpush.bf16.msrb.mxu3 %v8356_v49 }
 0x3c1   : > { %5685 = vmatpush.bf16.msra.mxu2 %v7976_v58 }
 0x3c3   : > { %v5470_v25 = vpop.f32.mrf.mxu1 }
 0x3c4   : > { %5647 = vmatpush.bf16.msrb.mxu3 %v8308_v5 }
 0x3c5   : > { %5686 = vmatpush.bf16.msra.mxu2 %v7928_v6 }
 0x3c8   : > { %5648 = vmatpush.bf16.msrb.mxu3 %v8260_v17  ;;  %v5507_v10 = vpop.f32.mrf.mxu0 }
 0x3c9   : > { %5687 = vmatpush.bf16.msra.mxu2 %v7880_v52 }
 0x3cb   : > { %5649 = vmatmul.bf16.vlgmr.msrb.gmra.mxu3 %v10325_v16 }
 0x3cc   : > { %5693 = vmatpush.bf16.msra.mxu3 %v8600_v12  ;;  %5688 = vmatmul.bf16.vlgmr.msra.gmra.mxu2 %v10264_v60  ;;  %v5404_v60 = vadd.f32 %v10903_v3, %v3144_v47  ;;  %v8261_v3 = vld [vmem:[%s9999_s20 + $0x958] sm:$0xf0] }
 0x3cd   : > { %v8264_v43 = vor.u32 %v9185_v21, %v8261_v3 }
 0x3ce   : > { %v5417_v7 = vadd.f32 %v10944_v4, %v5404_v60  ;;  %v5442_v35 = vpop.f32.mrf.mxu3 }
 0x3d0   : > { %5694 = vmatpush.bf16.msra.mxu3 %v8552_v20  ;;  %v5430_v56 = vadd.f32 %v5429_v55, %v5417_v7  ;;  %v5509_v36 = vpop.f32.mrf.mxu0 }
 0x3d1   : > { %v5481_v40 = vpop.f32.mrf.mxu2 }
 0x3d2   : > { %v5443_v39 = vadd.f32 %v5442_v35, %v5430_v56  ;;  %v5482_v11 = vadd.f32 %v5481_v40, %v5469_v42 }
 0x3d4   : > { %5695 = vmatpush.bf16.msra.mxu3 %v8504_v23  ;;  %5712 = vst [vmem:[%s10678_s27 + $0x30] sm:$0xff] %v5443_v39 }
 0x3d6   : > { %v5444_v44 = vpop.f32.mrf.mxu3 }
 0x3d8   : > { %5696 = vmatpush.bf16.msra.mxu3 %v8456_v59 }
 0x3d9   : > { %v5483_v4 = vpop.f32.mrf.mxu2 }
 0x3db   : > { %v5520_v45 = vpop.f32.mrf.mxu1 }
 0x3dc   : > { %5697 = vmatpush.bf16.msra.mxu3 %v8408_v27 }
 0x3e0   : > { %5698 = vmatpush.bf16.msra.mxu3 %v8360_v48 }
 0x3e3   : > { %v5522_v46 = vpop.f32.mrf.mxu1 }
 0x3e4   : > { %5699 = vmatpush.bf16.msra.mxu3 %v8312_v41 }
 0x3e8   : > { %5700 = vmatpush.bf16.msra.mxu3 %v8264_v43  ;;  %v5559_v49 = vpop.f32.mrf.mxu0 }
 0x3eb   : > { %5701 = vmatmul.bf16.vlgmr.msra.gmra.mxu3 %v10325_v16  ;;  %v3135_v16 = vld [vmem:[%s10630_s30 + $0x8] sm:$0xf] }
 0x3ec   : > { %v3146_v19 = vperm.slane %v3135_v16, 0  ;;  %v3147_v52 = vperm.slane %v3135_v16, 1  ;;  %v3148_v26 = vperm.slane %v3135_v16, 2  ;;  %v3149_v56 = vperm.slane %v3135_v16, 3 }
 0x3ee   : > { %v5494_v54 = vpop.f32.mrf.mxu3  ;;  %v5508_v6 = vadd.f32 %v5507_v10, %v3146_v19  ;;  %v5560_v15 = vadd.f32 %v5559_v49, %v3147_v52 }
 0x3ef   : > { %v5495_v58 = vadd.f32 %v5494_v54, %v5482_v11 }
 0x3f0   : > { %v5561_v57 = vpop.f32.mrf.mxu0  ;;  %v5521_v31 = vadd.f32 %v5520_v45, %v5508_v6 }
 0x3f1   : > { %v5533_v62 = vpop.f32.mrf.mxu2  ;;  %5713 = vst [vmem:[%s10678_s27 + $0x38] sm:$0xff] %v5495_v58 }
 0x3f2   : > { %v5534_v29 = vadd.f32 %v5533_v62, %v5521_v31 }
 0x3f6   : > { %v5496_v55 = vpop.f32.mrf.mxu3 }
 0x3f9   : > { %v5535_v38 = vpop.f32.mrf.mxu2 }
 0x3fb   : > { %v5572_v1 = vpop.f32.mrf.mxu1 }
 0x3fc   : > { %v5573_v61 = vadd.f32 %v5572_v1, %v5560_v15 }
 0x403   : > { %v5574_v5 = vpop.f32.mrf.mxu1 }
 0x408   : > { %v5611_v37 = vpop.f32.mrf.mxu0 }
 0x409   : > { %v5612_v0 = vadd.f32 %v5611_v37, %v3148_v26 }
 0x40e   : > { %v5546_v8 = vpop.f32.mrf.mxu3 }
 0x40f   : > { %v5547_v9 = vadd.f32 %v5546_v8, %v5534_v29 }
 0x410   : > { %v5613_v33 = vpop.f32.mrf.mxu0 }
 0x411   : > { %v5585_v22 = vpop.f32.mrf.mxu2  ;;  %5714 = vst [vmem:[%s10678_s27 + $0x40] sm:$0xff] %v5547_v9 }
 0x412   : > { %v5586_v20 = vadd.f32 %v5585_v22, %v5573_v61 }
 0x416   : > { %v5548_v17 = vpop.f32.mrf.mxu3 }
 0x419   : > { %v5587_v50 = vpop.f32.mrf.mxu2 }
 0x41b   : > { %v5624_v12 = vpop.f32.mrf.mxu1 }
 0x41c   : > { %v5625_v10 = vadd.f32 %v5624_v12, %v5612_v0 }
 0x423   : > { %v5626_v14 = vpop.f32.mrf.mxu1 }
 0x428   : > { %v5663_v51 = vpop.f32.mrf.mxu0 }
 0x429   : > { %v5664_v32 = vadd.f32 %v5663_v51, %v3149_v56 }
 0x42e   : > { %v5598_v2 = vpop.f32.mrf.mxu3 }
 0x42f   : > { %v5599_v23 = vadd.f32 %v5598_v2, %v5586_v20  ;;  %v5637_v25 = vpop.f32.mrf.mxu2 }
 0x430   : > { %v5665_v13 = vpop.f32.mrf.mxu0  ;;  %v5638_v27 = vadd.f32 %v5637_v25, %v5625_v10 }
 0x431   : > { %5715 = vst [vmem:[%s10678_s27 + $0x48] sm:$0xff] %v5599_v23 }
 0x436   : > { %v5600_v24 = vpop.f32.mrf.mxu3 }
 0x437   : > { %v5639_v59 = vpop.f32.mrf.mxu2 }
 0x439   : > { %v5676_v63 = vpop.f32.mrf.mxu1 }
 0x43a   : > { %v5677_v34 = vadd.f32 %v5676_v63, %v5664_v32 }
 0x441   : > { %v5678_v47 = vpop.f32.mrf.mxu1 }
 0x44e   : > { %v5650_v60 = vpop.f32.mrf.mxu3 }
 0x44f   : > { %v5651_v28 = vadd.f32 %v5650_v60, %v5638_v27  ;;  %v5689_v30 = vpop.f32.mrf.mxu2 }
 0x450   : > { %v5690_v35 = vadd.f32 %v5689_v30, %v5677_v34 }
 0x451   : > { %5716 = vst [vmem:[%s10678_s27 + $0x50] sm:$0xff] %v5651_v28 }
 0x456   : > { %v5652_v7 = vpop.f32.mrf.mxu3 }
 0x457   : > { %v5691_v48 = vpop.f32.mrf.mxu2 }
 0x46e   : > { %v5702_v36 = vpop.f32.mrf.mxu3 }
 0x46f   : > { %v5703_v39 = vadd.f32 %v5702_v36, %v5690_v35 }
 0x471   : > { %5717 = vst [vmem:[%s10678_s27 + $0x58] sm:$0xff] %v5703_v39 }
 0x472   : > { %9707 = shalt.err (!%p9704_p1)
}
 0x473   : > { %9315 = dma.vmem_to_hbm [thread:$0]  (%p9901_p0), %s5733_s26, 1536, %s5735_s18, %s5719_s5  }
 0x476   : > { %v5704_v40 = vpop.f32.mrf.mxu3 }
 0x477 PF: > { %s11102_s17 = sld [smem:[#allocation24_spill]]  ;;  %p11104_p7 = scmp.ge.s32.totalorder %s9762_s12, 2 }
 0x479   : > { %p9347_p10 = pnand %p11104_p7, %p9907_p5 }
 0x47b   : > { %p9348_p8 = pneg %p9347_p10 }
 0x47d   : > { %s5746_s20 = sand.u32 1, %s11102_s17  }
 0x47e   : > { %s5747_s24 = scalar_lea.sflag [#allocation4], %s5746_s20 }
 0x47f   : > { %9745 = dma.done.wait (%p9348_p8), %s5747_s24, 1536  }
 0x480   : > { %9747 = vsyncadd (%p9348_p8), %s5747_s24, 4294965760  ;;  %s11105_s12 = sld [smem:[#allocation25_spill]]  ;;  %s11107_s30 = smov %s9754_s10 }
 0x481   : > { %s11106_s1 = sld [smem:[#allocation26_spill]]  ;;  %s11108_s10 = smov %s9758_s11 }
 0x486   : > { %p26_p3 = scmp.ge.s32.totalorder %s11105_s12, 4  }
 0x487   : > { %s11109_s11 = smov %s11106_s1 }
 0x488   :  { %28 = sbr.rel (!%p26_p3) target bundleno = 14 (0xe), region = 141 }
 0x48d   :  { %5753 = vsyncpa [#allocation3], 1 }
 0x48e   :  { %5755 = vsyncpa [#allocation3 + $0x1], 1 }
 0x48f   :  { %5756 = vsyncpa [#allocation6], 1 }
 0x490   :  { %5757 = vsyncpa [#allocation9], 1 }
 0x491   :  { %5758 = vsyncpa [#allocation12], 1 }
 0x492   :  { %5759 = vsyncpa [#allocation15], 1 }
 0x493   :  { %5761 = vsyncpa [#allocation15 + $0x1], 1 }
 0x494   :  { %5762 = vsyncpa [#allocation4], 1 }
 0x495   :  { %5764 = vsyncpa [#allocation4 + $0x1], 1 }

// kernel: tpu_custom_call.1
= control target key start
LH: loop header
LB: loop body
LE: loop exit
PB: predicated region body
PF: predicated region fallthrough
CT: control target
= control target key end

     0   :  { %s11059_s0 = inlined_call_operand.hbm [shape: bf16[8,128], index: 0, kind: input, shape index: {}]   ;;  %s11060_s1 = inlined_call_operand.hbm [shape: bf16[128,512], index: 1, kind: input, shape index: {}]   ;;  %s11061_s2 = inlined_call_operand.hbm [shape: f32[1,512], index: 2, kind: input, shape index: {}]   ;;  %s11062_s3 = inlined_call_operand.hbm [shape: bf16[512,512], index: 3, kind: input, shape index: {}]   ;;  %s11063_s4 = inlined_call_operand.hbm [shape: f32[1,512], index: 4, kind: input, shape index: {}]   ;;  %s11064_s5 = inlined_call_operand.hbm [shape: bf16[512,512], index: 5, kind: input, shape index: {}]   ;;  %s11065_s6 = inlined_call_operand.hbm [shape: f32[1,512], index: 6, kind: input, shape index: {}]   ;;  %s11066_s7 = inlined_call_operand.hbm [shape: bf16[2,512,1536], index: 7, kind: input, shape index: {}]   ;;  %s11067_s8 = inlined_call_operand.hbm [shape: f32[1,3072], index: 8, kind: input, shape index: {}]   ;;  %s11068_s9 = inlined_call_operand.hbm [shape: f32[8,3072], index: 9, kind: output, shape index: {}]  }
   0x1   :  { %11075 = sst [smem:[#allocation28_spill]] %s11059_s0 }
   0x2   :  { %11076 = sst [smem:[#allocation29_spill]] %s11060_s1 }
   0x3   :  { %11077 = sst [smem:[#allocation30_spill]] %s11062_s3 }
   0x4   :  { %11078 = sst [smem:[#allocation31_spill]] %s11064_s5 }
   0x5   :  { %14 = vsyncpa [#allocation3], 0 }
   0x6   :  { %15 = vsyncpa [#allocation6], 0 }
   0x7   :  { %16 = vsyncpa [#allocation9], 0 }
   0x8   :  { %17 = vsyncpa [#allocation12], 0 }
   0x9   :  { %18 = vsyncpa [#allocation15], 0 }
   0xa   :  { %20 = vsyncpa [#allocation15 + $0x1], 0 }
   0xb   :  { %21 = vsyncpa [#allocation4], 0 }
   0xc   :  { %23 = vsyncpa [#allocation4 + $0x1], 0  ;;  %s9825_s30 = smov 0   ;;  %s9827_s10 = smov 0  }
   0xd   :  { %s9829_s11 = smov 0   ;;  %s9831_s12 = smov 0  }
   0xe LB: > { %11079 = sst [smem:[#allocation24_spill]] %s9750_s30  ;;  %s9849_s16 = sadd.s32 4294967295, %s9762_s12   ;;  %s9762_s12 = sphi %s9831_s12, %s11105_s12   ;;  %s9758_s11 = sphi %s9829_s11, %s11109_s11   ;;  %s9754_s10 = sphi %s9827_s10, %s11108_s10   ;;  %s9750_s30 = sphi %s9825_s30, %s11107_s30  }
   0xf   : > { %s11080_s1 = sld [smem:[#allocation29_spill]]  ;;  %p5895_p0 = scmp.ge.s32.totalorder %s9762_s12, 1 }
  0x10   : > { %p11074_p1 = scmp.eq.s32.totalorder %s9849_s16, 0  ;;  %p259_p2 = scmp.lt.s32.totalorder %s9762_s12, 3 }
  0x11   : > { %s9764_s18 = smov [#allocation5]   ;;  %s11082_s3 = sld [smem:[#allocation30_spill]] }
  0x12   : > { %p9854_p3 = pnand %p5895_p0, %p259_p2  ;;  %s284_s19 = sshll.u32 %s9764_s18, 4  ;;  %s285_s19 = int_to_ptr.vmem [resolvable:$true] %s284_s19 }
  0x13   : > { %s11084_s5 = sld [smem:[#allocation31_spill]]  ;;  %s9765_s27 = smov [#allocation8]  }
  0x14   : > { %p9317_p4 = pneg %p9854_p3  ;;  %s310_s28 = sshll.u32 %s9765_s27, 4  ;;  %s311_s28 = int_to_ptr.vmem [resolvable:$true] %s310_s28 }
  0x15   : > { %s282_s15 = sshll.u32 %s11080_s1, 4  ;;  %s9766_s29 = smov 256   ;;  %s283_s15 = int_to_ptr.hbm [resolvable:$true] %s282_s15 }
  0x16   : > { %p9866_p6 = pnand %p9317_p4, %p11074_p1  ;;  %s9767_s13 = smov 16  }
  0x17   : > { %s308_s22 = sshll.u32 %s11082_s3, 4  ;;  %s9768_s14 = smov [#allocation11]   ;;  %s309_s22 = int_to_ptr.hbm [resolvable:$true] %s308_s22 }
  0x18   : > { %9323 = dma.hbm_to_vmem [thread:$0]  (!%p9866_p6), %s283_s15, 4096, %s285_s19, [#allocation6], %s9766_s29, %s9766_s29, %s9767_s13  }
  0x19   : > { %s334_s26 = sshll.u32 %s11084_s5, 4  ;;  %s336_s18 = sshll.u32 %s9768_s14, 4  ;;  %s335_s26 = int_to_ptr.hbm [resolvable:$true] %s334_s26  ;;  %s337_s18 = int_to_ptr.vmem [resolvable:$true] %s336_s18 }
  0x1a   : > { %9329 = dma.hbm_to_vmem [thread:$0]  (!%p9866_p6), %s309_s22, 16384, %s311_s28, [#allocation9], %s9766_s29, %s9766_s29, %s9767_s13  }
  0x1b   : > { %9335 = dma.hbm_to_vmem [thread:$0]  (!%p9866_p6), %s335_s26, 16384, %s337_s18, [#allocation12], %s9766_s29, %s9766_s29, %s9767_s13  }
  0x1c   : > { %s5894_s20 = sadd.s32 4294967294, %s9762_s12   ;;  %s9881_s21 = sadd.s32 1, %s9762_s12  }
  0x1d   : > { %11085 = sst [smem:[#allocation25_spill]] %s9881_s21  ;;  %s183_s15 = sadd.s32 1, %s9758_s11 }
  0x1e   : > { %s180_s19 = ssub.s32 %s9762_s12, %s9881_s21  ;;  %p190_p7 = scmp.ne.s32.totalorder %s9758_s11, %s9754_s10 }
  0x1f   : > { %p181_p8 = scmp.eq.s32.totalorder %s180_s19, 0  ;;  %p191_p9 = scmp.eq.s32.totalorder %s9762_s12, 0 }
  0x20   : > { %p196_p10 = scmp.ne.s32.totalorder %s9754_s10, %s9750_s30  ;;  %p246_p11 = scmp.eq.s32.totalorder %s9849_s16, 1 }
  0x21   : > { %s9893_s22 = scalar_select %p181_p8, %s9758_s11, %s183_s15  }
  0x22   : > { %p192_p12 = por %p191_p9, %p190_p7  ;;  %p9897_p13 = por %p11074_p1, %p196_p10 }
  0x23   : > { %11086 = sst [smem:[#allocation26_spill]] %s9893_s22  ;;  %p9901_p0 = por %p246_p11, %p190_p7 }
  0x24   : > { %p252_p2 = scmp.eq.s32.totalorder %s5894_s20, 1  ;;  %p9357_p4 = scmp.lt.s32.totalorder %s9762_s12, 2 }
  0x25   : > { %s362_s26 = sand.u32 1, %s9762_s12   ;;  %s11071_s28 = sand.u32 1, %s9758_s11  }
  0x26   : > { %p9907_p5 = por %p252_p2, %p196_p10  ;;  %s9278_s29 = smul.u32 3072, %s9762_s12 }
  0x27   : > { %s9277_s13 = smul.u32 3072, %s11071_s28  ;;  %p9915_p8 = pnand %p9357_p4, %p192_p12 }
  0x28   : > { %s11089_s27 = scalar_select %p9907_p5, 1, 0 }
  0x29   : > { %s371_s20 = scalar_lea.hbm %s11066_s7, %s9278_s29  ;;  %s366_s1 = scalar_lea.vmem [#allocation14], %s9277_s13 }
  0x2a   : > { %11090 = sst [smem:[#allocation27_spill]] %s11089_s27  ;;  %s372_s19 = sshll.u32 %s371_s20, 4  ;;  %s373_s19 = int_to_ptr.hbm [resolvable:$true] %s372_s19 }
  0x2b   : > { %s374_s3 = sshll.u32 %s366_s1, 4  ;;  %s11092_s0 = sld [smem:[#allocation28_spill]]  ;;  %s375_s3 = int_to_ptr.vmem [resolvable:$true] %s374_s3 }
  0x2c   : > { %s9925_s28 = scalar_lea.sflag [#allocation15], %s362_s26  ;;  %s9500_s27 = sshra.s32 %s373_s19, 4  ;;  %s9501_s27 = int_to_ptr.hbm [resolvable:$true] %s9500_s27 }
  0x2d   : > { %s9502_s30 = scalar_lea.hbm %s9501_s27, 3072  ;;  %p9504_p9 = pneg %p9915_p8 }
  0x2e   : > { %p9503_p7 = scmp.ne.s32.totalorder %s9501_s27, %s9502_s30  ;;  %s9507_s1 = scalar_lea.hbm %s11066_s7, 6144 }
  0x2f   : > { %p9508_p12 = scmp.lt.s32.totalorder %s9501_s27, %s11066_s7  ;;  %p9509_p2 = scmp.lt.s32.totalorder %s9507_s1, %s9502_s30 }
  0x30   : > { %p9505_p10 = pnand %p9504_p9, %p9503_p7 }
  0x31   : > { %s271_s21 = sshll.u32 %s11092_s0, 4  ;;  %p9510_p4 = por %p9509_p2, %p9508_p12  ;;  %s272_s21 = int_to_ptr.hbm [resolvable:$true] %s271_s21 }
  0x32   : > { %p9506_p11 = pneg %p9505_p10 }
  0x34   : > { %p9511_p1 = pnand %p9510_p4, %p9506_p11 }
  0x36   : > { %9514 = shalt.err (!%p9511_p1)
}
  0x37   : > { %s9769_s5 = smov 768   ;;  %s9770_s22 = smov 48  }
  0x38   : > { %9342 = dma.hbm_to_vmem [thread:$0]  (!%p9915_p8), %s373_s19, 49152, %s375_s3, %s9925_s28, %s9769_s5, %s9769_s5, %s9770_s22  }
  0x39   : > { %s9771_s26 = smov [#allocation2]   ;;  %s297_s27 = sshll.u32 %s11061_s2, 4  ;;  %s298_s27 = int_to_ptr.hbm [resolvable:$true] %s297_s27 }
  0x3a   : > { %s273_s20 = sshll.u32 %s9771_s26, 4  ;;  %s323_s18 = sshll.u32 %s11063_s4, 4  ;;  %s274_s20 = int_to_ptr.vmem [resolvable:$true] %s273_s20  ;;  %s324_s18 = int_to_ptr.hbm [resolvable:$true] %s323_s18 }
  0x3b   : > { %9320 = dma.hbm_to_vmem [thread:$0]  (!%p9866_p6), %s272_s21, 64, %s274_s20, [#allocation3]  }
  0x3c   : > { %s9772_s15 = smov [#allocation7]   ;;  %s9773_s19 = smov [#allocation10]  }
  0x3d   : > { %s299_s3 = sshll.u32 %s9772_s15, 4  ;;  %s325_s5 = sshll.u32 %s9773_s19, 4  ;;  %s300_s3 = int_to_ptr.vmem [resolvable:$true] %s299_s3  ;;  %s326_s5 = int_to_ptr.vmem [resolvable:$true] %s325_s5 }
  0x3e   : > { %9326 = dma.hbm_to_vmem [thread:$0]  (!%p9866_p6), %s298_s27, 64, %s300_s3, [#allocation6]  }
  0x3f   : > { %s349_s29 = sshll.u32 %s11065_s6, 4  ;;  %s11093_s21 = sand.u32 1, %s9758_s11   ;;  %s350_s29 = int_to_ptr.hbm [resolvable:$true] %s349_s29 }
  0x40   : > { %9332 = dma.hbm_to_vmem [thread:$0]  (!%p9866_p6), %s324_s18, 64, %s326_s5, [#allocation9]  }
  0x41   : > { %s9279_s20 = smul.u32 12, %s11093_s21  ;;  %s9774_s13 = smov [#allocation13]  }
  0x42   : > { %s351_s30 = sshll.u32 %s9774_s13, 4  ;;  %s389_s1 = smul.u32 12, %s9762_s12  ;;  %s352_s30 = int_to_ptr.vmem [resolvable:$true] %s351_s30 }
  0x43   : > { %9338 = dma.hbm_to_vmem [thread:$0]  (!%p9866_p6), %s350_s29, 64, %s352_s30, [#allocation12]  }
  0x44   : > { %s392_s3 = scalar_lea.hbm %s11067_s8, %s389_s1  ;;  %s388_s19 = scalar_lea.vmem [#allocation16], %s9279_s20 }
  0x45   : > { %s396_s22 = sshll.u32 %s388_s19, 4  ;;  %s394_s26 = sshll.u32 %s392_s3, 4  ;;  %s397_s22 = int_to_ptr.vmem [resolvable:$true] %s396_s22  ;;  %s395_s26 = int_to_ptr.hbm [resolvable:$true] %s394_s26 }
  0x46   : > { %s9650_s0 = sshra.s32 %s395_s26, 4  ;;  %s9657_s29 = scalar_lea.hbm %s11067_s8, 24  ;;  %s9651_s0 = int_to_ptr.hbm [resolvable:$true] %s9650_s0 }
  0x47   : > { %s9652_s18 = scalar_lea.hbm %s9651_s0, 12  ;;  %p9658_p6 = scmp.lt.s32.totalorder %s9651_s0, %s11067_s8 }
  0x48   : > { %p9653_p1 = scmp.ne.s32.totalorder %s9651_s0, %s9652_s18  ;;  %p9659_p11 = scmp.lt.s32.totalorder %s9657_s29, %s9652_s18 }
  0x4a   : > { %p9655_p7 = pnand %p9653_p1, %p9504_p9  ;;  %p9660_p12 = por %p9659_p11, %p9658_p6 }
  0x4c   : > { %p9656_p10 = pneg %p9655_p7 }
  0x4e   : > { %p9661_p2 = pnand %p9660_p12, %p9656_p10 }
  0x50   : > { %9664 = shalt.err (!%p9661_p2)
}
  0x51   : > { %9345 = dma.hbm_to_vmem [thread:$0]  (!%p9915_p8), %s395_s26, 192, %s397_s22, %s9925_s28  }
  0x52   : > { %405 = sbr.rel (%p9854_p3) target bundleno = 1143 (0x477), region = 56  ;;  %p11094_p9 = scmp.eq.s32.totalorder (!%p9854_p3), %s9849_s16, 0 }
  0x57   : > { %9725 = dma.done.wait (%p11094_p9), [#allocation3], 64   ;;  %p11095_p4 = pmov %p11094_p9 }
  0x59   : > { %9727 = vsyncadd (%p11095_p4), [#allocation3], 4294967232  ;;  %p11096_p1 = pmov %p11095_p4 }
  0x5b   : > { %9729 = dma.done.wait (%p11096_p1), [#allocation6], 4160   ;;  %p11097_p7 = pmov %p11096_p1 }
  0x5c   : > { %p11098_p10 = pmov %p11096_p1 }
  0x5d   : > { %9731 = vsyncadd (%p11097_p7), [#allocation6], 4294963136 }
  0x5e   : > { %9733 = dma.done.wait (%p11098_p10), [#allocation9], 16448   ;;  %p11099_p8 = pmov %p11096_p1 }
  0x5f   : > { %p11100_p3 = pmov %p11096_p1 }
  0x60   : > { %9735 = vsyncadd (%p11099_p8), [#allocation9], 4294950848 }
  0x61   : > { %9737 = dma.done.wait (%p11100_p3), [#allocation12], 16448   ;;  %p11101_p6 = pmov %p11096_p1 }
  0x62   : > { %s442_s0 = sand.u32 1, %s9849_s16   ;;  %s9996_s17 = sand.u32 1, %s9754_s10  }
  0x63   : > { %9739 = vsyncadd (%p11101_p6), [#allocation12], 4294950848  ;;  %s9280_s28 = smul.u32 3072, %s9996_s17  ;;  %s443_s14 = scalar_lea.sflag [#allocation15], %s442_s0 }
  0x65   : > { %s9999_s20 = scalar_lea.vmem [#allocation14], %s9280_s28 }
  0x66   : > { %9741 = dma.done.wait (%p9897_p13), %s443_s14, 49344  }
  0x67   : > { %9743 = vsyncadd (%p9897_p13), %s443_s14, 4294917952  ;;  %v6027_v0 = vld [vmem:[#allocation5 + $0xe0] sm:$0xf]  ;;  %v8634_v1 = vld [vmem:[#allocation5 + $0xec] sm:$0xf0]  ;;  %s9281_s24 = smul.u32 12, %s9996_s17 }
  0x68   : > { %v8632_v2 = vld [vmem:[#allocation5 + $0xe4] sm:$0xf]  ;;  %v6028_v3 = vor.u32 %v8634_v1, %v6027_v0  ;;  %v6029_v4 = vld [vmem:[#allocation5 + $0xf0] sm:$0xf0]  ;;  %v6035_v5 = vld [vmem:[#allocation5 + $0xe8] sm:$0xf] }
  0x69   : > { %v8635_v6 = vld [vmem:[#allocation5 + $0xf4] sm:$0xf0]  ;;  %v6032_v7 = vor.u32 %v8632_v2, %v6029_v4  ;;  %v8633_v9 = vld [vmem:[#allocation5 + $0xec] sm:$0xf]  ;;  %v6037_v10 = vld [vmem:[#allocation5 + $0xf8] sm:$0xf0] }
  0x6a   : > { %v6036_v8 = vor.u32 %v8635_v6, %v6035_v5  ;;  %v6011_v11 = vld [vmem:[#allocation5 + $0xc0] sm:$0xf]  ;;  %702 = vmatpush.bf16.msra.mxu0 %v6028_v3  ;;  %v6040_v12 = vor.u32 %v8633_v9, %v6037_v10  ;;  %v8630_v13 = vld [vmem:[#allocation5 + $0xcc] sm:$0xf0]  ;;  %v8628_v14 = vld [vmem:[#allocation5 + $0xc4] sm:$0xf] }
  0x6b   : > { %v6013_v15 = vld [vmem:[#allocation5 + $0xd0] sm:$0xf0]  ;;  %715 = vmatpush.bf16.msra.mxu1 %v6032_v7  ;;  %v6012_v16 = vor.u32 %v8630_v13, %v6011_v11  ;;  %v6019_v18 = vld [vmem:[#allocation5 + $0xc8] sm:$0xf]  ;;  %v8631_v19 = vld [vmem:[#allocation5 + $0xd4] sm:$0xf0] }
  0x6c   : > { %728 = vmatpush.bf16.msra.mxu2 %v6036_v8  ;;  %v6016_v17 = vor.u32 %v8628_v14, %v6013_v15  ;;  %v8629_v20 = vld [vmem:[#allocation5 + $0xcc] sm:$0xf]  ;;  %741 = vmatpush.bf16.msra.mxu3 %v6040_v12  ;;  %v6020_v21 = vor.u32 %v8631_v19, %v6019_v18  ;;  %v6021_v22 = vld [vmem:[#allocation5 + $0xd8] sm:$0xf0]  ;;  %v5995_v23 = vld [vmem:[#allocation5 + $0xa0] sm:$0xf] }
  0x6d   : > { %v8626_v24 = vld [vmem:[#allocation5 + $0xac] sm:$0xf0]  ;;  %v6024_v25 = vor.u32 %v8629_v20, %v6021_v22  ;;  %v8624_v26 = vld [vmem:[#allocation5 + $0xa4] sm:$0xf]  ;;  %v5997_v27 = vld [vmem:[#allocation5 + $0xb0] sm:$0xf0] }
  0x6e   : > { %v6003_v28 = vld [vmem:[#allocation5 + $0xa8] sm:$0xf]  ;;  %703 = vmatpush.bf16.msra.mxu0 %v6012_v16  ;;  %v5996_v29 = vor.u32 %v8626_v24, %v5995_v23  ;;  %v8627_v30 = vld [vmem:[#allocation5 + $0xb4] sm:$0xf0]  ;;  %v8625_v31 = vld [vmem:[#allocation5 + $0xac] sm:$0xf]  ;;  %v6000_v33 = vor.u32 %v8624_v26, %v5997_v27 }
  0x6f   : > { %v6005_v32 = vld [vmem:[#allocation5 + $0xb8] sm:$0xf0]  ;;  %716 = vmatpush.bf16.msra.mxu1 %v6016_v17  ;;  %v6004_v34 = vor.u32 %v8627_v30, %v6003_v28  ;;  %v5979_v35 = vld [vmem:[#allocation5 + $0x80] sm:$0xf]  ;;  %v8622_v36 = vld [vmem:[#allocation5 + $0x8c] sm:$0xf0] }
  0x70   : > { %729 = vmatpush.bf16.msra.mxu2 %v6020_v21  ;;  %v8620_v37 = vld [vmem:[#allocation5 + $0x84] sm:$0xf]  ;;  %742 = vmatpush.bf16.msra.mxu3 %v6024_v25  ;;  %v6008_v38 = vor.u32 %v8625_v31, %v6005_v32  ;;  %v5981_v39 = vld [vmem:[#allocation5 + $0x90] sm:$0xf0]  ;;  %v5987_v40 = vld [vmem:[#allocation5 + $0x88] sm:$0xf]  ;;  %v5980_v44 = vor.u32 %v8622_v36, %v5979_v35 }
  0x71   : > { %v8623_v41 = vld [vmem:[#allocation5 + $0x94] sm:$0xf0]  ;;  %v8621_v42 = vld [vmem:[#allocation5 + $0x8c] sm:$0xf]  ;;  %v5989_v43 = vld [vmem:[#allocation5 + $0x98] sm:$0xf0]  ;;  %v5984_v45 = vor.u32 %v8620_v37, %v5981_v39 }
  0x72   : > { %704 = vmatpush.bf16.msra.mxu0 %v5996_v29  ;;  %v5988_v46 = vor.u32 %v8623_v41, %v5987_v40  ;;  %v5963_v47 = vld [vmem:[#allocation5 + $0x60] sm:$0xf]  ;;  %v8618_v48 = vld [vmem:[#allocation5 + $0x6c] sm:$0xf0]  ;;  %v8616_v49 = vld [vmem:[#allocation5 + $0x64] sm:$0xf]  ;;  %v5992_v50 = vor.u32 %v8621_v42, %v5989_v43 }
  0x73   : > { %717 = vmatpush.bf16.msra.mxu1 %v6000_v33  ;;  %v5965_v51 = vld [vmem:[#allocation5 + $0x70] sm:$0xf0]  ;;  %v5971_v52 = vld [vmem:[#allocation5 + $0x68] sm:$0xf]  ;;  %v8619_v53 = vld [vmem:[#allocation5 + $0x74] sm:$0xf0]  ;;  %v5964_v56 = vor.u32 %v8618_v48, %v5963_v47 }
  0x74   : > { %730 = vmatpush.bf16.msra.mxu2 %v6004_v34  ;;  %743 = vmatpush.bf16.msra.mxu3 %v6008_v38  ;;  %v8617_v54 = vld [vmem:[#allocation5 + $0x6c] sm:$0xf]  ;;  %v5973_v55 = vld [vmem:[#allocation5 + $0x78] sm:$0xf0]  ;;  %v5968_v57 = vor.u32 %v8616_v49, %v5965_v51  ;;  %v5972_v58 = vor.u32 %v8619_v53, %v5971_v52  ;;  %v5947_v59 = vld [vmem:[#allocation5 + $0x40] sm:$0xf] }
  0x75   : > { %v8614_v60 = vld [vmem:[#allocation5 + $0x4c] sm:$0xf0]  ;;  %v8612_v61 = vld [vmem:[#allocation5 + $0x44] sm:$0xf]  ;;  %v5976_v62 = vor.u32 %v8617_v54, %v5973_v55  ;;  %v5949_v63 = vld [vmem:[#allocation5 + $0x50] sm:$0xf0] }
  0x76   : > { %705 = vmatpush.bf16.msra.mxu0 %v5980_v44  ;;  %v5955_v0 = vld [vmem:[#allocation5 + $0x48] sm:$0xf]  ;;  %v8615_v1 = vld [vmem:[#allocation5 + $0x54] sm:$0xf0]  ;;  %v8613_v2 = vld [vmem:[#allocation5 + $0x4c] sm:$0xf]  ;;  %v5948_v4 = vor.u32 %v8614_v60, %v5947_v59  ;;  %v5952_v5 = vor.u32 %v8612_v61, %v5949_v63 }
  0x77   : > { %718 = vmatpush.bf16.msra.mxu1 %v5984_v45  ;;  %v5957_v3 = vld [vmem:[#allocation5 + $0x58] sm:$0xf0]  ;;  %v5956_v6 = vor.u32 %v8615_v1, %v5955_v0  ;;  %v5931_v7 = vld [vmem:[#allocation5 + $0x20] sm:$0xf]  ;;  %v8610_v8 = vld [vmem:[#allocation5 + $0x2c] sm:$0xf0] }
  0x78   : > { %731 = vmatpush.bf16.msra.mxu2 %v5988_v46  ;;  %744 = vmatpush.bf16.msra.mxu3 %v5992_v50  ;;  %v8608_v9 = vld [vmem:[#allocation5 + $0x24] sm:$0xf]  ;;  %v5960_v10 = vor.u32 %v8613_v2, %v5957_v3  ;;  %v5933_v11 = vld [vmem:[#allocation5 + $0x30] sm:$0xf0]  ;;  %v5939_v12 = vld [vmem:[#allocation5 + $0x28] sm:$0xf]  ;;  %v5932_v16 = vor.u32 %v8610_v8, %v5931_v7 }
  0x79   : > { %v8611_v13 = vld [vmem:[#allocation5 + $0x34] sm:$0xf0]  ;;  %v8609_v14 = vld [vmem:[#allocation5 + $0x2c] sm:$0xf]  ;;  %v5941_v15 = vld [vmem:[#allocation5 + $0x38] sm:$0xf0]  ;;  %v5936_v18 = vor.u32 %v8608_v9, %v5933_v11 }
  0x7a   : > { %706 = vmatpush.bf16.msra.mxu0 %v5964_v56  ;;  %v5915_v17 = vld [vmem:[#allocation5] sm:$0xf]  ;;  %v5940_v19 = vor.u32 %v8611_v13, %v5939_v12  ;;  %v8606_v20 = vld [vmem:[#allocation5 + $0xc] sm:$0xf0]  ;;  %v8604_v21 = vld [vmem:[#allocation5 + $0x4] sm:$0xf]  ;;  %v5944_v23 = vor.u32 %v8609_v14, %v5941_v15 }
  0x7b   : > { %719 = vmatpush.bf16.msra.mxu1 %v5968_v57  ;;  %v5917_v22 = vld [vmem:[#allocation5 + $0x10] sm:$0xf0]  ;;  %v5923_v24 = vld [vmem:[#allocation5 + $0x8] sm:$0xf]  ;;  %v8607_v25 = vld [vmem:[#allocation5 + $0x14] sm:$0xf0]  ;;  %v5916_v30 = vor.u32 %v8606_v20, %v5915_v17 }
  0x7c   : > { %732 = vmatpush.bf16.msra.mxu2 %v5972_v58  ;;  %745 = vmatpush.bf16.msra.mxu3 %v5976_v62  ;;  %v8605_v26 = vld [vmem:[#allocation5 + $0xc] sm:$0xf]  ;;  %v5925_v27 = vld [vmem:[#allocation5 + $0x18] sm:$0xf0]  ;;  %v6155_v28 = vld [vmem:[#allocation8 + $0xe0] sm:$0xf]  ;;  %v5920_v33 = vor.u32 %v8604_v21, %v5917_v22  ;;  %v5924_v34 = vor.u32 %v8607_v25, %v5923_v24 }
  0x7d   : > { %v8666_v29 = vld [vmem:[#allocation8 + $0xec] sm:$0xf0]  ;;  %v6283_v31 = vld [vmem:[#allocation8 + $0x1e0] sm:$0xf]  ;;  %v5928_v35 = vor.u32 %v8605_v26, %v5925_v27  ;;  %v499_v44 = vld [vmem:[#allocation2] sm:$0xf] }
  0x7e   : > { %707 = vmatpush.bf16.msra.mxu0 %v5948_v4  ;;  %v8698_v32 = vld [vmem:[#allocation8 + $0x1ec] sm:$0xf0]  ;;  %v6156_v36 = vor.u32 %v8666_v29, %v6155_v28  ;;  %v6139_v37 = vld [vmem:[#allocation8 + $0xc0] sm:$0xf]  ;;  %s10630_s30 = scalar_lea.vmem [#allocation16], %s9281_s24  ;;  %s9282_s1 = smul.u32 96, %s9996_s17 }
  0x7f   : > { %720 = vmatpush.bf16.msra.mxu1 %v5952_v5  ;;  %v6411_v38 = vld [vmem:[#allocation8 + $0x2e0] sm:$0xf]  ;;  %v8730_v39 = vld [vmem:[#allocation8 + $0x2ec] sm:$0xf0]  ;;  %v6284_v40 = vor.u32 %v8698_v32, %v6283_v31  ;;  %s9276_s15 = smul.u32 96, %s9849_s16  ;;  %s5719_s5 = scalar_lea.sflag [#allocation4], %s9996_s17 }
  0x80   : > { %733 = vmatpush.bf16.msra.mxu2 %v5956_v6  ;;  %746 = vmatpush.bf16.msra.mxu3 %v5960_v10  ;;  %v8662_v41 = vld [vmem:[#allocation8 + $0xcc] sm:$0xf0]  ;;  %v6539_v42 = vld [vmem:[#allocation8 + $0x3e0] sm:$0xf]  ;;  %v6412_v47 = vor.u32 %v8730_v39, %v6411_v38  ;;  %s10678_s27 = scalar_lea.vmem [#allocation17], %s9282_s1  ;;  %s9700_s13 = scalar_lea.hbm %s11068_s9, 192 }
  0x81   : > { %v8762_v43 = vld [vmem:[#allocation8 + $0x3ec] sm:$0xf0]  ;;  %v6267_v45 = vld [vmem:[#allocation8 + $0x1c0] sm:$0xf]  ;;  %v6140_v48 = vor.u32 %v8662_v41, %v6139_v37  ;;  %s5730_s22 = scalar_lea.hbm %s11068_s9, %s9276_s15  ;;  %s5732_s26 = sshll.u32 %s10678_s27, 4  ;;  %s5733_s26 = int_to_ptr.vmem [resolvable:$true] %s5732_s26 }
  0x82   : > { %708 = vmatpush.bf16.msra.mxu0 %v5932_v16  ;;  %v8694_v46 = vld [vmem:[#allocation8 + $0x1cc] sm:$0xf0]  ;;  %v6540_v49 = vor.u32 %v8762_v43, %v6539_v42  ;;  %v6123_v50 = vld [vmem:[#allocation8 + $0xa0] sm:$0xf]  ;;  %s5734_s18 = sshll.u32 %s5730_s22, 4  ;;  %s5735_s18 = int_to_ptr.hbm [resolvable:$true] %s5734_s18 }
  0x83   : > { %721 = vmatpush.bf16.msra.mxu1 %v5936_v18  ;;  %v6395_v51 = vld [vmem:[#allocation8 + $0x2c0] sm:$0xf]  ;;  %v8726_v52 = vld [vmem:[#allocation8 + $0x2cc] sm:$0xf0]  ;;  %v6268_v53 = vor.u32 %v8694_v46, %v6267_v45  ;;  %s9694_s23 = sshra.s32 %s5735_s18, 4  ;;  %s9695_s23 = int_to_ptr.hbm [resolvable:$true] %s9694_s23 }
  0x84   : > { %734 = vmatpush.bf16.msra.mxu2 %v5940_v19  ;;  %747 = vmatpush.bf16.msra.mxu3 %v5944_v23  ;;  %v8658_v54 = vld [vmem:[#allocation8 + $0xac] sm:$0xf0]  ;;  %v6523_v55 = vld [vmem:[#allocation8 + $0x3c0] sm:$0xf]  ;;  %v6396_v59 = vor.u32 %v8726_v52, %v6395_v51  ;;  %s9696_s29 = scalar_lea.hbm %s9695_s23, 96  ;;  %p9701_p2 = scmp.lt.s32.totalorder %s9695_s23, %s11068_s9 }
  0x85   : > { %v8758_v56 = vld [vmem:[#allocation8 + $0x3cc] sm:$0xf0]  ;;  %v6251_v57 = vld [vmem:[#allocation8 + $0x1a0] sm:$0xf]  ;;  %v6124_v60 = vor.u32 %v8658_v54, %v6123_v50  ;;  %p9697_p13 = scmp.ne.s32.totalorder %s9695_s23, %s9696_s29  ;;  %p9702_p9 = scmp.lt.s32.totalorder %s9700_s13, %s9696_s29 }
  0x86   : > { %709 = vmatpush.bf16.msra.mxu0 %v5916_v30  ;;  %v8690_v58 = vld [vmem:[#allocation8 + $0x1ac] sm:$0xf0]  ;;  %v6524_v61 = vor.u32 %v8758_v56, %v6523_v55  ;;  %v6107_v62 = vld [vmem:[#allocation8 + $0x80] sm:$0xf]  ;;  %v8664_v55 = vld [vmem:[#allocation8 + $0xe4] sm:$0xf] }
  0x87   : > { %722 = vmatpush.bf16.msra.mxu1 %v5920_v33  ;;  %v6379_v63 = vld [vmem:[#allocation8 + $0x2a0] sm:$0xf]  ;;  %v8722_v0 = vld [vmem:[#allocation8 + $0x2ac] sm:$0xf0]  ;;  %v6252_v1 = vor.u32 %v8690_v58, %v6251_v57  ;;  %v6157_v56 = vld [vmem:[#allocation8 + $0xf0] sm:$0xf0]  ;;  %p9698_p11 = pnand %p9697_p13, %p9901_p0  ;;  %p9703_p4 = por %p9702_p9, %p9701_p2 }
  0x88   : > { %735 = vmatpush.bf16.msra.mxu2 %v5924_v34  ;;  %748 = vmatpush.bf16.msra.mxu3 %v5928_v35  ;;  %v8654_v2 = vld [vmem:[#allocation8 + $0x8c] sm:$0xf0]  ;;  %v6507_v3 = vld [vmem:[#allocation8 + $0x3a0] sm:$0xf]  ;;  %v6380_v7 = vor.u32 %v8722_v0, %v6379_v63  ;;  %v8696_v57 = vld [vmem:[#allocation8 + $0x1e4] sm:$0xf] }
  0x89   : > { %710 = vmatmul.bf16.vlgmr.msra.gmra.mxu0 %v499_v44  ;;  %v8754_v4 = vld [vmem:[#allocation8 + $0x3ac] sm:$0xf0]  ;;  %v6235_v5 = vld [vmem:[#allocation8 + $0x180] sm:$0xf]  ;;  %v6108_v8 = vor.u32 %v8654_v2, %v6107_v62  ;;  %v6285_v58 = vld [vmem:[#allocation8 + $0x1f0] sm:$0xf0]  ;;  %p9699_p12 = pneg %p9698_p11 }
  0x8a   : > { %1540 = vmatpush.bf16.msrb.mxu0 %v6156_v36  ;;  %723 = vmatmul.bf16.vlgmr.msra.gmra.mxu1 %v499_v44  ;;  %v8686_v6 = vld [vmem:[#allocation8 + $0x18c] sm:$0xf0]  ;;  %v6508_v9 = vor.u32 %v8754_v4, %v6507_v3  ;;  %v6091_v10 = vld [vmem:[#allocation8 + $0x60] sm:$0xf]  ;;  %v8660_v62 = vld [vmem:[#allocation8 + $0xc4] sm:$0xf]  ;;  %v6160_v3 = vor.u32 %v8664_v55, %v6157_v56 }
  0x8b   : > { %1553 = vmatpush.bf16.msrb.mxu1 %v6284_v40  ;;  %736 = vmatmul.bf16.vlgmr.msra.gmra.mxu2 %v499_v44  ;;  %v6363_v11 = vld [vmem:[#allocation8 + $0x280] sm:$0xf]  ;;  %v8718_v12 = vld [vmem:[#allocation8 + $0x28c] sm:$0xf0]  ;;  %v6236_v13 = vor.u32 %v8686_v6, %v6235_v5  ;;  %v8728_v5 = vld [vmem:[#allocation8 + $0x2e4] sm:$0xf]  ;;  %p9704_p1 = pnand %p9703_p4, %p9699_p12 }
  0x8c   : > { %749 = vmatmul.bf16.vlgmr.msra.gmra.mxu3 %v499_v44  ;;  %1566 = vmatpush.bf16.msrb.mxu2 %v6412_v47  ;;  %v8650_v14 = vld [vmem:[#allocation8 + $0x6c] sm:$0xf0]  ;;  %v6491_v15 = vld [vmem:[#allocation8 + $0x380] sm:$0xf]  ;;  %v6364_v19 = vor.u32 %v8718_v12, %v6363_v11  ;;  %v6413_v6 = vld [vmem:[#allocation8 + $0x2f0] sm:$0xf0] }
  0x8d   : > { %1579 = vmatpush.bf16.msrb.mxu3 %v6540_v49  ;;  %v8750_v16 = vld [vmem:[#allocation8 + $0x38c] sm:$0xf0]  ;;  %v6219_v17 = vld [vmem:[#allocation8 + $0x160] sm:$0xf]  ;;  %v6092_v20 = vor.u32 %v8650_v14, %v6091_v10  ;;  %v6541_v10 = vld [vmem:[#allocation8 + $0x3f0] sm:$0xf0] }
  0x8e   : > { %1541 = vmatpush.bf16.msrb.mxu0 %v6140_v48  ;;  %v8682_v18 = vld [vmem:[#allocation8 + $0x16c] sm:$0xf0]  ;;  %v6492_v21 = vor.u32 %v8750_v16, %v6491_v15  ;;  %v6075_v22 = vld [vmem:[#allocation8 + $0x40] sm:$0xf]  ;;  %v8692_v11 = vld [vmem:[#allocation8 + $0x1c4] sm:$0xf]  ;;  %v6416_v15 = vor.u32 %v8728_v5, %v6413_v6 }
  0x8f   : > { %1554 = vmatpush.bf16.msrb.mxu1 %v6268_v53  ;;  %v6347_v23 = vld [vmem:[#allocation8 + $0x260] sm:$0xf]  ;;  %v8714_v24 = vld [vmem:[#allocation8 + $0x26c] sm:$0xf0]  ;;  %v6220_v25 = vor.u32 %v8682_v18, %v6219_v17  ;;  %v6269_v12 = vld [vmem:[#allocation8 + $0x1d0] sm:$0xf0] }
  0x90   : > { %1567 = vmatpush.bf16.msrb.mxu2 %v6396_v59  ;;  %v8646_v26 = vld [vmem:[#allocation8 + $0x4c] sm:$0xf0]  ;;  %v6475_v27 = vld [vmem:[#allocation8 + $0x360] sm:$0xf]  ;;  %v6348_v31 = vor.u32 %v8714_v24, %v6347_v23  ;;  %v8656_v18 = vld [vmem:[#allocation8 + $0xa4] sm:$0xf] }
  0x91   : > { %1580 = vmatpush.bf16.msrb.mxu3 %v6524_v61  ;;  %v8746_v28 = vld [vmem:[#allocation8 + $0x36c] sm:$0xf0]  ;;  %v6203_v29 = vld [vmem:[#allocation8 + $0x140] sm:$0xf]  ;;  %v6076_v32 = vor.u32 %v8646_v26, %v6075_v22  ;;  %v6125_v22 = vld [vmem:[#allocation8 + $0xb0] sm:$0xf0] }
  0x92   : > { %1542 = vmatpush.bf16.msrb.mxu0 %v6124_v60  ;;  %v8678_v30 = vld [vmem:[#allocation8 + $0x14c] sm:$0xf0]  ;;  %v6476_v33 = vor.u32 %v8746_v28, %v6475_v27  ;;  %v6059_v34 = vld [vmem:[#allocation8 + $0x20] sm:$0xf]  ;;  %v8756_v23 = vld [vmem:[#allocation8 + $0x3c4] sm:$0xf]  ;;  %v6128_v28 = vor.u32 %v8656_v18, %v6125_v22 }
  0x93   : > { %1555 = vmatpush.bf16.msrb.mxu1 %v6252_v1  ;;  %v6331_v35 = vld [vmem:[#allocation8 + $0x240] sm:$0xf]  ;;  %v8710_v36 = vld [vmem:[#allocation8 + $0x24c] sm:$0xf0]  ;;  %v6204_v37 = vor.u32 %v8678_v30, %v6203_v29  ;;  %v6525_v24 = vld [vmem:[#allocation8 + $0x3d0] sm:$0xf0] }
  0x94   : > { %1568 = vmatpush.bf16.msrb.mxu2 %v6380_v7  ;;  %v8642_v38 = vld [vmem:[#allocation8 + $0x2c] sm:$0xf0]  ;;  %v6459_v39 = vld [vmem:[#allocation8 + $0x340] sm:$0xf]  ;;  %v6332_v43 = vor.u32 %v8710_v36, %v6331_v35  ;;  %v6288_v7 = vor.u32 %v8696_v57, %v6285_v58  ;;  %v6253_v26 = vld [vmem:[#allocation8 + $0x1b0] sm:$0xf0]  ;;  %v6528_v29 = vor.u32 %v8756_v23, %v6525_v24 }
  0x95   : > { %1581 = vmatpush.bf16.msrb.mxu3 %v6508_v9  ;;  %v8742_v40 = vld [vmem:[#allocation8 + $0x34c] sm:$0xf0]  ;;  %v6187_v41 = vld [vmem:[#allocation8 + $0x120] sm:$0xf]  ;;  %v6060_v45 = vor.u32 %v8642_v38, %v6059_v34  ;;  %v8760_v9 = vld [vmem:[#allocation8 + $0x3e4] sm:$0xf] }
  0x96   : > { %1543 = vmatpush.bf16.msrb.mxu0 %v6108_v8  ;;  %v8674_v42 = vld [vmem:[#allocation8 + $0x12c] sm:$0xf0]  ;;  %v6043_v44 = vld [vmem:[#allocation8] sm:$0xf]  ;;  %v6460_v46 = vor.u32 %v8742_v40, %v6459_v39  ;;  %v6141_v8 = vld [vmem:[#allocation8 + $0xd0] sm:$0xf0]  ;;  %v6544_v17 = vor.u32 %v8760_v9, %v6541_v10 }
  0x97   : > { %1556 = vmatpush.bf16.msrb.mxu1 %v6236_v13  ;;  %v8638_v47 = vld [vmem:[#allocation8 + $0xc] sm:$0xf0]  ;;  %v6315_v48 = vld [vmem:[#allocation8 + $0x220] sm:$0xf]  ;;  %v6188_v50 = vor.u32 %v8674_v42, %v6187_v41  ;;  %v6144_v16 = vor.u32 %v8660_v62, %v6141_v8  ;;  %v8652_v30 = vld [vmem:[#allocation8 + $0x84] sm:$0xf] }
  0x98   : > { %1569 = vmatpush.bf16.msrb.mxu2 %v6364_v19  ;;  %v8706_v49 = vld [vmem:[#allocation8 + $0x22c] sm:$0xf0]  ;;  %v6171_v51 = vld [vmem:[#allocation8 + $0x100] sm:$0xf]  ;;  %v6044_v60 = vor.u32 %v8638_v47, %v6043_v44  ;;  %v8724_v19 = vld [vmem:[#allocation8 + $0x2c4] sm:$0xf] }
  0x99   : > { %1582 = vmatpush.bf16.msrb.mxu3 %v6492_v21  ;;  %v6443_v52 = vld [vmem:[#allocation8 + $0x320] sm:$0xf]  ;;  %v8738_v53 = vld [vmem:[#allocation8 + $0x32c] sm:$0xf0]  ;;  %v6316_v59 = vor.u32 %v8706_v49, %v6315_v48  ;;  %v6272_v21 = vor.u32 %v8692_v11, %v6269_v12  ;;  %v6109_v34 = vld [vmem:[#allocation8 + $0x90] sm:$0xf0] }
  0x9a   : > { %1544 = vmatpush.bf16.msrb.mxu0 %v6092_v20  ;;  %v8670_v54 = vld [vmem:[#allocation8 + $0x10c] sm:$0xf0]  ;;  %v6444_v61 = vor.u32 %v8738_v53, %v6443_v52  ;;  %v6299_v63 = vld [vmem:[#allocation8 + $0x200] sm:$0xf]  ;;  %v6397_v20 = vld [vmem:[#allocation8 + $0x2d0] sm:$0xf0]  ;;  %v6112_v40 = vor.u32 %v8652_v30, %v6109_v34 }
  0x9b   : > { %1557 = vmatpush.bf16.msrb.mxu1 %v6220_v25  ;;  %v8702_v0 = vld [vmem:[#allocation8 + $0x20c] sm:$0xf0]  ;;  %v6427_v1 = vld [vmem:[#allocation8 + $0x300] sm:$0xf]  ;;  %v6172_v2 = vor.u32 %v8670_v54, %v6171_v51  ;;  %v8688_v25 = vld [vmem:[#allocation8 + $0x1a4] sm:$0xf]  ;;  %v6400_v27 = vor.u32 %v8724_v19, %v6397_v20 }
  0x9c   : > { %1570 = vmatpush.bf16.msrb.mxu2 %v6348_v31  ;;  %v8734_v4 = vld [vmem:[#allocation8 + $0x30c] sm:$0xf0]  ;;  %v6300_v13 = vor.u32 %v8702_v0, %v6299_v63  ;;  %v8720_v31 = vld [vmem:[#allocation8 + $0x2a4] sm:$0xf]  ;;  %v6509_v36 = vld [vmem:[#allocation8 + $0x3b0] sm:$0xf0] }
  0x9d   : > { %1583 = vmatpush.bf16.msrb.mxu3 %v6476_v33  ;;  %v6428_v14 = vor.u32 %v8734_v4, %v6427_v1  ;;  %v6256_v33 = vor.u32 %v8688_v25, %v6253_v26  ;;  %v8752_v35 = vld [vmem:[#allocation8 + $0x3a4] sm:$0xf]  ;;  %v6237_v38 = vld [vmem:[#allocation8 + $0x190] sm:$0xf0] }
  0x9e   : > { %1545 = vmatpush.bf16.msrb.mxu0 %v6076_v32  ;;  %v6381_v32 = vld [vmem:[#allocation8 + $0x2b0] sm:$0xf0]  ;;  %v6512_v41 = vor.u32 %v8752_v35, %v6509_v36  ;;  %v8648_v42 = vld [vmem:[#allocation8 + $0x64] sm:$0xf] }
  0x9f   : > { %1558 = vmatpush.bf16.msrb.mxu1 %v6204_v37  ;;  %v8684_v37 = vld [vmem:[#allocation8 + $0x184] sm:$0xf]  ;;  %v6384_v39 = vor.u32 %v8720_v31, %v6381_v32  ;;  %v6365_v44 = vld [vmem:[#allocation8 + $0x290] sm:$0xf0] }
  0xa0   : > { %1571 = vmatpush.bf16.msrb.mxu2 %v6332_v43  ;;  %v8716_v43 = vld [vmem:[#allocation8 + $0x284] sm:$0xf]  ;;  %v6493_v48 = vld [vmem:[#allocation8 + $0x390] sm:$0xf0] }
  0xa1   : > { %1584 = vmatpush.bf16.msrb.mxu3 %v6460_v46  ;;  %v6093_v46 = vld [vmem:[#allocation8 + $0x70] sm:$0xf0]  ;;  %v8748_v47 = vld [vmem:[#allocation8 + $0x384] sm:$0xf]  ;;  %v6368_v51 = vor.u32 %v8716_v43, %v6365_v44  ;;  %v8699_v43 = vld [vmem:[#allocation8 + $0x1f4] sm:$0xf0] }
  0xa2   : > { %1546 = vmatpush.bf16.msrb.mxu0 %v6060_v45  ;;  %v6240_v45 = vor.u32 %v8684_v37, %v6237_v38  ;;  %v8680_v49 = vld [vmem:[#allocation8 + $0x164] sm:$0xf]  ;;  %v6096_v52 = vor.u32 %v8648_v42, %v6093_v46  ;;  %v6496_v53 = vor.u32 %v8748_v47, %v6493_v48  ;;  %v6077_v56 = vld [vmem:[#allocation8 + $0x50] sm:$0xf0]  ;;  %v6291_v42 = vld [vmem:[#allocation8 + $0x1e8] sm:$0xf] }
  0xa3   : > { %1559 = vmatpush.bf16.msrb.mxu1 %v6188_v50  ;;  %v6221_v50 = vld [vmem:[#allocation8 + $0x170] sm:$0xf0]  ;;  %v8644_v55 = vld [vmem:[#allocation8 + $0x44] sm:$0xf] }
  0xa4   : > { %1572 = vmatpush.bf16.msrb.mxu2 %v6316_v59  ;;  %v6224_v54 = vor.u32 %v8680_v49, %v6221_v50  ;;  %v8676_v57 = vld [vmem:[#allocation8 + $0x144] sm:$0xf]  ;;  %v6205_v58 = vld [vmem:[#allocation8 + $0x150] sm:$0xf0]  ;;  %v6080_v59 = vor.u32 %v8644_v55, %v6077_v56  ;;  %v6292_v50 = vor.u32 %v8699_v43, %v6291_v42  ;;  %v8695_v55 = vld [vmem:[#allocation8 + $0x1d4] sm:$0xf0] }
  0xa5   : > { %1585 = vmatpush.bf16.msrb.mxu3 %v6444_v61  ;;  %v8712_v61 = vld [vmem:[#allocation8 + $0x264] sm:$0xf]  ;;  %v6349_v62 = vld [vmem:[#allocation8 + $0x270] sm:$0xf0] }
  0xa6   : > { %1547 = vmatpush.bf16.msrb.mxu0 %v6044_v60  ;;  %v6208_v60 = vor.u32 %v8676_v57, %v6205_v58  ;;  %v8744_v63 = vld [vmem:[#allocation8 + $0x364] sm:$0xf]  ;;  %v6352_v0 = vor.u32 %v8712_v61, %v6349_v62  ;;  %v6477_v1 = vld [vmem:[#allocation8 + $0x370] sm:$0xf0]  ;;  %v6419_v61 = vld [vmem:[#allocation8 + $0x2e8] sm:$0xf] }
  0xa7   : > { %1560 = vmatpush.bf16.msrb.mxu1 %v6172_v2  ;;  %v6480_v2 = vor.u32 %v8744_v63, %v6477_v1  ;;  %v6061_v4 = vld [vmem:[#allocation8 + $0x30] sm:$0xf0]  ;;  %v8672_v6 = vld [vmem:[#allocation8 + $0x124] sm:$0xf]  ;;  %v8731_v62 = vld [vmem:[#allocation8 + $0x2f4] sm:$0xf0] }
  0xa8   : > { %1573 = vmatpush.bf16.msrb.mxu2 %v6300_v13  ;;  %v8708_v9 = vld [vmem:[#allocation8 + $0x244] sm:$0xf]  ;;  %v6333_v10 = vld [vmem:[#allocation8 + $0x250] sm:$0xf0]  ;;  %v6547_v63 = vld [vmem:[#allocation8 + $0x3e8] sm:$0xf] }
  0xa9   : > { %1586 = vmatpush.bf16.msrb.mxu3 %v6428_v14  ;;  %v8740_v11 = vld [vmem:[#allocation8 + $0x344] sm:$0xf]  ;;  %v6336_v12 = vor.u32 %v8708_v9, %v6333_v10  ;;  %v6461_v13 = vld [vmem:[#allocation8 + $0x350] sm:$0xf0]  ;;  %v6420_v10 = vor.u32 %v8731_v62, %v6419_v61  ;;  %v8643_v61 = vld [vmem:[#allocation8 + $0x34] sm:$0xf0] }
  0xaa   : > { %1592 = vmatpush.bf16.msra.mxu0 %v6160_v3  ;;  %v8640_v3 = vld [vmem:[#allocation8 + $0x24] sm:$0xf]  ;;  %v6464_v14 = vor.u32 %v8740_v11, %v6461_v13  ;;  %v6173_v19 = vld [vmem:[#allocation8 + $0x110] sm:$0xf0]  ;;  %v6195_v62 = vld [vmem:[#allocation8 + $0x128] sm:$0xf] }
  0xab   : > { %1605 = vmatpush.bf16.msra.mxu1 %v6288_v7  ;;  %v6064_v5 = vor.u32 %v8640_v3, %v6061_v4  ;;  %v6189_v7 = vld [vmem:[#allocation8 + $0x130] sm:$0xf0]  ;;  %v8736_v24 = vld [vmem:[#allocation8 + $0x324] sm:$0xf]  ;;  %v8763_v3 = vld [vmem:[#allocation8 + $0x3f4] sm:$0xf0] }
  0xac   : > { %1618 = vmatpush.bf16.msra.mxu2 %v6416_v15  ;;  %v6192_v8 = vor.u32 %v8672_v6, %v6189_v7  ;;  %v8636_v15 = vld [vmem:[#allocation8 + $0x4] sm:$0xf]  ;;  %v6317_v22 = vld [vmem:[#allocation8 + $0x230] sm:$0xf0]  ;;  %v6131_v4 = vld [vmem:[#allocation8 + $0xa8] sm:$0xf] }
  0xad   : > { %1631 = vmatpush.bf16.msra.mxu3 %v6544_v17  ;;  %v8668_v17 = vld [vmem:[#allocation8 + $0x104] sm:$0xf]  ;;  %v6445_v25 = vld [vmem:[#allocation8 + $0x330] sm:$0xf0]  ;;  %v6259_v7 = vld [vmem:[#allocation8 + $0x1a8] sm:$0xf] }
  0xae   : > { %1593 = vmatpush.bf16.msra.mxu0 %v6144_v16  ;;  %v6045_v16 = vld [vmem:[#allocation8 + $0x10] sm:$0xf0]  ;;  %v6176_v20 = vor.u32 %v8668_v17, %v6173_v19  ;;  %v6448_v26 = vor.u32 %v8736_v24, %v6445_v25  ;;  %v8732_v30 = vld [vmem:[#allocation8 + $0x304] sm:$0xf]  ;;  %v8759_v19 = vld [vmem:[#allocation8 + $0x3d4] sm:$0xf0] }
  0xaf   : > { %1606 = vmatpush.bf16.msra.mxu1 %v6272_v21  ;;  %v6048_v18 = vor.u32 %v8636_v15, %v6045_v16  ;;  %v8704_v21 = vld [vmem:[#allocation8 + $0x224] sm:$0xf]  ;;  %v6429_v31 = vld [vmem:[#allocation8 + $0x310] sm:$0xf0]  ;;  %v8727_v15 = vld [vmem:[#allocation8 + $0x2d4] sm:$0xf0] }
  0xb0   : > { %1619 = vmatpush.bf16.msra.mxu2 %v6400_v27  ;;  %v6320_v23 = vor.u32 %v8704_v21, %v6317_v22  ;;  %v8700_v27 = vld [vmem:[#allocation8 + $0x204] sm:$0xf]  ;;  %v6432_v32 = vor.u32 %v8732_v30, %v6429_v31  ;;  %v6531_v16 = vld [vmem:[#allocation8 + $0x3c8] sm:$0xf]  ;;  %v8655_v21 = vld [vmem:[#allocation8 + $0x94] sm:$0xf0] }
  0xb1   : > { %1632 = vmatpush.bf16.msra.mxu3 %v6528_v29  ;;  %v6243_v22 = vld [vmem:[#allocation8 + $0x188] sm:$0xf]  ;;  %v8723_v30 = vld [vmem:[#allocation8 + $0x2b4] sm:$0xf0] }
  0xb2   : > { %1594 = vmatpush.bf16.msra.mxu0 %v6128_v28  ;;  %v6301_v28 = vld [vmem:[#allocation8 + $0x210] sm:$0xf0] }
  0xb3   : > { %1607 = vmatpush.bf16.msra.mxu1 %v6256_v33  ;;  %v6304_v29 = vor.u32 %v8700_v27, %v6301_v28  ;;  %v532_v33 = vld [vmem:[#allocation7] sm:$0xf]  ;;  %v6532_v27 = vor.u32 %v8759_v19, %v6531_v16  ;;  %v8697_v16 = vld [vmem:[#allocation8 + $0x1ec] sm:$0xf] }
  0xb4   : > { %1620 = vmatpush.bf16.msra.mxu2 %v6384_v39  ;;  %v534_v34 = vperm.slane %v532_v33, 0  ;;  %v535_v35 = vperm.slane %v532_v33, 1  ;;  %v6163_v39 = vld [vmem:[#allocation8 + $0xe8] sm:$0xf]  ;;  %v536_v46 = vperm.slane %v532_v33, 2  ;;  %v537_v49 = vperm.slane %v532_v33, 3 }
  0xb5   : > { %1633 = vmatpush.bf16.msra.mxu3 %v6512_v41  ;;  %v8755_v33 = vld [vmem:[#allocation8 + $0x3b4] sm:$0xf0] }
  0xb6   : > { %1595 = vmatpush.bf16.msra.mxu0 %v6112_v40  ;;  %v8667_v40 = vld [vmem:[#allocation8 + $0xf4] sm:$0xf0] }
  0xb7   : > { %1608 = vmatpush.bf16.msra.mxu1 %v6240_v45  ;;  %v6164_v47 = vor.u32 %v8667_v40, %v6163_v39  ;;  %v6371_v40 = vld [vmem:[#allocation8 + $0x288] sm:$0xf] }
  0xb8   : > { %1621 = vmatpush.bf16.msra.mxu2 %v6368_v51  ;;  %v6147_v51 = vld [vmem:[#allocation8 + $0xc8] sm:$0xf] }
  0xb9   : > { %1634 = vmatpush.bf16.msra.mxu3 %v6496_v53 }
  0xba   : > { %1596 = vmatpush.bf16.msra.mxu0 %v6096_v52  ;;  %v8663_v52 = vld [vmem:[#allocation8 + $0xd4] sm:$0xf0] }
  0xbb   : > { %1609 = vmatpush.bf16.msra.mxu1 %v6224_v54  ;;  %v6275_v54 = vld [vmem:[#allocation8 + $0x1c8] sm:$0xf] }
  0xbc   : > { %1622 = vmatpush.bf16.msra.mxu2 %v6352_v0 }
  0xbd   : > { %1635 = vmatpush.bf16.msra.mxu3 %v6480_v2  ;;  %v6276_v2 = vor.u32 %v8695_v55, %v6275_v54  ;;  %v6355_v54 = vld [vmem:[#allocation8 + $0x268] sm:$0xf]  ;;  %v8715_v55 = vld [vmem:[#allocation8 + $0x274] sm:$0xf0] }
  0xbe   : > { %1597 = vmatpush.bf16.msra.mxu0 %v6080_v59 }
  0xbf   : > { %1610 = vmatpush.bf16.msra.mxu1 %v6208_v60  ;;  %v6148_v60 = vor.u32 %v8663_v52, %v6147_v51 }
  0xc0   : > { %1623 = vmatpush.bf16.msra.mxu2 %v6336_v12  ;;  %v6548_v12 = vor.u32 %v8763_v3, %v6547_v63  ;;  %v8675_v63 = vld [vmem:[#allocation8 + $0x134] sm:$0xf0] }
  0xc1   : > { %1636 = vmatpush.bf16.msra.mxu3 %v6464_v14  ;;  %v6403_v14 = vld [vmem:[#allocation8 + $0x2c8] sm:$0xf]  ;;  %v8711_v3 = vld [vmem:[#allocation8 + $0x254] sm:$0xf0] }
  0xc2   : > { %1598 = vmatpush.bf16.msra.mxu0 %v6064_v5  ;;  %v8659_v5 = vld [vmem:[#allocation8 + $0xb4] sm:$0xf0]  ;;  %v6404_v25 = vor.u32 %v8727_v15, %v6403_v14  ;;  %v6165_v15 = vld [vmem:[#allocation8 + $0xf8] sm:$0xf0] }
  0xc3   : > { %1611 = vmatpush.bf16.msra.mxu1 %v6192_v8  ;;  %v8691_v8 = vld [vmem:[#allocation8 + $0x1b4] sm:$0xf0]  ;;  %v6132_v13 = vor.u32 %v8659_v5, %v6131_v4  ;;  %v6467_v4 = vld [vmem:[#allocation8 + $0x348] sm:$0xf] }
  0xc4   : > { %1624 = vmatpush.bf16.msra.mxu2 %v6320_v23  ;;  %v8687_v23 = vld [vmem:[#allocation8 + $0x194] sm:$0xf0] }
  0xc5   : > { %1637 = vmatpush.bf16.msra.mxu3 %v6448_v26  ;;  %v6244_v31 = vor.u32 %v8687_v23, %v6243_v22 }
  0xc6   : > { %1599 = vmatpush.bf16.msra.mxu0 %v6048_v18  ;;  %v6260_v18 = vor.u32 %v8691_v8, %v6259_v7  ;;  %v8743_v7 = vld [vmem:[#allocation8 + $0x354] sm:$0xf0]  ;;  %v6051_v8 = vld [vmem:[#allocation8 + $0x8] sm:$0xf] }
  0xc7   : > { %1612 = vmatpush.bf16.msra.mxu1 %v6176_v20  ;;  %v6115_v20 = vld [vmem:[#allocation8 + $0x88] sm:$0xf]  ;;  %v6468_v19 = vor.u32 %v8743_v7, %v6467_v4  ;;  %v6517_v7 = vld [vmem:[#allocation8 + $0x3b8] sm:$0xf0] }
  0xc8   : > { %1625 = vmatpush.bf16.msra.mxu2 %v6304_v29  ;;  %v6116_v28 = vor.u32 %v8655_v21, %v6115_v20  ;;  %v6387_v29 = vld [vmem:[#allocation8 + $0x2a8] sm:$0xf]  ;;  %v8707_v21 = vld [vmem:[#allocation8 + $0x234] sm:$0xf0] }
  0xc9   : > { %1638 = vmatpush.bf16.msra.mxu3 %v6432_v32  ;;  %v6515_v32 = vld [vmem:[#allocation8 + $0x3a8] sm:$0xf] }
  0xca   : > { %v6516_v39 = vor.u32 %v8755_v33, %v6515_v32  ;;  %v6323_v20 = vld [vmem:[#allocation8 + $0x228] sm:$0xf]  ;;  %v6277_v32 = vld [vmem:[#allocation8 + $0x1d8] sm:$0xf0] }
 0x106   : > { %v711_v36 = vpop.f32.mrf.mxu0 }
 0x107   : > { %v712_v37 = vadd.f32 %v711_v36, %v534_v34  ;;  %v724_v38 = vpop.f32.mrf.mxu1  ;;  %v6099_v34 = vld [vmem:[#allocation8 + $0x68] sm:$0xf] }
 0x108   : > { %v725_v41 = vadd.f32 %v724_v38, %v535_v35  ;;  %v8651_v35 = vld [vmem:[#allocation8 + $0x74] sm:$0xf0]  ;;  %v6227_v36 = vld [vmem:[#allocation8 + $0x168] sm:$0xf]  ;;  %v6388_v38 = vor.u32 %v8723_v30, %v6387_v29  ;;  %v6324_v29 = vor.u32 %v8707_v21, %v6323_v20  ;;  %v6149_v30 = vld [vmem:[#allocation8 + $0xd8] sm:$0xf0] }
 0x109   : > { %v754_v44 = vmax.f32 %v712_v37, 0.0  ;;  %v8683_v37 = vld [vmem:[#allocation8 + $0x174] sm:$0xf0]  ;;  %v6100_v42 = vor.u32 %v8651_v35, %v6099_v34  ;;  %v6307_v34 = vld [vmem:[#allocation8 + $0x208] sm:$0xf] }
 0x10a   : > { %v755_v45 = vmax.f32 %v725_v41, 0.0  ;;  %v8719_v41 = vld [vmem:[#allocation8 + $0x294] sm:$0xf0]  ;;  %v6228_v43 = vor.u32 %v8683_v37, %v6227_v36  ;;  %v6435_v36 = vld [vmem:[#allocation8 + $0x308] sm:$0xf] }
 0x10b   : > { %v10005_v48 = vpack.c.bf16 %v754_v44, %v754_v44  ;;  %v6499_v44 = vld [vmem:[#allocation8 + $0x388] sm:$0xf]  ;;  %v6372_v51 = vor.u32 %v8719_v41, %v6371_v40  ;;  %v8703_v35 = vld [vmem:[#allocation8 + $0x214] sm:$0xf0]  ;;  %v8749_v20 = vld [vmem:[#allocation8 + $0x38c] sm:$0xf] }
 0x10c   : > { %v10007_v53 = vpack.c.bf16 %v755_v45, %v755_v45  ;;  %v8751_v45 = vld [vmem:[#allocation8 + $0x394] sm:$0xf0]  ;;  %v6501_v21 = vld [vmem:[#allocation8 + $0x398] sm:$0xf0] }
 0x10d   : > { %1548 = vmatmul.bf16.vlgmr.msrb.gmra.mxu0 %v10005_v48  ;;  %v6500_v52 = vor.u32 %v8751_v45, %v6499_v44  ;;  %v8735_v37 = vld [vmem:[#allocation8 + $0x314] sm:$0xf0]  ;;  %v8657_v44 = vld [vmem:[#allocation8 + $0xac] sm:$0xf]  ;;  %v6308_v45 = vor.u32 %v8703_v35, %v6307_v34  ;;  %v6069_v35 = vld [vmem:[#allocation8 + $0x38] sm:$0xf0] }
 0x10e   : > { %v737_v56 = vpop.f32.mrf.mxu2  ;;  %1561 = vmatmul.bf16.vlgmr.msrb.gmra.mxu1 %v10007_v53  ;;  %1644 = vmatpush.bf16.msrb.mxu0 %v6164_v47  ;;  %v713_v59 = vpop.f32.mrf.mxu0  ;;  %v8647_v47 = vld [vmem:[#allocation8 + $0x54] sm:$0xf0]  ;;  %v8641_v34 = vld [vmem:[#allocation8 + $0x2c] sm:$0xf] }
 0x10f   : > { %v738_v57 = vadd.f32 %v737_v56, %v536_v46  ;;  %v750_v58 = vpop.f32.mrf.mxu3  ;;  %1657 = vmatpush.bf16.msrb.mxu1 %v6292_v50  ;;  %v726_v1 = vpop.f32.mrf.mxu1  ;;  %v6083_v46 = vld [vmem:[#allocation8 + $0x48] sm:$0xf]  ;;  %v8679_v50 = vld [vmem:[#allocation8 + $0x154] sm:$0xf0] }
 0x110   : > { %v751_v0 = vadd.f32 %v750_v58, %v537_v49  ;;  %v6211_v49 = vld [vmem:[#allocation8 + $0x148] sm:$0xf]  ;;  %v6084_v56 = vor.u32 %v8647_v47, %v6083_v46  ;;  %v8747_v59 = vld [vmem:[#allocation8 + $0x374] sm:$0xf0]  ;;  %v6133_v46 = vld [vmem:[#allocation8 + $0xb8] sm:$0xf0] }
 0x111   : > { %v756_v6 = vmax.f32 %v738_v57, 0.0  ;;  %v6212_v57 = vor.u32 %v8679_v50, %v6211_v49  ;;  %v6483_v58 = vld [vmem:[#allocation8 + $0x368] sm:$0xf]  ;;  %v8689_v47 = vld [vmem:[#allocation8 + $0x1ac] sm:$0xf]  ;;  %v6436_v50 = vor.u32 %v8735_v37, %v6435_v36 }
 0x112   : > { %v757_v9 = vmax.f32 %v751_v0, 0.0  ;;  %1645 = vmatpush.bf16.msrb.mxu0 %v6148_v60  ;;  %v6067_v60 = vld [vmem:[#allocation8 + $0x28] sm:$0xf]  ;;  %v6356_v0 = vor.u32 %v8715_v55, %v6355_v54  ;;  %v6484_v1 = vor.u32 %v8747_v59, %v6483_v58  ;;  %v6261_v49 = vld [vmem:[#allocation8 + $0x1b8] sm:$0xf0] }
 0x113   : > { %v10011_v11 = vpack.c.bf16 %v756_v6, %v756_v6  ;;  %1658 = vmatpush.bf16.msrb.mxu1 %v6276_v2  ;;  %v6339_v2 = vld [vmem:[#allocation8 + $0x248] sm:$0xf]  ;;  %v6068_v5 = vor.u32 %v8643_v61, %v6067_v60  ;;  %v6196_v6 = vor.u32 %v8675_v63, %v6195_v62  ;;  %v8725_v54 = vld [vmem:[#allocation8 + $0x2cc] sm:$0xf]  ;;  %v6405_v55 = vld [vmem:[#allocation8 + $0x2d8] sm:$0xf0] }
 0x114   : > { %v10013_v17 = vpack.c.bf16 %v757_v9, %v757_v9  ;;  %v8639_v9 = vld [vmem:[#allocation8 + $0x14] sm:$0xf0]  ;;  %v6340_v14 = vor.u32 %v8711_v3, %v6339_v2  ;;  %v8757_v58 = vld [vmem:[#allocation8 + $0x3cc] sm:$0xf]  ;;  %v6533_v59 = vld [vmem:[#allocation8 + $0x3d8] sm:$0xf0] }
 0x115   : > { %1574 = vmatmul.bf16.vlgmr.msrb.gmra.mxu2 %v10011_v11  ;;  %v6052_v22 = vor.u32 %v8639_v9, %v6051_v8  ;;  %v8653_v60 = vld [vmem:[#allocation8 + $0x8c] sm:$0xf]  ;;  %v6117_v61 = vld [vmem:[#allocation8 + $0x98] sm:$0xf0] }
 0x116   : > { %1587 = vmatmul.bf16.vlgmr.msrb.gmra.mxu3 %v10013_v17  ;;  %1670 = vmatpush.bf16.msrb.mxu2 %v6420_v10  ;;  %v739_v24 = vpop.f32.mrf.mxu2  ;;  %v6179_v10 = vld [vmem:[#allocation8 + $0x108] sm:$0xf]  ;;  %v8685_v62 = vld [vmem:[#allocation8 + $0x18c] sm:$0xf]  ;;  %v6245_v63 = vld [vmem:[#allocation8 + $0x198] sm:$0xf0]  ;;  %v6120_v4 = vor.u32 %v8653_v60, %v6117_v61 }
 0x117   : > { %1683 = vmatpush.bf16.msrb.mxu3 %v6548_v12  ;;  %v752_v26 = vpop.f32.mrf.mxu3  ;;  %1646 = vmatpush.bf16.msrb.mxu0 %v6132_v13  ;;  %v8671_v12 = vld [vmem:[#allocation8 + $0x114] sm:$0xf0]  ;;  %v8665_v13 = vld [vmem:[#allocation8 + $0xec] sm:$0xf]  ;;  %v6451_v24 = vld [vmem:[#allocation8 + $0x328] sm:$0xf] }
 0x118   : > { %1659 = vmatpush.bf16.msrb.mxu1 %v6260_v18  ;;  %v6293_v18 = vld [vmem:[#allocation8 + $0x1f8] sm:$0xf0]  ;;  %v6180_v23 = vor.u32 %v8671_v12, %v6179_v10  ;;  %v6168_v26 = vor.u32 %v8665_v13, %v6165_v15  ;;  %v8721_v2 = vld [vmem:[#allocation8 + $0x2ac] sm:$0xf] }
 0x119   : > { %v6389_v3 = vld [vmem:[#allocation8 + $0x2b8] sm:$0xf0]  ;;  %v8649_v8 = vld [vmem:[#allocation8 + $0x6c] sm:$0xf] }
 0x11a   : > { %1671 = vmatpush.bf16.msrb.mxu2 %v6404_v25  ;;  %v8739_v25 = vld [vmem:[#allocation8 + $0x334] sm:$0xf0]  ;;  %v6101_v9 = vld [vmem:[#allocation8 + $0x78] sm:$0xf0]  ;;  %v8681_v10 = vld [vmem:[#allocation8 + $0x16c] sm:$0xf]  ;;  %v6392_v13 = vor.u32 %v8721_v2, %v6389_v3 }
 0x11b   : > { %1684 = vmatpush.bf16.msrb.mxu3 %v6532_v27  ;;  %1647 = vmatpush.bf16.msrb.mxu0 %v6116_v28  ;;  %v6296_v27 = vor.u32 %v8697_v16, %v6293_v18  ;;  %v8661_v28 = vld [vmem:[#allocation8 + $0xcc] sm:$0xf]  ;;  %v6452_v33 = vor.u32 %v8739_v25, %v6451_v24  ;;  %v6229_v12 = vld [vmem:[#allocation8 + $0x178] sm:$0xf0]  ;;  %v6104_v18 = vor.u32 %v8649_v8, %v6101_v9 }
 0x11c   : > { %1660 = vmatpush.bf16.msrb.mxu1 %v6244_v31  ;;  %v8693_v31 = vld [vmem:[#allocation8 + $0x1cc] sm:$0xf]  ;;  %v6152_v40 = vor.u32 %v8661_v28, %v6149_v30  ;;  %v6373_v16 = vld [vmem:[#allocation8 + $0x298] sm:$0xf0] }
 0x11d   : > { %1600 = vmatmul.bf16.vlgmr.msra.gmra.mxu0 %v10005_v48  ;;  %v6280_v41 = vor.u32 %v8693_v31, %v6277_v32  ;;  %v8717_v15 = vld [vmem:[#allocation8 + $0x28c] sm:$0xf]  ;;  %v6213_v25 = vld [vmem:[#allocation8 + $0x158] sm:$0xf0] }
 0x11e   : > { %1672 = vmatpush.bf16.msrb.mxu2 %v6388_v38  ;;  %1613 = vmatmul.bf16.vlgmr.msra.gmra.mxu1 %v10007_v53  ;;  %v8729_v38 = vld [vmem:[#allocation8 + $0x2ec] sm:$0xf]  ;;  %v6197_v37 = vld [vmem:[#allocation8 + $0x138] sm:$0xf0] }
 0x11f   : > { %1685 = vmatpush.bf16.msrb.mxu3 %v6516_v39  ;;  %1648 = vmatpush.bf16.msrb.mxu0 %v6100_v42  ;;  %v6421_v39 = vld [vmem:[#allocation8 + $0x2f8] sm:$0xf0]  ;;  %v8761_v42 = vld [vmem:[#allocation8 + $0x3ec] sm:$0xf] }
 0x120   : > { %1661 = vmatpush.bf16.msrb.mxu1 %v6228_v43  ;;  %v6549_v43 = vld [vmem:[#allocation8 + $0x3f8] sm:$0xf0]  ;;  %v8677_v24 = vld [vmem:[#allocation8 + $0x14c] sm:$0xf] }
 0x121   : > { %v8713_v28 = vld [vmem:[#allocation8 + $0x26c] sm:$0xf]  ;;  %v6216_v31 = vor.u32 %v8677_v24, %v6213_v25  ;;  %v6309_v9 = vld [vmem:[#allocation8 + $0x218] sm:$0xf0]  ;;  %v6907_v25 = vld [vmem:[#allocation11 + $0x2c0] sm:$0xf] }
 0x122   : > { %1673 = vmatpush.bf16.msrb.mxu2 %v6372_v51  ;;  %v6424_v51 = vor.u32 %v8729_v38, %v6421_v39  ;;  %v8745_v32 = vld [vmem:[#allocation8 + $0x36c] sm:$0xf] }
 0x123   : > { %1686 = vmatpush.bf16.msrb.mxu3 %v6500_v52  ;;  %1649 = vmatpush.bf16.msrb.mxu0 %v6084_v56  ;;  %v6552_v52 = vor.u32 %v8761_v42, %v6549_v43  ;;  %v6136_v56 = vor.u32 %v8657_v44, %v6133_v46  ;;  %v8673_v36 = vld [vmem:[#allocation8 + $0x12c] sm:$0xf]  ;;  %v6072_v43 = vor.u32 %v8641_v34, %v6069_v35  ;;  %v8778_v34 = vld [vmem:[#allocation11 + $0x6c] sm:$0xf0] }
 0x124   : > { %1662 = vmatpush.bf16.msrb.mxu1 %v6212_v57  ;;  %v6264_v57 = vor.u32 %v8689_v47, %v6261_v49  ;;  %v8741_v42 = vld [vmem:[#allocation8 + $0x34c] sm:$0xf]  ;;  %v6200_v44 = vor.u32 %v8673_v36, %v6197_v37  ;;  %v6053_v47 = vld [vmem:[#allocation8 + $0x18] sm:$0xf0]  ;;  %v6731_v36 = vld [vmem:[#allocation11 + $0x160] sm:$0xf] }
 0x125   : > { %1626 = vmatmul.bf16.vlgmr.msra.gmra.mxu2 %v10011_v11  ;;  %v8637_v46 = vld [vmem:[#allocation8 + $0xc] sm:$0xf]  ;;  %v8810_v37 = vld [vmem:[#allocation11 + $0x16c] sm:$0xf0] }
 0x126   : > { %1639 = vmatmul.bf16.vlgmr.msra.gmra.mxu3 %v10013_v17  ;;  %1674 = vmatpush.bf16.msrb.mxu2 %v6356_v0  ;;  %v6408_v0 = vor.u32 %v8725_v54, %v6405_v55  ;;  %v8669_v49 = vld [vmem:[#allocation8 + $0x10c] sm:$0xf]  ;;  %v8794_v54 = vld [vmem:[#allocation11 + $0xec] sm:$0xf0]  ;;  %v6795_v55 = vld [vmem:[#allocation11 + $0x1e0] sm:$0xf]  ;;  %v6056_v60 = vor.u32 %v8637_v46, %v6053_v47 }
 0x127   : > { %1687 = vmatpush.bf16.msrb.mxu3 %v6484_v1  ;;  %1650 = vmatpush.bf16.msrb.mxu0 %v6068_v5  ;;  %v6536_v1 = vor.u32 %v8757_v58, %v6533_v59  ;;  %v6248_v5 = vor.u32 %v8685_v62, %v6245_v63  ;;  %v8705_v58 = vld [vmem:[#allocation8 + $0x22c] sm:$0xf]  ;;  %v6325_v59 = vld [vmem:[#allocation8 + $0x238] sm:$0xf0]  ;;  %v6555_v47 = vld [vmem:[#allocation11] sm:$0xf] }
 0x128   : > { %1663 = vmatpush.bf16.msrb.mxu1 %v6196_v6  ;;  %v8753_v6 = vld [vmem:[#allocation8 + $0x3ac] sm:$0xf]  ;;  %v6453_v63 = vld [vmem:[#allocation8 + $0x338] sm:$0xf0]  ;;  %v6328_v3 = vor.u32 %v8705_v58, %v6325_v59  ;;  %v8784_v58 = vld [vmem:[#allocation11 + $0xa4] sm:$0xf] }
 0x129   : > { %v8737_v62 = vld [vmem:[#allocation8 + $0x32c] sm:$0xf]  ;;  %v6637_v59 = vld [vmem:[#allocation11 + $0xb0] sm:$0xf0] }
 0x12a   : > { %1675 = vmatpush.bf16.msrb.mxu2 %v6340_v14  ;;  %v6520_v14 = vor.u32 %v8753_v6, %v6517_v7  ;;  %v8822_v6 = vld [vmem:[#allocation11 + $0x1cc] sm:$0xf0]  ;;  %v6456_v7 = vor.u32 %v8737_v62, %v6453_v63  ;;  %v8701_v8 = vld [vmem:[#allocation8 + $0x20c] sm:$0xf]  ;;  %v6891_v63 = vld [vmem:[#allocation11 + $0x2a0] sm:$0xf] }
 0x12b   : > { %1688 = vmatpush.bf16.msrb.mxu3 %v6468_v19  ;;  %1651 = vmatpush.bf16.msrb.mxu0 %v6052_v22  ;;  %v6232_v19 = vor.u32 %v8681_v10, %v6229_v12  ;;  %v8645_v22 = vld [vmem:[#allocation8 + $0x4c] sm:$0xf]  ;;  %v6437_v12 = vld [vmem:[#allocation8 + $0x318] sm:$0xf0]  ;;  %v8802_v62 = vld [vmem:[#allocation11 + $0x12c] sm:$0xf0] }
 0x12c   : > { %1664 = vmatpush.bf16.msrb.mxu1 %v6180_v23  ;;  %v6085_v23 = vld [vmem:[#allocation8 + $0x58] sm:$0xf0]  ;;  %v8733_v10 = vld [vmem:[#allocation8 + $0x30c] sm:$0xf] }
 0x12d   : > { %v6088_v30 = vor.u32 %v8645_v22, %v6085_v23  ;;  %v6763_v22 = vld [vmem:[#allocation11 + $0x1a0] sm:$0xf]  ;;  %v8818_v23 = vld [vmem:[#allocation11 + $0x1ac] sm:$0xf0] }
 0x12e   : > { %1676 = vmatpush.bf16.msrb.mxu2 %v6324_v29  ;;  %1652 = vmatmul.bf16.vlgmr.msrb.gmra.mxu0 %v10005_v48  ;;  %v6357_v29 = vld [vmem:[#allocation8 + $0x278] sm:$0xf0] }
 0x12f   : > { %1696 = vmatpush.bf16.msra.mxu0 %v6168_v26  ;;  %1689 = vmatpush.bf16.msrb.mxu3 %v6452_v33  ;;  %v6376_v26 = vor.u32 %v8717_v15, %v6373_v16  ;;  %v6485_v33 = vld [vmem:[#allocation8 + $0x378] sm:$0xf0]  ;;  %v6360_v38 = vor.u32 %v8713_v28, %v6357_v29  ;;  %v6619_v28 = vld [vmem:[#allocation11 + $0x80] sm:$0xf]  ;;  %v8782_v29 = vld [vmem:[#allocation11 + $0x8c] sm:$0xf0] }
 0x130   : > { %1709 = vmatpush.bf16.msra.mxu1 %v6296_v27  ;;  %v6504_v27 = vor.u32 %v8749_v20, %v6501_v21  ;;  %v6488_v39 = vor.u32 %v8745_v32, %v6485_v33  ;;  %v8786_v20 = vld [vmem:[#allocation11 + $0xac] sm:$0xf0]  ;;  %v6440_v21 = vor.u32 %v8733_v10, %v6437_v12  ;;  %v6620_v33 = vor.u32 %v8782_v29, %v6619_v28  ;;  %v6843_v29 = vld [vmem:[#allocation11 + $0x240] sm:$0xf] }
 0x131   : > { %1665 = vmatmul.bf16.vlgmr.msrb.gmra.mxu1 %v10007_v53  ;;  %v8814_v32 = vld [vmem:[#allocation11 + $0x18c] sm:$0xf0] }
 0x132   : > { %1677 = vmatpush.bf16.msrb.mxu2 %v6308_v45  ;;  %v6469_v45 = vld [vmem:[#allocation8 + $0x358] sm:$0xf0]  ;;  %v8846_v10 = vld [vmem:[#allocation11 + $0x28c] sm:$0xf0] }
 0x133   : > { %1697 = vmatpush.bf16.msra.mxu0 %v6152_v40  ;;  %1690 = vmatpush.bf16.msrb.mxu3 %v6436_v50  ;;  %v8709_v40 = vld [vmem:[#allocation8 + $0x24c] sm:$0xf]  ;;  %v6181_v50 = vld [vmem:[#allocation8 + $0x118] sm:$0xf0] }
 0x134   : > { %1710 = vmatpush.bf16.msra.mxu1 %v6280_v41  ;;  %v6341_v41 = vld [vmem:[#allocation8 + $0x258] sm:$0xf0]  ;;  %v6184_v61 = vor.u32 %v8669_v49, %v6181_v50  ;;  %v8766_v49 = vld [vmem:[#allocation11 + $0xc] sm:$0xf0]  ;;  %v8792_v50 = vld [vmem:[#allocation11 + $0xe4] sm:$0xf] }
 0x135   : > { %1678 = vmatmul.bf16.vlgmr.msrb.gmra.mxu2 %v10011_v11 }
 0x136   : > { %1722 = vmatpush.bf16.msra.mxu2 %v6424_v51  ;;  %1691 = vmatmul.bf16.vlgmr.msrb.gmra.mxu3 %v10013_v17  ;;  %v6667_v51 = vld [vmem:[#allocation11 + $0xe0] sm:$0xf] }
 0x137   : > { %1735 = vmatpush.bf16.msra.mxu3 %v6552_v52  ;;  %1698 = vmatpush.bf16.msra.mxu0 %v6136_v56  ;;  %v6344_v52 = vor.u32 %v8709_v40, %v6341_v41  ;;  %v8826_v56 = vld [vmem:[#allocation11 + $0x1ec] sm:$0xf0]  ;;  %v6732_v41 = vor.u32 %v8810_v37, %v6731_v36  ;;  %v6827_v36 = vld [vmem:[#allocation11 + $0x220] sm:$0xf] }
 0x138   : > { %1711 = vmatpush.bf16.msra.mxu1 %v6264_v57  ;;  %v6472_v57 = vor.u32 %v8741_v42, %v6469_v45  ;;  %v6796_v2 = vor.u32 %v8826_v56, %v6795_v55  ;;  %v8774_v40 = vld [vmem:[#allocation11 + $0x4c] sm:$0xf0]  ;;  %v6715_v42 = vld [vmem:[#allocation11 + $0x140] sm:$0xf]  ;;  %v8788_v55 = vld [vmem:[#allocation11 + $0xc4] sm:$0xf] }
 0x139   : > { %v8770_v45 = vld [vmem:[#allocation11 + $0x2c] sm:$0xf0]  ;;  %v6653_v56 = vld [vmem:[#allocation11 + $0xd0] sm:$0xf0] }
 0x13a   : > { %1723 = vmatpush.bf16.msra.mxu2 %v6408_v0  ;;  %v6668_v0 = vor.u32 %v8794_v54, %v6667_v51  ;;  %v6669_v51 = vld [vmem:[#allocation11 + $0xf0] sm:$0xf0]  ;;  %v8834_v37 = vld [vmem:[#allocation11 + $0x22c] sm:$0xf0] }
 0x13b   : > { %1736 = vmatpush.bf16.msra.mxu3 %v6536_v1  ;;  %1699 = vmatpush.bf16.msra.mxu0 %v6120_v4  ;;  %v6651_v1 = vld [vmem:[#allocation11 + $0xc0] sm:$0xf]  ;;  %v8790_v4 = vld [vmem:[#allocation11 + $0xcc] sm:$0xf0]  ;;  %v6672_v54 = vor.u32 %v8792_v50, %v6669_v51  ;;  %v6733_v50 = vld [vmem:[#allocation11 + $0x170] sm:$0xf0] }
 0x13c   : > { %1712 = vmatpush.bf16.msra.mxu1 %v6248_v5  ;;  %v6779_v5 = vld [vmem:[#allocation11 + $0x1c0] sm:$0xf]  ;;  %v6652_v15 = vor.u32 %v8790_v4, %v6651_v1  ;;  %v8850_v1 = vld [vmem:[#allocation11 + $0x2ac] sm:$0xf0] }
 0x13d   : > { %v6780_v16 = vor.u32 %v8822_v6, %v6779_v5  ;;  %v6892_v4 = vor.u32 %v8850_v1, %v6891_v63  ;;  %v6683_v6 = vld [vmem:[#allocation11 + $0x100] sm:$0xf] }
 0x13e   : > { %1724 = vmatpush.bf16.msra.mxu2 %v6392_v13  ;;  %v6923_v13 = vld [vmem:[#allocation11 + $0x2e0] sm:$0xf] }
 0x13f   : > { %1737 = vmatpush.bf16.msra.mxu3 %v6520_v14  ;;  %1700 = vmatpush.bf16.msra.mxu0 %v6104_v18  ;;  %v8858_v14 = vld [vmem:[#allocation11 + $0x2ec] sm:$0xf0]  ;;  %v6312_v18 = vor.u32 %v8701_v8, %v6309_v9  ;;  %v6875_v8 = vld [vmem:[#allocation11 + $0x280] sm:$0xf] }
 0x140   : > { %1713 = vmatpush.bf16.msra.mxu1 %v6232_v19  ;;  %v6635_v19 = vld [vmem:[#allocation11 + $0xa0] sm:$0xf]  ;;  %v6924_v24 = vor.u32 %v8858_v14, %v6923_v13  ;;  %v6876_v12 = vor.u32 %v8846_v10, %v6875_v8  ;;  %v8776_v13 = vld [vmem:[#allocation11 + $0x64] sm:$0xf]  ;;  %v6605_v14 = vld [vmem:[#allocation11 + $0x70] sm:$0xf0] }
 0x141   : > { %v6701_v8 = vld [vmem:[#allocation11 + $0x130] sm:$0xf0] }
 0x142   : > { %1725 = vmatpush.bf16.msra.mxu2 %v6376_v26  ;;  %v8854_v26 = vld [vmem:[#allocation11 + $0x2cc] sm:$0xf0] }
 0x143   : > { %1738 = vmatpush.bf16.msra.mxu3 %v6504_v27  ;;  %1701 = vmatpush.bf16.msra.mxu0 %v6088_v30  ;;  %v6636_v27 = vor.u32 %v8786_v20, %v6635_v19  ;;  %v6764_v30 = vor.u32 %v8818_v23, %v6763_v22  ;;  %v6859_v19 = vld [vmem:[#allocation11 + $0x260] sm:$0xf]  ;;  %v8842_v20 = vld [vmem:[#allocation11 + $0x26c] sm:$0xf0]  ;;  %v8772_v23 = vld [vmem:[#allocation11 + $0x44] sm:$0xf] }
 0x144   : > { %1714 = vmatpush.bf16.msra.mxu1 %v6216_v31  ;;  %v6747_v31 = vld [vmem:[#allocation11 + $0x180] sm:$0xf]  ;;  %v6860_v22 = vor.u32 %v8842_v20, %v6859_v19  ;;  %v8796_v20 = vld [vmem:[#allocation11 + $0x104] sm:$0xf] }
 0x145   : > { %v6748_v35 = vor.u32 %v8814_v32, %v6747_v31  ;;  %v8768_v32 = vld [vmem:[#allocation11 + $0x24] sm:$0xf] }
 0x146   : > { %1726 = vmatpush.bf16.msra.mxu2 %v6360_v38 }
 0x147   : > { %1739 = vmatpush.bf16.msra.mxu3 %v6488_v39  ;;  %1702 = vmatpush.bf16.msra.mxu0 %v6072_v43  ;;  %v6587_v39 = vld [vmem:[#allocation11 + $0x40] sm:$0xf]  ;;  %v8806_v43 = vld [vmem:[#allocation11 + $0x14c] sm:$0xf0] }
 0x148   : > { %1715 = vmatpush.bf16.msra.mxu1 %v6200_v44  ;;  %v6571_v44 = vld [vmem:[#allocation11 + $0x20] sm:$0xf] }
 0x149   : > { %v6572_v46 = vor.u32 %v8770_v45, %v6571_v44  ;;  %v6811_v44 = vld [vmem:[#allocation11 + $0x200] sm:$0xf]  ;;  %v8830_v45 = vld [vmem:[#allocation11 + $0x20c] sm:$0xf0] }
 0x14a   : > { %1727 = vmatpush.bf16.msra.mxu2 %v6344_v52  ;;  %v6556_v52 = vor.u32 %v8766_v49, %v6555_v47  ;;  %v8890_v47 = vld [vmem:[#allocation11 + $0x3ec] sm:$0xf0]  ;;  %v8808_v49 = vld [vmem:[#allocation11 + $0x164] sm:$0xf] }
 0x14b   : > { %1740 = vmatpush.bf16.msra.mxu3 %v6472_v57  ;;  %1703 = vmatpush.bf16.msra.mxu0 %v6056_v60  ;;  %v6656_v57 = vor.u32 %v8788_v55, %v6653_v56  ;;  %v6640_v60 = vor.u32 %v8784_v58, %v6637_v59  ;;  %v6925_v55 = vld [vmem:[#allocation11 + $0x2f0] sm:$0xf0]  ;;  %v8886_v58 = vld [vmem:[#allocation11 + $0x3cc] sm:$0xf0] }
 0x14c   : > { %1716 = vmatpush.bf16.msra.mxu1 %v6184_v61  ;;  %v6699_v61 = vld [vmem:[#allocation11 + $0x120] sm:$0xf] }
 0x14e   : > { %1728 = vmatpush.bf16.msra.mxu2 %v6328_v3  ;;  %1704 = vmatmul.bf16.vlgmr.msra.gmra.mxu0 %v10005_v48  ;;  %v6908_v48 = vor.u32 %v8854_v26, %v6907_v25  ;;  %v6621_v3 = vld [vmem:[#allocation11 + $0x90] sm:$0xf0]  ;;  %v8820_v25 = vld [vmem:[#allocation11 + $0x1c4] sm:$0xf] }
 0x14f   : > { %2534 = vmatpush.bf16.msrb.mxu0 %v6668_v0  ;;  %1741 = vmatpush.bf16.msra.mxu3 %v6456_v7  ;;  %v6700_v0 = vor.u32 %v8802_v62, %v6699_v61  ;;  %v8798_v7 = vld [vmem:[#allocation11 + $0x10c] sm:$0xf0]  ;;  %v6717_v61 = vld [vmem:[#allocation11 + $0x150] sm:$0xf0]  ;;  %v8852_v62 = vld [vmem:[#allocation11 + $0x2c4] sm:$0xf] }
 0x150   : > { %2547 = vmatpush.bf16.msrb.mxu1 %v6796_v2  ;;  %v8780_v2 = vld [vmem:[#allocation11 + $0x84] sm:$0xf]  ;;  %v6684_v9 = vor.u32 %v8798_v7, %v6683_v6 }
 0x151   : > { %1717 = vmatmul.bf16.vlgmr.msra.gmra.mxu1 %v10007_v53  ;;  %v6603_v53 = vld [vmem:[#allocation11 + $0x60] sm:$0xf]  ;;  %v6624_v5 = vor.u32 %v8780_v2, %v6621_v3  ;;  %v10029_v2 = vld [vmem:[#allocation10] sm:$0xf]  ;;  %v8800_v7 = vld [vmem:[#allocation11 + $0x124] sm:$0xf] }
 0x152   : > { %1729 = vmatpush.bf16.msra.mxu2 %v6312_v18  ;;  %v6604_v38 = vor.u32 %v8778_v34, %v6603_v53  ;;  %v6797_v18 = vld [vmem:[#allocation11 + $0x1f0] sm:$0xf0]  ;;  %v7019_v3 = vld [vmem:[#allocation11 + $0x3a0] sm:$0xf] }
 0x153   : > { %2535 = vmatpush.bf16.msrb.mxu0 %v6652_v15  ;;  %1742 = vmatpush.bf16.msra.mxu3 %v6440_v21  ;;  %v8824_v15 = vld [vmem:[#allocation11 + $0x1e4] sm:$0xf]  ;;  %v6765_v34 = vld [vmem:[#allocation11 + $0x1b0] sm:$0xf0] }
 0x154   : > { %2548 = vmatpush.bf16.msrb.mxu1 %v6780_v16  ;;  %v6608_v16 = vor.u32 %v8776_v13, %v6605_v14  ;;  %v6800_v21 = vor.u32 %v8824_v15, %v6797_v18  ;;  %v6893_v13 = vld [vmem:[#allocation11 + $0x2b0] sm:$0xf0]  ;;  %v892_v14 = vperm.slane %v10029_v2, 0  ;;  %v8878_v18 = vld [vmem:[#allocation11 + $0x38c] sm:$0xf0] }
 0x155   : > { %1730 = vmatmul.bf16.vlgmr.msra.gmra.mxu2 %v10011_v11  ;;  %v6588_v11 = vor.u32 %v8774_v40, %v6587_v39  ;;  %v8764_v39 = vld [vmem:[#allocation11 + $0x4] sm:$0xf]  ;;  %v6557_v40 = vld [vmem:[#allocation11 + $0x10] sm:$0xf0] }
 0x156   : > { %2560 = vmatpush.bf16.msrb.mxu2 %v6924_v24  ;;  %1743 = vmatmul.bf16.vlgmr.msra.gmra.mxu3 %v10013_v17  ;;  %v6716_v17 = vor.u32 %v8806_v43, %v6715_v42  ;;  %v6589_v24 = vld [vmem:[#allocation11 + $0x50] sm:$0xf0]  ;;  %v6560_v42 = vor.u32 %v8764_v39, %v6557_v40 }
 0x157   : > { %2536 = vmatpush.bf16.msrb.mxu0 %v6636_v27  ;;  %v6592_v26 = vor.u32 %v8772_v23, %v6589_v24  ;;  %v6781_v27 = vld [vmem:[#allocation11 + $0x1d0] sm:$0xf0] }
 0x158   : > { %2549 = vmatpush.bf16.msrb.mxu1 %v6764_v30  ;;  %v6784_v28 = vor.u32 %v8820_v25, %v6781_v27  ;;  %v8838_v30 = vld [vmem:[#allocation11 + $0x24c] sm:$0xf0]  ;;  %v6749_v43 = vld [vmem:[#allocation11 + $0x190] sm:$0xf0]  ;;  %v6987_v27 = vld [vmem:[#allocation11 + $0x360] sm:$0xf] }
 0x159   : > { %v6844_v31 = vor.u32 %v8838_v30, %v6843_v29  ;;  %v6877_v24 = vld [vmem:[#allocation11 + $0x290] sm:$0xf0] }
 0x15a   : > { %2561 = vmatpush.bf16.msrb.mxu2 %v6908_v48  ;;  %v6573_v48 = vld [vmem:[#allocation11 + $0x30] sm:$0xf0] }
 0x15b   : > { %2537 = vmatpush.bf16.msrb.mxu0 %v6620_v33  ;;  %v8816_v33 = vld [vmem:[#allocation11 + $0x1a4] sm:$0xf]  ;;  %v6576_v53 = vor.u32 %v8768_v32, %v6573_v48  ;;  %v6861_v32 = vld [vmem:[#allocation11 + $0x270] sm:$0xf0] }
 0x15c   : > { %2550 = vmatpush.bf16.msrb.mxu1 %v6748_v35  ;;  %v6768_v35 = vor.u32 %v8816_v33, %v6765_v34  ;;  %v6971_v34 = vld [vmem:[#allocation11 + $0x340] sm:$0xf] }
 0x15e   : > { %2562 = vmatpush.bf16.msrb.mxu2 %v6892_v4  ;;  %v8882_v4 = vld [vmem:[#allocation11 + $0x3ac] sm:$0xf0] }
 0x15f   : > { %2538 = vmatpush.bf16.msrb.mxu0 %v6604_v38  ;;  %v6828_v38 = vor.u32 %v8834_v37, %v6827_v36  ;;  %v7020_v6 = vor.u32 %v8882_v4, %v7019_v3  ;;  %v8836_v37 = vld [vmem:[#allocation11 + $0x244] sm:$0xf] }
 0x160   : > { %2551 = vmatpush.bf16.msrb.mxu1 %v6732_v41  ;;  %v8812_v41 = vld [vmem:[#allocation11 + $0x184] sm:$0xf] }
 0x162   : > { %2563 = vmatpush.bf16.msrb.mxu2 %v6876_v12  ;;  %v6704_v12 = vor.u32 %v8800_v7, %v6701_v8 }
 0x163   : > { %2539 = vmatpush.bf16.msrb.mxu0 %v6588_v11  ;;  %v6752_v11 = vor.u32 %v8812_v41, %v6749_v43  ;;  %v6675_v43 = vld [vmem:[#allocation11 + $0xe8] sm:$0xf] }
 0x164   : > { %2552 = vmatpush.bf16.msrb.mxu1 %v6716_v17  ;;  %v7051_v17 = vld [vmem:[#allocation11 + $0x3e0] sm:$0xf] }
 0x165   : > { %v7052_v51 = vor.u32 %v8890_v47, %v7051_v17 }
 0x166   : > { %2564 = vmatpush.bf16.msrb.mxu2 %v6860_v22  ;;  %v8844_v22 = vld [vmem:[#allocation11 + $0x284] sm:$0xf] }
 0x167   : > { %2540 = vmatpush.bf16.msrb.mxu0 %v6572_v46  ;;  %v6812_v46 = vor.u32 %v8830_v45, %v6811_v44  ;;  %2573 = vmatpush.bf16.msrb.mxu3 %v7052_v51  ;;  %v8866_v44 = vld [vmem:[#allocation11 + $0x32c] sm:$0xf0] }
 0x168   : > { %2553 = vmatpush.bf16.msrb.mxu1 %v6700_v0  ;;  %v6909_v0 = vld [vmem:[#allocation11 + $0x2d0] sm:$0xf0] }
 0x169   : > { %v6912_v1 = vor.u32 %v8852_v62, %v6909_v0  ;;  %v6813_v0 = vld [vmem:[#allocation11 + $0x210] sm:$0xf0] }
 0x16a   : > { %2565 = vmatpush.bf16.msrb.mxu2 %v6844_v31  ;;  %v8840_v31 = vld [vmem:[#allocation11 + $0x264] sm:$0xf] }
 0x16b   : > { %2541 = vmatpush.bf16.msrb.mxu0 %v6556_v52  ;;  %v6736_v52 = vor.u32 %v8808_v49, %v6733_v50  ;;  %v6864_v33 = vor.u32 %v8840_v31, %v6861_v32  ;;  %v8832_v49 = vld [vmem:[#allocation11 + $0x224] sm:$0xf]  ;;  %v6829_v50 = vld [vmem:[#allocation11 + $0x230] sm:$0xf0]  ;;  %v8779_v31 = vld [vmem:[#allocation11 + $0x74] sm:$0xf0] }
 0x16c   : > { %2554 = vmatpush.bf16.msrb.mxu1 %v6684_v9  ;;  %v8848_v9 = vld [vmem:[#allocation11 + $0x2a4] sm:$0xf]  ;;  %v6803_v32 = vld [vmem:[#allocation11 + $0x1e8] sm:$0xf] }
 0x16d   : > { %v6896_v15 = vor.u32 %v8848_v9, %v6893_v13  ;;  %v6643_v9 = vld [vmem:[#allocation11 + $0xa8] sm:$0xf]  ;;  %v8787_v13 = vld [vmem:[#allocation11 + $0xb4] sm:$0xf0] }
 0x16e   : > { %2566 = vmatpush.bf16.msrb.mxu2 %v6828_v38  ;;  %v6845_v38 = vld [vmem:[#allocation11 + $0x250] sm:$0xf0] }
 0x16f   : > { %2586 = vmatpush.bf16.msra.mxu0 %v6672_v54  ;;  %v8856_v54 = vld [vmem:[#allocation11 + $0x2e4] sm:$0xf]  ;;  %v6848_v40 = vor.u32 %v8836_v37, %v6845_v38 }
 0x170   : > { %2599 = vmatpush.bf16.msra.mxu1 %v6800_v21  ;;  %v6928_v56 = vor.u32 %v8856_v54, %v6925_v55  ;;  %v6685_v21 = vld [vmem:[#allocation11 + $0x110] sm:$0xf0]  ;;  %v893_v55 = vperm.slane %v10029_v2, 1 }
 0x171   : > { %v6688_v23 = vor.u32 %v8796_v20, %v6685_v21  ;;  %v6627_v20 = vld [vmem:[#allocation11 + $0x88] sm:$0xf] }
 0x172   : > { %2567 = vmatpush.bf16.msrb.mxu2 %v6812_v46  ;;  %v8795_v46 = vld [vmem:[#allocation11 + $0xf4] sm:$0xf0] }
 0x173   : > { %2587 = vmatpush.bf16.msra.mxu0 %v6656_v57  ;;  %v7035_v57 = vld [vmem:[#allocation11 + $0x3c0] sm:$0xf] }
 0x174   : > { %2600 = vmatpush.bf16.msra.mxu1 %v6784_v28  ;;  %v7036_v59 = vor.u32 %v8886_v58, %v7035_v57  ;;  %v8874_v28 = vld [vmem:[#allocation11 + $0x36c] sm:$0xf0]  ;;  %v6676_v57 = vor.u32 %v8795_v46, %v6675_v43  ;;  %v8791_v58 = vld [vmem:[#allocation11 + $0xd4] sm:$0xf0]  ;;  %v6787_v43 = vld [vmem:[#allocation11 + $0x1c8] sm:$0xf] }
 0x175   : > { %v6988_v30 = vor.u32 %v8874_v28, %v6987_v27  ;;  %v894_v46 = vperm.slane %v10029_v2, 2 }
 0x176   : > { %2612 = vmatpush.bf16.msra.mxu2 %v6928_v56  ;;  %2574 = vmatpush.bf16.msrb.mxu3 %v7036_v59  ;;  %v6659_v56 = vld [vmem:[#allocation11 + $0xc8] sm:$0xf]  ;;  %v6939_v59 = vld [vmem:[#allocation11 + $0x300] sm:$0xf] }
 0x177   : > { %2588 = vmatpush.bf16.msra.mxu0 %v6640_v60  ;;  %v8804_v60 = vld [vmem:[#allocation11 + $0x144] sm:$0xf]  ;;  %v6660_v8 = vor.u32 %v8791_v58, %v6659_v56  ;;  %v6771_v56 = vld [vmem:[#allocation11 + $0x1a8] sm:$0xf] }
 0x178   : > { %2601 = vmatpush.bf16.msra.mxu1 %v6768_v35  ;;  %v6720_v63 = vor.u32 %v8804_v60, %v6717_v61  ;;  %v8870_v35 = vld [vmem:[#allocation11 + $0x34c] sm:$0xf0]  ;;  %v8868_v58 = vld [vmem:[#allocation11 + $0x344] sm:$0xf] }
 0x179   : > { %v6972_v36 = vor.u32 %v8870_v35, %v6971_v34  ;;  %v8862_v60 = vld [vmem:[#allocation11 + $0x30c] sm:$0xf0]  ;;  %v7005_v34 = vld [vmem:[#allocation11 + $0x390] sm:$0xf0] }
 0x17a   : > { %2613 = vmatpush.bf16.msra.mxu2 %v6912_v1  ;;  %2575 = vmatpush.bf16.msrb.mxu3 %v7020_v6  ;;  %v6940_v62 = vor.u32 %v8862_v60, %v6939_v59  ;;  %v8888_v1 = vld [vmem:[#allocation11 + $0x3e4] sm:$0xf]  ;;  %v6973_v59 = vld [vmem:[#allocation11 + $0x350] sm:$0xf0] }
 0x17b   : > { %2589 = vmatpush.bf16.msra.mxu0 %v6624_v5 }
 0x17c   : > { %2602 = vmatpush.bf16.msra.mxu1 %v6752_v11  ;;  %v6955_v11 = vld [vmem:[#allocation11 + $0x320] sm:$0xf] }
 0x17d   : > { %v6956_v47 = vor.u32 %v8866_v44, %v6955_v11  ;;  %v8823_v44 = vld [vmem:[#allocation11 + $0x1d4] sm:$0xf0] }
 0x17e   : > { %2614 = vmatpush.bf16.msra.mxu2 %v6896_v15  ;;  %v7037_v15 = vld [vmem:[#allocation11 + $0x3d0] sm:$0xf0] }
 0x17f   : > { %2590 = vmatpush.bf16.msra.mxu0 %v6608_v16  ;;  %v7003_v16 = vld [vmem:[#allocation11 + $0x380] sm:$0xf] }
 0x180   : > { %2603 = vmatpush.bf16.msra.mxu1 %v6736_v52  ;;  %v7004_v19 = vor.u32 %v8878_v18, %v7003_v16  ;;  %v6832_v52 = vor.u32 %v8832_v49, %v6829_v50 }
 0x182   : > { %2576 = vmatpush.bf16.msrb.mxu3 %v7004_v19  ;;  %v6644_v19 = vor.u32 %v8787_v13, %v6643_v9  ;;  %v6957_v9 = vld [vmem:[#allocation11 + $0x330] sm:$0xf0]  ;;  %v6677_v13 = vld [vmem:[#allocation11 + $0xf8] sm:$0xf0] }
 0x183   : > { %2591 = vmatpush.bf16.msra.mxu0 %v6592_v26  ;;  %v6880_v26 = vor.u32 %v8844_v22, %v6877_v24  ;;  %v8783_v22 = vld [vmem:[#allocation11 + $0x94] sm:$0xf0]  ;;  %v7021_v24 = vld [vmem:[#allocation11 + $0x3b0] sm:$0xf0] }
 0x184   : > { %2604 = vmatpush.bf16.msra.mxu1 %v6720_v63  ;;  %v8828_v63 = vld [vmem:[#allocation11 + $0x204] sm:$0xf] }
 0x185   : > { %2615 = vmatpush.bf16.msra.mxu2 %v6880_v26  ;;  %v6816_v4 = vor.u32 %v8828_v63, %v6813_v0  ;;  %v6976_v63 = vor.u32 %v8868_v58, %v6973_v59  ;;  %v6883_v58 = vld [vmem:[#allocation11 + $0x288] sm:$0xf]  ;;  %v8847_v59 = vld [vmem:[#allocation11 + $0x294] sm:$0xf0] }
 0x186   : > { %2577 = vmatpush.bf16.msrb.mxu3 %v6988_v30  ;;  %v6611_v30 = vld [vmem:[#allocation11 + $0x68] sm:$0xf] }
 0x187   : > { %2592 = vmatpush.bf16.msra.mxu0 %v6576_v53 }
 0x188   : > { %2605 = vmatpush.bf16.msra.mxu1 %v6704_v12 }
 0x189   : > { %2616 = vmatpush.bf16.msra.mxu2 %v6864_v33  ;;  %v8827_v33 = vld [vmem:[#allocation11 + $0x1f4] sm:$0xf0] }
 0x18a   : > { %v1549_v5 = vpop.f32.mrf.mxu0  ;;  %2578 = vmatpush.bf16.msrb.mxu3 %v6972_v36 }
 0x18b   : > { %2593 = vmatpush.bf16.msra.mxu0 %v6560_v42  ;;  %v1562_v10 = vpop.f32.mrf.mxu1  ;;  %v1550_v25 = vadd.f32 %v1549_v5, %v892_v14  ;;  %v7053_v5 = vld [vmem:[#allocation11 + $0x3f0] sm:$0xf0]  ;;  %v8884_v14 = vld [vmem:[#allocation11 + $0x3c4] sm:$0xf] }
 0x18c   : > { %2606 = vmatpush.bf16.msra.mxu1 %v6688_v23  ;;  %v7056_v7 = vor.u32 %v8888_v1, %v7053_v5  ;;  %v7040_v18 = vor.u32 %v8884_v14, %v7037_v15  ;;  %v8880_v23 = vld [vmem:[#allocation11 + $0x3a4] sm:$0xf]  ;;  %v8767_v5 = vld [vmem:[#allocation11 + $0x14] sm:$0xf0] }
 0x18d   : > { %v1563_v53 = vadd.f32 %v1562_v10, %v1550_v25  ;;  %2617 = vmatpush.bf16.msra.mxu2 %v6848_v40  ;;  %v7024_v26 = vor.u32 %v8880_v23, %v7021_v24  ;;  %v6804_v40 = vor.u32 %v8827_v33, %v6803_v32  ;;  %v6931_v24 = vld [vmem:[#allocation11 + $0x2e8] sm:$0xf] }
 0x18e   : > { %2579 = vmatpush.bf16.msrb.mxu3 %v6956_v47 }
 0x191   : > { %2618 = vmatpush.bf16.msra.mxu2 %v6832_v52  ;;  %v6788_v52 = vor.u32 %v8823_v44, %v6787_v43 }
 0x192   : > { %v1551_v29 = vpop.f32.mrf.mxu0  ;;  %2580 = vmatpush.bf16.msrb.mxu3 %v6940_v62 }
 0x193   : > { %v1564_v48 = vpop.f32.mrf.mxu1  ;;  %v6628_v29 = vor.u32 %v8783_v22, %v6627_v20  ;;  %v8811_v22 = vld [vmem:[#allocation11 + $0x174] sm:$0xf0] }
 0x195   : > { %2619 = vmatpush.bf16.msra.mxu2 %v6816_v4  ;;  %v6563_v4 = vld [vmem:[#allocation11 + $0x8] sm:$0xf] }
 0x196   : > { %2625 = vmatpush.bf16.msra.mxu3 %v7056_v7  ;;  %v8815_v7 = vld [vmem:[#allocation11 + $0x194] sm:$0xf0] }
 0x198   : > { %v1575_v39 = vpop.f32.mrf.mxu2 }
 0x199   : > { %v1576_v41 = vadd.f32 %v1575_v39, %v1563_v53  ;;  %v1588_v42 = vpop.f32.mrf.mxu3  ;;  %v8876_v53 = vld [vmem:[#allocation11 + $0x384] sm:$0xf]  ;;  %v6612_v39 = vor.u32 %v8779_v31, %v6611_v30  ;;  %v6661_v30 = vld [vmem:[#allocation11 + $0xd8] sm:$0xf0] }
 0x19a   : > { %v1601_v17 = vpop.f32.mrf.mxu0  ;;  %2626 = vmatpush.bf16.msra.mxu3 %v7040_v18  ;;  %v7008_v36 = vor.u32 %v8876_v53, %v7005_v34  ;;  %v6723_v34 = vld [vmem:[#allocation11 + $0x148] sm:$0xf] }
 0x19b   : > { %v1589_v45 = vadd.f32 %v1588_v42, %v1576_v41  ;;  %v1614_v51 = vpop.f32.mrf.mxu1  ;;  %v1602_v10 = vadd.f32 %v1601_v17, %v893_v55  ;;  %v6595_v41 = vld [vmem:[#allocation11 + $0x48] sm:$0xf]  ;;  %v8775_v42 = vld [vmem:[#allocation11 + $0x54] sm:$0xf0]  ;;  %v6989_v17 = vld [vmem:[#allocation11 + $0x370] sm:$0xf0] }
 0x19c   : > { %v8771_v55 = vld [vmem:[#allocation11 + $0x34] sm:$0xf0] }
 0x19d   : > { %v1748_v54 = vmax.f32 %v1589_v45, 0.0  ;;  %v1615_v21 = vadd.f32 %v1614_v51, %v1602_v10  ;;  %v8872_v45 = vld [vmem:[#allocation11 + $0x364] sm:$0xf]  ;;  %v6596_v51 = vor.u32 %v8775_v42, %v6595_v41 }
 0x19e   : > { %2627 = vmatpush.bf16.msra.mxu3 %v7024_v26  ;;  %v6992_v49 = vor.u32 %v8872_v45, %v6989_v17  ;;  %v6941_v26 = vld [vmem:[#allocation11 + $0x310] sm:$0xf0]  ;;  %v6707_v17 = vld [vmem:[#allocation11 + $0x128] sm:$0xf] }
 0x19f   : > { %v10033_v61 = vpack.c.bf16 %v1748_v54, %v1748_v54  ;;  %v6579_v54 = vld [vmem:[#allocation11 + $0x28] sm:$0xf] }
 0x1a0   : > { %v1577_v3 = vpop.f32.mrf.mxu2  ;;  %v6580_v1 = vor.u32 %v8771_v55, %v6579_v54 }
 0x1a1   : > { %v1590_v6 = vpop.f32.mrf.mxu3  ;;  %2542 = vmatmul.bf16.vlgmr.msrb.gmra.mxu0 %v10033_v61 }
 0x1a2   : > { %2638 = vmatpush.bf16.msrb.mxu0 %v6676_v57  ;;  %v1603_v12 = vpop.f32.mrf.mxu0  ;;  %2628 = vmatpush.bf16.msra.mxu3 %v7008_v36  ;;  %v8819_v57 = vld [vmem:[#allocation11 + $0x1b4] sm:$0xf0]  ;;  %v6755_v6 = vld [vmem:[#allocation11 + $0x188] sm:$0xf] }
 0x1a3   : > { %v1616_v16 = vpop.f32.mrf.mxu1  ;;  %v6772_v3 = vor.u32 %v8819_v57, %v6771_v56  ;;  %v8793_v12 = vld [vmem:[#allocation11 + $0xec] sm:$0xf]  ;;  %v6756_v20 = vor.u32 %v8815_v7, %v6755_v6  ;;  %v6915_v36 = vld [vmem:[#allocation11 + $0x2c8] sm:$0xf]  ;;  %v8799_v57 = vld [vmem:[#allocation11 + $0x114] sm:$0xf0]  ;;  %v6884_v6 = vor.u32 %v8847_v59, %v6883_v58 }
 0x1a4   : > { %v6680_v23 = vor.u32 %v8793_v12, %v6677_v13  ;;  %v6691_v56 = vld [vmem:[#allocation11 + $0x108] sm:$0xf]  ;;  %v8773_v12 = vld [vmem:[#allocation11 + $0x4c] sm:$0xf]  ;;  %v6597_v13 = vld [vmem:[#allocation11 + $0x58] sm:$0xf0] }
 0x1a5   : > { %v7043_v59 = vld [vmem:[#allocation11 + $0x3c8] sm:$0xf] }
 0x1a6   : > { %2639 = vmatpush.bf16.msrb.mxu0 %v6660_v8  ;;  %2629 = vmatpush.bf16.msra.mxu3 %v6992_v49  ;;  %v8864_v8 = vld [vmem:[#allocation11 + $0x324] sm:$0xf]  ;;  %v8851_v49 = vld [vmem:[#allocation11 + $0x2b4] sm:$0xf0] }
 0x1a7   : > { %v6960_v14 = vor.u32 %v8864_v8, %v6957_v9  ;;  %v6867_v8 = vld [vmem:[#allocation11 + $0x268] sm:$0xf] }
 0x1a8   : > { %v1627_v25 = vpop.f32.mrf.mxu2 }
 0x1a9   : > { %v1628_v27 = vadd.f32 %v1627_v25, %v1615_v21  ;;  %v1640_v28 = vpop.f32.mrf.mxu3  ;;  %v6739_v21 = vld [vmem:[#allocation11 + $0x168] sm:$0xf]  ;;  %v8860_v25 = vld [vmem:[#allocation11 + $0x304] sm:$0xf] }
 0x1aa   : > { %2640 = vmatpush.bf16.msrb.mxu0 %v6644_v19  ;;  %2630 = vmatpush.bf16.msra.mxu3 %v6976_v63  ;;  %v6564_v19 = vor.u32 %v8767_v5, %v6563_v4  ;;  %v6944_v31 = vor.u32 %v8860_v25, %v6941_v26  ;;  %v6692_v4 = vor.u32 %v8799_v57, %v6691_v56  ;;  %v895_v5 = vperm.slane %v10029_v2, 3  ;;  %v8817_v25 = vld [vmem:[#allocation11 + $0x1ac] sm:$0xf]  ;;  %v6773_v26 = vld [vmem:[#allocation11 + $0x1b8] sm:$0xf0] }
 0x1ab   : > { %v1641_v48 = vadd.f32 %v1640_v28, %v1628_v27  ;;  %v1653_v35 = vpop.f32.mrf.mxu0  ;;  %v8859_v28 = vld [vmem:[#allocation11 + $0x2f4] sm:$0xf0] }
 0x1ac   : > { %v1654_v60 = vadd.f32 %v1653_v35, %v894_v46  ;;  %v6932_v33 = vor.u32 %v8859_v28, %v6931_v24  ;;  %v8807_v35 = vld [vmem:[#allocation11 + $0x154] sm:$0xf0] }
 0x1ad   : > { %v1749_v37 = vmax.f32 %v1641_v48, 0.0  ;;  %v6740_v48 = vor.u32 %v8811_v22, %v6739_v21  ;;  %v6724_v43 = vor.u32 %v8807_v35, %v6723_v34  ;;  %v8803_v46 = vld [vmem:[#allocation11 + $0x134] sm:$0xf0]  ;;  %v8769_v22 = vld [vmem:[#allocation11 + $0x2c] sm:$0xf] }
 0x1ae   : > { %v1666_v38 = vpop.f32.mrf.mxu1  ;;  %2641 = vmatpush.bf16.msrb.mxu0 %v6628_v29  ;;  %2631 = vmatpush.bf16.msra.mxu3 %v6960_v14  ;;  %v8789_v29 = vld [vmem:[#allocation11 + $0xcc] sm:$0xf]  ;;  %v8839_v21 = vld [vmem:[#allocation11 + $0x254] sm:$0xf0] }
 0x1af   : > { %v10036_v11 = vpack.c.bf16 %v1749_v37, %v1749_v37  ;;  %v1667_v10 = vadd.f32 %v1666_v38, %v1654_v60  ;;  %v6664_v53 = vor.u32 %v8789_v29, %v6661_v30  ;;  %v8855_v38 = vld [vmem:[#allocation11 + $0x2d4] sm:$0xf0]  ;;  %v8777_v60 = vld [vmem:[#allocation11 + $0x6c] sm:$0xf]  ;;  %v6835_v30 = vld [vmem:[#allocation11 + $0x228] sm:$0xf] }
 0x1b0   : > { %v1629_v47 = vpop.f32.mrf.mxu2  ;;  %v6916_v44 = vor.u32 %v8855_v38, %v6915_v36  ;;  %v8821_v14 = vld [vmem:[#allocation11 + $0x1cc] sm:$0xf]  ;;  %v6757_v36 = vld [vmem:[#allocation11 + $0x198] sm:$0xf0] }
 0x1b1   : > { %v1642_v50 = vpop.f32.mrf.mxu3  ;;  %2555 = vmatmul.bf16.vlgmr.msrb.gmra.mxu1 %v10036_v11  ;;  %2594 = vmatmul.bf16.vlgmr.msra.gmra.mxu0 %v10033_v61  ;;  %v6899_v47 = vld [vmem:[#allocation11 + $0x2a8] sm:$0xf]  ;;  %v8813_v35 = vld [vmem:[#allocation11 + $0x18c] sm:$0xf] }
 0x1b2   : > { %2642 = vmatpush.bf16.msrb.mxu0 %v6612_v39  ;;  %2651 = vmatpush.bf16.msrb.mxu1 %v6804_v40  ;;  %v8785_v39 = vld [vmem:[#allocation11 + $0xac] sm:$0xf]  ;;  %v6645_v40 = vld [vmem:[#allocation11 + $0xb8] sm:$0xf0]  ;;  %v6900_v54 = vor.u32 %v8851_v49, %v6899_v47 }
 0x1b3   : > { %v1655_v62 = vpop.f32.mrf.mxu0  ;;  %2632 = vmatpush.bf16.msra.mxu3 %v6944_v31  ;;  %v6648_v45 = vor.u32 %v8785_v39, %v6645_v40  ;;  %v8781_v50 = vld [vmem:[#allocation11 + $0x8c] sm:$0xf]  ;;  %v6741_v49 = vld [vmem:[#allocation11 + $0x178] sm:$0xf0] }
 0x1b4   : > { %v6613_v62 = vld [vmem:[#allocation11 + $0x78] sm:$0xf0]  ;;  %v8809_v47 = vld [vmem:[#allocation11 + $0x16c] sm:$0xf] }
 0x1b5   : > { %v6616_v7 = vor.u32 %v8777_v60, %v6613_v62  ;;  %v6744_v57 = vor.u32 %v8809_v47, %v6741_v49  ;;  %v8887_v60 = vld [vmem:[#allocation11 + $0x3d4] sm:$0xf0]  ;;  %v8805_v62 = vld [vmem:[#allocation11 + $0x14c] sm:$0xf]  ;;  %v7061_v47 = vld [vmem:[#allocation11 + $0x3f8] sm:$0xf0] }
 0x1b6   : > { %v1668_v0 = vpop.f32.mrf.mxu1  ;;  %2643 = vmatpush.bf16.msrb.mxu0 %v6596_v51  ;;  %2652 = vmatpush.bf16.msrb.mxu1 %v6788_v52  ;;  %v6629_v51 = vld [vmem:[#allocation11 + $0x98] sm:$0xf0]  ;;  %v6708_v52 = vor.u32 %v8803_v46, %v6707_v17  ;;  %v7059_v17 = vld [vmem:[#allocation11 + $0x3e8] sm:$0xf]  ;;  %v8891_v46 = vld [vmem:[#allocation11 + $0x3f4] sm:$0xf0] }
 0x1b7   : > { %v6632_v55 = vor.u32 %v8781_v50, %v6629_v51  ;;  %v8825_v0 = vld [vmem:[#allocation11 + $0x1ec] sm:$0xf]  ;;  %v6933_v51 = vld [vmem:[#allocation11 + $0x2f8] sm:$0xf0] }
 0x1b8   : > { %v1679_v15 = vpop.f32.mrf.mxu2  ;;  %v8857_v50 = vld [vmem:[#allocation11 + $0x2ec] sm:$0xf] }
 0x1b9   : > { %v1692_v16 = vpop.f32.mrf.mxu3  ;;  %v1680_v18 = vadd.f32 %v1679_v15, %v1667_v10  ;;  %v8843_v10 = vld [vmem:[#allocation11 + $0x274] sm:$0xf0]  ;;  %v6789_v15 = vld [vmem:[#allocation11 + $0x1d8] sm:$0xf0]  ;;  %v6936_v58 = vor.u32 %v8857_v50, %v6933_v51  ;;  %v8885_v51 = vld [vmem:[#allocation11 + $0x3cc] sm:$0xf] }
 0x1ba   : > { %2644 = vmatpush.bf16.msrb.mxu0 %v6580_v1  ;;  %2653 = vmatpush.bf16.msrb.mxu1 %v6772_v3  ;;  %v6805_v1 = vld [vmem:[#allocation11 + $0x1f8] sm:$0xf0]  ;;  %v6792_v2 = vor.u32 %v8821_v14, %v6789_v15 }
 0x1bb   : > { %v1693_v27 = vadd.f32 %v1692_v16, %v1680_v18  ;;  %v6808_v9 = vor.u32 %v8825_v0, %v6805_v1  ;;  %v6868_v16 = vor.u32 %v8843_v10, %v6867_v8  ;;  %v6600_v18 = vor.u32 %v8773_v12, %v6597_v13  ;;  %v6725_v0 = vld [vmem:[#allocation11 + $0x158] sm:$0xf0]  ;;  %v8853_v1 = vld [vmem:[#allocation11 + $0x2cc] sm:$0xf]  ;;  %v7027_v8 = vld [vmem:[#allocation11 + $0x3a8] sm:$0xf] }
 0x1bc   : > { %v8801_v10 = vld [vmem:[#allocation11 + $0x12c] sm:$0xf]  ;;  %v6709_v12 = vld [vmem:[#allocation11 + $0x138] sm:$0xf0] }
 0x1bd   : > { %v1750_v32 = vmax.f32 %v1693_v27, 0.0  ;;  %v8849_v13 = vld [vmem:[#allocation11 + $0x2ac] sm:$0xf]  ;;  %v6901_v14 = vld [vmem:[#allocation11 + $0x2b8] sm:$0xf0] }
 0x1be   : > { %2645 = vmatpush.bf16.msrb.mxu0 %v6564_v19  ;;  %2654 = vmatpush.bf16.msrb.mxu1 %v6756_v20  ;;  %v6851_v19 = vld [vmem:[#allocation11 + $0x248] sm:$0xf] }
 0x1bf   : > { %v10041_v37 = vpack.c.bf16 %v1750_v32, %v1750_v32  ;;  %v6852_v28 = vor.u32 %v8839_v21, %v6851_v19  ;;  %v6776_v32 = vor.u32 %v8817_v25, %v6773_v26  ;;  %v8879_v19 = vld [vmem:[#allocation11 + $0x394] sm:$0xf0]  ;;  %v8845_v21 = vld [vmem:[#allocation11 + $0x28c] sm:$0xf]  ;;  %v6995_v26 = vld [vmem:[#allocation11 + $0x368] sm:$0xf] }
 0x1c0   : > { %v1681_v41 = vpop.f32.mrf.mxu2 }
 0x1c1   : > { %v1694_v42 = vpop.f32.mrf.mxu3  ;;  %2607 = vmatmul.bf16.vlgmr.msra.gmra.mxu1 %v10036_v11  ;;  %2646 = vmatmul.bf16.vlgmr.msrb.gmra.mxu0 %v10033_v61 }
 0x1c2   : > { %2690 = vmatpush.bf16.msra.mxu0 %v6680_v23  ;;  %2568 = vmatmul.bf16.vlgmr.msrb.gmra.mxu2 %v10041_v37  ;;  %v6581_v23 = vld [vmem:[#allocation11 + $0x38] sm:$0xf0]  ;;  %v6819_v42 = vld [vmem:[#allocation11 + $0x208] sm:$0xf] }
 0x1c3   : > { %2655 = vmatpush.bf16.msrb.mxu1 %v6740_v48  ;;  %2664 = vmatpush.bf16.msrb.mxu2 %v6932_v33  ;;  %v6584_v29 = vor.u32 %v8769_v22, %v6581_v23  ;;  %v8835_v48 = vld [vmem:[#allocation11 + $0x234] sm:$0xf0]  ;;  %v8765_v33 = vld [vmem:[#allocation11 + $0xc] sm:$0xf]  ;;  %v6885_v22 = vld [vmem:[#allocation11 + $0x298] sm:$0xf0] }
 0x1c4   : > { %v6836_v40 = vor.u32 %v8835_v48, %v6835_v30  ;;  %v6888_v25 = vor.u32 %v8845_v21, %v6885_v22  ;;  %v8871_v48 = vld [vmem:[#allocation11 + $0x354] sm:$0xf0]  ;;  %v8946_v21 = vld [vmem:[%s9999_s20 + $0x1ac] sm:$0xf0]  ;;  %v7211_v22 = vld [vmem:[%s9999_s20 + $0x120] sm:$0xf] }
 0x1c6   : > { %2691 = vmatpush.bf16.msra.mxu0 %v6664_v53  ;;  %v6565_v53 = vld [vmem:[#allocation11 + $0x18] sm:$0xf0] }
 0x1c7   : > { %2656 = vmatpush.bf16.msrb.mxu1 %v6724_v43  ;;  %2665 = vmatpush.bf16.msrb.mxu2 %v6916_v44  ;;  %v6568_v41 = vor.u32 %v8765_v33, %v6565_v53  ;;  %v8831_v43 = vld [vmem:[#allocation11 + $0x214] sm:$0xf0]  ;;  %v8837_v33 = vld [vmem:[#allocation11 + $0x24c] sm:$0xf]  ;;  %v6853_v53 = vld [vmem:[#allocation11 + $0x258] sm:$0xf0] }
 0x1ca   : > { %2692 = vmatpush.bf16.msra.mxu0 %v6648_v45  ;;  %v6760_v45 = vor.u32 %v8813_v35, %v6757_v36  ;;  %v6856_v35 = vor.u32 %v8837_v33, %v6853_v53  ;;  %v6963_v36 = vld [vmem:[#allocation11 + $0x328] sm:$0xf]  ;;  %v9066_v33 = vld [vmem:[%s9999_s20 + $0x56c] sm:$0xf0] }
 0x1cb   : > { %v1705_v63 = vpop.f32.mrf.mxu0  ;;  %2657 = vmatpush.bf16.msrb.mxu1 %v6708_v52  ;;  %2666 = vmatpush.bf16.msrb.mxu2 %v6900_v54  ;;  %v6820_v54 = vor.u32 %v8831_v43, %v6819_v42  ;;  %v6947_v43 = vld [vmem:[#allocation11 + $0x308] sm:$0xf] }
 0x1cc   : > { %v1706_v20 = vadd.f32 %v1705_v63, %v895_v5  ;;  %v7044_v5 = vor.u32 %v8887_v60, %v7043_v59  ;;  %v8877_v59 = vld [vmem:[#allocation11 + $0x38c] sm:$0xf]  ;;  %v7013_v60 = vld [vmem:[#allocation11 + $0x398] sm:$0xf0] }
 0x1ce   : > { %v1718_v3 = vpop.f32.mrf.mxu1  ;;  %2693 = vmatpush.bf16.msra.mxu0 %v6632_v55  ;;  %v7060_v55 = vor.u32 %v8891_v46, %v7059_v17  ;;  %v6821_v17 = vld [vmem:[#allocation11 + $0x218] sm:$0xf0]  ;;  %v8889_v46 = vld [vmem:[#allocation11 + $0x3ec] sm:$0xf] }
 0x1cf   : > { %2658 = vmatpush.bf16.msrb.mxu1 %v6692_v4  ;;  %2667 = vmatpush.bf16.msrb.mxu2 %v6884_v6  ;;  %v1719_v31 = vadd.f32 %v1718_v3, %v1706_v20  ;;  %v6917_v3 = vld [vmem:[#allocation11 + $0x2d8] sm:$0xf0]  ;;  %v6728_v6 = vor.u32 %v8805_v62, %v6725_v0  ;;  %v8797_v20 = vld [vmem:[#allocation11 + $0x10c] sm:$0xf]  ;;  %v7064_v50 = vor.u32 %v8889_v46, %v7061_v47  ;;  %v7405_v46 = vld [vmem:[%s9999_s20 + $0x2d0] sm:$0xf0] }
 0x1d0   : > { %v7016_v62 = vor.u32 %v8877_v59, %v7013_v60  ;;  %v6997_v0 = vld [vmem:[#allocation11 + $0x378] sm:$0xf0] }
 0x1d2   : > { %2694 = vmatpush.bf16.msra.mxu0 %v6616_v7  ;;  %2659 = vmatmul.bf16.vlgmr.msrb.gmra.mxu1 %v10036_v11  ;;  %v6920_v7 = vor.u32 %v8853_v1, %v6917_v3  ;;  %v7403_v1 = vld [vmem:[%s9999_s20 + $0x2a0] sm:$0xf]  ;;  %v8982_v3 = vld [vmem:[%s9999_s20 + $0x2cc] sm:$0xf0] }
 0x1d3   : > { %2703 = vmatpush.bf16.msra.mxu1 %v6808_v9  ;;  %v1707_v24 = vpop.f32.mrf.mxu0  ;;  %2620 = vmatmul.bf16.vlgmr.msra.gmra.mxu2 %v10041_v37  ;;  %v8883_v9 = vld [vmem:[#allocation11 + $0x3b4] sm:$0xf0] }
 0x1d4   : > { %2668 = vmatpush.bf16.msrb.mxu2 %v6868_v16  ;;  %v7028_v15 = vor.u32 %v8883_v9, %v7027_v8  ;;  %v6904_v16 = vor.u32 %v8849_v13, %v6901_v14  ;;  %v8865_v8 = vld [vmem:[#allocation11 + $0x32c] sm:$0xf]  ;;  %v6965_v9 = vld [vmem:[#allocation11 + $0x338] sm:$0xf0] }
 0x1d5   : > { %v6968_v13 = vor.u32 %v8865_v8, %v6965_v9  ;;  %v7499_v8 = vld [vmem:[%s9999_s20 + $0x360] sm:$0xf]  ;;  %v9006_v9 = vld [vmem:[%s9999_s20 + $0x38c] sm:$0xf0] }
 0x1d6   : > { %v1720_v27 = vpop.f32.mrf.mxu1  ;;  %2695 = vmatpush.bf16.msra.mxu0 %v6600_v18  ;;  %v7011_v18 = vld [vmem:[#allocation11 + $0x388] sm:$0xf] }
 0x1d7   : > { %2704 = vmatpush.bf16.msra.mxu1 %v6792_v2  ;;  %v6693_v2 = vld [vmem:[#allocation11 + $0x118] sm:$0xf0]  ;;  %v7012_v23 = vor.u32 %v8879_v19, %v7011_v18  ;;  %v8875_v27 = vld [vmem:[#allocation11 + $0x374] sm:$0xf0] }
 0x1d8   : > { %v1731_v34 = vpop.f32.mrf.mxu2  ;;  %2669 = vmatpush.bf16.msrb.mxu2 %v6852_v28  ;;  %v6696_v24 = vor.u32 %v8797_v20, %v6693_v2  ;;  %v8841_v28 = vld [vmem:[#allocation11 + $0x26c] sm:$0xf]  ;;  %v6996_v30 = vor.u32 %v8875_v27, %v6995_v26  ;;  %v6949_v18 = vld [vmem:[#allocation11 + $0x318] sm:$0xf0]  ;;  %v7259_v2 = vld [vmem:[%s9999_s20 + $0x180] sm:$0xf] }
 0x1d9   : > { %v1732_v38 = vadd.f32 %v1731_v34, %v1719_v31  ;;  %v1744_v39 = vpop.f32.mrf.mxu3  ;;  %v9078_v26 = vld [vmem:[%s9999_s20 + $0x5cc] sm:$0xf0] }
 0x1da   : > { %2696 = vmatpush.bf16.msra.mxu0 %v6584_v29  ;;  %v6869_v29 = vld [vmem:[#allocation11 + $0x278] sm:$0xf0] }
 0x1db   : > { %v1745_v44 = vadd.f32 %v1744_v39, %v1732_v38  ;;  %2705 = vmatpush.bf16.msra.mxu1 %v6776_v32  ;;  %v6872_v31 = vor.u32 %v8841_v28, %v6869_v29  ;;  %v6979_v32 = vld [vmem:[#allocation11 + $0x348] sm:$0xf]  ;;  %v8867_v38 = vld [vmem:[#allocation11 + $0x334] sm:$0xf0]  ;;  %v8833_v39 = vld [vmem:[#allocation11 + $0x22c] sm:$0xf] }
 0x1dc   : > { %2670 = vmatpush.bf16.msrb.mxu2 %v6836_v40  ;;  %v6980_v34 = vor.u32 %v8871_v48, %v6979_v32  ;;  %v6837_v40 = vld [vmem:[#allocation11 + $0x238] sm:$0xf0]  ;;  %v7739_v48 = vld [vmem:[%s9999_s20 + $0x540] sm:$0xf] }
 0x1dd   : > { %v1751_v52 = vmax.f32 %v1745_v44, 0.0  ;;  %v6840_v42 = vor.u32 %v8833_v39, %v6837_v40  ;;  %v8863_v44 = vld [vmem:[#allocation11 + $0x314] sm:$0xf0]  ;;  %v7740_v53 = vor.u32 %v9066_v33, %v7739_v48  ;;  %v9126_v48 = vld [vmem:[%s9999_s20 + $0x74c] sm:$0xf0] }
 0x1de   : > { %2697 = vmatpush.bf16.msra.mxu0 %v6568_v41  ;;  %v6964_v41 = vor.u32 %v8867_v38, %v6963_v36  ;;  %v6948_v49 = vor.u32 %v8863_v44, %v6947_v43  ;;  %v9054_v38 = vld [vmem:[%s9999_s20 + $0x50c] sm:$0xf0]  ;;  %v7643_v43 = vld [vmem:[%s9999_s20 + $0x480] sm:$0xf] }
 0x1df   : > { %v10049_v56 = vpack.c.bf16 %v1751_v52, %v1751_v52  ;;  %2706 = vmatpush.bf16.msra.mxu1 %v6760_v45  ;;  %v8829_v45 = vld [vmem:[#allocation11 + $0x20c] sm:$0xf]  ;;  %v7045_v52 = vld [vmem:[#allocation11 + $0x3d8] sm:$0xf0] }
 0x1e0   : > { %v1733_v63 = vpop.f32.mrf.mxu2  ;;  %2671 = vmatpush.bf16.msrb.mxu2 %v6820_v54  ;;  %v7048_v54 = vor.u32 %v8885_v51, %v7045_v52  ;;  %v8171_v51 = vld [vmem:[%s9999_s20 + $0x8a0] sm:$0xf] }
 0x1e1   : > { %v1746_v4 = vpop.f32.mrf.mxu3  ;;  %2581 = vmatmul.bf16.vlgmr.msrb.gmra.mxu3 %v10049_v56  ;;  %2698 = vmatmul.bf16.vlgmr.msra.gmra.mxu0 %v10033_v61  ;;  %v6712_v61 = vor.u32 %v8801_v10, %v6709_v12  ;;  %v8873_v63 = vld [vmem:[#allocation11 + $0x36c] sm:$0xf]  ;;  %v7355_v10 = vld [vmem:[%s9999_s20 + $0x240] sm:$0xf]  ;;  %v8970_v12 = vld [vmem:[%s9999_s20 + $0x26c] sm:$0xf0] }
 0x1e2   : > { %2677 = vmatpush.bf16.msrb.mxu3 %v7060_v55  ;;  %v8881_v55 = vld [vmem:[#allocation11 + $0x3ac] sm:$0xf]  ;;  %v7404_v4 = vor.u32 %v8982_v3, %v7403_v1  ;;  %v7356_v14 = vor.u32 %v8970_v12, %v7355_v10  ;;  %v8123_v1 = vld [vmem:[%s9999_s20 + $0x840] sm:$0xf]  ;;  %v7500_v12 = vor.u32 %v9006_v9, %v7499_v8  ;;  %v7597_v8 = vld [vmem:[%s9999_s20 + $0x450] sm:$0xf0] }
 0x1e3   : > { %2707 = vmatpush.bf16.msra.mxu1 %v6744_v57  ;;  %2672 = vmatmul.bf16.vlgmr.msrb.gmra.mxu2 %v10041_v37  ;;  %v7029_v57 = vld [vmem:[#allocation11 + $0x3b8] sm:$0xf0]  ;;  %v8075_v10 = vld [vmem:[%s9999_s20 + $0x7e0] sm:$0xf] }
 0x1e4   : > { %2716 = vmatpush.bf16.msra.mxu2 %v6936_v58  ;;  %v7032_v58 = vor.u32 %v8881_v55, %v7029_v57  ;;  %5082 = vmatpush.bf16.msrb.mxu0 %v7404_v4  ;;  %v8964_v55 = vld [vmem:[%s9999_s20 + $0x244] sm:$0xf]  ;;  %v7357_v57 = vld [vmem:[%s9999_s20 + $0x270] sm:$0xf0]  ;;  %v9162_v4 = vld [vmem:[%s9999_s20 + $0x86c] sm:$0xf0] }
 0x1e6   : > { %2678 = vmatpush.bf16.msrb.mxu3 %v7044_v5  ;;  %v7000_v5 = vor.u32 %v8873_v63, %v6997_v0  ;;  %v7547_v63 = vld [vmem:[%s9999_s20 + $0x3c0] sm:$0xf]  ;;  %v9018_v0 = vld [vmem:[%s9999_s20 + $0x3ec] sm:$0xf0] }
 0x1e7   : > { %2708 = vmatpush.bf16.msra.mxu1 %v6728_v6  ;;  %v8869_v6 = vld [vmem:[#allocation11 + $0x34c] sm:$0xf]  ;;  %v7548_v3 = vor.u32 %v9018_v0, %v7547_v63  ;;  %v7645_v0 = vld [vmem:[%s9999_s20 + $0x4b0] sm:$0xf0] }
 0x1e8   : > { %2717 = vmatpush.bf16.msra.mxu2 %v6920_v7  ;;  %v6981_v7 = vld [vmem:[#allocation11 + $0x358] sm:$0xf0]  ;;  %5083 = vmatpush.bf16.msrb.mxu0 %v7356_v14  ;;  %v8940_v14 = vld [vmem:[%s9999_s20 + $0x184] sm:$0xf] }
 0x1ea   : > { %2679 = vmatpush.bf16.msrb.mxu3 %v7028_v15  ;;  %v7307_v15 = vld [vmem:[%s9999_s20 + $0x1e0] sm:$0xf] }
 0x1eb   : > { %2709 = vmatpush.bf16.msra.mxu1 %v6712_v61  ;;  %v8958_v61 = vld [vmem:[%s9999_s20 + $0x20c] sm:$0xf0] }
 0x1ec   : > { %2718 = vmatpush.bf16.msra.mxu2 %v6904_v16  ;;  %v8861_v16 = vld [vmem:[#allocation11 + $0x30c] sm:$0xf]  ;;  %v7308_v19 = vor.u32 %v8958_v61, %v7307_v15  ;;  %v7261_v15 = vld [vmem:[%s9999_s20 + $0x1b0] sm:$0xf0] }
 0x1ed   : > { %v6952_v20 = vor.u32 %v8861_v16, %v6949_v18 }
 0x1ee   : > { %2680 = vmatpush.bf16.msrb.mxu3 %v7012_v23  ;;  %5084 = vmatpush.bf16.msrb.mxu0 %v7308_v19  ;;  %v7260_v23 = vor.u32 %v8946_v21, %v7259_v2  ;;  %v7264_v19 = vor.u32 %v8940_v14, %v7261_v15  ;;  %v8994_v2 = vld [vmem:[%s9999_s20 + $0x32c] sm:$0xf0]  ;;  %v8027_v21 = vld [vmem:[%s9999_s20 + $0x780] sm:$0xf] }
 0x1ef   : > { %2710 = vmatpush.bf16.msra.mxu1 %v6696_v24  ;;  %v8934_v24 = vld [vmem:[%s9999_s20 + $0x14c] sm:$0xf0]  ;;  %v8507_v15 = vld [vmem:[%s9999_s20 + $0xb40] sm:$0xf] }
 0x1f0   : > { %2719 = vmatpush.bf16.msra.mxu2 %v6888_v25  ;;  %v7787_v25 = vld [vmem:[%s9999_s20 + $0x5a0] sm:$0xf]  ;;  %v7212_v28 = vor.u32 %v8934_v24, %v7211_v22  ;;  %v9138_v22 = vld [vmem:[%s9999_s20 + $0x7ac] sm:$0xf0] }
 0x1f1   : > { %2633 = vmatmul.bf16.vlgmr.msra.gmra.mxu3 %v10049_v56  ;;  %v7788_v27 = vor.u32 %v9078_v26, %v7787_v25  ;;  %v8028_v24 = vor.u32 %v9138_v22, %v8027_v21  ;;  %v8928_v25 = vld [vmem:[%s9999_s20 + $0x124] sm:$0xf]  ;;  %v7213_v26 = vld [vmem:[%s9999_s20 + $0x150] sm:$0xf0] }
 0x1f2   : > { %2681 = vmatpush.bf16.msrb.mxu3 %v6996_v30  ;;  %2711 = vmatmul.bf16.vlgmr.msra.gmra.mxu1 %v10036_v11  ;;  %v6824_v11 = vor.u32 %v8829_v45, %v6821_v17  ;;  %v7163_v30 = vld [vmem:[%s9999_s20 + $0xc0] sm:$0xf]  ;;  %v9042_v45 = vld [vmem:[%s9999_s20 + $0x4ac] sm:$0xf0]  ;;  %v8976_v17 = vld [vmem:[%s9999_s20 + $0x2a4] sm:$0xf] }
 0x1f3   : > { %5085 = vmatpush.bf16.msrb.mxu0 %v7260_v23  ;;  %5095 = vmatpush.bf16.msrb.mxu1 %v7788_v27  ;;  %v7644_v47 = vor.u32 %v9042_v45, %v7643_v43  ;;  %v9072_v27 = vld [vmem:[%s9999_s20 + $0x5a4] sm:$0xf]  ;;  %v7117_v45 = vld [vmem:[%s9999_s20 + $0x90] sm:$0xf0] }
 0x1f4   : > { %2720 = vmatpush.bf16.msra.mxu2 %v6872_v31  ;;  %v8922_v31 = vld [vmem:[%s9999_s20 + $0xec] sm:$0xf0] }
 0x1f5   : > { %v7164_v32 = vor.u32 %v8922_v31, %v7163_v30  ;;  %v7789_v30 = vld [vmem:[%s9999_s20 + $0x5d0] sm:$0xf0] }
 0x1f6   : > { %2682 = vmatpush.bf16.msrb.mxu3 %v6980_v34  ;;  %v7115_v34 = vld [vmem:[%s9999_s20 + $0x60] sm:$0xf]  ;;  %v7792_v31 = vor.u32 %v9072_v27, %v7789_v30  ;;  %v7501_v30 = vld [vmem:[%s9999_s20 + $0x390] sm:$0xf0] }
 0x1f7   : > { %5086 = vmatpush.bf16.msrb.mxu0 %v7212_v28  ;;  %5096 = vmatpush.bf16.msrb.mxu1 %v7740_v53  ;;  %v7216_v28 = vor.u32 %v8928_v25, %v7213_v26  ;;  %v8916_v53 = vld [vmem:[%s9999_s20 + $0xc4] sm:$0xf]  ;;  %v8459_v25 = vld [vmem:[%s9999_s20 + $0xae0] sm:$0xf]  ;;  %v9246_v26 = vld [vmem:[%s9999_s20 + $0xb0c] sm:$0xf0] }
 0x1f8   : > { %2721 = vmatpush.bf16.msra.mxu2 %v6856_v35  ;;  %v8910_v35 = vld [vmem:[%s9999_s20 + $0x8c] sm:$0xf0]  ;;  %v8460_v27 = vor.u32 %v9246_v26, %v8459_v25  ;;  %v7363_v25 = vld [vmem:[%s9999_s20 + $0x248] sm:$0xf]  ;;  %v8971_v26 = vld [vmem:[%s9999_s20 + $0x274] sm:$0xf0] }
 0x1f9   : > { %v7116_v36 = vor.u32 %v8910_v35, %v7115_v34  ;;  %v7165_v34 = vld [vmem:[%s9999_s20 + $0xf0] sm:$0xf0]  ;;  %v9060_v35 = vld [vmem:[%s9999_s20 + $0x544] sm:$0xf] }
 0x1fa   : > { %2683 = vmatpush.bf16.msrb.mxu3 %v6964_v41  ;;  %v7067_v41 = vld [vmem:[%s9999_s20] sm:$0xf] }
 0x1fb   : > { %5087 = vmatpush.bf16.msrb.mxu0 %v7164_v32  ;;  %v7979_v32 = vld [vmem:[%s9999_s20 + $0x720] sm:$0xf] }
 0x1fc   : > { %2722 = vmatpush.bf16.msra.mxu2 %v6840_v42  ;;  %v8898_v42 = vld [vmem:[%s9999_s20 + $0x2c] sm:$0xf0]  ;;  %v7980_v33 = vor.u32 %v9126_v48, %v7979_v32  ;;  %v8077_v48 = vld [vmem:[%s9999_s20 + $0x810] sm:$0xf0] }
 0x1fd   : > { %v7068_v44 = vor.u32 %v8898_v42, %v7067_v41  ;;  %v7931_v41 = vld [vmem:[%s9999_s20 + $0x6c0] sm:$0xf]  ;;  %v9114_v42 = vld [vmem:[%s9999_s20 + $0x6ec] sm:$0xf0] }
 0x1fe   : > { %2684 = vmatpush.bf16.msrb.mxu3 %v6948_v49  ;;  %v7408_v49 = vor.u32 %v8976_v17, %v7405_v46  ;;  %v7932_v43 = vor.u32 %v9114_v42, %v7931_v41  ;;  %v9048_v17 = vld [vmem:[%s9999_s20 + $0x4e4] sm:$0xf]  ;;  %v7453_v41 = vld [vmem:[%s9999_s20 + $0x330] sm:$0xf0] }
 0x1ff   : > { %5088 = vmatpush.bf16.msrb.mxu0 %v7116_v36  ;;  %v9132_v42 = vld [vmem:[%s9999_s20 + $0x784] sm:$0xf] }
 0x200   : > { %2723 = vmatpush.bf16.msra.mxu2 %v6824_v11  ;;  %v7595_v11 = vld [vmem:[%s9999_s20 + $0x420] sm:$0xf] }
 0x201   : > { %2685 = vmatmul.bf16.vlgmr.msrb.gmra.mxu3 %v10049_v56 }
 0x202   : > { %2729 = vmatpush.bf16.msra.mxu3 %v7064_v50  ;;  %v9030_v50 = vld [vmem:[%s9999_s20 + $0x44c] sm:$0xf0] }
 0x203   : > { %2724 = vmatmul.bf16.vlgmr.msra.gmra.mxu2 %v10041_v37  ;;  %v6984_v37 = vor.u32 %v8869_v6, %v6981_v7  ;;  %5089 = vmatpush.bf16.msrb.mxu0 %v7068_v44  ;;  %v7596_v52 = vor.u32 %v9030_v50, %v7595_v11  ;;  %v7309_v6 = vld [vmem:[%s9999_s20 + $0x210] sm:$0xf0]  ;;  %v8124_v7 = vor.u32 %v9162_v4, %v8123_v1  ;;  %v8904_v44 = vld [vmem:[%s9999_s20 + $0x64] sm:$0xf]  ;;  %v7883_v11 = vld [vmem:[%s9999_s20 + $0x660] sm:$0xf] }
 0x204   : > { %v7120_v46 = vor.u32 %v8904_v44, %v7117_v45  ;;  %v9102_v50 = vld [vmem:[%s9999_s20 + $0x68c] sm:$0xf0]  ;;  %v8029_v45 = vld [vmem:[%s9999_s20 + $0x7b0] sm:$0xf0] }
 0x205   : > { %v9090_v4 = vld [vmem:[%s9999_s20 + $0x62c] sm:$0xf0] }
 0x206   : > { %2730 = vmatpush.bf16.msra.mxu3 %v7048_v54  ;;  %v9174_v54 = vld [vmem:[%s9999_s20 + $0x8cc] sm:$0xf0] }
 0x207   : > { %5134 = vmatpush.bf16.msra.mxu0 %v7408_v49  ;;  %v8172_v60 = vor.u32 %v9174_v54, %v8171_v51  ;;  %v8892_v54 = vld [vmem:[%s9999_s20 + $0x4] sm:$0xf] }
 0x209   : > { %5108 = vmatpush.bf16.msrb.mxu2 %v8172_v60 }
 0x20a   : > { %2731 = vmatpush.bf16.msra.mxu3 %v7032_v58 }
 0x20d   : > { %5109 = vmatpush.bf16.msrb.mxu2 %v8124_v7  ;;  %v9270_v7 = vld [vmem:[%s9999_s20 + $0xbcc] sm:$0xf0] }
 0x20e   : > { %2732 = vmatpush.bf16.msra.mxu3 %v7016_v62  ;;  %v7360_v62 = vor.u32 %v8964_v55, %v7357_v57  ;;  %v7069_v55 = vld [vmem:[%s9999_s20 + $0x30] sm:$0xf0]  ;;  %v9036_v57 = vld [vmem:[%s9999_s20 + $0x484] sm:$0xf] }
 0x20f   : > { %v7072_v63 = vor.u32 %v8892_v54, %v7069_v55  ;;  %v7648_v1 = vor.u32 %v9036_v57, %v7645_v0 }
 0x210   : > { %5135 = vmatpush.bf16.msra.mxu0 %v7360_v62 }
 0x212   : > { %2733 = vmatpush.bf16.msra.mxu3 %v7000_v5  ;;  %v8952_v5 = vld [vmem:[%s9999_s20 + $0x1e4] sm:$0xf] }
 0x216   : > { %2734 = vmatpush.bf16.msra.mxu3 %v6984_v37  ;;  %v7312_v37 = vor.u32 %v8952_v5, %v7309_v6  ;;  %v8555_v5 = vld [vmem:[%s9999_s20 + $0xba0] sm:$0xf] }
 0x217   : > { %v8556_v9 = vor.u32 %v9270_v7, %v8555_v5  ;;  %v9198_v7 = vld [vmem:[%s9999_s20 + $0x98c] sm:$0xf0] }
 0x218   : > { %5136 = vmatpush.bf16.msra.mxu0 %v7312_v37  ;;  %v9024_v37 = vld [vmem:[%s9999_s20 + $0x424] sm:$0xf] }
 0x21a   : > { %2735 = vmatpush.bf16.msra.mxu3 %v6968_v13  ;;  %v9150_v13 = vld [vmem:[%s9999_s20 + $0x80c] sm:$0xf0] }
 0x21b   : > { %v8076_v18 = vor.u32 %v9150_v13, %v8075_v10  ;;  %v7600_v10 = vor.u32 %v9024_v37, %v7597_v8  ;;  %v8173_v13 = vld [vmem:[%s9999_s20 + $0x8d0] sm:$0xf0] }
 0x21c   : > { %5137 = vmatpush.bf16.msra.mxu0 %v7264_v19  ;;  %v9012_v19 = vld [vmem:[%s9999_s20 + $0x3c4] sm:$0xf] }
 0x21d   : > { %5110 = vmatpush.bf16.msrb.mxu2 %v8076_v18 }
 0x21e   : > { %2736 = vmatpush.bf16.msra.mxu3 %v6952_v20  ;;  %v10071_v29 = vpop.f32.mrf.mxu0  ;;  %v7451_v20 = vld [vmem:[%s9999_s20 + $0x300] sm:$0xf] }
 0x21f   : > { %v7452_v23 = vor.u32 %v8994_v2, %v7451_v20  ;;  %v7549_v20 = vld [vmem:[%s9999_s20 + $0x3f0] sm:$0xf0]  ;;  %v9156_v2 = vld [vmem:[%s9999_s20 + $0x844] sm:$0xf] }
 0x220   : > { %5138 = vmatpush.bf16.msra.mxu0 %v7216_v28  ;;  %v7552_v22 = vor.u32 %v9012_v19, %v7549_v20  ;;  %v9000_v28 = vld [vmem:[%s9999_s20 + $0x364] sm:$0xf] }
 0x221   : > { %2737 = vmatmul.bf16.vlgmr.msra.gmra.mxu3 %v10049_v56  ;;  %v7691_v56 = vld [vmem:[%s9999_s20 + $0x4e0] sm:$0xf]  ;;  %5111 = vmatpush.bf16.msrb.mxu2 %v8028_v24  ;;  %v7504_v32 = vor.u32 %v9000_v28, %v7501_v30  ;;  %v8557_v28 = vld [vmem:[%s9999_s20 + $0xbd0] sm:$0xf0] }
 0x222   : > { %v7692_v40 = vor.u32 %v9054_v38, %v7691_v56  ;;  %v7168_v38 = vor.u32 %v8916_v53, %v7165_v34  ;;  %5121 = vmatpush.bf16.msrb.mxu3 %v8556_v9  ;;  %v10163_v53 = vld [vmem:[#allocation13] sm:$0xf]  ;;  %v8411_v34 = vld [vmem:[%s9999_s20 + $0xa80] sm:$0xf]  ;;  %v9096_v9 = vld [vmem:[%s9999_s20 + $0x664] sm:$0xf] }
 0x224   : > { %5097 = vmatpush.bf16.msrb.mxu1 %v7692_v40  ;;  %5139 = vmatpush.bf16.msra.mxu0 %v7168_v38 }
 0x225   : > { %5112 = vmatpush.bf16.msrb.mxu2 %v7980_v33 }
 0x226   : > { %v2545_v39 = vpop.f32.mrf.mxu0 }
 0x227   : > { %v7741_v39 = vld [vmem:[%s9999_s20 + $0x570] sm:$0xf0] }
 0x228   : > { %5098 = vmatpush.bf16.msrb.mxu1 %v7644_v47  ;;  %v7744_v40 = vor.u32 %v9060_v35, %v7741_v39  ;;  %v7693_v47 = vld [vmem:[%s9999_s20 + $0x510] sm:$0xf0]  ;;  %5140 = vmatpush.bf16.msra.mxu0 %v7120_v46  ;;  %v9234_v35 = vld [vmem:[%s9999_s20 + $0xaac] sm:$0xf0]  ;;  %v1886_v46 = vperm.slane %v10163_v53, 0 }
 0x229   : > { %v7696_v49 = vor.u32 %v9048_v17, %v7693_v47  ;;  %5113 = vmatpush.bf16.msrb.mxu2 %v7932_v43  ;;  %v8412_v39 = vor.u32 %v9234_v35, %v8411_v34  ;;  %v8032_v17 = vor.u32 %v9132_v42, %v8029_v45  ;;  %v8363_v47 = vld [vmem:[%s9999_s20 + $0xa20] sm:$0xf]  ;;  %v8959_v34 = vld [vmem:[%s9999_s20 + $0x214] sm:$0xf0]  ;;  %v9252_v35 = vld [vmem:[%s9999_s20 + $0xb44] sm:$0xf] }
 0x22a   : > { %v2544_v57 = vadd.f32 %v10071_v29, %v1886_v46  ;;  %v8267_v29 = vld [vmem:[%s9999_s20 + $0x960] sm:$0xf]  ;;  %v7267_v45 = vld [vmem:[%s9999_s20 + $0x188] sm:$0xf]  ;;  %v8947_v46 = vld [vmem:[%s9999_s20 + $0x1b4] sm:$0xf0] }
 0x22b   : > { %v8268_v8 = vor.u32 %v9198_v7, %v8267_v29  ;;  %v8923_v29 = vld [vmem:[%s9999_s20 + $0xf4] sm:$0xf0]  ;;  %v7747_v7 = vld [vmem:[%s9999_s20 + $0x548] sm:$0xf] }
 0x22c   : > { %5099 = vmatpush.bf16.msrb.mxu1 %v7596_v52  ;;  %v7884_v52 = vor.u32 %v9102_v50, %v7883_v11  ;;  %5141 = vmatpush.bf16.msra.mxu0 %v7072_v63  ;;  %v9120_v50 = vld [vmem:[%s9999_s20 + $0x724] sm:$0xf] }
 0x22e   : > { %v10093_v58 = vpop.f32.mrf.mxu1  ;;  %v10095_v59 = vpop.f32.mrf.mxu0  ;;  %5114 = vmatpush.bf16.msrb.mxu2 %v7884_v52  ;;  %v7981_v52 = vld [vmem:[%s9999_s20 + $0x750] sm:$0xf0] }
 0x22f   : > { %v7984_v54 = vor.u32 %v9120_v50, %v7981_v52  ;;  %v7268_v52 = vor.u32 %v8947_v46, %v7267_v45 }
 0x230   : > { %5100 = vmatpush.bf16.msrb.mxu1 %v7548_v3  ;;  %v7835_v3 = vld [vmem:[%s9999_s20 + $0x600] sm:$0xf] }
 0x231   : > { %v7836_v6 = vor.u32 %v9090_v4, %v7835_v3  ;;  %v7933_v3 = vld [vmem:[%s9999_s20 + $0x6f0] sm:$0xf0]  ;;  %v2557_v4 = vadd.f32 %v10093_v58, %v2544_v57  ;;  %v8983_v58 = vld [vmem:[%s9999_s20 + $0x2d4] sm:$0xf0] }
 0x232   : > { %v8935_v57 = vld [vmem:[%s9999_s20 + $0x154] sm:$0xf0] }
 0x233   : > { %5115 = vmatpush.bf16.msrb.mxu2 %v7836_v6 }
 0x234   : > { %5101 = vmatpush.bf16.msrb.mxu1 %v7500_v12  ;;  %v9168_v12 = vld [vmem:[%s9999_s20 + $0x8a4] sm:$0xf] }
 0x235   : > { %v8176_v14 = vor.u32 %v9168_v12, %v8173_v13  ;;  %v7411_v13 = vld [vmem:[%s9999_s20 + $0x2a8] sm:$0xf] }
 0x236   : > { %v2558_v61 = vpop.f32.mrf.mxu1  ;;  %v2597_v16 = vpop.f32.mrf.mxu0  ;;  %v7412_v19 = vor.u32 %v8983_v58, %v7411_v13  ;;  %v1888_v13 = vperm.slane %v10163_v53, 2 }
 0x237   : > { %v9258_v61 = vld [vmem:[%s9999_s20 + $0xb6c] sm:$0xf0]  ;;  %5160 = vmatpush.bf16.msra.mxu2 %v8176_v14 }
 0x238   : > { %5102 = vmatpush.bf16.msrb.mxu1 %v7452_v23  ;;  %v8508_v18 = vor.u32 %v9258_v61, %v8507_v15  ;;  %v8125_v23 = vld [vmem:[%s9999_s20 + $0x870] sm:$0xf0]  ;;  %v8219_v61 = vld [vmem:[%s9999_s20 + $0x900] sm:$0xf] }
 0x239   : > { %v8128_v24 = vor.u32 %v9156_v2, %v8125_v23  ;;  %v9084_v2 = vld [vmem:[%s9999_s20 + $0x604] sm:$0xf] }
 0x23a   : > { %5122 = vmatpush.bf16.msrb.mxu3 %v8508_v18  ;;  %v9264_v23 = vld [vmem:[%s9999_s20 + $0xba4] sm:$0xf] }
 0x23b   : > { %5161 = vmatpush.bf16.msra.mxu2 %v8128_v24  ;;  %v8560_v30 = vor.u32 %v9264_v23, %v8557_v28  ;;  %v8899_v28 = vld [vmem:[%s9999_s20 + $0x34] sm:$0xf0] }
 0x23c   : > { %5147 = vmatpush.bf16.msra.mxu1 %v7792_v31  ;;  %v9144_v31 = vld [vmem:[%s9999_s20 + $0x7e4] sm:$0xf] }
 0x23d   : > { %v8080_v33 = vor.u32 %v9144_v31, %v8077_v48  ;;  %v1887_v31 = vperm.slane %v10163_v53, 1  ;;  %v7364_v48 = vor.u32 %v8971_v26, %v7363_v25 }
 0x23e   : > { %v10122_v56 = vpop.f32.mrf.mxu1  ;;  %v10124_v36 = vpop.f32.mrf.mxu0  ;;  %5123 = vmatpush.bf16.msrb.mxu3 %v8460_v27 }
 0x23f   : > { %5162 = vmatpush.bf16.msra.mxu2 %v8080_v33  ;;  %v7315_v33 = vld [vmem:[%s9999_s20 + $0x1e8] sm:$0xf]  ;;  %v2648_v23 = vadd.f32 %v10124_v36, %v1888_v13  ;;  %v9151_v13 = vld [vmem:[%s9999_s20 + $0x814] sm:$0xf0] }
 0x240   : > { %5148 = vmatpush.bf16.msra.mxu1 %v7744_v40  ;;  %v8988_v40 = vld [vmem:[%s9999_s20 + $0x304] sm:$0xf] }
 0x241   : > { %v7456_v44 = vor.u32 %v8988_v40, %v7453_v41  ;;  %v2596_v41 = vadd.f32 %v10095_v59, %v1887_v31 }
 0x242   : > { %5124 = vmatpush.bf16.msrb.mxu3 %v8412_v39  ;;  %v8509_v39 = vld [vmem:[%s9999_s20 + $0xb70] sm:$0xf0] }
 0x243   : > { %5163 = vmatpush.bf16.msra.mxu2 %v8032_v17  ;;  %v8512_v40 = vor.u32 %v9252_v35, %v8509_v39  ;;  %v2609_v17 = vadd.f32 %v10122_v56, %v2596_v41  ;;  %v7413_v35 = vld [vmem:[%s9999_s20 + $0x2d8] sm:$0xf0] }
 0x244   : > { %5149 = vmatpush.bf16.msra.mxu1 %v7696_v49  ;;  %v9222_v49 = vld [vmem:[%s9999_s20 + $0xa4c] sm:$0xf0] }
 0x245   : > { %v10135_v51 = vpop.f32.mrf.mxu2  ;;  %v8364_v11 = vor.u32 %v9222_v49, %v8363_v47  ;;  %v9240_v47 = vld [vmem:[%s9999_s20 + $0xae4] sm:$0xf]  ;;  %v8461_v49 = vld [vmem:[%s9999_s20 + $0xb10] sm:$0xf0] }
 0x246   : > { %v2610_v60 = vpop.f32.mrf.mxu1  ;;  %v2649_v62 = vpop.f32.mrf.mxu0  ;;  %v2570_v6 = vadd.f32 %v10135_v51, %v2557_v4 }
 0x247   : > { %5125 = vmatpush.bf16.msrb.mxu3 %v8364_v11  ;;  %v8315_v60 = vld [vmem:[%s9999_s20 + $0x9c0] sm:$0xf]  ;;  %v9210_v62 = vld [vmem:[%s9999_s20 + $0x9ec] sm:$0xf0]  ;;  %5164 = vmatpush.bf16.msra.mxu2 %v7984_v54  ;;  %v8464_v11 = vor.u32 %v9240_v47, %v8461_v49  ;;  %v7219_v54 = vld [vmem:[%s9999_s20 + $0x128] sm:$0xf] }
 0x248   : > { %5150 = vmatpush.bf16.msra.mxu1 %v7648_v1  ;;  %v8316_v0 = vor.u32 %v9210_v62, %v8315_v60  ;;  %v9108_v1 = vld [vmem:[%s9999_s20 + $0x6c4] sm:$0xf]  ;;  %v7795_v60 = vld [vmem:[%s9999_s20 + $0x5a8] sm:$0xf]  ;;  %v9079_v62 = vld [vmem:[%s9999_s20 + $0x5d4] sm:$0xf0]  ;;  %v7220_v4 = vor.u32 %v8935_v57, %v7219_v54 }
 0x249   : > { %v7936_v5 = vor.u32 %v9108_v1, %v7933_v3  ;;  %v8179_v47 = vld [vmem:[%s9999_s20 + $0x8a8] sm:$0xf]  ;;  %v9180_v49 = vld [vmem:[%s9999_s20 + $0x904] sm:$0xf] }
 0x24b   : > { %5126 = vmatpush.bf16.msrb.mxu3 %v8316_v0  ;;  %5165 = vmatpush.bf16.msra.mxu2 %v7936_v5  ;;  %v8413_v0 = vld [vmem:[%s9999_s20 + $0xab0] sm:$0xf0]  ;;  %v7796_v5 = vor.u32 %v9079_v62, %v7795_v60 }
 0x24c   : > { %5151 = vmatpush.bf16.msra.mxu1 %v7600_v10  ;;  %v7885_v10 = vld [vmem:[%s9999_s20 + $0x690] sm:$0xf0] }
 0x24d   : > { %v2571_v16 = vpop.f32.mrf.mxu2  ;;  %v7888_v14 = vor.u32 %v9096_v9, %v7885_v10  ;;  %v9216_v9 = vld [vmem:[%s9999_s20 + $0xa24] sm:$0xf]  ;;  %v8365_v10 = vld [vmem:[%s9999_s20 + $0xa50] sm:$0xf0] }
 0x24e   : > { %v9186_v16 = vld [vmem:[%s9999_s20 + $0x92c] sm:$0xf0] }
 0x24f   : > { %v10154_v21 = vpop.f32.mrf.mxu1  ;;  %5127 = vmatpush.bf16.msrb.mxu3 %v8268_v8  ;;  %5166 = vmatpush.bf16.msra.mxu2 %v7888_v14  ;;  %v8220_v20 = vor.u32 %v9186_v16, %v8219_v61  ;;  %v9067_v8 = vld [vmem:[%s9999_s20 + $0x574] sm:$0xf0]  ;;  %v7699_v16 = vld [vmem:[%s9999_s20 + $0x4e8] sm:$0xf] }
 0x250   : > { %5152 = vmatpush.bf16.msra.mxu1 %v7552_v22  ;;  %v7837_v22 = vld [vmem:[%s9999_s20 + $0x630] sm:$0xf0]  ;;  %v8911_v61 = vld [vmem:[%s9999_s20 + $0x94] sm:$0xf0]  ;;  %v2661_v31 = vadd.f32 %v10154_v21, %v2648_v23  ;;  %v7221_v23 = vld [vmem:[%s9999_s20 + $0x158] sm:$0xf0] }
 0x251   : > { %v7840_v27 = vor.u32 %v9084_v2, %v7837_v22  ;;  %v8317_v2 = vld [vmem:[%s9999_s20 + $0x9f0] sm:$0xf0] }
 0x253   : > { %5128 = vmatpush.bf16.msrb.mxu3 %v8220_v20  ;;  %5167 = vmatpush.bf16.msra.mxu2 %v7840_v27  ;;  %v9204_v20 = vld [vmem:[%s9999_s20 + $0x9c4] sm:$0xf]  ;;  %v7075_v27 = vld [vmem:[%s9999_s20 + $0x8] sm:$0xf] }
 0x254   : > { %5153 = vmatpush.bf16.msra.mxu1 %v7504_v32  ;;  %v8320_v22 = vor.u32 %v9204_v20, %v8317_v2  ;;  %v7076_v41 = vor.u32 %v8899_v28, %v7075_v27  ;;  %v8035_v20 = vld [vmem:[%s9999_s20 + $0x788] sm:$0xf]  ;;  %v9139_v2 = vld [vmem:[%s9999_s20 + $0x7b4] sm:$0xf0] }
 0x255   : > { %v8036_v28 = vor.u32 %v9139_v2, %v8035_v20  ;;  %v8515_v2 = vld [vmem:[%s9999_s20 + $0xb48] sm:$0xf] }
 0x256   : > { %v10167_v38 = vpop.f32.mrf.mxu2 }
 0x257   : > { %v2662_v43 = vpop.f32.mrf.mxu1  ;;  %5173 = vmatpush.bf16.msra.mxu3 %v8560_v30  ;;  %v2622_v59 = vadd.f32 %v10167_v38, %v2609_v17  ;;  %v7651_v30 = vld [vmem:[%s9999_s20 + $0x488] sm:$0xf] }
 0x258   : > { %5154 = vmatpush.bf16.msra.mxu1 %v7456_v44  ;;  %v7316_v44 = vor.u32 %v8959_v34, %v7315_v33  ;;  %v8269_v33 = vld [vmem:[%s9999_s20 + $0x990] sm:$0xf0]  ;;  %v8977_v34 = vld [vmem:[%s9999_s20 + $0x2ac] sm:$0xf] }
 0x259   : > { %v7416_v46 = vor.u32 %v8977_v34, %v7413_v35  ;;  %v7173_v34 = vld [vmem:[%s9999_s20 + $0xf8] sm:$0xf0]  ;;  %v9061_v35 = vld [vmem:[%s9999_s20 + $0x54c] sm:$0xf] }
 0x25b   : > { %5174 = vmatpush.bf16.msra.mxu3 %v8512_v40 }
 0x25e   : > { %v10178_v55 = vpop.f32.mrf.mxu0  ;;  %v2623_v63 = vpop.f32.mrf.mxu2 }
 0x25f   : > { %5175 = vmatpush.bf16.msra.mxu3 %v8464_v11  ;;  %v9228_v63 = vld [vmem:[%s9999_s20 + $0xa84] sm:$0xf]  ;;  %v9175_v11 = vld [vmem:[%s9999_s20 + $0x8d4] sm:$0xf0] }
 0x260   : > { %v8416_v1 = vor.u32 %v9228_v63, %v8413_v0  ;;  %v7555_v63 = vld [vmem:[%s9999_s20 + $0x3c8] sm:$0xf]  ;;  %v9019_v0 = vld [vmem:[%s9999_s20 + $0x3f4] sm:$0xf0] }
 0x263   : > { %5176 = vmatpush.bf16.msra.mxu3 %v8416_v1  ;;  %v8131_v1 = vld [vmem:[%s9999_s20 + $0x848] sm:$0xf] }
 0x264   : > { %v2582_v37 = vpop.f32.mrf.mxu3 }
 0x265   : > { %v2583_v12 = vadd.f32 %v2582_v37, %v2570_v6  ;;  %v7171_v6 = vld [vmem:[%s9999_s20 + $0xc8] sm:$0xf] }
 0x266   : > { %v2701_v51 = vpop.f32.mrf.mxu0  ;;  %v10195_v18 = vpop.f32.mrf.mxu2  ;;  %v7172_v14 = vor.u32 %v8923_v29, %v7171_v6  ;;  %v7556_v6 = vor.u32 %v9019_v0, %v7555_v63  ;;  %v7653_v63 = vld [vmem:[%s9999_s20 + $0x4b8] sm:$0xf0]  ;;  %v7419_v0 = vld [vmem:[%s9999_s20 + $0x2b0] sm:$0xf] }
 0x267   : > { %v2742_v15 = vmax.f32 %v2583_v12, 0.0  ;;  %v8368_v12 = vor.u32 %v9216_v9, %v8365_v10  ;;  %v7748_v51 = vor.u32 %v9067_v8, %v7747_v7  ;;  %v2674_v39 = vadd.f32 %v10195_v18, %v2661_v31  ;;  %v8221_v18 = vld [vmem:[%s9999_s20 + $0x930] sm:$0xf0]  ;;  %v7507_v9 = vld [vmem:[%s9999_s20 + $0x368] sm:$0xf] }
 0x268   : > { %v9007_v10 = vld [vmem:[%s9999_s20 + $0x394] sm:$0xf0]  ;;  %v7987_v31 = vld [vmem:[%s9999_s20 + $0x728] sm:$0xf] }
 0x269   : > { %v10200_v24 = vpack.c.bf16 %v2742_v15, %v2742_v15  ;;  %v7123_v15 = vld [vmem:[%s9999_s20 + $0x68] sm:$0xf]  ;;  %5177 = vmatpush.bf16.msra.mxu3 %v8368_v12 }
 0x26a   : > { %v7124_v25 = vor.u32 %v8911_v61, %v7123_v15  ;;  %v8083_v12 = vld [vmem:[%s9999_s20 + $0x7e8] sm:$0xf] }
 0x26b   : > { %5090 = vmatmul.bf16.vlgmr.msrb.gmra.mxu0 %v10200_v24  ;;  %v8084_v15 = vor.u32 %v9151_v13, %v8083_v12  ;;  %v9169_v12 = vld [vmem:[%s9999_s20 + $0x8ac] sm:$0xf]  ;;  %v8181_v13 = vld [vmem:[%s9999_s20 + $0x8d8] sm:$0xf0] }
 0x26c   : > { %5186 = vmatpush.bf16.msrb.mxu0 %v7412_v19  ;;  %v2584_v32 = vpop.f32.mrf.mxu3  ;;  %v9055_v19 = vld [vmem:[%s9999_s20 + $0x514] sm:$0xf0]  ;;  %v8184_v20 = vor.u32 %v9169_v12, %v8181_v13  ;;  %v8323_v12 = vld [vmem:[%s9999_s20 + $0x9c8] sm:$0xf] }
 0x26d   : > { %v7700_v26 = vor.u32 %v9055_v19, %v7699_v16  ;;  %v9043_v32 = vld [vmem:[%s9999_s20 + $0x4b4] sm:$0xf0]  ;;  %5178 = vmatpush.bf16.msra.mxu3 %v8320_v22  ;;  %v7459_v16 = vld [vmem:[%s9999_s20 + $0x308] sm:$0xf]  ;;  %v8929_v22 = vld [vmem:[%s9999_s20 + $0x12c] sm:$0xf] }
 0x26e   : > { %v2675_v43 = vpop.f32.mrf.mxu2  ;;  %v7652_v21 = vor.u32 %v9043_v32, %v7651_v30  ;;  %v8995_v19 = vld [vmem:[%s9999_s20 + $0x334] sm:$0xf0]  ;;  %v7224_v30 = vor.u32 %v8929_v22, %v7221_v23  ;;  %v9013_v23 = vld [vmem:[%s9999_s20 + $0x3cc] sm:$0xf] }
 0x26f   : > { %v10212_v42 = vpop.f32.mrf.mxu1  ;;  %v7603_v43 = vld [vmem:[%s9999_s20 + $0x428] sm:$0xf]  ;;  %v7460_v27 = vor.u32 %v8995_v19, %v7459_v16  ;;  %v9259_v22 = vld [vmem:[%s9999_s20 + $0xb74] sm:$0xf0] }
 0x270   : > { %5187 = vmatpush.bf16.msrb.mxu0 %v7364_v48  ;;  %v9192_v48 = vld [vmem:[%s9999_s20 + $0x964] sm:$0xf]  ;;  %v9211_v13 = vld [vmem:[%s9999_s20 + $0x9f4] sm:$0xf0] }
 0x271   : > { %v8272_v36 = vor.u32 %v9192_v48, %v8269_v33  ;;  %v9127_v48 = vld [vmem:[%s9999_s20 + $0x754] sm:$0xf0]  ;;  %v8917_v33 = vld [vmem:[%s9999_s20 + $0xcc] sm:$0xf] }
 0x273   : > { %5179 = vmatpush.bf16.msra.mxu3 %v8272_v36  ;;  %v7749_v36 = vld [vmem:[%s9999_s20 + $0x578] sm:$0xf0] }
 0x274   : > { %5188 = vmatpush.bf16.msrb.mxu0 %v7316_v44  ;;  %v2634_v50 = vpop.f32.mrf.mxu3  ;;  %v9031_v44 = vld [vmem:[%s9999_s20 + $0x454] sm:$0xf0] }
 0x275   : > { %v2635_v56 = vadd.f32 %v2634_v50, %v2622_v59  ;;  %v8965_v59 = vld [vmem:[%s9999_s20 + $0x24c] sm:$0xf]  ;;  %v7365_v50 = vld [vmem:[%s9999_s20 + $0x278] sm:$0xf0]  ;;  %v7604_v57 = vor.u32 %v9031_v44, %v7603_v43  ;;  %v7752_v43 = vor.u32 %v9061_v35, %v7749_v36  ;;  %v9115_v44 = vld [vmem:[%s9999_s20 + $0x6f4] sm:$0xf0] }
 0x276   : > { %v7368_v62 = vor.u32 %v8965_v59, %v7365_v50  ;;  %v7891_v59 = vld [vmem:[%s9999_s20 + $0x668] sm:$0xf]  ;;  %v9103_v50 = vld [vmem:[%s9999_s20 + $0x694] sm:$0xf0] }
 0x277   : > { %v2743_v3 = vmax.f32 %v2635_v56, 0.0  ;;  %v2714_v38 = vpop.f32.mrf.mxu1  ;;  %v8180_v56 = vor.u32 %v9175_v11, %v8179_v47  ;;  %v7701_v47 = vld [vmem:[%s9999_s20 + $0x518] sm:$0xf0]  ;;  %v8467_v35 = vld [vmem:[%s9999_s20 + $0xae8] sm:$0xf] }
 0x278   : > { %5189 = vmatpush.bf16.msrb.mxu0 %v7268_v52  ;;  %v8224_v52 = vor.u32 %v9180_v49, %v8221_v18  ;;  %v8953_v38 = vld [vmem:[%s9999_s20 + $0x1ec] sm:$0xf]  ;;  %v9247_v36 = vld [vmem:[%s9999_s20 + $0xb14] sm:$0xf0] }
 0x279   : > { %v10229_v37 = vpack.c.bf16 %v2743_v3, %v2743_v3  ;;  %v9163_v3 = vld [vmem:[%s9999_s20 + $0x874] sm:$0xf0] }
 0x27a   : > { %5180 = vmatpush.bf16.msra.mxu3 %v8224_v52  ;;  %v8132_v7 = vor.u32 %v9163_v3, %v8131_v1 }
 0x27b   : > { %5103 = vmatmul.bf16.vlgmr.msrb.gmra.mxu1 %v10229_v37  ;;  %5142 = vmatmul.bf16.vlgmr.msra.gmra.mxu0 %v10200_v24 }
 0x27c   : > { %5190 = vmatpush.bf16.msrb.mxu0 %v7220_v4  ;;  %5199 = vmatpush.bf16.msrb.mxu1 %v7796_v5  ;;  %v2636_v58 = vpop.f32.mrf.mxu3  ;;  %v7317_v4 = vld [vmem:[%s9999_s20 + $0x218] sm:$0xf0] }
 0x27d   : > { %v7320_v8 = vor.u32 %v8953_v38, %v7317_v4  ;;  %v8941_v58 = vld [vmem:[%s9999_s20 + $0x18c] sm:$0xf]  ;;  %v7843_v4 = vld [vmem:[%s9999_s20 + $0x608] sm:$0xf] }
 0x280   : > { %5191 = vmatpush.bf16.msrb.mxu0 %v7172_v14  ;;  %5200 = vmatpush.bf16.msrb.mxu1 %v7748_v51  ;;  %v7269_v14 = vld [vmem:[%s9999_s20 + $0x1b8] sm:$0xf0]  ;;  %v7508_v51 = vor.u32 %v9007_v10, %v7507_v9  ;;  %v9271_v9 = vld [vmem:[%s9999_s20 + $0xbd4] sm:$0xf0]  ;;  %v9025_v10 = vld [vmem:[%s9999_s20 + $0x42c] sm:$0xf] }
 0x281   : > { %v7272_v61 = vor.u32 %v8941_v58, %v7269_v14  ;;  %v7371_v14 = vld [vmem:[%s9999_s20 + $0x250] sm:$0xf] }
 0x284   : > { %5192 = vmatpush.bf16.msrb.mxu0 %v7124_v25  ;;  %5201 = vmatpush.bf16.msrb.mxu1 %v7700_v26  ;;  %v2686_v40 = vpop.f32.mrf.mxu3  ;;  %v9073_v25 = vld [vmem:[%s9999_s20 + $0x5ac] sm:$0xf]  ;;  %v7797_v26 = vld [vmem:[%s9999_s20 + $0x5d8] sm:$0xf0] }
 0x285   : > { %v2687_v45 = vadd.f32 %v2686_v40, %v2674_v39  ;;  %v7800_v32 = vor.u32 %v9073_v25, %v7797_v26  ;;  %v1889_v39 = vperm.slane %v10163_v53, 3  ;;  %v7988_v40 = vor.u32 %v9127_v48, %v7987_v31  ;;  %v9049_v53 = vld [vmem:[%s9999_s20 + $0x4ec] sm:$0xf]  ;;  %v7557_v26 = vld [vmem:[%s9999_s20 + $0x3f8] sm:$0xf0] }
 0x286   : > { %v10256_v17 = vpop.f32.mrf.mxu2  ;;  %v8960_v31 = vld [vmem:[%s9999_s20 + $0x21c] sm:$0xf0]  ;;  %v8516_v48 = vor.u32 %v9259_v22, %v8515_v2  ;;  %v8324_v22 = vor.u32 %v9211_v13, %v8323_v12  ;;  %v7515_v13 = vld [vmem:[%s9999_s20 + $0x370] sm:$0xf] }
 0x287   : > { %v2744_v54 = vmax.f32 %v2687_v45, 0.0  ;;  %v8905_v45 = vld [vmem:[%s9999_s20 + $0x6c] sm:$0xf]  ;;  %v2700_v49 = vadd.f32 %v10178_v55, %v1889_v39  ;;  %v8984_v55 = vld [vmem:[%s9999_s20 + $0x2dc] sm:$0xf0] }
 0x288   : > { %5193 = vmatpush.bf16.msrb.mxu0 %v7076_v41  ;;  %5202 = vmatpush.bf16.msrb.mxu1 %v7652_v21  ;;  %v7176_v41 = vor.u32 %v8917_v33, %v7173_v34  ;;  %v7939_v21 = vld [vmem:[%s9999_s20 + $0x6c8] sm:$0xf]  ;;  %v7560_v33 = vor.u32 %v9013_v23, %v7557_v26  ;;  %v9001_v39 = vld [vmem:[%s9999_s20 + $0x36c] sm:$0xf]  ;;  %v9056_v2 = vld [vmem:[%s9999_s20 + $0x51c] sm:$0xf0] }
 0x289   : > { %v10264_v60 = vpack.c.bf16 %v2744_v54, %v2744_v54  ;;  %v7940_v18 = vor.u32 %v9115_v44, %v7939_v21  ;;  %v2713_v52 = vadd.f32 %v10212_v42, %v2700_v49  ;;  %v7704_v54 = vor.u32 %v9049_v53, %v7701_v47  ;;  %v9145_v21 = vld [vmem:[%s9999_s20 + $0x7ec] sm:$0xf]  ;;  %v7275_v44 = vld [vmem:[%s9999_s20 + $0x190] sm:$0xf]  ;;  %v8419_v53 = vld [vmem:[%s9999_s20 + $0xa88] sm:$0xf] }
 0x28a   : > { %v7892_v42 = vor.u32 %v9103_v50, %v7891_v59  ;;  %v7461_v59 = vld [vmem:[%s9999_s20 + $0x338] sm:$0xf0]  ;;  %v9199_v26 = vld [vmem:[%s9999_s20 + $0x994] sm:$0xf0] }
 0x28b   : > { %5116 = vmatmul.bf16.vlgmr.msrb.gmra.mxu2 %v10264_v60  ;;  %5155 = vmatmul.bf16.vlgmr.msra.gmra.mxu1 %v10229_v37  ;;  %v2726_v1 = vadd.f32 %v10256_v17, %v2713_v52  ;;  %v7605_v17 = vld [vmem:[%s9999_s20 + $0x458] sm:$0xf0]  ;;  %v9133_v52 = vld [vmem:[%s9999_s20 + $0x78c] sm:$0xf] }
 0x28c   : > { %5238 = vmatpush.bf16.msra.mxu0 %v7416_v46  ;;  %5203 = vmatpush.bf16.msrb.mxu1 %v7604_v57  ;;  %v2688_v5 = vpop.f32.mrf.mxu3  ;;  %v7125_v46 = vld [vmem:[%s9999_s20 + $0x98] sm:$0xf0]  ;;  %v8893_v57 = vld [vmem:[%s9999_s20 + $0xc] sm:$0xf]  ;;  %v7608_v19 = vor.u32 %v9025_v10, %v7605_v17 }
 0x28d   : > { %5194 = vmatmul.bf16.vlgmr.msrb.gmra.mxu0 %v10200_v24  ;;  %5212 = vmatpush.bf16.msrb.mxu2 %v8180_v56  ;;  %v7128_v11 = vor.u32 %v8905_v45, %v7125_v46  ;;  %v7077_v56 = vld [vmem:[%s9999_s20 + $0x38] sm:$0xf0]  ;;  %v9091_v5 = vld [vmem:[%s9999_s20 + $0x634] sm:$0xf0]  ;;  %v8948_v45 = vld [vmem:[%s9999_s20 + $0x1bc] sm:$0xf0]  ;;  %v8468_v46 = vor.u32 %v9247_v36, %v8467_v35 }
 0x28e   : > { %v2727_v29 = vpop.f32.mrf.mxu2  ;;  %v7080_v38 = vor.u32 %v8893_v57, %v7077_v56  ;;  %v7276_v50 = vor.u32 %v8948_v45, %v7275_v44  ;;  %v7227_v57 = vld [vmem:[%s9999_s20 + $0x130] sm:$0xf]  ;;  %v8936_v56 = vld [vmem:[%s9999_s20 + $0x15c] sm:$0xf0]  ;;  %v8978_v36 = vld [vmem:[%s9999_s20 + $0x2b4] sm:$0xf] }
 0x290   : > { %5239 = vmatpush.bf16.msra.mxu0 %v7368_v62  ;;  %5204 = vmatpush.bf16.msrb.mxu1 %v7556_v6  ;;  %v9037_v62 = vld [vmem:[%s9999_s20 + $0x48c] sm:$0xf] }
 0x291   : > { %5213 = vmatpush.bf16.msrb.mxu2 %v8132_v7  ;;  %v7656_v29 = vor.u32 %v9037_v62, %v7653_v63  ;;  %v7420_v7 = vor.u32 %v8984_v55, %v7419_v0  ;;  %v7803_v62 = vld [vmem:[%s9999_s20 + $0x5b0] sm:$0xf]  ;;  %v9080_v63 = vld [vmem:[%s9999_s20 + $0x5dc] sm:$0xf0] }
 0x294   : > { %5240 = vmatpush.bf16.msra.mxu0 %v7320_v8  ;;  %5205 = vmatpush.bf16.msrb.mxu1 %v7508_v51  ;;  %v8563_v8 = vld [vmem:[%s9999_s20 + $0xba8] sm:$0xf]  ;;  %v8972_v51 = vld [vmem:[%s9999_s20 + $0x27c] sm:$0xf0] }
 0x295   : > { %5214 = vmatpush.bf16.msrb.mxu2 %v8084_v15  ;;  %v7844_v15 = vor.u32 %v9091_v5, %v7843_v4  ;;  %v7372_v25 = vor.u32 %v8972_v51, %v7371_v14  ;;  %v7804_v4 = vor.u32 %v9080_v63, %v7803_v62  ;;  %v9121_v5 = vld [vmem:[%s9999_s20 + $0x72c] sm:$0xf] }
 0x296   : > { %v9109_v51 = vld [vmem:[%s9999_s20 + $0x6cc] sm:$0xf] }
 0x298   : > { %5241 = vmatpush.bf16.msra.mxu0 %v7272_v61  ;;  %5206 = vmatpush.bf16.msrb.mxu1 %v7460_v27  ;;  %v8564_v61 = vor.u32 %v9271_v9, %v8563_v8  ;;  %v9157_v27 = vld [vmem:[%s9999_s20 + $0x84c] sm:$0xf]  ;;  %v7755_v8 = vld [vmem:[%s9999_s20 + $0x550] sm:$0xf]  ;;  %v9068_v9 = vld [vmem:[%s9999_s20 + $0x57c] sm:$0xf0] }
 0x299   : > { %5215 = vmatpush.bf16.msrb.mxu2 %v8036_v28  ;;  %v8133_v28 = vld [vmem:[%s9999_s20 + $0x878] sm:$0xf0]  ;;  %v7756_v14 = vor.u32 %v9068_v9, %v7755_v8  ;;  %v9241_v9 = vld [vmem:[%s9999_s20 + $0xaec] sm:$0xf] }
 0x29a   : > { %v8136_v34 = vor.u32 %v9157_v27, %v8133_v28 }
 0x29b   : > { %5168 = vmatmul.bf16.vlgmr.msra.gmra.mxu2 %v10264_v60  ;;  %5207 = vmatmul.bf16.vlgmr.msrb.gmra.mxu1 %v10229_v37 }
 0x29c   : > { %5242 = vmatpush.bf16.msra.mxu0 %v7224_v30  ;;  %5251 = vmatpush.bf16.msra.mxu1 %v7800_v32  ;;  %v7323_v30 = vld [vmem:[%s9999_s20 + $0x1f0] sm:$0xf] }
 0x29d   : > { %5216 = vmatpush.bf16.msrb.mxu2 %v7988_v40  ;;  %v7324_v40 = vor.u32 %v8960_v31, %v7323_v30  ;;  %v9097_v30 = vld [vmem:[%s9999_s20 + $0x66c] sm:$0xf]  ;;  %v7893_v31 = vld [vmem:[%s9999_s20 + $0x698] sm:$0xf0] }
 0x2a0   : > { %5243 = vmatpush.bf16.msra.mxu0 %v7176_v41  ;;  %5252 = vmatpush.bf16.msra.mxu1 %v7752_v43  ;;  %v7509_v41 = vld [vmem:[%s9999_s20 + $0x398] sm:$0xf0] }
 0x2a1   : > { %5217 = vmatpush.bf16.msrb.mxu2 %v7940_v18  ;;  %v8085_v43 = vld [vmem:[%s9999_s20 + $0x818] sm:$0xf0]  ;;  %v7512_v47 = vor.u32 %v9001_v39, %v7509_v41  ;;  %v9235_v18 = vld [vmem:[%s9999_s20 + $0xab4] sm:$0xf0]  ;;  %v7421_v39 = vld [vmem:[%s9999_s20 + $0x2e0] sm:$0xf0] }
 0x2a2   : > { %v8088_v49 = vor.u32 %v9145_v21, %v8085_v43  ;;  %v8420_v0 = vor.u32 %v9235_v18, %v8419_v53  ;;  %v8227_v41 = vld [vmem:[%s9999_s20 + $0x908] sm:$0xf]  ;;  %v9187_v21 = vld [vmem:[%s9999_s20 + $0x934] sm:$0xf0]  ;;  %v9085_v43 = vld [vmem:[%s9999_s20 + $0x60c] sm:$0xf] }
 0x2a3   : > { %v9265_v53 = vld [vmem:[%s9999_s20 + $0xbac] sm:$0xf]  ;;  %v7611_v18 = vld [vmem:[%s9999_s20 + $0x430] sm:$0xf] }
 0x2a4   : > { %v2738_v3 = vpop.f32.mrf.mxu3  ;;  %5244 = vmatpush.bf16.msra.mxu0 %v7128_v11  ;;  %5253 = vmatpush.bf16.msra.mxu1 %v7704_v54  ;;  %v8989_v11 = vld [vmem:[%s9999_s20 + $0x30c] sm:$0xf]  ;;  %v8037_v54 = vld [vmem:[%s9999_s20 + $0x7b8] sm:$0xf0] }
 0x2a5   : > { %v2739_v6 = vadd.f32 %v2738_v3, %v2726_v1  ;;  %5218 = vmatpush.bf16.msrb.mxu2 %v7892_v42  ;;  %v7464_v55 = vor.u32 %v8989_v11, %v7461_v59  ;;  %v8040_v1 = vor.u32 %v9133_v52, %v8037_v54  ;;  %v8371_v3 = vld [vmem:[%s9999_s20 + $0xa28] sm:$0xf]  ;;  %v9223_v42 = vld [vmem:[%s9999_s20 + $0xa54] sm:$0xf0]  ;;  %v9032_v11 = vld [vmem:[%s9999_s20 + $0x45c] sm:$0xf0] }
 0x2a6   : > { %v8372_v10 = vor.u32 %v9223_v42, %v8371_v3  ;;  %v8187_v59 = vld [vmem:[%s9999_s20 + $0x8b0] sm:$0xf]  ;;  %v9176_v52 = vld [vmem:[%s9999_s20 + $0x8dc] sm:$0xf0]  ;;  %v8966_v54 = vld [vmem:[%s9999_s20 + $0x254] sm:$0xf]  ;;  %v7612_v63 = vor.u32 %v9032_v11, %v7611_v18 }
 0x2a7   : > { %v2745_v58 = vmax.f32 %v2739_v6, 0.0  ;;  %v7989_v6 = vld [vmem:[%s9999_s20 + $0x758] sm:$0xf0]  ;;  %v7563_v42 = vld [vmem:[%s9999_s20 + $0x3d0] sm:$0xf] }
 0x2a8   : > { %5245 = vmatpush.bf16.msra.mxu0 %v7080_v38  ;;  %5254 = vmatpush.bf16.msra.mxu1 %v7656_v29  ;;  %v7228_v38 = vor.u32 %v8936_v56, %v7227_v57  ;;  %v7179_v29 = vld [vmem:[%s9999_s20 + $0xd0] sm:$0xf]  ;;  %v7992_v17 = vor.u32 %v9121_v5, %v7989_v6  ;;  %v7373_v57 = vld [vmem:[%s9999_s20 + $0x280] sm:$0xf0]  ;;  %v9164_v5 = vld [vmem:[%s9999_s20 + $0x87c] sm:$0xf0] }
 0x2a9   : > { %v10325_v16 = vpack.c.bf16 %v2745_v58, %v2745_v58  ;;  %5219 = vmatpush.bf16.msrb.mxu2 %v7844_v15  ;;  %v7941_v15 = vld [vmem:[%s9999_s20 + $0x6f8] sm:$0xf0]  ;;  %v7376_v3 = vor.u32 %v8966_v54, %v7373_v57  ;;  %v8954_v6 = vld [vmem:[%s9999_s20 + $0x1f4] sm:$0xf]  ;;  %v9205_v18 = vld [vmem:[%s9999_s20 + $0x9cc] sm:$0xf] }
 0x2aa   : > { %v7944_v23 = vor.u32 %v9109_v51, %v7941_v15  ;;  %v9152_v51 = vld [vmem:[%s9999_s20 + $0x81c] sm:$0xf0]  ;;  %v8942_v15 = vld [vmem:[%s9999_s20 + $0x194] sm:$0xf]  ;;  %v8325_v11 = vld [vmem:[%s9999_s20 + $0x9f8] sm:$0xf0] }
 0x2ab   : > { %5129 = vmatmul.bf16.vlgmr.msrb.gmra.mxu3 %v10325_v16  ;;  %5246 = vmatmul.bf16.vlgmr.msra.gmra.mxu0 %v10200_v24  ;;  %v9116_v57 = vld [vmem:[%s9999_s20 + $0x6fc] sm:$0xf0] }
 0x2ac   : > { %5290 = vmatpush.bf16.msrb.mxu0 %v7420_v7  ;;  %5225 = vmatpush.bf16.msrb.mxu3 %v8564_v61  ;;  %v2740_v32 = vpop.f32.mrf.mxu3  ;;  %v8924_v7 = vld [vmem:[%s9999_s20 + $0xfc] sm:$0xf0]  ;;  %v7131_v61 = vld [vmem:[%s9999_s20 + $0x70] sm:$0xf] }
 0x2ad   : > { %5255 = vmatpush.bf16.msra.mxu1 %v7608_v19  ;;  %5264 = vmatpush.bf16.msra.mxu2 %v8184_v20  ;;  %v7180_v58 = vor.u32 %v8924_v7, %v7179_v29  ;;  %v8912_v19 = vld [vmem:[%s9999_s20 + $0x9c] sm:$0xf0]  ;;  %v7707_v20 = vld [vmem:[%s9999_s20 + $0x4f0] sm:$0xf]  ;;  %v7325_v29 = vld [vmem:[%s9999_s20 + $0x220] sm:$0xf0] }
 0x2ae   : > { %5220 = vmatmul.bf16.vlgmr.msrb.gmra.mxu2 %v10264_v60  ;;  %v7132_v27 = vor.u32 %v8912_v19, %v7131_v61  ;;  %v7708_v28 = vor.u32 %v9056_v2, %v7707_v20  ;;  %v7083_v32 = vld [vmem:[%s9999_s20 + $0x10] sm:$0xf]  ;;  %v7328_v12 = vor.u32 %v8954_v6, %v7325_v29  ;;  %v7277_v61 = vld [vmem:[%s9999_s20 + $0x1c0] sm:$0xf0]  ;;  %v9229_v2 = vld [vmem:[%s9999_s20 + $0xa8c] sm:$0xf] }
 0x2af   : > { %v8894_v29 = vld [vmem:[%s9999_s20 + $0x14] sm:$0xf] }
 0x2b0   : > { %5291 = vmatpush.bf16.msrb.mxu0 %v7372_v25  ;;  %5226 = vmatpush.bf16.msrb.mxu3 %v8516_v48  ;;  %v8275_v25 = vld [vmem:[%s9999_s20 + $0x968] sm:$0xf]  ;;  %v8900_v48 = vld [vmem:[%s9999_s20 + $0x3c] sm:$0xf0] }
 0x2b1   : > { %5256 = vmatpush.bf16.msra.mxu1 %v7560_v33  ;;  %5265 = vmatpush.bf16.msra.mxu2 %v8136_v34  ;;  %v7659_v33 = vld [vmem:[%s9999_s20 + $0x490] sm:$0xf]  ;;  %v9044_v34 = vld [vmem:[%s9999_s20 + $0x4bc] sm:$0xf0]  ;;  %v8276_v35 = vor.u32 %v9199_v26, %v8275_v25  ;;  %v7084_v44 = vor.u32 %v8900_v48, %v7083_v32  ;;  %v7280_v25 = vor.u32 %v8942_v15, %v7277_v61  ;;  %v7229_v32 = vld [vmem:[%s9999_s20 + $0x160] sm:$0xf0] }
 0x2b2   : > { %v7660_v45 = vor.u32 %v9044_v34, %v7659_v33  ;;  %v7467_v26 = vld [vmem:[%s9999_s20 + $0x310] sm:$0xf]  ;;  %v9074_v33 = vld [vmem:[%s9999_s20 + $0x5b4] sm:$0xf]  ;;  %v7805_v34 = vld [vmem:[%s9999_s20 + $0x5e0] sm:$0xf0] }
 0x2b3   : > { %v8571_v15 = vld [vmem:[%s9999_s20 + $0xbb0] sm:$0xf]  ;;  %v9272_v61 = vld [vmem:[%s9999_s20 + $0xbdc] sm:$0xf0] }
 0x2b4   : > { %5292 = vmatpush.bf16.msrb.mxu0 %v7324_v40  ;;  %5227 = vmatpush.bf16.msrb.mxu3 %v8468_v46  ;;  %v7896_v40 = vor.u32 %v9097_v30, %v7893_v31  ;;  %v7845_v46 = vld [vmem:[%s9999_s20 + $0x638] sm:$0xf0]  ;;  %v9140_v30 = vld [vmem:[%s9999_s20 + $0x7bc] sm:$0xf0]  ;;  %v8930_v31 = vld [vmem:[%s9999_s20 + $0x134] sm:$0xf] }
 0x2b5   : > { %5257 = vmatpush.bf16.msra.mxu1 %v7512_v47  ;;  %5266 = vmatpush.bf16.msra.mxu2 %v8088_v49  ;;  %v8565_v47 = vld [vmem:[%s9999_s20 + $0xbd8] sm:$0xf0]  ;;  %v7424_v49 = vor.u32 %v8978_v36, %v7421_v39  ;;  %v7848_v56 = vor.u32 %v9085_v43, %v7845_v46  ;;  %v9217_v36 = vld [vmem:[%s9999_s20 + $0xa2c] sm:$0xf]  ;;  %v7808_v43 = vor.u32 %v9074_v33, %v7805_v34  ;;  %v7181_v46 = vld [vmem:[%s9999_s20 + $0x100] sm:$0xf0] }
 0x2b6   : > { %v8568_v62 = vor.u32 %v9265_v53, %v8565_v47  ;;  %v8373_v39 = vld [vmem:[%s9999_s20 + $0xa58] sm:$0xf0]  ;;  %v9062_v47 = vld [vmem:[%s9999_s20 + $0x554] sm:$0xf]  ;;  %v8523_v33 = vld [vmem:[%s9999_s20 + $0xb50] sm:$0xf] }
 0x2b7   : > { %v8376_v53 = vor.u32 %v9217_v36, %v8373_v39  ;;  %v9260_v34 = vld [vmem:[%s9999_s20 + $0xb7c] sm:$0xf0]  ;;  %v9014_v39 = vld [vmem:[%s9999_s20 + $0x3d4] sm:$0xf] }
 0x2b8   : > { %5293 = vmatpush.bf16.msrb.mxu0 %v7276_v50  ;;  %5228 = vmatpush.bf16.msrb.mxu3 %v8420_v0  ;;  %v8228_v50 = vor.u32 %v9187_v21, %v8227_v41  ;;  %v9253_v0 = vld [vmem:[%s9999_s20 + $0xb4c] sm:$0xf]  ;;  %v7232_v41 = vor.u32 %v8930_v31, %v7229_v32  ;;  %v7995_v21 = vld [vmem:[%s9999_s20 + $0x730] sm:$0xf]  ;;  %v7379_v31 = vld [vmem:[%s9999_s20 + $0x258] sm:$0xf] }
 0x2b9   : > { %5258 = vmatpush.bf16.msra.mxu1 %v7464_v55  ;;  %5267 = vmatpush.bf16.msra.mxu2 %v8040_v1  ;;  %v8517_v55 = vld [vmem:[%s9999_s20 + $0xb78] sm:$0xf0]  ;;  %v8188_v1 = vor.u32 %v9176_v52, %v8187_v59  ;;  %v7947_v52 = vld [vmem:[%s9999_s20 + $0x6d0] sm:$0xf]  ;;  %v8973_v32 = vld [vmem:[%s9999_s20 + $0x284] sm:$0xf0] }
 0x2ba   : > { %v8520_v7 = vor.u32 %v9253_v0, %v8517_v55  ;;  %v9050_v0 = vld [vmem:[%s9999_s20 + $0x4f4] sm:$0xf]  ;;  %v7709_v55 = vld [vmem:[%s9999_s20 + $0x520] sm:$0xf0] }
 0x2bb   : > { %5181 = vmatmul.bf16.vlgmr.msra.gmra.mxu3 %v10325_v16  ;;  %v7712_v6 = vor.u32 %v9050_v0, %v7709_v55  ;;  %v8427_v0 = vld [vmem:[%s9999_s20 + $0xa90] sm:$0xf]  ;;  %v9236_v55 = vld [vmem:[%s9999_s20 + $0xabc] sm:$0xf0] }
 0x2bc   : > { %5294 = vmatpush.bf16.msrb.mxu0 %v7228_v38  ;;  %5229 = vmatpush.bf16.msrb.mxu3 %v8372_v10  ;;  %v9020_v38 = vld [vmem:[%s9999_s20 + $0x3fc] sm:$0xf0]  ;;  %v8469_v10 = vld [vmem:[%s9999_s20 + $0xb18] sm:$0xf0] }
 0x2bd   : > { %5303 = vmatpush.bf16.msrb.mxu1 %v7804_v4  ;;  %5268 = vmatpush.bf16.msra.mxu2 %v7992_v17  ;;  %v8139_v4 = vld [vmem:[%s9999_s20 + $0x850] sm:$0xf]  ;;  %v7564_v8 = vor.u32 %v9020_v38, %v7563_v42  ;;  %v8472_v19 = vor.u32 %v9241_v9, %v8469_v10  ;;  %v7948_v42 = vor.u32 %v9116_v57, %v7947_v52  ;;  %v7661_v10 = vld [vmem:[%s9999_s20 + $0x4c0] sm:$0xf0]  ;;  %v9146_v52 = vld [vmem:[%s9999_s20 + $0x7f4] sm:$0xf] }
 0x2be   : > { %5259 = vmatmul.bf16.vlgmr.msra.gmra.mxu1 %v10229_v37  ;;  %v8140_v17 = vor.u32 %v9164_v5, %v8139_v4  ;;  %v7899_v4 = vld [vmem:[%s9999_s20 + $0x670] sm:$0xf]  ;;  %v9104_v5 = vld [vmem:[%s9999_s20 + $0x69c] sm:$0xf0] }
 0x2c0   : > { %5295 = vmatpush.bf16.msrb.mxu0 %v7180_v58  ;;  %5230 = vmatpush.bf16.msrb.mxu3 %v8324_v22  ;;  %v9008_v58 = vld [vmem:[%s9999_s20 + $0x39c] sm:$0xf0]  ;;  %v8421_v22 = vld [vmem:[%s9999_s20 + $0xab8] sm:$0xf0] }
 0x2c1   : > { %5304 = vmatpush.bf16.msrb.mxu1 %v7756_v14  ;;  %5269 = vmatpush.bf16.msra.mxu2 %v7944_v23  ;;  %v8091_v14 = vld [vmem:[%s9999_s20 + $0x7f0] sm:$0xf]  ;;  %v7516_v20 = vor.u32 %v9008_v58, %v7515_v13  ;;  %v8424_v48 = vor.u32 %v9229_v2, %v8421_v22  ;;  %v9181_v13 = vld [vmem:[%s9999_s20 + $0x90c] sm:$0xf]  ;;  %v8229_v58 = vld [vmem:[%s9999_s20 + $0x938] sm:$0xf0] }
 0x2c2   : > { %v8092_v23 = vor.u32 %v9152_v51, %v8091_v14  ;;  %v7900_v14 = vor.u32 %v9104_v5, %v7899_v4  ;;  %v7851_v2 = vld [vmem:[%s9999_s20 + $0x610] sm:$0xf]  ;;  %v9092_v22 = vld [vmem:[%s9999_s20 + $0x63c] sm:$0xf0]  ;;  %v9134_v5 = vld [vmem:[%s9999_s20 + $0x794] sm:$0xf] }
 0x2c4   : > { %5296 = vmatpush.bf16.msrb.mxu0 %v7132_v27  ;;  %5231 = vmatpush.bf16.msrb.mxu3 %v8276_v35  ;;  %v8996_v27 = vld [vmem:[%s9999_s20 + $0x33c] sm:$0xf0] }
 0x2c5   : > { %5305 = vmatpush.bf16.msrb.mxu1 %v7708_v28  ;;  %5270 = vmatpush.bf16.msra.mxu2 %v7896_v40  ;;  %v8043_v28 = vld [vmem:[%s9999_s20 + $0x790] sm:$0xf]  ;;  %v7468_v35 = vor.u32 %v8996_v27, %v7467_v26  ;;  %v7613_v26 = vld [vmem:[%s9999_s20 + $0x460] sm:$0xf0]  ;;  %v9170_v27 = vld [vmem:[%s9999_s20 + $0x8b4] sm:$0xf] }
 0x2c6   : > { %v8044_v40 = vor.u32 %v9140_v30, %v8043_v28  ;;  %v8189_v28 = vld [vmem:[%s9999_s20 + $0x8e0] sm:$0xf0]  ;;  %v8572_v30 = vor.u32 %v9272_v61, %v8571_v15  ;;  %v9122_v15 = vld [vmem:[%s9999_s20 + $0x734] sm:$0xf] }
 0x2c7   : > { %v8192_v36 = vor.u32 %v9170_v27, %v8189_v28  ;;  %v7997_v61 = vld [vmem:[%s9999_s20 + $0x760] sm:$0xf0]  ;;  %v9212_v27 = vld [vmem:[%s9999_s20 + $0x9fc] sm:$0xf0] }
 0x2c8   : > { %5297 = vmatpush.bf16.msrb.mxu0 %v7084_v44  ;;  %5232 = vmatpush.bf16.msrb.mxu3 %v8228_v50  ;;  %v9128_v44 = vld [vmem:[%s9999_s20 + $0x75c] sm:$0xf0]  ;;  %v8000_v28 = vor.u32 %v9122_v15, %v7997_v61  ;;  %v7571_v15 = vld [vmem:[%s9999_s20 + $0x3d8] sm:$0xf] }
 0x2c9   : > { %5306 = vmatpush.bf16.msrb.mxu1 %v7660_v45  ;;  %5271 = vmatpush.bf16.msra.mxu2 %v7848_v56  ;;  %v8918_v45 = vld [vmem:[%s9999_s20 + $0xd4] sm:$0xf]  ;;  %v7996_v59 = vor.u32 %v9128_v44, %v7995_v21  ;;  %v8524_v44 = vor.u32 %v9260_v34, %v8523_v33  ;;  %v7139_v33 = vld [vmem:[%s9999_s20 + $0x78] sm:$0xf] }
 0x2ca   : > { %v7184_v50 = vor.u32 %v8918_v45, %v7181_v46  ;;  %v8906_v56 = vld [vmem:[%s9999_s20 + $0x74] sm:$0xf]  ;;  %v7331_v45 = vld [vmem:[%s9999_s20 + $0x1f8] sm:$0xf]  ;;  %v8961_v46 = vld [vmem:[%s9999_s20 + $0x224] sm:$0xf0] }
 0x2cb   : > { %5298 = vmatmul.bf16.vlgmr.msrb.gmra.mxu0 %v10200_v24  ;;  %5233 = vmatmul.bf16.vlgmr.msrb.gmra.mxu3 %v10325_v16  ;;  %v9158_v21 = vld [vmem:[%s9999_s20 + $0x854] sm:$0xf] }
 0x2cc   : > { %5342 = vmatpush.bf16.msra.mxu0 %v7424_v49  ;;  %5277 = vmatpush.bf16.msra.mxu3 %v8568_v62  ;;  %v7757_v49 = vld [vmem:[%s9999_s20 + $0x580] sm:$0xf0] }
 0x2cd   : > { %5307 = vmatpush.bf16.msrb.mxu1 %v7612_v63  ;;  %5316 = vmatpush.bf16.msrb.mxu2 %v8188_v1  ;;  %v7760_v54 = vor.u32 %v9062_v47, %v7757_v49  ;;  %v7133_v62 = vld [vmem:[%s9999_s20 + $0xa0] sm:$0xf0]  ;;  %v8328_v63 = vor.u32 %v9205_v18, %v8325_v11  ;;  %v9193_v1 = vld [vmem:[%s9999_s20 + $0x96c] sm:$0xf]  ;;  %v9248_v47 = vld [vmem:[%s9999_s20 + $0xb1c] sm:$0xf0] }
 0x2ce   : > { %5272 = vmatmul.bf16.vlgmr.msra.gmra.mxu2 %v10264_v60  ;;  %v7136_v38 = vor.u32 %v8906_v56, %v7133_v62  ;;  %v9002_v11 = vld [vmem:[%s9999_s20 + $0x374] sm:$0xf]  ;;  %v7283_v56 = vld [vmem:[%s9999_s20 + $0x198] sm:$0xf]  ;;  %v8949_v62 = vld [vmem:[%s9999_s20 + $0x1c4] sm:$0xf0] }
 0x2cf   : > { %v7284_v4 = vor.u32 %v8949_v62, %v7283_v56  ;;  %v9188_v56 = vld [vmem:[%s9999_s20 + $0x93c] sm:$0xf0] }
 0x2d0   : > { %5343 = vmatpush.bf16.msra.mxu0 %v7376_v3  ;;  %5278 = vmatpush.bf16.msra.mxu3 %v8520_v7  ;;  %v8277_v3 = vld [vmem:[%s9999_s20 + $0x998] sm:$0xf0]  ;;  %v7085_v7 = vld [vmem:[%s9999_s20 + $0x40] sm:$0xf0] }
 0x2d1   : > { %5308 = vmatpush.bf16.msrb.mxu1 %v7564_v8  ;;  %5317 = vmatpush.bf16.msrb.mxu2 %v8140_v17  ;;  %v9038_v8 = vld [vmem:[%s9999_s20 + $0x494] sm:$0xf]  ;;  %v8280_v9 = vor.u32 %v9193_v1, %v8277_v3  ;;  %v7427_v17 = vld [vmem:[%s9999_s20 + $0x2b8] sm:$0xf]  ;;  %v7088_v51 = vor.u32 %v8894_v29, %v7085_v7  ;;  %v8428_v7 = vor.u32 %v9236_v55, %v8427_v0  ;;  %v8573_v55 = vld [vmem:[%s9999_s20 + $0xbe0] sm:$0xf0] }
 0x2d2   : > { %v7235_v29 = vld [vmem:[%s9999_s20 + $0x138] sm:$0xf]  ;;  %v9266_v0 = vld [vmem:[%s9999_s20 + $0xbb4] sm:$0xf] }
 0x2d4   : > { %5344 = vmatpush.bf16.msra.mxu0 %v7328_v12  ;;  %5279 = vmatpush.bf16.msra.mxu3 %v8472_v19  ;;  %v8985_v12 = vld [vmem:[%s9999_s20 + $0x2e4] sm:$0xf0]  ;;  %v7664_v19 = vor.u32 %v9038_v8, %v7661_v10 }
 0x2d5   : > { %5309 = vmatpush.bf16.msrb.mxu1 %v7516_v20  ;;  %5318 = vmatpush.bf16.msrb.mxu2 %v8092_v23  ;;  %v7428_v20 = vor.u32 %v8985_v12, %v7427_v17  ;;  %v9026_v23 = vld [vmem:[%s9999_s20 + $0x434] sm:$0xf]  ;;  %v8937_v8 = vld [vmem:[%s9999_s20 + $0x164] sm:$0xf0]  ;;  %v8379_v17 = vld [vmem:[%s9999_s20 + $0xa30] sm:$0xf] }
 0x2d6   : > { %v9081_v10 = vld [vmem:[%s9999_s20 + $0x5e4] sm:$0xf0]  ;;  %v9224_v12 = vld [vmem:[%s9999_s20 + $0xa5c] sm:$0xf0] }
 0x2d8   : > { %5345 = vmatpush.bf16.msra.mxu0 %v7280_v25  ;;  %5280 = vmatpush.bf16.msra.mxu3 %v8424_v48  ;;  %v8232_v25 = vor.u32 %v9181_v13, %v8229_v58  ;;  %v7852_v48 = vor.u32 %v9092_v22, %v7851_v2  ;;  %v8925_v2 = vld [vmem:[%s9999_s20 + $0x104] sm:$0xf0]  ;;  %v7763_v22 = vld [vmem:[%s9999_s20 + $0x558] sm:$0xf] }
 0x2d9   : > { %5310 = vmatpush.bf16.msrb.mxu1 %v7468_v35  ;;  %5319 = vmatpush.bf16.msrb.mxu2 %v8044_v40  ;;  %v7616_v35 = vor.u32 %v9026_v23, %v7613_v26  ;;  %v7380_v40 = vor.u32 %v8973_v32, %v7379_v31  ;;  %v9069_v23 = vld [vmem:[%s9999_s20 + $0x584] sm:$0xf0]  ;;  %v8331_v26 = vld [vmem:[%s9999_s20 + $0x9d0] sm:$0xf]  ;;  %v9110_v32 = vld [vmem:[%s9999_s20 + $0x6d4] sm:$0xf] }
 0x2da   : > { %v7764_v31 = vor.u32 %v9069_v23, %v7763_v22  ;;  %v8332_v34 = vor.u32 %v9212_v27, %v8331_v26  ;;  %v8955_v26 = vld [vmem:[%s9999_s20 + $0x1fc] sm:$0xf]  ;;  %v7333_v27 = vld [vmem:[%s9999_s20 + $0x228] sm:$0xf0] }
 0x2dc   : > { %5346 = vmatpush.bf16.msra.mxu0 %v7232_v41  ;;  %5281 = vmatpush.bf16.msra.mxu3 %v8376_v53  ;;  %v7565_v41 = vld [vmem:[%s9999_s20 + $0x400] sm:$0xf0]  ;;  %v8475_v53 = vld [vmem:[%s9999_s20 + $0xaf0] sm:$0xf] }
 0x2dd   : > { %5355 = vmatpush.bf16.msra.mxu1 %v7808_v43  ;;  %5320 = vmatpush.bf16.msrb.mxu2 %v7996_v59  ;;  %v8141_v43 = vld [vmem:[%s9999_s20 + $0x880] sm:$0xf0]  ;;  %v7568_v49 = vor.u32 %v9014_v39, %v7565_v41  ;;  %v7332_v59 = vor.u32 %v8961_v46, %v7331_v45  ;;  %v8476_v57 = vor.u32 %v9248_v47, %v8475_v53  ;;  %v9057_v39 = vld [vmem:[%s9999_s20 + $0x524] sm:$0xf0]  ;;  %v9200_v41 = vld [vmem:[%s9999_s20 + $0x99c] sm:$0xf0] }
 0x2de   : > { %5311 = vmatmul.bf16.vlgmr.msrb.gmra.mxu1 %v10229_v37  ;;  %v8144_v18 = vor.u32 %v9158_v21, %v8141_v43  ;;  %v9098_v43 = vld [vmem:[%s9999_s20 + $0x674] sm:$0xf]  ;;  %v7901_v46 = vld [vmem:[%s9999_s20 + $0x6a0] sm:$0xf0]  ;;  %v7091_v53 = vld [vmem:[%s9999_s20 + $0x18] sm:$0xf] }
 0x2df   : > { %v8901_v47 = vld [vmem:[%s9999_s20 + $0x44] sm:$0xf0]  ;;  %v7904_v62 = vor.u32 %v9098_v43, %v7901_v46  ;;  %v8429_v43 = vld [vmem:[%s9999_s20 + $0xac0] sm:$0xf0]  ;;  %v7475_v46 = vld [vmem:[%s9999_s20 + $0x318] sm:$0xf] }
 0x2e0   : > { %5347 = vmatpush.bf16.msra.mxu0 %v7184_v50  ;;  %5282 = vmatpush.bf16.msra.mxu3 %v8328_v63  ;;  %v7517_v50 = vld [vmem:[%s9999_s20 + $0x3a0] sm:$0xf0] }
 0x2e1   : > { %5356 = vmatpush.bf16.msra.mxu1 %v7760_v54  ;;  %5321 = vmatpush.bf16.msrb.mxu2 %v7948_v42  ;;  %v8093_v54 = vld [vmem:[%s9999_s20 + $0x820] sm:$0xf0]  ;;  %v7520_v1 = vor.u32 %v9002_v11, %v7517_v50  ;;  %v8990_v42 = vld [vmem:[%s9999_s20 + $0x314] sm:$0xf]  ;;  %v9045_v11 = vld [vmem:[%s9999_s20 + $0x4c4] sm:$0xf0] }
 0x2e2   : > { %v8096_v3 = vor.u32 %v9146_v52, %v8093_v54  ;;  %v7429_v54 = vld [vmem:[%s9999_s20 + $0x2e8] sm:$0xf0] }
 0x2e4   : > { %5348 = vmatpush.bf16.msra.mxu0 %v7136_v38  ;;  %5283 = vmatpush.bf16.msra.mxu3 %v8280_v9  ;;  %v7469_v38 = vld [vmem:[%s9999_s20 + $0x340] sm:$0xf0]  ;;  %v7811_v9 = vld [vmem:[%s9999_s20 + $0x5b8] sm:$0xf] }
 0x2e5   : > { %5357 = vmatpush.bf16.msra.mxu1 %v7712_v6  ;;  %5322 = vmatpush.bf16.msrb.mxu2 %v7900_v14  ;;  %v8045_v6 = vld [vmem:[%s9999_s20 + $0x7c0] sm:$0xf0]  ;;  %v7472_v13 = vor.u32 %v8990_v42, %v7469_v38  ;;  %v7236_v14 = vor.u32 %v8937_v8, %v7235_v29  ;;  %v9086_v42 = vld [vmem:[%s9999_s20 + $0x614] sm:$0xf]  ;;  %v9033_v29 = vld [vmem:[%s9999_s20 + $0x464] sm:$0xf0] }
 0x2e6   : > { %v8048_v58 = vor.u32 %v9134_v5, %v8045_v6  ;;  %v7853_v38 = vld [vmem:[%s9999_s20 + $0x640] sm:$0xf0]  ;;  %v9177_v8 = vld [vmem:[%s9999_s20 + $0x8e4] sm:$0xf0] }
 0x2e8   : > { %5349 = vmatpush.bf16.msra.mxu0 %v7088_v51  ;;  %5284 = vmatpush.bf16.msra.mxu3 %v8232_v25  ;;  %v10483_v63 = vpop.f32.mrf.mxu0  ;;  %v7812_v51 = vor.u32 %v9081_v10, %v7811_v9  ;;  %v8576_v9 = vor.u32 %v9266_v0, %v8573_v55  ;;  %v8967_v10 = vld [vmem:[%s9999_s20 + $0x25c] sm:$0xf]  ;;  %v9218_v55 = vld [vmem:[%s9999_s20 + $0xa34] sm:$0xf] }
 0x2e9   : > { %5358 = vmatpush.bf16.msra.mxu1 %v7664_v19  ;;  %5323 = vmatpush.bf16.msrb.mxu2 %v7852_v48  ;;  %v7187_v19 = vld [vmem:[%s9999_s20 + $0xd8] sm:$0xf]  ;;  %v7949_v48 = vld [vmem:[%s9999_s20 + $0x700] sm:$0xf0] }
 0x2ea   : > { %v7952_v21 = vor.u32 %v9110_v32, %v7949_v48  ;;  %v7523_v48 = vld [vmem:[%s9999_s20 + $0x378] sm:$0xf] }
 0x2eb   : > { %5350 = vmatmul.bf16.vlgmr.msra.gmra.mxu0 %v10200_v24  ;;  %5285 = vmatmul.bf16.vlgmr.msra.gmra.mxu3 %v10325_v16 }
 0x2ec   : > { %5394 = vmatpush.bf16.msrb.mxu0 %v7428_v20  ;;  %5329 = vmatpush.bf16.msrb.mxu3 %v8572_v30  ;;  %v8380_v20 = vor.u32 %v9224_v12, %v8379_v17  ;;  %v7188_v30 = vor.u32 %v8925_v2, %v7187_v19  ;;  %v7381_v17 = vld [vmem:[%s9999_s20 + $0x288] sm:$0xf0]  ;;  %v7856_v12 = vor.u32 %v9086_v42, %v7853_v38  ;;  %v9021_v19 = vld [vmem:[%s9999_s20 + $0x404] sm:$0xf0] }
 0x2ed   : > { %5359 = vmatpush.bf16.msra.mxu1 %v7616_v35  ;;  %5368 = vmatpush.bf16.msra.mxu2 %v8192_v36  ;;  %v8913_v35 = vld [vmem:[%s9999_s20 + $0xa4] sm:$0xf0]  ;;  %v7715_v36 = vld [vmem:[%s9999_s20 + $0x4f8] sm:$0xf]  ;;  %v7384_v61 = vor.u32 %v8967_v10, %v7381_v17  ;;  %v7765_v10 = vld [vmem:[%s9999_s20 + $0x588] sm:$0xf0] }
 0x2ee   : > { %5324 = vmatmul.bf16.vlgmr.msrb.gmra.mxu2 %v10264_v60  ;;  %v7716_v45 = vor.u32 %v9057_v39, %v7715_v36  ;;  %v9165_v2 = vld [vmem:[%s9999_s20 + $0x884] sm:$0xf0]  ;;  %v9206_v17 = vld [vmem:[%s9999_s20 + $0x9d4] sm:$0xf] }
 0x2ef   : > { %v9153_v36 = vld [vmem:[%s9999_s20 + $0x824] sm:$0xf0] }
 0x2f0   : > { %5395 = vmatpush.bf16.msrb.mxu0 %v7380_v40  ;;  %5330 = vmatpush.bf16.msrb.mxu3 %v8524_v44  ;;  %v5093_v25 = vpop.f32.mrf.mxu0  ;;  %v8283_v40 = vld [vmem:[%s9999_s20 + $0x970] sm:$0xf]  ;;  %v7140_v44 = vor.u32 %v8913_v35, %v7139_v33  ;;  %v7336_v33 = vor.u32 %v8955_v26, %v7333_v27  ;;  %v8099_v35 = vld [vmem:[%s9999_s20 + $0x7f8] sm:$0xf]  ;;  %v9194_v27 = vld [vmem:[%s9999_s20 + $0x974] sm:$0xf] }
 0x2f1   : > { %5360 = vmatpush.bf16.msra.mxu1 %v7568_v49  ;;  %5369 = vmatpush.bf16.msra.mxu2 %v8144_v18  ;;  %v8284_v49 = vor.u32 %v9200_v41, %v8283_v40  ;;  %v7667_v18 = vld [vmem:[%s9999_s20 + $0x498] sm:$0xf]  ;;  %v8943_v40 = vld [vmem:[%s9999_s20 + $0x19c] sm:$0xf]  ;;  %v7285_v41 = vld [vmem:[%s9999_s20 + $0x1c8] sm:$0xf0] }
 0x2f4   : > { %5396 = vmatpush.bf16.msrb.mxu0 %v7332_v59  ;;  %5331 = vmatpush.bf16.msrb.mxu3 %v8476_v57  ;;  %v8979_v59 = vld [vmem:[%s9999_s20 + $0x2bc] sm:$0xf]  ;;  %v8235_v57 = vld [vmem:[%s9999_s20 + $0x910] sm:$0xf] }
 0x2f5   : > { %5361 = vmatpush.bf16.msra.mxu1 %v7520_v1  ;;  %5370 = vmatpush.bf16.msra.mxu2 %v8096_v3  ;;  %v7092_v1 = vor.u32 %v8901_v47, %v7091_v53  ;;  %v7668_v3 = vor.u32 %v9045_v11, %v7667_v18  ;;  %v7432_v5 = vor.u32 %v8979_v59, %v7429_v54  ;;  %v8997_v53 = vld [vmem:[%s9999_s20 + $0x344] sm:$0xf0]  ;;  %v8931_v11 = vld [vmem:[%s9999_s20 + $0x13c] sm:$0xf] }
 0x2f6   : > { %v8236_v6 = vor.u32 %v9188_v56, %v8235_v57  ;;  %v7288_v47 = vor.u32 %v8943_v40, %v7285_v41  ;;  %v9141_v18 = vld [vmem:[%s9999_s20 + $0x7c4] sm:$0xf0]  ;;  %v7237_v57 = vld [vmem:[%s9999_s20 + $0x168] sm:$0xf0]  ;;  %v9075_v56 = vld [vmem:[%s9999_s20 + $0x5bc] sm:$0xf] }
 0x2f7   : > { %v7240_v38 = vor.u32 %v8931_v11, %v7237_v57  ;;  %v7669_v40 = vld [vmem:[%s9999_s20 + $0x4c8] sm:$0xf0]  ;;  %v7435_v41 = vld [vmem:[%s9999_s20 + $0x2c0] sm:$0xf]  ;;  %v7859_v11 = vld [vmem:[%s9999_s20 + $0x618] sm:$0xf] }
 0x2f8   : > { %5397 = vmatpush.bf16.msrb.mxu0 %v7284_v4  ;;  %5332 = vmatpush.bf16.msrb.mxu3 %v8428_v7  ;;  %v10521_v50 = vpop.f32.mrf.mxu1  ;;  %v10523_v52 = vpop.f32.mrf.mxu0  ;;  %v7619_v4 = vld [vmem:[%s9999_s20 + $0x438] sm:$0xf]  ;;  %v9027_v57 = vld [vmem:[%s9999_s20 + $0x43c] sm:$0xf] }
 0x2f9   : > { %5362 = vmatpush.bf16.msra.mxu1 %v7472_v13  ;;  %5371 = vmatpush.bf16.msra.mxu2 %v8048_v58  ;;  %v8195_v7 = vld [vmem:[%s9999_s20 + $0x8b8] sm:$0xf]  ;;  %v9254_v13 = vld [vmem:[%s9999_s20 + $0xb54] sm:$0xf]  ;;  %v8525_v58 = vld [vmem:[%s9999_s20 + $0xb80] sm:$0xf0] }
 0x2fa   : > { %v8528_v25 = vor.u32 %v9254_v13, %v8525_v58 }
 0x2fc   : > { %5398 = vmatpush.bf16.msrb.mxu0 %v7236_v14  ;;  %5333 = vmatpush.bf16.msrb.mxu3 %v8380_v20  ;;  %v7620_v14 = vor.u32 %v9033_v29, %v7619_v4  ;;  %v8147_v20 = vld [vmem:[%s9999_s20 + $0x858] sm:$0xf]  ;;  %v8919_v29 = vld [vmem:[%s9999_s20 + $0xdc] sm:$0xf] }
 0x2fd   : > { %5407 = vmatpush.bf16.msrb.mxu1 %v7812_v51  ;;  %5372 = vmatpush.bf16.msra.mxu2 %v8000_v28  ;;  %v8196_v51 = vor.u32 %v9177_v8, %v8195_v7  ;;  %v9242_v28 = vld [vmem:[%s9999_s20 + $0xaf4] sm:$0xf]  ;;  %v8148_v32 = vor.u32 %v9165_v2, %v8147_v20  ;;  %v7189_v8 = vld [vmem:[%s9999_s20 + $0x108] sm:$0xf0] }
 0x2fe   : > { %5363 = vmatmul.bf16.vlgmr.msra.gmra.mxu1 %v10229_v37 }
 0x300   : > { %5399 = vmatpush.bf16.msrb.mxu0 %v7188_v30  ;;  %5334 = vmatpush.bf16.msrb.mxu3 %v8332_v34  ;;  %v5106_v22 = vpop.f32.mrf.mxu1  ;;  %v5145_v23 = vpop.f32.mrf.mxu0  ;;  %v8477_v30 = vld [vmem:[%s9999_s20 + $0xb20] sm:$0xf0]  ;;  %v9009_v34 = vld [vmem:[%s9999_s20 + $0x3a4] sm:$0xf0] }
 0x301   : > { %5408 = vmatpush.bf16.msrb.mxu1 %v7764_v31  ;;  %5373 = vmatpush.bf16.msra.mxu2 %v7952_v21  ;;  %v7572_v31 = vor.u32 %v9021_v19, %v7571_v15  ;;  %v8480_v39 = vor.u32 %v9242_v28, %v8477_v30  ;;  %v9230_v21 = vld [vmem:[%s9999_s20 + $0xa94] sm:$0xf]  ;;  %v7955_v15 = vld [vmem:[%s9999_s20 + $0x6d8] sm:$0xf]  ;;  %v8907_v19 = vld [vmem:[%s9999_s20 + $0x7c] sm:$0xf] }
 0x302   : > { %v8432_v54 = vor.u32 %v9230_v21, %v8429_v43  ;;  %v7141_v22 = vld [vmem:[%s9999_s20 + $0xa8] sm:$0xf0]  ;;  %v9051_v23 = vld [vmem:[%s9999_s20 + $0x4fc] sm:$0xf]  ;;  %v8285_v28 = vld [vmem:[%s9999_s20 + $0x9a0] sm:$0xf0] }
 0x303   : > { %v8986_v21 = vld [vmem:[%s9999_s20 + $0x2ec] sm:$0xf0]  ;;  %v9182_v43 = vld [vmem:[%s9999_s20 + $0x914] sm:$0xf] }
 0x304   : > { %5400 = vmatpush.bf16.msrb.mxu0 %v7140_v44  ;;  %5335 = vmatpush.bf16.msrb.mxu3 %v8284_v49  ;;  %v7524_v44 = vor.u32 %v9009_v34, %v7523_v48  ;;  %v8051_v49 = vld [vmem:[%s9999_s20 + $0x798] sm:$0xf]  ;;  %v8895_v34 = vld [vmem:[%s9999_s20 + $0x1c] sm:$0xf] }
 0x305   : > { %5409 = vmatpush.bf16.msrb.mxu1 %v7716_v45  ;;  %5374 = vmatpush.bf16.msra.mxu2 %v7904_v62  ;;  %v8100_v45 = vor.u32 %v9153_v36, %v8099_v35  ;;  %v7813_v62 = vld [vmem:[%s9999_s20 + $0x5e8] sm:$0xf0]  ;;  %v8052_v42 = vor.u32 %v9141_v18, %v8051_v49  ;;  %v8288_v36 = vor.u32 %v9194_v27, %v8285_v28 }
 0x306   : > { %v7816_v4 = vor.u32 %v9075_v56, %v7813_v62  ;;  %v7093_v35 = vld [vmem:[%s9999_s20 + $0x48] sm:$0xf0]  ;;  %v7436_v62 = vor.u32 %v8986_v21, %v7435_v41  ;;  %v8991_v21 = vld [vmem:[%s9999_s20 + $0x31c] sm:$0xf] }
 0x307   : > { %v7096_v49 = vor.u32 %v8895_v34, %v7093_v35  ;;  %v8950_v34 = vld [vmem:[%s9999_s20 + $0x1cc] sm:$0xf0] }
 0x308   : > { %5401 = vmatpush.bf16.msrb.mxu0 %v7092_v1  ;;  %5336 = vmatpush.bf16.msrb.mxu3 %v8236_v6  ;;  %v10564_v59 = vpop.f32.mrf.mxu1  ;;  %v8381_v1 = vld [vmem:[%s9999_s20 + $0xa60] sm:$0xf0]  ;;  %v9129_v6 = vld [vmem:[%s9999_s20 + $0x764] sm:$0xf0] }
 0x309   : > { %5410 = vmatpush.bf16.msrb.mxu1 %v7668_v3  ;;  %5375 = vmatpush.bf16.msra.mxu2 %v7856_v12  ;;  %v7476_v3 = vor.u32 %v8997_v53, %v7475_v46  ;;  %v8384_v7 = vor.u32 %v9218_v55, %v8381_v1  ;;  %v8333_v12 = vld [vmem:[%s9999_s20 + $0xa00] sm:$0xf0]  ;;  %v8579_v53 = vld [vmem:[%s9999_s20 + $0xbb8] sm:$0xf]  ;;  %v7621_v1 = vld [vmem:[%s9999_s20 + $0x468] sm:$0xf0] }
 0x30a   : > { %v10569_v0 = vpop.f32.mrf.mxu0  ;;  %v8336_v2 = vor.u32 %v9206_v17, %v8333_v12  ;;  %v7573_v12 = vld [vmem:[%s9999_s20 + $0x408] sm:$0xf0] }
 0x30b   : > { %5402 = vmatmul.bf16.vlgmr.msrb.gmra.mxu0 %v10200_v24  ;;  %5337 = vmatmul.bf16.vlgmr.msrb.gmra.mxu3 %v10325_v16 }
 0x30c   : > { %5446 = vmatpush.bf16.msra.mxu0 %v7432_v5  ;;  %5381 = vmatpush.bf16.msra.mxu3 %v8576_v9  ;;  %v8003_v5 = vld [vmem:[%s9999_s20 + $0x738] sm:$0xf]  ;;  %v9063_v9 = vld [vmem:[%s9999_s20 + $0x55c] sm:$0xf] }
 0x30d   : > { %5411 = vmatpush.bf16.msrb.mxu1 %v7620_v14  ;;  %5420 = vmatpush.bf16.msrb.mxu2 %v8196_v51  ;;  %v8004_v58 = vor.u32 %v9129_v6, %v8003_v5  ;;  %v7192_v14 = vor.u32 %v8919_v29, %v7189_v8  ;;  %v7768_v51 = vor.u32 %v9063_v9, %v7765_v10  ;;  %v8974_v5 = vld [vmem:[%s9999_s20 + $0x28c] sm:$0xf0]  ;;  %v8531_v29 = vld [vmem:[%s9999_s20 + $0xb58] sm:$0xf]  ;;  %v9015_v10 = vld [vmem:[%s9999_s20 + $0x3dc] sm:$0xf] }
 0x30e   : > { %5376 = vmatmul.bf16.vlgmr.msra.gmra.mxu2 %v10264_v60  ;;  %v10581_v13 = vpop.f32.mrf.mxu2  ;;  %v7624_v8 = vor.u32 %v9027_v57, %v7621_v1  ;;  %v9225_v1 = vld [vmem:[%s9999_s20 + $0xa64] sm:$0xf0] }
 0x310   : > { %5447 = vmatpush.bf16.msra.mxu0 %v7384_v61  ;;  %5382 = vmatpush.bf16.msra.mxu3 %v8528_v25  ;;  %v9117_v61 = vld [vmem:[%s9999_s20 + $0x704] sm:$0xf0]  ;;  %v5158_v20 = vpop.f32.mrf.mxu1  ;;  %v7717_v25 = vld [vmem:[%s9999_s20 + $0x528] sm:$0xf0] }
 0x311   : > { %5412 = vmatpush.bf16.msrb.mxu1 %v7572_v31  ;;  %5421 = vmatpush.bf16.msrb.mxu2 %v8148_v32  ;;  %v7956_v30 = vor.u32 %v9117_v61, %v7955_v15  ;;  %v7907_v31 = vld [vmem:[%s9999_s20 + $0x678] sm:$0xf]  ;;  %v7144_v32 = vor.u32 %v8907_v19, %v7141_v22  ;;  %v7720_v48 = vor.u32 %v9051_v23, %v7717_v25  ;;  %v7339_v15 = vld [vmem:[%s9999_s20 + $0x200] sm:$0xf]  ;;  %v8962_v61 = vld [vmem:[%s9999_s20 + $0x22c] sm:$0xf0] }
 0x312   : > { %v5197_v26 = vpop.f32.mrf.mxu0  ;;  %v8483_v20 = vld [vmem:[%s9999_s20 + $0xaf8] sm:$0xf]  ;;  %v10633_v22 = vld [vmem:[%s10630_s30] sm:$0xff]  ;;  %v7576_v23 = vor.u32 %v9015_v10, %v7573_v12  ;;  %v7340_v28 = vor.u32 %v8962_v61, %v7339_v15 }
 0x313   : > { %v9003_v26 = vld [vmem:[%s9999_s20 + $0x37c] sm:$0xf]  ;;  %v3138_v35 = vperm.slane %v10633_v22, 0  ;;  %v9070_v10 = vld [vmem:[%s9999_s20 + $0x58c] sm:$0xf0] }
 0x314   : > { %5448 = vmatpush.bf16.msra.mxu0 %v7336_v33  ;;  %5383 = vmatpush.bf16.msra.mxu3 %v8480_v39  ;;  %v9105_v33 = vld [vmem:[%s9999_s20 + $0x6a4] sm:$0xf0]  ;;  %v9039_v39 = vld [vmem:[%s9999_s20 + $0x49c] sm:$0xf]  ;;  %v8339_v12 = vld [vmem:[%s9999_s20 + $0x9d8] sm:$0xf] }
 0x315   : > { %5413 = vmatpush.bf16.msrb.mxu1 %v7524_v44  ;;  %5422 = vmatpush.bf16.msrb.mxu2 %v8100_v45  ;;  %v8237_v44 = vld [vmem:[%s9999_s20 + $0x940] sm:$0xf0]  ;;  %v7908_v46 = vor.u32 %v9105_v33, %v7907_v31  ;;  %v7672_v18 = vor.u32 %v9039_v39, %v7669_v40  ;;  %v9147_v31 = vld [vmem:[%s9999_s20 + $0x7fc] sm:$0xf]  ;;  %v7291_v33 = vld [vmem:[%s9999_s20 + $0x1a0] sm:$0xf]  ;;  %v5092_v57 = vadd.f32 %v10483_v63, %v3138_v35 }
 0x316   : > { %v5119_v45 = vpop.f32.mrf.mxu2  ;;  %v8240_v55 = vor.u32 %v9182_v43, %v8237_v44  ;;  %v9237_v39 = vld [vmem:[%s9999_s20 + $0xac4] sm:$0xf0]  ;;  %v7477_v43 = vld [vmem:[%s9999_s20 + $0x348] sm:$0xf0]  ;;  %v7292_v44 = vor.u32 %v8950_v34, %v7291_v33  ;;  %v9099_v34 = vld [vmem:[%s9999_s20 + $0x67c] sm:$0xf] }
 0x317   : > { %v9135_v45 = vld [vmem:[%s9999_s20 + $0x79c] sm:$0xf]  ;;  %v8005_v63 = vld [vmem:[%s9999_s20 + $0x768] sm:$0xf0] }
 0x318   : > { %5449 = vmatpush.bf16.msra.mxu0 %v7288_v47  ;;  %5384 = vmatpush.bf16.msra.mxu3 %v8432_v54  ;;  %v9273_v47 = vld [vmem:[%s9999_s20 + $0xbe4] sm:$0xf0]  ;;  %v10608_v56 = vpop.f32.mrf.mxu1 }
 0x319   : > { %5414 = vmatpush.bf16.msrb.mxu1 %v7476_v3  ;;  %5423 = vmatpush.bf16.msrb.mxu2 %v8052_v42  ;;  %v9093_v54 = vld [vmem:[%s9999_s20 + $0x644] sm:$0xf0]  ;;  %v9171_v3 = vld [vmem:[%s9999_s20 + $0x8bc] sm:$0xf]  ;;  %v8197_v42 = vld [vmem:[%s9999_s20 + $0x8e8] sm:$0xf0] }
 0x31a   : > { %v7860_v6 = vor.u32 %v9093_v54, %v7859_v11  ;;  %v8200_v9 = vor.u32 %v9171_v3, %v8197_v42  ;;  %v7819_v11 = vld [vmem:[%s9999_s20 + $0x5c0] sm:$0xf]  ;;  %v9082_v54 = vld [vmem:[%s9999_s20 + $0x5ec] sm:$0xf0]  ;;  %v7480_v3 = vor.u32 %v8991_v21, %v7477_v43 }
 0x31b   : > { %v7675_v43 = vld [vmem:[%s9999_s20 + $0x4a0] sm:$0xf] }
 0x31c   : > { %5450 = vmatpush.bf16.msra.mxu0 %v7240_v38  ;;  %5385 = vmatpush.bf16.msra.mxu3 %v8384_v7  ;;  %v8580_v38 = vor.u32 %v9273_v47, %v8579_v53  ;;  %v9261_v7 = vld [vmem:[%s9999_s20 + $0xb84] sm:$0xf0]  ;;  %v7243_v53 = vld [vmem:[%s9999_s20 + $0x140] sm:$0xf] }
 0x31d   : > { %5459 = vmatpush.bf16.msra.mxu1 %v7816_v4  ;;  %5424 = vmatpush.bf16.msrb.mxu2 %v8004_v58  ;;  %v7387_v4 = vld [vmem:[%s9999_s20 + $0x260] sm:$0xf]  ;;  %v9159_v58 = vld [vmem:[%s9999_s20 + $0x85c] sm:$0xf] }
 0x31e   : > { %5415 = vmatmul.bf16.vlgmr.msrb.gmra.mxu1 %v10229_v37  ;;  %v7388_v17 = vor.u32 %v8974_v5, %v7387_v4  ;;  %v10624_v19 = vpop.f32.mrf.mxu2  ;;  %v7820_v5 = vor.u32 %v9082_v54, %v7819_v11  ;;  %v9267_v54 = vld [vmem:[%s9999_s20 + $0xbbc] sm:$0xf] }
 0x320   : > { %5451 = vmatpush.bf16.msra.mxu0 %v7192_v14  ;;  %5386 = vmatpush.bf16.msra.mxu3 %v8336_v2  ;;  %v8149_v14 = vld [vmem:[%s9999_s20 + $0x888] sm:$0xf0]  ;;  %v9249_v2 = vld [vmem:[%s9999_s20 + $0xb24] sm:$0xf0]  ;;  %v5210_v27 = vpop.f32.mrf.mxu1 }
 0x321   : > { %5460 = vmatpush.bf16.msra.mxu1 %v7768_v51  ;;  %5425 = vmatpush.bf16.msrb.mxu2 %v7956_v30  ;;  %v8532_v51 = vor.u32 %v9261_v7, %v8531_v29  ;;  %v8152_v25 = vor.u32 %v9159_v58, %v8149_v14  ;;  %v7525_v30 = vld [vmem:[%s9999_s20 + $0x3a8] sm:$0xf0]  ;;  %v7195_v29 = vld [vmem:[%s9999_s20 + $0xe0] sm:$0xf]  ;;  %v9213_v58 = vld [vmem:[%s9999_s20 + $0xa04] sm:$0xf0] }
 0x322   : > { %v7528_v40 = vor.u32 %v9003_v26, %v7525_v30  ;;  %v8914_v26 = vld [vmem:[%s9999_s20 + $0xac] sm:$0xf0]  ;;  %v7723_v27 = vld [vmem:[%s9999_s20 + $0x500] sm:$0xf]  ;;  %v8291_v30 = vld [vmem:[%s9999_s20 + $0x978] sm:$0xf] }
 0x324   : > { %5452 = vmatpush.bf16.msra.mxu0 %v7144_v32  ;;  %5387 = vmatpush.bf16.msra.mxu3 %v8288_v36  ;;  %v8101_v32 = vld [vmem:[%s9999_s20 + $0x828] sm:$0xf0]  ;;  %v8435_v36 = vld [vmem:[%s9999_s20 + $0xa98] sm:$0xf] }
 0x325   : > { %5461 = vmatpush.bf16.msra.mxu1 %v7720_v48  ;;  %5426 = vmatpush.bf16.msrb.mxu2 %v7908_v46  ;;  %v8484_v48 = vor.u32 %v9249_v2, %v8483_v20  ;;  %v8104_v41 = vor.u32 %v9147_v31, %v8101_v32  ;;  %v8053_v46 = vld [vmem:[%s9999_s20 + $0x7c8] sm:$0xf0]  ;;  %v9111_v20 = vld [vmem:[%s9999_s20 + $0x6dc] sm:$0xf]  ;;  %v9201_v31 = vld [vmem:[%s9999_s20 + $0x9a4] sm:$0xf0] }
 0x326   : > { %v8056_v42 = vor.u32 %v9135_v45, %v8053_v46  ;;  %v7957_v2 = vld [vmem:[%s9999_s20 + $0x708] sm:$0xf0]  ;;  %v3139_v32 = vperm.slane %v10633_v22, 1  ;;  %v8292_v21 = vor.u32 %v9201_v31, %v8291_v30  ;;  %v8980_v45 = vld [vmem:[%s9999_s20 + $0x2c4] sm:$0xf] }
 0x327   : > { %v7960_v33 = vor.u32 %v9111_v20, %v7957_v2  ;;  %v7437_v46 = vld [vmem:[%s9999_s20 + $0x2f0] sm:$0xf0]  ;;  %v9022_v20 = vld [vmem:[%s9999_s20 + $0x40c] sm:$0xf0]  ;;  %v8155_v2 = vld [vmem:[%s9999_s20 + $0x860] sm:$0xf] }
 0x328   : > { %5453 = vmatpush.bf16.msra.mxu0 %v7096_v49  ;;  %5388 = vmatpush.bf16.msra.mxu3 %v8240_v55  ;;  %v10651_v47 = vpop.f32.mrf.mxu0  ;;  %v8436_v49 = vor.u32 %v9237_v39, %v8435_v36  ;;  %v8387_v55 = vld [vmem:[%s9999_s20 + $0xa38] sm:$0xf]  ;;  %v7909_v39 = vld [vmem:[%s9999_s20 + $0x6a8] sm:$0xf0] }
 0x329   : > { %5462 = vmatpush.bf16.msra.mxu1 %v7672_v18  ;;  %5427 = vmatpush.bf16.msrb.mxu2 %v7860_v6  ;;  %v8938_v18 = vld [vmem:[%s9999_s20 + $0x16c] sm:$0xf0]  ;;  %v9123_v6 = vld [vmem:[%s9999_s20 + $0x73c] sm:$0xf]  ;;  %v8388_v7 = vor.u32 %v9225_v1, %v8387_v55  ;;  %v7912_v11 = vor.u32 %v9099_v34, %v7909_v39  ;;  %v8485_v30 = vld [vmem:[%s9999_s20 + $0xb28] sm:$0xf0] }
 0x32a   : > { %v7244_v4 = vor.u32 %v8938_v18, %v7243_v53  ;;  %v8008_v14 = vor.u32 %v9123_v6, %v8005_v63  ;;  %v8243_v53 = vld [vmem:[%s9999_s20 + $0x918] sm:$0xf]  ;;  %v9087_v1 = vld [vmem:[%s9999_s20 + $0x61c] sm:$0xf]  ;;  %v8203_v6 = vld [vmem:[%s9999_s20 + $0x8c0] sm:$0xf] }
 0x32b   : > { %5454 = vmatmul.bf16.vlgmr.msra.gmra.mxu0 %v10200_v24  ;;  %5389 = vmatmul.bf16.vlgmr.msra.gmra.mxu3 %v10325_v16  ;;  %v9178_v63 = vld [vmem:[%s9999_s20 + $0x8ec] sm:$0xf0] }
 0x32c   : > { %5498 = vmatpush.bf16.msrb.mxu0 %v7436_v62  ;;  %5433 = vmatpush.bf16.msrb.mxu3 %v8580_v38  ;;  %v5171_v62 = vpop.f32.mrf.mxu2  ;;  %v5105_v38 = vadd.f32 %v10521_v50, %v5092_v57  ;;  %v8581_v57 = vld [vmem:[%s9999_s20 + $0xbe8] sm:$0xf0]  ;;  %v9154_v39 = vld [vmem:[%s9999_s20 + $0x82c] sm:$0xf0] }
 0x32d   : > { %5463 = vmatpush.bf16.msra.mxu1 %v7624_v8  ;;  %5472 = vmatpush.bf16.msra.mxu2 %v8200_v9  ;;  %v8926_v8 = vld [vmem:[%s9999_s20 + $0x10c] sm:$0xf0]  ;;  %v7771_v9 = vld [vmem:[%s9999_s20 + $0x560] sm:$0xf] }
 0x32e   : > { %5428 = vmatmul.bf16.vlgmr.msrb.gmra.mxu2 %v10264_v60  ;;  %v5130_v50 = vpop.f32.mrf.mxu3  ;;  %v7196_v15 = vor.u32 %v8926_v8, %v7195_v29  ;;  %v7772_v61 = vor.u32 %v9070_v10, %v7771_v9  ;;  %v5144_v29 = vadd.f32 %v10523_v52, %v3139_v32  ;;  %v8584_v8 = vor.u32 %v9267_v54, %v8581_v57  ;;  %v8968_v9 = vld [vmem:[%s9999_s20 + $0x264] sm:$0xf]  ;;  %v7389_v10 = vld [vmem:[%s9999_s20 + $0x290] sm:$0xf0]  ;;  %v8059_v54 = vld [vmem:[%s9999_s20 + $0x7a0] sm:$0xf] }
 0x32f   : > { %v9142_v57 = vld [vmem:[%s9999_s20 + $0x7cc] sm:$0xf0] }
 0x330   : > { %5499 = vmatpush.bf16.msrb.mxu0 %v7388_v17  ;;  %5434 = vmatpush.bf16.msrb.mxu3 %v8532_v51  ;;  %v5118_v17 = vadd.f32 %v10581_v13, %v5105_v38  ;;  %v7147_v13 = vld [vmem:[%s9999_s20 + $0x80] sm:$0xf]  ;;  %v7440_v38 = vor.u32 %v8980_v45, %v7437_v46  ;;  %v8437_v45 = vld [vmem:[%s9999_s20 + $0xac8] sm:$0xf0] }
 0x331   : > { %5464 = vmatpush.bf16.msra.mxu1 %v7576_v23  ;;  %5473 = vmatpush.bf16.msra.mxu2 %v8152_v25  ;;  %v5249_v23 = vpop.f32.mrf.mxu0  ;;  %v8340_v25 = vor.u32 %v9213_v58, %v8339_v12  ;;  %v7148_v35 = vor.u32 %v8914_v26, %v7147_v13  ;;  %v9255_v58 = vld [vmem:[%s9999_s20 + $0xb5c] sm:$0xf]  ;;  %v9166_v13 = vld [vmem:[%s9999_s20 + $0x88c] sm:$0xf0]  ;;  %v7341_v26 = vld [vmem:[%s9999_s20 + $0x230] sm:$0xf0] }
 0x332   : > { %v5131_v51 = vadd.f32 %v5130_v50, %v5118_v17  ;;  %v8533_v50 = vld [vmem:[%s9999_s20 + $0xb88] sm:$0xf0]  ;;  %v8156_v32 = vor.u32 %v9166_v13, %v8155_v2 }
 0x334   : > { %5500 = vmatpush.bf16.msrb.mxu0 %v7340_v28  ;;  %5435 = vmatpush.bf16.msrb.mxu3 %v8484_v48  ;;  %v9058_v28 = vld [vmem:[%s9999_s20 + $0x52c] sm:$0xf0]  ;;  %5706 = vst [vmem:[%s10678_s27] sm:$0xff] %v5131_v51  ;;  %v10685_v48 = vpop.f32.mrf.mxu2  ;;  %v8204_v51 = vor.u32 %v9178_v63, %v8203_v6  ;;  %v8389_v6 = vld [vmem:[%s9999_s20 + $0xa68] sm:$0xf0] }
 0x335   : > { %5465 = vmatpush.bf16.msra.mxu1 %v7528_v40  ;;  %5474 = vmatpush.bf16.msra.mxu2 %v8104_v41  ;;  %v7724_v36 = vor.u32 %v9058_v28, %v7723_v27  ;;  %v7099_v40 = vld [vmem:[%s9999_s20 + $0x20] sm:$0xf]  ;;  %v8902_v41 = vld [vmem:[%s9999_s20 + $0x4c] sm:$0xf0]  ;;  %v9243_v28 = vld [vmem:[%s9999_s20 + $0xafc] sm:$0xf] }
 0x336   : > { %v5132_v18 = vpop.f32.mrf.mxu3  ;;  %v7100_v62 = vor.u32 %v8902_v41, %v7099_v40  ;;  %v8488_v41 = vor.u32 %v9243_v28, %v8485_v30  ;;  %v7149_v28 = vld [vmem:[%s9999_s20 + $0xb0] sm:$0xf0]  ;;  %v9052_v30 = vld [vmem:[%s9999_s20 + $0x504] sm:$0xf] }
 0x337   : > { %v8998_v18 = vld [vmem:[%s9999_s20 + $0x34c] sm:$0xf0] }
 0x338   : > { %5501 = vmatpush.bf16.msrb.mxu0 %v7292_v44  ;;  %5436 = vmatpush.bf16.msrb.mxu3 %v8436_v49  ;;  %v9046_v44 = vld [vmem:[%s9999_s20 + $0x4cc] sm:$0xf0]  ;;  %v9189_v49 = vld [vmem:[%s9999_s20 + $0x944] sm:$0xf0] }
 0x339   : > { %5466 = vmatpush.bf16.msra.mxu1 %v7480_v3  ;;  %5475 = vmatpush.bf16.msra.mxu2 %v8056_v42  ;;  %v7676_v55 = vor.u32 %v9046_v44, %v7675_v43  ;;  %v7861_v3 = vld [vmem:[%s9999_s20 + $0x648] sm:$0xf0]  ;;  %v7627_v42 = vld [vmem:[%s9999_s20 + $0x440] sm:$0xf]  ;;  %v7293_v43 = vld [vmem:[%s9999_s20 + $0x1d0] sm:$0xf0] }
 0x33a   : > { %v7864_v12 = vor.u32 %v9087_v1, %v7861_v3  ;;  %v9231_v44 = vld [vmem:[%s9999_s20 + $0xa9c] sm:$0xf]  ;;  %v7245_v1 = vld [vmem:[%s9999_s20 + $0x170] sm:$0xf0]  ;;  %v9076_v3 = vld [vmem:[%s9999_s20 + $0x5c4] sm:$0xf] }
 0x33c   : > { %5502 = vmatpush.bf16.msrb.mxu0 %v7244_v4  ;;  %5437 = vmatpush.bf16.msrb.mxu3 %v8388_v7  ;;  %v8244_v4 = vor.u32 %v9189_v49, %v8243_v53  ;;  %v10706_v7 = vpop.f32.mrf.mxu1  ;;  %v5223_v17 = vpop.f32.mrf.mxu2  ;;  %v7483_v49 = vld [vmem:[%s9999_s20 + $0x320] sm:$0xf] }
 0x33d   : > { %5511 = vmatpush.bf16.msrb.mxu1 %v7820_v5  ;;  %5476 = vmatpush.bf16.msra.mxu2 %v8008_v14  ;;  %v9034_v5 = vld [vmem:[%s9999_s20 + $0x46c] sm:$0xf0]  ;;  %v5157_v14 = vadd.f32 %v10564_v59, %v5144_v29  ;;  %v8956_v59 = vld [vmem:[%s9999_s20 + $0x204] sm:$0xf]  ;;  %v7484_v29 = vor.u32 %v8998_v18, %v7483_v49  ;;  %v8011_v17 = vld [vmem:[%s9999_s20 + $0x740] sm:$0xf] }
 0x33e   : > { %5467 = vmatmul.bf16.vlgmr.msra.gmra.mxu1 %v10229_v37  ;;  %v7628_v52 = vor.u32 %v9034_v5, %v7627_v42  ;;  %v5182_v27 = vpop.f32.mrf.mxu3  ;;  %v7344_v34 = vor.u32 %v8956_v59, %v7341_v26  ;;  %v7821_v42 = vld [vmem:[%s9999_s20 + $0x5f0] sm:$0xf0]  ;;  %v9219_v5 = vld [vmem:[%s9999_s20 + $0xa3c] sm:$0xf]  ;;  %v7963_v59 = vld [vmem:[%s9999_s20 + $0x6e0] sm:$0xf] }
 0x33f   : > { %v5170_v23 = vadd.f32 %v10624_v19, %v5157_v14  ;;  %v7197_v14 = vld [vmem:[%s9999_s20 + $0x110] sm:$0xf0]  ;;  %v9118_v26 = vld [vmem:[%s9999_s20 + $0x70c] sm:$0xf0]  ;;  %v7443_v49 = vld [vmem:[%s9999_s20 + $0x2c8] sm:$0xf] }
 0x340   : > { %5503 = vmatpush.bf16.msrb.mxu0 %v7196_v15  ;;  %5438 = vmatpush.bf16.msrb.mxu3 %v8340_v25  ;;  %v7579_v15 = vld [vmem:[%s9999_s20 + $0x3e0] sm:$0xf]  ;;  %v8536_v25 = vor.u32 %v9255_v58, %v8533_v50  ;;  %v8920_v58 = vld [vmem:[%s9999_s20 + $0xe4] sm:$0xf]  ;;  %v8392_v50 = vor.u32 %v9219_v5, %v8389_v6  ;;  %v8987_v18 = vld [vmem:[%s9999_s20 + $0x2f4] sm:$0xf0] }
 0x341   : > { %5512 = vmatpush.bf16.msrb.mxu1 %v7772_v61  ;;  %5477 = vmatpush.bf16.msra.mxu2 %v7960_v33  ;;  %v7392_v61 = vor.u32 %v8968_v9, %v7389_v10  ;;  %v5183_v31 = vadd.f32 %v5182_v27, %v5170_v23  ;;  %v7580_v19 = vor.u32 %v9022_v20, %v7579_v15  ;;  %v7531_v33 = vld [vmem:[%s9999_s20 + $0x380] sm:$0xf]  ;;  %v8341_v20 = vld [vmem:[%s9999_s20 + $0xa08] sm:$0xf0] }
 0x342   : > { %v7824_v10 = vor.u32 %v9076_v3, %v7821_v42  ;;  %v7200_v23 = vor.u32 %v8920_v58, %v7197_v14  ;;  %v7867_v42 = vld [vmem:[%s9999_s20 + $0x620] sm:$0xf]  ;;  %v7444_v5 = vor.u32 %v8987_v18, %v7443_v49  ;;  %v8975_v58 = vld [vmem:[%s9999_s20 + $0x294] sm:$0xf0]  ;;  %v9136_v18 = vld [vmem:[%s9999_s20 + $0x7a4] sm:$0xf] }
 0x343   : > { %5707 = vst [vmem:[%s10678_s27 + $0x8] sm:$0xff] %v5183_v31  ;;  %v7725_v31 = vld [vmem:[%s9999_s20 + $0x530] sm:$0xf0] }
 0x344   : > { %5504 = vmatpush.bf16.msrb.mxu0 %v7148_v35  ;;  %5439 = vmatpush.bf16.msrb.mxu3 %v8292_v21  ;;  %v9010_v35 = vld [vmem:[%s9999_s20 + $0x3ac] sm:$0xf0]  ;;  %v5262_v40 = vpop.f32.mrf.mxu1  ;;  %v8944_v21 = vld [vmem:[%s9999_s20 + $0x1a4] sm:$0xf] }
 0x345   : > { %5513 = vmatpush.bf16.msrb.mxu1 %v7724_v36  ;;  %5478 = vmatpush.bf16.msra.mxu2 %v7912_v11  ;;  %v8107_v36 = vld [vmem:[%s9999_s20 + $0x800] sm:$0xf]  ;;  %v7532_v46 = vor.u32 %v9010_v35, %v7531_v33  ;;  %v7296_v11 = vor.u32 %v8944_v21, %v7293_v43  ;;  %v7964_v35 = vor.u32 %v9118_v26, %v7963_v59  ;;  %v8896_v43 = vld [vmem:[%s9999_s20 + $0x24] sm:$0xf]  ;;  %v8157_v59 = vld [vmem:[%s9999_s20 + $0x890] sm:$0xf0] }
 0x346   : > { %v8108_v53 = vor.u32 %v9154_v39, %v8107_v36  ;;  %v7915_v36 = vld [vmem:[%s9999_s20 + $0x680] sm:$0xf]  ;;  %v9106_v39 = vld [vmem:[%s9999_s20 + $0x6ac] sm:$0xf0]  ;;  %v7728_v21 = vor.u32 %v9052_v30, %v7725_v31 }
 0x347   : > { %v9250_v30 = vld [vmem:[%s9999_s20 + $0xb2c] sm:$0xf0] }
 0x348   : > { %5505 = vmatpush.bf16.msrb.mxu0 %v7100_v62  ;;  %5440 = vmatpush.bf16.msrb.mxu3 %v8244_v4  ;;  %v8932_v62 = vld [vmem:[%s9999_s20 + $0x144] sm:$0xf]  ;;  %v5184_v4 = vpop.f32.mrf.mxu3  ;;  %v10745_v63 = vpop.f32.mrf.mxu0 }
 0x349   : > { %5514 = vmatpush.bf16.msrb.mxu1 %v7676_v55  ;;  %5479 = vmatpush.bf16.msra.mxu2 %v7864_v12  ;;  %v8440_v55 = vor.u32 %v9231_v44, %v8437_v45  ;;  %v7248_v9 = vor.u32 %v8932_v62, %v7245_v1  ;;  %v9130_v12 = vld [vmem:[%s9999_s20 + $0x76c] sm:$0xf0]  ;;  %v7101_v44 = vld [vmem:[%s9999_s20 + $0x50] sm:$0xf0]  ;;  %v9040_v45 = vld [vmem:[%s9999_s20 + $0x4a4] sm:$0xf] }
 0x34a   : > { %v8012_v2 = vor.u32 %v9130_v12, %v8011_v17  ;;  %v8587_v62 = vld [vmem:[%s9999_s20 + $0xbc0] sm:$0xf]  ;;  %v7104_v1 = vor.u32 %v8896_v43, %v7101_v44  ;;  %v9028_v4 = vld [vmem:[%s9999_s20 + $0x444] sm:$0xf]  ;;  %v7395_v12 = vld [vmem:[%s9999_s20 + $0x268] sm:$0xf] }
 0x34b   : > { %5506 = vmatmul.bf16.vlgmr.msrb.gmra.mxu0 %v10200_v24  ;;  %5441 = vmatmul.bf16.vlgmr.msrb.gmra.mxu3 %v10325_v16  ;;  %v9238_v43 = vld [vmem:[%s9999_s20 + $0xacc] sm:$0xf0] }
 0x34c   : > { %5550 = vmatpush.bf16.msra.mxu0 %v7440_v38  ;;  %5485 = vmatpush.bf16.msra.mxu3 %v8584_v8  ;;  %v3140_v38 = vperm.slane %v10633_v22, 2  ;;  %v8060_v8 = vor.u32 %v9142_v57, %v8059_v54  ;;  %v8245_v54 = vld [vmem:[%s9999_s20 + $0x948] sm:$0xf0]  ;;  %v7916_v57 = vor.u32 %v9106_v39, %v7915_v36 }
 0x34d   : > { %5515 = vmatpush.bf16.msrb.mxu1 %v7628_v52  ;;  %5524 = vmatpush.bf16.msrb.mxu2 %v8204_v51  ;;  %v9064_v52 = vld [vmem:[%s9999_s20 + $0x564] sm:$0xf]  ;;  %v7773_v51 = vld [vmem:[%s9999_s20 + $0x590] sm:$0xf0] }
 0x34e   : > { %5480 = vmatmul.bf16.vlgmr.msra.gmra.mxu2 %v10264_v60  ;;  %v5196_v15 = vadd.f32 %v10569_v0, %v3140_v38  ;;  %v8908_v0 = vld [vmem:[%s9999_s20 + $0x84] sm:$0xf]  ;;  %v9094_v38 = vld [vmem:[%s9999_s20 + $0x64c] sm:$0xf0] }
 0x34f   : > { %v7868_v14 = vor.u32 %v9094_v38, %v7867_v42  ;;  %v8395_v38 = vld [vmem:[%s9999_s20 + $0xa40] sm:$0xf] }
 0x350   : > { %5551 = vmatpush.bf16.msra.mxu0 %v7392_v61  ;;  %5486 = vmatpush.bf16.msra.mxu3 %v8536_v25  ;;  %v9207_v61 = vld [vmem:[%s9999_s20 + $0x9dc] sm:$0xf]  ;;  %v5209_v13 = vadd.f32 %v10608_v56, %v5196_v15  ;;  %v7776_v25 = vor.u32 %v9064_v52, %v7773_v51  ;;  %v5301_v33 = vpop.f32.mrf.mxu0  ;;  %v8539_v52 = vld [vmem:[%s9999_s20 + $0xb60] sm:$0xf]  ;;  %v9262_v51 = vld [vmem:[%s9999_s20 + $0xb8c] sm:$0xf0] }
 0x351   : > { %5516 = vmatpush.bf16.msrb.mxu1 %v7580_v19  ;;  %5525 = vmatpush.bf16.msrb.mxu2 %v8156_v32  ;;  %v8344_v27 = vor.u32 %v9207_v61, %v8341_v20  ;;  %v9195_v56 = vld [vmem:[%s9999_s20 + $0x97c] sm:$0xf]  ;;  %v8293_v32 = vld [vmem:[%s9999_s20 + $0x9a8] sm:$0xf0]  ;;  %v8540_v26 = vor.u32 %v9262_v51, %v8539_v52  ;;  %v7533_v33 = vld [vmem:[%s9999_s20 + $0x3b0] sm:$0xf0] }
 0x352   : > { %v5222_v19 = vadd.f32 %v10685_v48, %v5209_v13  ;;  %v10769_v48 = vpop.f32.mrf.mxu2  ;;  %v7396_v13 = vor.u32 %v8975_v58, %v7395_v12  ;;  %v7203_v12 = vld [vmem:[%s9999_s20 + $0xe8] sm:$0xf]  ;;  %v9071_v52 = vld [vmem:[%s9999_s20 + $0x594] sm:$0xf0] }
 0x354   : > { %5552 = vmatpush.bf16.msra.mxu0 %v7344_v34  ;;  %5487 = vmatpush.bf16.msra.mxu3 %v8488_v41  ;;  %v5234_v34 = vpop.f32.mrf.mxu3  ;;  %v7152_v41 = vor.u32 %v8908_v0, %v7149_v28  ;;  %v7347_v0 = vld [vmem:[%s9999_s20 + $0x208] sm:$0xf]  ;;  %v8491_v28 = vld [vmem:[%s9999_s20 + $0xb00] sm:$0xf] }
 0x355   : > { %5517 = vmatpush.bf16.msrb.mxu1 %v7532_v46  ;;  %5526 = vmatpush.bf16.msrb.mxu2 %v8108_v53  ;;  %v5235_v40 = vadd.f32 %v5234_v34, %v5222_v19  ;;  %v8296_v46 = vor.u32 %v9195_v56, %v8293_v32  ;;  %v7677_v53 = vld [vmem:[%s9999_s20 + $0x4d0] sm:$0xf0]  ;;  %v9004_v56 = vld [vmem:[%s9999_s20 + $0x384] sm:$0xf]  ;;  %v8492_v39 = vor.u32 %v9250_v30, %v8491_v28  ;;  %v9059_v28 = vld [vmem:[%s9999_s20 + $0x534] sm:$0xf0] }
 0x356   : > { %v7680_v3 = vor.u32 %v9040_v45, %v7677_v53  ;;  %v9148_v34 = vld [vmem:[%s9999_s20 + $0x804] sm:$0xf]  ;;  %v7536_v44 = vor.u32 %v9004_v56, %v7533_v33  ;;  %v7485_v53 = vld [vmem:[%s9999_s20 + $0x350] sm:$0xf0] }
 0x357   : > { %5708 = vst [vmem:[%s10678_s27 + $0x10] sm:$0xff] %v5235_v40  ;;  %v7299_v40 = vld [vmem:[%s9999_s20 + $0x1a8] sm:$0xf]  ;;  %v9100_v33 = vld [vmem:[%s9999_s20 + $0x684] sm:$0xf] }
 0x358   : > { %5553 = vmatpush.bf16.msra.mxu0 %v7296_v11  ;;  %5488 = vmatpush.bf16.msra.mxu3 %v8440_v55  ;;  %v9183_v11 = vld [vmem:[%s9999_s20 + $0x91c] sm:$0xf]  ;;  %v9274_v55 = vld [vmem:[%s9999_s20 + $0xbec] sm:$0xf0] }
 0x359   : > { %5518 = vmatpush.bf16.msrb.mxu1 %v7484_v29  ;;  %5527 = vmatpush.bf16.msrb.mxu2 %v8060_v8  ;;  %v8248_v6 = vor.u32 %v9183_v11, %v8245_v54  ;;  %v7629_v29 = vld [vmem:[%s9999_s20 + $0x470] sm:$0xf0]  ;;  %v9172_v8 = vld [vmem:[%s9999_s20 + $0x8c4] sm:$0xf]  ;;  %v8588_v17 = vor.u32 %v9274_v55, %v8587_v62  ;;  %v7251_v54 = vld [vmem:[%s9999_s20 + $0x148] sm:$0xf] }
 0x35a   : > { %v5275_v15 = vpop.f32.mrf.mxu2  ;;  %v7632_v61 = vor.u32 %v9028_v4, %v7629_v29  ;;  %v8061_v11 = vld [vmem:[%s9999_s20 + $0x7d0] sm:$0xf0]  ;;  %v8939_v62 = vld [vmem:[%s9999_s20 + $0x174] sm:$0xf0]  ;;  %v7827_v55 = vld [vmem:[%s9999_s20 + $0x5c8] sm:$0xf] }
 0x35b   : > { %v9226_v4 = vld [vmem:[%s9999_s20 + $0xa6c] sm:$0xf0]  ;;  %v7252_v29 = vor.u32 %v8939_v62, %v7251_v54  ;;  %v8347_v15 = vld [vmem:[%s9999_s20 + $0x9e0] sm:$0xf]  ;;  %v8589_v54 = vld [vmem:[%s9999_s20 + $0xbf0] sm:$0xf0] }
 0x35c   : > { %5554 = vmatpush.bf16.msra.mxu0 %v7248_v9  ;;  %5489 = vmatpush.bf16.msra.mxu3 %v8392_v50  ;;  %v8205_v9 = vld [vmem:[%s9999_s20 + $0x8f0] sm:$0xf0]  ;;  %v5236_v50 = vpop.f32.mrf.mxu3  ;;  %v8396_v58 = vor.u32 %v9226_v4, %v8395_v38 }
 0x35d   : > { %5563 = vmatpush.bf16.msra.mxu1 %v7824_v10  ;;  %5528 = vmatpush.bf16.msrb.mxu2 %v8012_v2  ;;  %v10788_v10 = vpop.f32.mrf.mxu1  ;;  %v8208_v20 = vor.u32 %v9172_v8, %v8205_v9  ;;  %v9016_v2 = vld [vmem:[%s9999_s20 + $0x3e4] sm:$0xf]  ;;  %v8927_v50 = vld [vmem:[%s9999_s20 + $0x114] sm:$0xf0] }
 0x35e   : > { %5519 = vmatmul.bf16.vlgmr.msrb.gmra.mxu1 %v10229_v37  ;;  %v9124_v9 = vld [vmem:[%s9999_s20 + $0x744] sm:$0xf] }
 0x360   : > { %5555 = vmatpush.bf16.msra.mxu0 %v7200_v23  ;;  %5490 = vmatpush.bf16.msra.mxu3 %v8344_v27  ;;  %v7581_v23 = vld [vmem:[%s9999_s20 + $0x410] sm:$0xf0]  ;;  %v8963_v27 = vld [vmem:[%s9999_s20 + $0x234] sm:$0xf0] }
 0x361   : > { %5564 = vmatpush.bf16.msra.mxu1 %v7776_v25  ;;  %5529 = vmatpush.bf16.msrb.mxu2 %v7964_v35  ;;  %v9160_v25 = vld [vmem:[%s9999_s20 + $0x864] sm:$0xf]  ;;  %v7584_v31 = vor.u32 %v9016_v2, %v7581_v23  ;;  %v7348_v32 = vor.u32 %v8963_v27, %v7347_v0  ;;  %v8109_v35 = vld [vmem:[%s9999_s20 + $0x830] sm:$0xf0]  ;;  %v8915_v0 = vld [vmem:[%s9999_s20 + $0xb4] sm:$0xf0] }
 0x362   : > { %v8160_v19 = vor.u32 %v9160_v25, %v8157_v59  ;;  %v8112_v45 = vor.u32 %v9148_v34, %v8109_v35  ;;  %v9112_v25 = vld [vmem:[%s9999_s20 + $0x6e4] sm:$0xf]  ;;  %v7965_v59 = vld [vmem:[%s9999_s20 + $0x710] sm:$0xf0]  ;;  %v7731_v27 = vld [vmem:[%s9999_s20 + $0x508] sm:$0xf] }
 0x363   : > { %v7917_v34 = vld [vmem:[%s9999_s20 + $0x6b0] sm:$0xf0] }
 0x364   : > { %5556 = vmatpush.bf16.msra.mxu0 %v7152_v41  ;;  %5491 = vmatpush.bf16.msra.mxu3 %v8296_v46  ;;  %v8951_v41 = vld [vmem:[%s9999_s20 + $0x1d4] sm:$0xf0]  ;;  %v8992_v46 = vld [vmem:[%s9999_s20 + $0x324] sm:$0xf] }
 0x365   : > { %5565 = vmatpush.bf16.msra.mxu1 %v7728_v21  ;;  %5530 = vmatpush.bf16.msrb.mxu2 %v7916_v57  ;;  %v5314_v36 = vpop.f32.mrf.mxu1  ;;  %v8443_v21 = vld [vmem:[%s9999_s20 + $0xaa0] sm:$0xf]  ;;  %v7300_v49 = vor.u32 %v8951_v41, %v7299_v40  ;;  %v7107_v40 = vld [vmem:[%s9999_s20 + $0x28] sm:$0xf]  ;;  %v8903_v41 = vld [vmem:[%s9999_s20 + $0x54] sm:$0xf0] }
 0x366   : > { %v8444_v57 = vor.u32 %v9238_v43, %v8443_v21  ;;  %v7683_v21 = vld [vmem:[%s9999_s20 + $0x4a8] sm:$0xf] }
 0x368   : > { %5557 = vmatpush.bf16.msra.mxu0 %v7104_v1  ;;  %5492 = vmatpush.bf16.msra.mxu3 %v8248_v6  ;;  %v9083_v1 = vld [vmem:[%s9999_s20 + $0x5f4] sm:$0xf0]  ;;  %v10822_v42 = vpop.f32.mrf.mxu0  ;;  %v8064_v6 = vor.u32 %v9136_v18, %v8061_v11  ;;  %v7920_v18 = vor.u32 %v9100_v33, %v7917_v34  ;;  %v9268_v11 = vld [vmem:[%s9999_s20 + $0xbc4] sm:$0xf]  ;;  %v8945_v34 = vld [vmem:[%s9999_s20 + $0x1ac] sm:$0xf] }
 0x369   : > { %5566 = vmatpush.bf16.msra.mxu1 %v7680_v3  ;;  %5531 = vmatpush.bf16.msrb.mxu2 %v7868_v14  ;;  %v3141_v3 = vperm.slane %v10633_v22, 3  ;;  %v7828_v8 = vor.u32 %v9083_v1, %v7827_v55  ;;  %v7779_v14 = vld [vmem:[%s9999_s20 + $0x568] sm:$0xf]  ;;  %v9088_v55 = vld [vmem:[%s9999_s20 + $0x624] sm:$0xf] }
 0x36a   : > { %v7780_v23 = vor.u32 %v9071_v52, %v7779_v14  ;;  %v7869_v1 = vld [vmem:[%s9999_s20 + $0x650] sm:$0xf0]  ;;  %v9256_v14 = vld [vmem:[%s9999_s20 + $0xb64] sm:$0xf] }
 0x36b   : > { %5558 = vmatmul.bf16.vlgmr.msra.gmra.mxu0 %v10200_v24  ;;  %5493 = vmatmul.bf16.vlgmr.msra.gmra.mxu3 %v10325_v16  ;;  %v5248_v51 = vadd.f32 %v10651_v47, %v3141_v3  ;;  %v7155_v47 = vld [vmem:[%s9999_s20 + $0x88] sm:$0xf]  ;;  %v8541_v52 = vld [vmem:[%s9999_s20 + $0xb90] sm:$0xf0] }
 0x36c   : > { %5602 = vmatpush.bf16.msrb.mxu0 %v7444_v5  ;;  %5537 = vmatpush.bf16.msrb.mxu3 %v8588_v17  ;;  %v7488_v5 = vor.u32 %v8992_v46, %v7485_v53  ;;  %v8013_v17 = vld [vmem:[%s9999_s20 + $0x770] sm:$0xf0]  ;;  %v7156_v36 = vor.u32 %v8915_v0, %v7155_v47  ;;  %v7445_v46 = vld [vmem:[%s9999_s20 + $0x2f8] sm:$0xf0]  ;;  %v8251_v53 = vld [vmem:[%s9999_s20 + $0x920] sm:$0xf] }
 0x36d   : > { %5567 = vmatpush.bf16.msra.mxu1 %v7632_v61  ;;  %5576 = vmatpush.bf16.msra.mxu2 %v8208_v20  ;;  %v9214_v61 = vld [vmem:[%s9999_s20 + $0xa0c] sm:$0xf0]  ;;  %v8016_v20 = vor.u32 %v9124_v9, %v8013_v17  ;;  %v5261_v2 = vadd.f32 %v10706_v7, %v5248_v51  ;;  %v7635_v3 = vld [vmem:[%s9999_s20 + $0x448] sm:$0xf]  ;;  %v8969_v9 = vld [vmem:[%s9999_s20 + $0x26c] sm:$0xf] }
 0x36e   : > { %5532 = vmatmul.bf16.vlgmr.msrb.gmra.mxu2 %v10264_v60  ;;  %v5286_v56 = vpop.f32.mrf.mxu3  ;;  %v7397_v17 = vld [vmem:[%s9999_s20 + $0x298] sm:$0xf0]  ;;  %v8957_v47 = vld [vmem:[%s9999_s20 + $0x20c] sm:$0xf]  ;;  %v9244_v0 = vld [vmem:[%s9999_s20 + $0xb04] sm:$0xf] }
 0x36f   : > { %v5274_v30 = vadd.f32 %v10769_v48, %v5261_v2  ;;  %v7400_v2 = vor.u32 %v8969_v9, %v7397_v17  ;;  %v8921_v9 = vld [vmem:[%s9999_s20 + $0xec] sm:$0xf]  ;;  %v7205_v17 = vld [vmem:[%s9999_s20 + $0x118] sm:$0xf0] }
 0x370   : > { %5603 = vmatpush.bf16.msrb.mxu0 %v7396_v13  ;;  %5538 = vmatpush.bf16.msrb.mxu3 %v8540_v26  ;;  %v7204_v13 = vor.u32 %v8927_v50, %v7203_v12  ;;  %v8348_v26 = vor.u32 %v9214_v61, %v8347_v15  ;;  %v5353_v7 = vpop.f32.mrf.mxu0  ;;  %v7872_v50 = vor.u32 %v9088_v55, %v7869_v1  ;;  %v9220_v55 = vld [vmem:[%s9999_s20 + $0xa44] sm:$0xf]  ;;  %v8397_v1 = vld [vmem:[%s9999_s20 + $0xa70] sm:$0xf0] }
 0x371   : > { %5568 = vmatpush.bf16.msra.mxu1 %v7584_v31  ;;  %5577 = vmatpush.bf16.msra.mxu2 %v8160_v19  ;;  %v8299_v31 = vld [vmem:[%s9999_s20 + $0x980] sm:$0xf]  ;;  %v9202_v19 = vld [vmem:[%s9999_s20 + $0x9ac] sm:$0xf0]  ;;  %v5287_v35 = vadd.f32 %v5286_v56, %v5274_v30  ;;  %v10848_v48 = vpop.f32.mrf.mxu2  ;;  %v7539_v7 = vld [vmem:[%s9999_s20 + $0x388] sm:$0xf] }
 0x372   : > { %v8300_v43 = vor.u32 %v9202_v19, %v8299_v31  ;;  %v9011_v19 = vld [vmem:[%s9999_s20 + $0x3b4] sm:$0xf0]  ;;  %v8115_v56 = vld [vmem:[%s9999_s20 + $0x808] sm:$0xf] }
 0x373   : > { %5709 = vst [vmem:[%s10678_s27 + $0x18] sm:$0xff] %v5287_v35  ;;  %v7301_v35 = vld [vmem:[%s9999_s20 + $0x1d8] sm:$0xf0] }
 0x374   : > { %5604 = vmatpush.bf16.msrb.mxu0 %v7348_v32  ;;  %5539 = vmatpush.bf16.msrb.mxu3 %v8492_v39  ;;  %v7968_v32 = vor.u32 %v9112_v25, %v7965_v59  ;;  %v7732_v39 = vor.u32 %v9059_v28, %v7731_v27  ;;  %v9167_v25 = vld [vmem:[%s9999_s20 + $0x894] sm:$0xf0]  ;;  %v8544_v59 = vor.u32 %v9256_v14, %v8541_v52  ;;  %v8493_v27 = vld [vmem:[%s9999_s20 + $0xb30] sm:$0xf0]  ;;  %v9208_v52 = vld [vmem:[%s9999_s20 + $0x9e4] sm:$0xf] }
 0x375   : > { %5569 = vmatpush.bf16.msra.mxu1 %v7536_v44  ;;  %5578 = vmatpush.bf16.msra.mxu2 %v8112_v45  ;;  %v9047_v44 = vld [vmem:[%s9999_s20 + $0x4d4] sm:$0xf0]  ;;  %v8981_v45 = vld [vmem:[%s9999_s20 + $0x2cc] sm:$0xf]  ;;  %v8496_v33 = vor.u32 %v9244_v0, %v8493_v27  ;;  %v8301_v27 = vld [vmem:[%s9999_s20 + $0x9b0] sm:$0xf0] }
 0x376   : > { %v7684_v62 = vor.u32 %v9047_v44, %v7683_v21  ;;  %v7448_v38 = vor.u32 %v8981_v45, %v7445_v46  ;;  %v5288_v12 = vpop.f32.mrf.mxu3  ;;  %v8999_v44 = vld [vmem:[%s9999_s20 + $0x354] sm:$0xf0]  ;;  %v7304_v45 = vor.u32 %v8945_v34, %v7301_v35  ;;  %v8067_v46 = vld [vmem:[%s9999_s20 + $0x7a8] sm:$0xf]  ;;  %v8897_v34 = vld [vmem:[%s9999_s20 + $0x2c] sm:$0xf] }
 0x377   : > { %v9065_v12 = vld [vmem:[%s9999_s20 + $0x56c] sm:$0xf] }
 0x378   : > { %5605 = vmatpush.bf16.msrb.mxu0 %v7300_v49  ;;  %5540 = vmatpush.bf16.msrb.mxu3 %v8444_v57  ;;  %v9190_v49 = vld [vmem:[%s9999_s20 + $0x94c] sm:$0xf0]  ;;  %v7108_v57 = vor.u32 %v8903_v41, %v7107_v40  ;;  %v8445_v40 = vld [vmem:[%s9999_s20 + $0xad0] sm:$0xf0]  ;;  %v7540_v41 = vor.u32 %v9011_v19, %v7539_v7 }
 0x379   : > { %5570 = vmatpush.bf16.msra.mxu1 %v7488_v5  ;;  %5579 = vmatpush.bf16.msra.mxu2 %v8064_v6  ;;  %v8252_v4 = vor.u32 %v9190_v49, %v8251_v53  ;;  %v9035_v5 = vld [vmem:[%s9999_s20 + $0x474] sm:$0xf0]  ;;  %v8211_v6 = vld [vmem:[%s9999_s20 + $0x8c8] sm:$0xf]  ;;  %v5327_v51 = vpop.f32.mrf.mxu2  ;;  %v8933_v49 = vld [vmem:[%s9999_s20 + $0x14c] sm:$0xf] }
 0x37a   : > { %v7636_v15 = vor.u32 %v9035_v5, %v7635_v3  ;;  %v9143_v53 = vld [vmem:[%s9999_s20 + $0x7d4] sm:$0xf0]  ;;  %v8349_v51 = vld [vmem:[%s9999_s20 + $0xa10] sm:$0xf0] }
 0x37c   : > { %5606 = vmatpush.bf16.msrb.mxu0 %v7252_v29  ;;  %5541 = vmatpush.bf16.msrb.mxu3 %v8396_v58  ;;  %v9179_v29 = vld [vmem:[%s9999_s20 + $0x8f4] sm:$0xf0]  ;;  %v10869_v58 = vpop.f32.mrf.mxu1 }
 0x37d   : > { %5615 = vmatpush.bf16.msrb.mxu1 %v7828_v8  ;;  %5580 = vmatpush.bf16.msra.mxu2 %v8016_v20  ;;  %v8592_v8 = vor.u32 %v9268_v11, %v8589_v54  ;;  %v8212_v61 = vor.u32 %v9179_v29, %v8211_v6  ;;  %v7587_v20 = vld [vmem:[%s9999_s20 + $0x3e8] sm:$0xf]  ;;  %v7253_v11 = vld [vmem:[%s9999_s20 + $0x178] sm:$0xf0]  ;;  %v9077_v54 = vld [vmem:[%s9999_s20 + $0x5cc] sm:$0xf] }
 0x37e   : > { %5571 = vmatmul.bf16.vlgmr.msra.gmra.mxu1 %v10229_v37  ;;  %v7256_v5 = vor.u32 %v8933_v49, %v7253_v11  ;;  %v8019_v29 = vld [vmem:[%s9999_s20 + $0x748] sm:$0xf]  ;;  %v9029_v11 = vld [vmem:[%s9999_s20 + $0x44c] sm:$0xf] }
 0x37f   : > { %v7875_v49 = vld [vmem:[%s9999_s20 + $0x628] sm:$0xf] }
 0x380   : > { %5607 = vmatpush.bf16.msrb.mxu0 %v7204_v13  ;;  %5542 = vmatpush.bf16.msrb.mxu3 %v8348_v26  ;;  %v9023_v13 = vld [vmem:[%s9999_s20 + $0x414] sm:$0xf0]  ;;  %v7349_v26 = vld [vmem:[%s9999_s20 + $0x238] sm:$0xf0] }
 0x381   : > { %5616 = vmatpush.bf16.msrb.mxu1 %v7780_v23  ;;  %5581 = vmatpush.bf16.msra.mxu2 %v7968_v32  ;;  %v8163_v23 = vld [vmem:[%s9999_s20 + $0x868] sm:$0xf]  ;;  %v7588_v28 = vor.u32 %v9023_v13, %v7587_v20  ;;  %v7352_v31 = vor.u32 %v8957_v47, %v7349_v26  ;;  %v9155_v32 = vld [vmem:[%s9999_s20 + $0x834] sm:$0xf0]  ;;  %v7208_v20 = vor.u32 %v8921_v9, %v7205_v17  ;;  %v9053_v47 = vld [vmem:[%s9999_s20 + $0x50c] sm:$0xf] }
 0x382   : > { %v8164_v30 = vor.u32 %v9167_v25, %v8163_v23  ;;  %v8116_v21 = vor.u32 %v9155_v32, %v8115_v56  ;;  %v7971_v13 = vld [vmem:[%s9999_s20 + $0x6e8] sm:$0xf]  ;;  %v9119_v23 = vld [vmem:[%s9999_s20 + $0x714] sm:$0xf0]  ;;  %v8909_v25 = vld [vmem:[%s9999_s20 + $0x8c] sm:$0xf] }
 0x383   : > { %v7733_v26 = vld [vmem:[%s9999_s20 + $0x538] sm:$0xf0]  ;;  %v7972_v7 = vor.u32 %v9119_v23, %v7971_v13  ;;  %v7923_v32 = vld [vmem:[%s9999_s20 + $0x688] sm:$0xf]  ;;  %v9017_v17 = vld [vmem:[%s9999_s20 + $0x3ec] sm:$0xf] }
 0x384   : > { %5608 = vmatpush.bf16.msrb.mxu0 %v7156_v36  ;;  %5543 = vmatpush.bf16.msrb.mxu3 %v8300_v43  ;;  %v5366_v36 = vpop.f32.mrf.mxu1  ;;  %v7491_v43 = vld [vmem:[%s9999_s20 + $0x328] sm:$0xf]  ;;  %v7736_v56 = vor.u32 %v9053_v47, %v7733_v26  ;;  %v7541_v13 = vld [vmem:[%s9999_s20 + $0x3b8] sm:$0xf0]  ;;  %v9149_v23 = vld [vmem:[%s9999_s20 + $0x80c] sm:$0xf] }
 0x385   : > { %5617 = vmatpush.bf16.msrb.mxu1 %v7732_v39  ;;  %5582 = vmatpush.bf16.msra.mxu2 %v7920_v18  ;;  %v9232_v39 = vld [vmem:[%s9999_s20 + $0xaa4] sm:$0xf]  ;;  %v7109_v36 = vld [vmem:[%s9999_s20 + $0x58] sm:$0xf0]  ;;  %v9239_v47 = vld [vmem:[%s9999_s20 + $0xad4] sm:$0xf0] }
 0x386   : > { %v8448_v18 = vor.u32 %v9232_v39, %v8445_v40  ;;  %v9041_v39 = vld [vmem:[%s9999_s20 + $0x4ac] sm:$0xf]  ;;  %v7685_v40 = vld [vmem:[%s9999_s20 + $0x4d8] sm:$0xf0] }
 0x388   : > { %5609 = vmatpush.bf16.msrb.mxu0 %v7108_v57  ;;  %5544 = vmatpush.bf16.msrb.mxu3 %v8252_v4  ;;  %v7829_v57 = vld [vmem:[%s9999_s20 + $0x5f8] sm:$0xf0]  ;;  %v10903_v3 = vpop.f32.mrf.mxu0  ;;  %v8068_v4 = vor.u32 %v9143_v53, %v8067_v46  ;;  %v7112_v46 = vor.u32 %v8897_v34, %v7109_v36  ;;  %v7688_v53 = vor.u32 %v9041_v39, %v7685_v40  ;;  %v9125_v36 = vld [vmem:[%s9999_s20 + $0x74c] sm:$0xf] }
 0x389   : > { %5618 = vmatpush.bf16.msrb.mxu1 %v7684_v62  ;;  %5583 = vmatpush.bf16.msra.mxu2 %v7872_v50  ;;  %v3142_v62 = vperm.slane %v10633_v22, 4  ;;  %v7832_v6 = vor.u32 %v9077_v54, %v7829_v57  ;;  %v8400_v22 = vor.u32 %v9220_v55, %v8397_v1  ;;  %v7781_v50 = vld [vmem:[%s9999_s20 + $0x598] sm:$0xf0] }
 0x38a   : > { %v7637_v57 = vld [vmem:[%s9999_s20 + $0x478] sm:$0xf0] }
 0x38b   : > { %5610 = vmatmul.bf16.vlgmr.msrb.gmra.mxu0 %v10200_v24  ;;  %5545 = vmatmul.bf16.vlgmr.msrb.gmra.mxu3 %v10325_v16  ;;  %v5300_v14 = vadd.f32 %v10745_v63, %v3142_v62  ;;  %v8352_v63 = vor.u32 %v9208_v52, %v8349_v51  ;;  %v9173_v62 = vld [vmem:[%s9999_s20 + $0x8cc] sm:$0xf]  ;;  %v8213_v55 = vld [vmem:[%s9999_s20 + $0x8f8] sm:$0xf0]  ;;  %v7640_v9 = vor.u32 %v9029_v11, %v7637_v57  ;;  %v8499_v51 = vld [vmem:[%s9999_s20 + $0xb08] sm:$0xf] }
 0x38c   : > { %5654 = vmatpush.bf16.msra.mxu0 %v7448_v38  ;;  %5589 = vmatpush.bf16.msra.mxu3 %v8592_v8  ;;  %v7492_v38 = vor.u32 %v8999_v44, %v7491_v43  ;;  %v9131_v8 = vld [vmem:[%s9999_s20 + $0x774] sm:$0xf0]  ;;  %v8595_v44 = vld [vmem:[%s9999_s20 + $0xbc8] sm:$0xf]  ;;  %v8021_v39 = vld [vmem:[%s9999_s20 + $0x778] sm:$0xf0] }
 0x38d   : > { %5619 = vmatpush.bf16.msrb.mxu1 %v7636_v15  ;;  %5628 = vmatpush.bf16.msrb.mxu2 %v8212_v61  ;;  %v8020_v15 = vor.u32 %v9131_v8, %v8019_v29  ;;  %v5313_v61 = vadd.f32 %v10788_v10, %v5300_v14  ;;  %v9196_v10 = vld [vmem:[%s9999_s20 + $0x984] sm:$0xf]  ;;  %v9263_v29 = vld [vmem:[%s9999_s20 + $0xb94] sm:$0xf0]  ;;  %v8165_v14 = vld [vmem:[%s9999_s20 + $0x898] sm:$0xf0] }
 0x38e   : > { %5584 = vmatmul.bf16.vlgmr.msra.gmra.mxu2 %v10264_v60  ;;  %v8304_v35 = vor.u32 %v9196_v10, %v8301_v27  ;;  %v8993_v10 = vld [vmem:[%s9999_s20 + $0x32c] sm:$0xf]  ;;  %v7493_v27 = vld [vmem:[%s9999_s20 + $0x358] sm:$0xf0]  ;;  %v9203_v11 = vld [vmem:[%s9999_s20 + $0x9b4] sm:$0xf0] }
 0x38f   : > { %v5326_v0 = vadd.f32 %v10848_v48, %v5313_v61  ;;  %v7496_v34 = vor.u32 %v8993_v10, %v7493_v27 }
 0x390   : > { %5655 = vmatpush.bf16.msra.mxu0 %v7400_v2  ;;  %5590 = vmatpush.bf16.msra.mxu3 %v8544_v59  ;;  %v7784_v2 = vor.u32 %v9065_v12, %v7781_v50  ;;  %v7157_v59 = vld [vmem:[%s9999_s20 + $0xb8] sm:$0xf0]  ;;  %v9161_v50 = vld [vmem:[%s9999_s20 + $0x86c] sm:$0xf] }
 0x391   : > { %5620 = vmatpush.bf16.msrb.mxu1 %v7588_v28  ;;  %5629 = vmatpush.bf16.msrb.mxu2 %v8164_v30  ;;  %v5338_v28 = vpop.f32.mrf.mxu3  ;;  %v5405_v30 = vpop.f32.mrf.mxu0  ;;  %v7160_v48 = vor.u32 %v8909_v25, %v7157_v59  ;;  %v7589_v12 = vld [vmem:[%s9999_s20 + $0x418] sm:$0xf0]  ;;  %v8451_v59 = vld [vmem:[%s9999_s20 + $0xaa8] sm:$0xf] }
 0x392   : > { %v10925_v19 = vpop.f32.mrf.mxu2  ;;  %v7592_v61 = vor.u32 %v9017_v17, %v7589_v12  ;;  %v8117_v25 = vld [vmem:[%s9999_s20 + $0x838] sm:$0xf0] }
 0x393   : > { %v8069_v30 = vld [vmem:[%s9999_s20 + $0x7d8] sm:$0xf0] }
 0x394   : > { %5656 = vmatpush.bf16.msra.mxu0 %v7352_v31  ;;  %5591 = vmatpush.bf16.msra.mxu3 %v8496_v33  ;;  %v5339_v31 = vadd.f32 %v5338_v28, %v5326_v0  ;;  %v9107_v33 = vld [vmem:[%s9999_s20 + $0x6b4] sm:$0xf0]  ;;  %v8120_v0 = vor.u32 %v9149_v23, %v8117_v25  ;;  %v9137_v28 = vld [vmem:[%s9999_s20 + $0x7ac] sm:$0xf] }
 0x395   : > { %5621 = vmatpush.bf16.msrb.mxu1 %v7540_v41  ;;  %5630 = vmatpush.bf16.msrb.mxu2 %v8116_v21  ;;  %v9184_v41 = vld [vmem:[%s9999_s20 + $0x924] sm:$0xf]  ;;  %v8253_v21 = vld [vmem:[%s9999_s20 + $0x950] sm:$0xf0]  ;;  %v7924_v43 = vor.u32 %v9107_v33, %v7923_v32  ;;  %v9227_v32 = vld [vmem:[%s9999_s20 + $0xa74] sm:$0xf0] }
 0x396   : > { %5710 = vst [vmem:[%s10678_s27 + $0x20] sm:$0xff] %v5339_v31  ;;  %v8256_v54 = vor.u32 %v9184_v41, %v8253_v21  ;;  %v10968_v31 = vld [vmem:[%s10630_s30] sm:$0xff]  ;;  %v8355_v21 = vld [vmem:[%s9999_s20 + $0x9e8] sm:$0xf] }
 0x398   : > { %5657 = vmatpush.bf16.msra.mxu0 %v7304_v45  ;;  %5592 = vmatpush.bf16.msra.mxu3 %v8448_v18  ;;  %v9275_v45 = vld [vmem:[%s9999_s20 + $0xbf4] sm:$0xf0] }
 0x399   : > { %5622 = vmatpush.bf16.msrb.mxu1 %v7492_v38  ;;  %5631 = vmatpush.bf16.msrb.mxu2 %v8068_v4  ;;  %v9095_v18 = vld [vmem:[%s9999_s20 + $0x654] sm:$0xf0]  ;;  %v8596_v1 = vor.u32 %v9275_v45, %v8595_v44  ;;  %v5340_v38 = vpop.f32.mrf.mxu3  ;;  %v8024_v44 = vor.u32 %v9125_v36, %v8021_v39 }
 0x39a   : > { %v5379_v8 = vpop.f32.mrf.mxu2  ;;  %v7925_v38 = vld [vmem:[%s9999_s20 + $0x6b8] sm:$0xf0] }
 0x39b   : > { %v10944_v4 = vpop.f32.mrf.mxu1  ;;  %v8597_v8 = vld [vmem:[%s9999_s20 + $0xbf8] sm:$0xf0] }
 0x39c   : > { %5658 = vmatpush.bf16.msra.mxu0 %v7256_v5  ;;  %5593 = vmatpush.bf16.msra.mxu3 %v8400_v22  ;;  %v7876_v5 = vor.u32 %v9095_v18, %v7875_v49  ;;  %v8216_v22 = vor.u32 %v9173_v62, %v8213_v55 }
 0x39d   : > { %5667 = vmatpush.bf16.msra.mxu1 %v7832_v6  ;;  %5632 = vmatpush.bf16.msrb.mxu2 %v8020_v15  ;;  %v8547_v6 = vld [vmem:[%s9999_s20 + $0xb68] sm:$0xf]  ;;  %v9251_v15 = vld [vmem:[%s9999_s20 + $0xb34] sm:$0xf0] }
 0x39e   : > { %5623 = vmatmul.bf16.vlgmr.msrb.gmra.mxu1 %v10229_v37  ;;  %v8548_v52 = vor.u32 %v9263_v29, %v8547_v6  ;;  %v9269_v29 = vld [vmem:[%s9999_s20 + $0xbcc] sm:$0xf] }
 0x39f   : > { %v8600_v12 = vor.u32 %v9269_v29, %v8597_v8 }
 0x3a0   : > { %5659 = vmatpush.bf16.msra.mxu0 %v7208_v20  ;;  %5594 = vmatpush.bf16.msra.mxu3 %v8352_v63  ;;  %v8168_v20 = vor.u32 %v9161_v50, %v8165_v14 }
 0x3a1   : > { %5668 = vmatpush.bf16.msra.mxu1 %v7784_v2  ;;  %5633 = vmatpush.bf16.msrb.mxu2 %v7972_v7  ;;  %v9005_v2 = vld [vmem:[%s9999_s20 + $0x38c] sm:$0xf]  ;;  %v8452_v7 = vor.u32 %v9239_v47, %v8451_v59  ;;  %v3144_v47 = vperm.slane %v10968_v31, 6 }
 0x3a2   : > { %v7544_v26 = vor.u32 %v9005_v2, %v7541_v13  ;;  %v9245_v2 = vld [vmem:[%s9999_s20 + $0xb0c] sm:$0xf]  ;;  %v8501_v13 = vld [vmem:[%s9999_s20 + $0xb38] sm:$0xf0] }
 0x3a3   : > { %v5418_v63 = vpop.f32.mrf.mxu1  ;;  %v8504_v23 = vor.u32 %v9245_v2, %v8501_v13 }
 0x3a4   : > { %5660 = vmatpush.bf16.msra.mxu0 %v7160_v48  ;;  %5595 = vmatpush.bf16.msra.mxu3 %v8304_v35  ;;  %v3143_v48 = vperm.slane %v10968_v31, 5  ;;  %v8072_v35 = vor.u32 %v9137_v28, %v8069_v30  ;;  %v8453_v63 = vld [vmem:[%s9999_s20 + $0xad8] sm:$0xf0]  ;;  %v9209_v28 = vld [vmem:[%s9999_s20 + $0x9ec] sm:$0xf] }
 0x3a5   : > { %5669 = vmatpush.bf16.msra.mxu1 %v7736_v56  ;;  %5634 = vmatpush.bf16.msrb.mxu2 %v7924_v43  ;;  %v8403_v56 = vld [vmem:[%s9999_s20 + $0xa48] sm:$0xf]  ;;  %v9215_v43 = vld [vmem:[%s9999_s20 + $0xa14] sm:$0xf0]  ;;  %v8357_v30 = vld [vmem:[%s9999_s20 + $0xa18] sm:$0xf0] }
 0x3a6   : > { %v8404_v40 = vor.u32 %v9227_v32, %v8403_v56  ;;  %v5352_v41 = vadd.f32 %v10822_v42, %v3143_v48  ;;  %v8356_v49 = vor.u32 %v9215_v43, %v8355_v21  ;;  %v8307_v42 = vld [vmem:[%s9999_s20 + $0x988] sm:$0xf]  ;;  %v8360_v48 = vor.u32 %v9209_v28, %v8357_v30  ;;  %v9197_v32 = vld [vmem:[%s9999_s20 + $0x98c] sm:$0xf] }
 0x3a7   : > { %v9185_v21 = vld [vmem:[%s9999_s20 + $0x92c] sm:$0xf] }
 0x3a8   : > { %5661 = vmatpush.bf16.msra.mxu0 %v7112_v46  ;;  %5596 = vmatpush.bf16.msra.mxu3 %v8256_v54  ;;  %v10973_v33 = vpop.f32.mrf.mxu0  ;;  %v5365_v45 = vadd.f32 %v10869_v58, %v5352_v41  ;;  %v9113_v46 = vld [vmem:[%s9999_s20 + $0x6ec] sm:$0xf] }
 0x3a9   : > { %5670 = vmatpush.bf16.msra.mxu1 %v7688_v53  ;;  %5635 = vmatpush.bf16.msrb.mxu2 %v7876_v5  ;;  %v7973_v53 = vld [vmem:[%s9999_s20 + $0x718] sm:$0xf0]  ;;  %v8308_v5 = vor.u32 %v9203_v11, %v8307_v42 }
 0x3aa   : > { %v5378_v18 = vadd.f32 %v10925_v19, %v5365_v45  ;;  %v7976_v58 = vor.u32 %v9113_v46, %v7973_v53  ;;  %v8259_v19 = vld [vmem:[%s9999_s20 + $0x928] sm:$0xf]  ;;  %v3145_v53 = vperm.slane %v10968_v31, 7 }
 0x3ab   : > { %5662 = vmatmul.bf16.vlgmr.msra.gmra.mxu0 %v10200_v24  ;;  %5597 = vmatmul.bf16.vlgmr.msra.gmra.mxu3 %v10325_v16  ;;  %v8500_v24 = vor.u32 %v9251_v15, %v8499_v51  ;;  %v9257_v51 = vld [vmem:[%s9999_s20 + $0xb6c] sm:$0xf]  ;;  %v8549_v15 = vld [vmem:[%s9999_s20 + $0xb98] sm:$0xf0] }
 0x3ac   : > { %5641 = vmatpush.bf16.msrb.mxu3 %v8596_v1  ;;  %5636 = vmatmul.bf16.vlgmr.msrb.gmra.mxu2 %v10264_v60  ;;  %v9101_v1 = vld [vmem:[%s9999_s20 + $0x68c] sm:$0xf] }
 0x3ad   : > { %5671 = vmatpush.bf16.msra.mxu1 %v7640_v9  ;;  %5680 = vmatpush.bf16.msra.mxu2 %v8216_v22  ;;  %v7928_v6 = vor.u32 %v9101_v1, %v7925_v38  ;;  %v9089_v9 = vld [vmem:[%s9999_s20 + $0x62c] sm:$0xf]  ;;  %v7877_v22 = vld [vmem:[%s9999_s20 + $0x658] sm:$0xf0] }
 0x3ae   : > { %v5390_v54 = vpop.f32.mrf.mxu3 }
 0x3af   : > { %v5391_v62 = vadd.f32 %v5390_v54, %v5378_v18  ;;  %v5456_v18 = vadd.f32 %v10973_v33, %v3145_v53 }
 0x3b0   : > { %5642 = vmatpush.bf16.msrb.mxu3 %v8548_v52  ;;  %v5457_v57 = vpop.f32.mrf.mxu0  ;;  %v7880_v52 = vor.u32 %v9089_v9, %v7877_v22 }
 0x3b1   : > { %5672 = vmatpush.bf16.msra.mxu1 %v7592_v61  ;;  %5681 = vmatpush.bf16.msra.mxu2 %v8168_v20  ;;  %v5429_v55 = vpop.f32.mrf.mxu2  ;;  %5711 = vst [vmem:[%s10678_s27 + $0x28] sm:$0xff] %v5391_v62  ;;  %v8552_v20 = vor.u32 %v9257_v51, %v8549_v15 }
 0x3b4   : > { %5643 = vmatpush.bf16.msrb.mxu3 %v8500_v24  ;;  %v9233_v24 = vld [vmem:[%s9999_s20 + $0xaac] sm:$0xf] }
 0x3b5   : > { %5673 = vmatpush.bf16.msra.mxu1 %v7544_v26  ;;  %5682 = vmatpush.bf16.msra.mxu2 %v8120_v0  ;;  %v8456_v59 = vor.u32 %v9233_v24, %v8453_v63  ;;  %v9221_v26 = vld [vmem:[%s9999_s20 + $0xa4c] sm:$0xf]  ;;  %v8405_v0 = vld [vmem:[%s9999_s20 + $0xa78] sm:$0xf0] }
 0x3b6   : > { %v5392_v50 = vpop.f32.mrf.mxu3  ;;  %v8408_v27 = vor.u32 %v9221_v26, %v8405_v0 }
 0x3b8   : > { %5644 = vmatpush.bf16.msrb.mxu3 %v8452_v7 }
 0x3b9   : > { %5674 = vmatpush.bf16.msra.mxu1 %v7496_v34  ;;  %5683 = vmatpush.bf16.msra.mxu2 %v8072_v35  ;;  %v5431_v61 = vpop.f32.mrf.mxu2  ;;  %v8309_v34 = vld [vmem:[%s9999_s20 + $0x9b8] sm:$0xf0] }
 0x3ba   : > { %v8312_v41 = vor.u32 %v9197_v32, %v8309_v34 }
 0x3bb   : > { %v5468_v14 = vpop.f32.mrf.mxu1 }
 0x3bc   : > { %5645 = vmatpush.bf16.msrb.mxu3 %v8404_v40  ;;  %5675 = vmatmul.bf16.vlgmr.msra.gmra.mxu1 %v10229_v37  ;;  %v9191_v37 = vld [vmem:[%s9999_s20 + $0x954] sm:$0xf0]  ;;  %v5469_v42 = vadd.f32 %v5468_v14, %v5456_v18 }
 0x3bd   : > { %5684 = vmatpush.bf16.msra.mxu2 %v8024_v44  ;;  %v8260_v17 = vor.u32 %v9191_v37, %v8259_v19 }
 0x3c0   : > { %5646 = vmatpush.bf16.msrb.mxu3 %v8356_v49 }
 0x3c1   : > { %5685 = vmatpush.bf16.msra.mxu2 %v7976_v58 }
 0x3c3   : > { %v5470_v25 = vpop.f32.mrf.mxu1 }
 0x3c4   : > { %5647 = vmatpush.bf16.msrb.mxu3 %v8308_v5 }
 0x3c5   : > { %5686 = vmatpush.bf16.msra.mxu2 %v7928_v6 }
 0x3c8   : > { %5648 = vmatpush.bf16.msrb.mxu3 %v8260_v17  ;;  %v5507_v10 = vpop.f32.mrf.mxu0 }
 0x3c9   : > { %5687 = vmatpush.bf16.msra.mxu2 %v7880_v52 }
 0x3cb   : > { %5649 = vmatmul.bf16.vlgmr.msrb.gmra.mxu3 %v10325_v16 }
 0x3cc   : > { %5693 = vmatpush.bf16.msra.mxu3 %v8600_v12  ;;  %5688 = vmatmul.bf16.vlgmr.msra.gmra.mxu2 %v10264_v60  ;;  %v5404_v60 = vadd.f32 %v10903_v3, %v3144_v47  ;;  %v8261_v3 = vld [vmem:[%s9999_s20 + $0x958] sm:$0xf0] }
 0x3cd   : > { %v8264_v43 = vor.u32 %v9185_v21, %v8261_v3 }
 0x3ce   : > { %v5417_v7 = vadd.f32 %v10944_v4, %v5404_v60  ;;  %v5442_v35 = vpop.f32.mrf.mxu3 }
 0x3d0   : > { %5694 = vmatpush.bf16.msra.mxu3 %v8552_v20  ;;  %v5430_v56 = vadd.f32 %v5429_v55, %v5417_v7  ;;  %v5509_v36 = vpop.f32.mrf.mxu0 }
 0x3d1   : > { %v5481_v40 = vpop.f32.mrf.mxu2 }
 0x3d2   : > { %v5443_v39 = vadd.f32 %v5442_v35, %v5430_v56  ;;  %v5482_v11 = vadd.f32 %v5481_v40, %v5469_v42 }
 0x3d4   : > { %5695 = vmatpush.bf16.msra.mxu3 %v8504_v23  ;;  %5712 = vst [vmem:[%s10678_s27 + $0x30] sm:$0xff] %v5443_v39 }
 0x3d6   : > { %v5444_v44 = vpop.f32.mrf.mxu3 }
 0x3d8   : > { %5696 = vmatpush.bf16.msra.mxu3 %v8456_v59 }
 0x3d9   : > { %v5483_v4 = vpop.f32.mrf.mxu2 }
 0x3db   : > { %v5520_v45 = vpop.f32.mrf.mxu1 }
 0x3dc   : > { %5697 = vmatpush.bf16.msra.mxu3 %v8408_v27 }
 0x3e0   : > { %5698 = vmatpush.bf16.msra.mxu3 %v8360_v48 }
 0x3e3   : > { %v5522_v46 = vpop.f32.mrf.mxu1 }
 0x3e4   : > { %5699 = vmatpush.bf16.msra.mxu3 %v8312_v41 }
 0x3e8   : > { %5700 = vmatpush.bf16.msra.mxu3 %v8264_v43  ;;  %v5559_v49 = vpop.f32.mrf.mxu0 }
 0x3eb   : > { %5701 = vmatmul.bf16.vlgmr.msra.gmra.mxu3 %v10325_v16  ;;  %v3135_v16 = vld [vmem:[%s10630_s30 + $0x8] sm:$0xf] }
 0x3ec   : > { %v3146_v19 = vperm.slane %v3135_v16, 0  ;;  %v3147_v52 = vperm.slane %v3135_v16, 1  ;;  %v3148_v26 = vperm.slane %v3135_v16, 2  ;;  %v3149_v56 = vperm.slane %v3135_v16, 3 }
 0x3ee   : > { %v5494_v54 = vpop.f32.mrf.mxu3  ;;  %v5508_v6 = vadd.f32 %v5507_v10, %v3146_v19  ;;  %v5560_v15 = vadd.f32 %v5559_v49, %v3147_v52 }
 0x3ef   : > { %v5495_v58 = vadd.f32 %v5494_v54, %v5482_v11 }
 0x3f0   : > { %v5561_v57 = vpop.f32.mrf.mxu0  ;;  %v5521_v31 = vadd.f32 %v5520_v45, %v5508_v6 }
 0x3f1   : > { %v5533_v62 = vpop.f32.mrf.mxu2  ;;  %5713 = vst [vmem:[%s10678_s27 + $0x38] sm:$0xff] %v5495_v58 }
 0x3f2   : > { %v5534_v29 = vadd.f32 %v5533_v62, %v5521_v31 }
 0x3f6   : > { %v5496_v55 = vpop.f32.mrf.mxu3 }
 0x3f9   : > { %v5535_v38 = vpop.f32.mrf.mxu2 }
 0x3fb   : > { %v5572_v1 = vpop.f32.mrf.mxu1 }
 0x3fc   : > { %v5573_v61 = vadd.f32 %v5572_v1, %v5560_v15 }
 0x403   : > { %v5574_v5 = vpop.f32.mrf.mxu1 }
 0x408   : > { %v5611_v37 = vpop.f32.mrf.mxu0 }
 0x409   : > { %v5612_v0 = vadd.f32 %v5611_v37, %v3148_v26 }
 0x40e   : > { %v5546_v8 = vpop.f32.mrf.mxu3 }
 0x40f   : > { %v5547_v9 = vadd.f32 %v5546_v8, %v5534_v29 }
 0x410   : > { %v5613_v33 = vpop.f32.mrf.mxu0 }
 0x411   : > { %v5585_v22 = vpop.f32.mrf.mxu2  ;;  %5714 = vst [vmem:[%s10678_s27 + $0x40] sm:$0xff] %v5547_v9 }
 0x412   : > { %v5586_v20 = vadd.f32 %v5585_v22, %v5573_v61 }
 0x416   : > { %v5548_v17 = vpop.f32.mrf.mxu3 }
 0x419   : > { %v5587_v50 = vpop.f32.mrf.mxu2 }
 0x41b   : > { %v5624_v12 = vpop.f32.mrf.mxu1 }
 0x41c   : > { %v5625_v10 = vadd.f32 %v5624_v12, %v5612_v0 }
 0x423   : > { %v5626_v14 = vpop.f32.mrf.mxu1 }
 0x428   : > { %v5663_v51 = vpop.f32.mrf.mxu0 }
 0x429   : > { %v5664_v32 = vadd.f32 %v5663_v51, %v3149_v56 }
 0x42e   : > { %v5598_v2 = vpop.f32.mrf.mxu3 }
 0x42f   : > { %v5599_v23 = vadd.f32 %v5598_v2, %v5586_v20  ;;  %v5637_v25 = vpop.f32.mrf.mxu2 }
 0x430   : > { %v5665_v13 = vpop.f32.mrf.mxu0  ;;  %v5638_v27 = vadd.f32 %v5637_v25, %v5625_v10 }
 0x431   : > { %5715 = vst [vmem:[%s10678_s27 + $0x48] sm:$0xff] %v5599_v23 }
 0x436   : > { %v5600_v24 = vpop.f32.mrf.mxu3 }
 0x437   : > { %v5639_v59 = vpop.f32.mrf.mxu2 }
 0x439   : > { %v5676_v63 = vpop.f32.mrf.mxu1 }
 0x43a   : > { %v5677_v34 = vadd.f32 %v5676_v63, %v5664_v32 }
 0x441   : > { %v5678_v47 = vpop.f32.mrf.mxu1 }
 0x44e   : > { %v5650_v60 = vpop.f32.mrf.mxu3 }
 0x44f   : > { %v5651_v28 = vadd.f32 %v5650_v60, %v5638_v27  ;;  %v5689_v30 = vpop.f32.mrf.mxu2 }
 0x450   : > { %v5690_v35 = vadd.f32 %v5689_v30, %v5677_v34 }
 0x451   : > { %5716 = vst [vmem:[%s10678_s27 + $0x50] sm:$0xff] %v5651_v28 }
 0x456   : > { %v5652_v7 = vpop.f32.mrf.mxu3 }
 0x457   : > { %v5691_v48 = vpop.f32.mrf.mxu2 }
 0x46e   : > { %v5702_v36 = vpop.f32.mrf.mxu3 }
 0x46f   : > { %v5703_v39 = vadd.f32 %v5702_v36, %v5690_v35 }
 0x471   : > { %5717 = vst [vmem:[%s10678_s27 + $0x58] sm:$0xff] %v5703_v39 }
 0x472   : > { %9707 = shalt.err (!%p9704_p1)
}
 0x473   : > { %9315 = dma.vmem_to_hbm [thread:$0]  (%p9901_p0), %s5733_s26, 1536, %s5735_s18, %s5719_s5  }
 0x476   : > { %v5704_v40 = vpop.f32.mrf.mxu3 }
 0x477 PF: > { %s11102_s17 = sld [smem:[#allocation24_spill]]  ;;  %p11104_p7 = scmp.ge.s32.totalorder %s9762_s12, 2 }
 0x479   : > { %p9347_p10 = pnand %p11104_p7, %p9907_p5 }
 0x47b   : > { %p9348_p8 = pneg %p9347_p10 }
 0x47d   : > { %s5746_s20 = sand.u32 1, %s11102_s17  }
 0x47e   : > { %s5747_s24 = scalar_lea.sflag [#allocation4], %s5746_s20 }
 0x47f   : > { %9745 = dma.done.wait (%p9348_p8), %s5747_s24, 1536  }
 0x480   : > { %9747 = vsyncadd (%p9348_p8), %s5747_s24, 4294965760  ;;  %s11105_s12 = sld [smem:[#allocation25_spill]]  ;;  %s11107_s30 = smov %s9754_s10 }
 0x481   : > { %s11106_s1 = sld [smem:[#allocation26_spill]]  ;;  %s11108_s10 = smov %s9758_s11 }
 0x486   : > { %p26_p3 = scmp.ge.s32.totalorder %s11105_s12, 4  }
 0x487   : > { %s11109_s11 = smov %s11106_s1 }
 0x488   :  { %28 = sbr.rel (!%p26_p3) target bundleno = 14 (0xe), region = 141 }
 0x48d   :  { %5753 = vsyncpa [#allocation3], 1 }
 0x48e   :  { %5755 = vsyncpa [#allocation3 + $0x1], 1 }
 0x48f   :  { %5756 = vsyncpa [#allocation6], 1 }
 0x490   :  { %5757 = vsyncpa [#allocation9], 1 }
 0x491   :  { %5758 = vsyncpa [#allocation12], 1 }
 0x492   :  { %5759 = vsyncpa [#allocation15], 1 }
 0x493   :  { %5761 = vsyncpa [#allocation15 + $0x1], 1 }
 0x494   :  { %5762 = vsyncpa [#allocation4], 1 }
 0x495   :  { %5764 = vsyncpa [#allocation4 + $0x1], 1 }

</bundles_post_ra>
